<compile_context>
chip_gen: v6e
topology: v6e:2x2x1
jax: 0.10.0
libtpu: 0.0.40
codegen_flags: <defaults>
</compile_context>

<pallas_src>
import math
from functools import partial

import jax
import jax.numpy as jnp
from jax.experimental import pallas as pl
from jax.experimental.pallas import tpu as pltpu

EPS = 1e-5  # PyTorch LayerNorm default eps


def _layernorm(y, gamma, beta):
    mu = jnp.mean(y, axis=-1, keepdims=True)
    var = jnp.mean((y - mu) ** 2, axis=-1, keepdims=True)  # biased, as in torch
    return (y - mu) * jax.lax.rsqrt(var + EPS) * gamma + beta


def transformer_layer_kernel(x_ref, wqkv_ref, wo_ref, w1_ref, w2_ref, vec_ref,
                             o_ref, qkv_sc, ctx_sc, *,
                             n_heads, b_blk, seq_len, embed_dim):
    E, S, H = embed_dim, seq_len, n_heads
    D = E // H

    # ---- unpack packed bias / LayerNorm slab (static, lane-aligned slices) ----
    bqkv = vec_ref[:, 0:3 * E]
    bo = vec_ref[:, 3 * E:4 * E]
    b1 = vec_ref[:, 4 * E:8 * E]
    b2 = vec_ref[:, 8 * E:9 * E]
    g1 = vec_ref[:, 9 * E:10 * E]
    be1 = vec_ref[:, 10 * E:11 * E]
    g2 = vec_ref[:, 11 * E:12 * E]
    be2 = vec_ref[:, 12 * E:13 * E]

    x = x_ref[...].astype(jnp.float32)           # (M, E) f32 residual / LN path

    # ---- packed QKV projection over the whole (Bblk*S, E) slab (big-M GEMM) ----
    qkv = jnp.dot(x_ref[...].astype(jnp.bfloat16), wqkv_ref[...],
                  preferred_element_type=jnp.float32) + bqkv       # (M, 3E) f32
    qkv_sc[...] = qkv.astype(jnp.bfloat16)       # stash; slice per-head from ref

    # ---- multi-head self-attention (per batch element, per head) ----
    for b in range(b_blk):
        r0 = b * S
        for h in range(H):
            q = qkv_sc[r0:r0 + S, h * D:(h + 1) * D]                 # (S, D) bf16
            k = qkv_sc[r0:r0 + S, E + h * D:E + (h + 1) * D]
            v = qkv_sc[r0:r0 + S, 2 * E + h * D:2 * E + (h + 1) * D]
            s = jnp.einsum("qd,kd->qk", q, k,
                           preferred_element_type=jnp.float32)       # (S, S) f32
            s = s - jnp.max(s, axis=-1, keepdims=True)
            p = jnp.exp(s)
            p = p * pl.reciprocal(jnp.sum(p, axis=-1, keepdims=True), approx=True)
            ctx_sc[r0:r0 + S, h * D:(h + 1) * D] = jnp.einsum(
                "qk,kd->qd", p.astype(jnp.bfloat16), v,
                preferred_element_type=jnp.float32).astype(jnp.bfloat16)

    # ---- output projection over the whole slab + residual + LayerNorm1 ----
    attn_out = jnp.dot(ctx_sc[...], wo_ref[...],
                       preferred_element_type=jnp.float32) + bo      # (M, E) f32
    y1 = _layernorm(x + attn_out, g1, be1)

    # ---- FFN: Linear -> ReLU -> Linear (big-M GEMMs) ----
    h1 = jnp.dot(y1.astype(jnp.bfloat16), w1_ref[...],
                 preferred_element_type=jnp.float32) + b1            # (M, 4E) f32
    h1 = jnp.maximum(h1, 0.0)
    ffn = jnp.dot(h1.astype(jnp.bfloat16), w2_ref[...],
                  preferred_element_type=jnp.float32) + b2           # (M, E) f32

    # ---- residual + LayerNorm2 ----
    o_ref[...] = _layernorm(y1 + ffn, g2, be2).astype(o_ref.dtype)


def _prepare_weights(params, n_heads):
    """Transpose frozen weights to contraction-ready bf16 layout, fold the
    1/sqrt(D) attention scale into Q rows/bias, and pack every small bias /
    LayerNorm vector into a single (1, 13E) f32 slab."""
    E = params["wo"].shape[0]
    D = E // n_heads
    scale = 1.0 / math.sqrt(D)
    qkv_scale = jnp.concatenate(
        [jnp.full((E,), scale, jnp.float32), jnp.ones((2 * E,), jnp.float32)])

    wqkv = (params["wqkv"] * qkv_scale[:, None]).T.astype(jnp.bfloat16)  # (E, 3E)
    wo = params["wo"].T.astype(jnp.bfloat16)                             # (E, E)
    w1 = params["w1"].T.astype(jnp.bfloat16)                             # (E, 4E)
    w2 = params["w2"].T.astype(jnp.bfloat16)                             # (4E, E)
    vec = jnp.concatenate([
        params["bqkv"] * qkv_scale,   # (3E,)
        params["bo"], params["b1"], params["b2"],
        params["g1"], params["be1"], params["g2"], params["be2"],
    ]).astype(jnp.float32).reshape(1, -1)                                # (1, 13E)
    return wqkv, wo, w1, w2, vec


def _vmem_limit_bytes():
    """Generation-aware VMEM budget: ~75% of physical per-core VMEM (leaves
    headroom for double-buffered activation blocks / Mosaic scratch / spills),
    capped at 100 MiB.  Falls back to 48 MiB (safe on v7x's 64 MiB/TC)."""
    try:
        cap = pltpu.get_tpu_info().vmem_capacity_bytes
        return int(min(100 * 1024 * 1024, (cap * 3) // 4))
    except Exception:
        return 48 * 1024 * 1024


def _pick_batch_block(batch, seq):
    """Largest divisor of `batch` such that M = Bblk*seq targets ~256 MXU rows."""
    target = max(1, -(-256 // seq))  # cdiv(256, seq)
    b_blk = 1
    for d in range(1, batch + 1):
        if batch % d == 0 and d <= target:
            b_blk = d
    return b_blk


def transformer_layer(x, params, n_heads):
    B, S, E = x.shape
    H = n_heads
    assert E % H == 0
    D = E // H
    assert E % 128 == 0, "E must be a multiple of 128 (lane width)"
    # Lane-aligned per-head scratch writes require D % 128 == 0; otherwise the
    # kernel would silently fall into masked partial-lane stores.
    # TODO(synk): add a packed/masked path for D < 128 instead of asserting.
    assert D % 128 == 0, "head_dim (E / n_heads) must be a multiple of 128"

    wqkv, wo, w1, w2, vec = _prepare_weights(params, n_heads)

    b_blk = _pick_batch_block(B, S)
    m_blk = b_blk * S
    assert m_blk % 8 == 0, "Bblk*S must be a multiple of 8 (sublane tiling)"

    x2 = x.reshape(B * S, E)  # fold batch rows into the GEMM M dimension

    # Weights are grid-invariant: single untiled resident copy in VMEM (no
    # double-buffering).  Only the activation row-slab is pipelined.
    weight_spec = pl.BlockSpec(memory_space=pltpu.MemorySpace.VMEM)
    in_specs = [pl.BlockSpec((m_blk, E), lambda i: (i, 0))] + [weight_spec] * 5
    out_specs = pl.BlockSpec((m_blk, E), lambda i: (i, 0))

    grid_spec = pltpu.PrefetchScalarGridSpec(
        num_scalar_prefetch=0,
        grid=(B // b_blk,),
        in_specs=in_specs,
        out_specs=out_specs,
        scratch_shapes=[
            pltpu.VMEM((m_blk, 3 * E), jnp.bfloat16),   # bf16 QKV slab
            pltpu.VMEM((m_blk, E), jnp.bfloat16),       # per-head attn contexts
        ],
    )

    out2 = pl.pallas_call(
        partial(transformer_layer_kernel, n_heads=H, b_blk=b_blk,
                seq_len=S, embed_dim=E),
        out_shape=jax.ShapeDtypeStruct((B * S, E), x.dtype),
        grid_spec=grid_spec,
        compiler_params=pltpu.CompilerParams(
            dimension_semantics=("parallel",),
            vmem_limit_bytes=_vmem_limit_bytes(),
        ),
    )(x2, wqkv, wo, w1, w2, vec)
    return out2.reshape(B, S, E)


def make_params(key, embed_dim):
    """Frozen parameters in the native PyTorch layout (f32)."""
    E = embed_dim
    ks = jax.random.split(key, 12)
    return {
        # nn.MultiheadAttention packed in_proj (3E, E) + bias (3E,)
        "wqkv": jax.random.normal(ks[0], (3 * E, E), jnp.float32) * 0.08,
        "bqkv": jax.random.normal(ks[1], (3 * E,), jnp.float32) * 0.02,
        # out_proj Linear(E, E)
        "wo": jax.random.normal(ks[2], (E, E), jnp.float32) * 0.08,
        "bo": jax.random.normal(ks[3], (E,), jnp.float32) * 0.02,
        # ffn: Linear(E, 4E) -> ReLU -> Linear(4E, E)
        "w1": jax.random.normal(ks[4], (4 * E, E), jnp.float32) * 0.08,
        "b1": jax.random.normal(ks[5], (4 * E,), jnp.float32) * 0.02,
        "w2": jax.random.normal(ks[6], (E, 4 * E), jnp.float32) * 0.08,
        "b2": jax.random.normal(ks[7], (E,), jnp.float32) * 0.02,
        # LayerNorm affine params (elementwise_affine=True)
        "g1": jnp.ones((E,), jnp.float32)
              + jax.random.normal(ks[8], (E,), jnp.float32) * 0.01,
        "be1": jax.random.normal(ks[9], (E,), jnp.float32) * 0.01,
        "g2": jnp.ones((E,), jnp.float32)
              + jax.random.normal(ks[10], (E,), jnp.float32) * 0.01,
        "be2": jax.random.normal(ks[11], (E,), jnp.float32) * 0.01,
    }


def reference_forward(x, p, n_heads):
    """Pure-JAX f32 reference matching the PyTorch forward semantics."""
    B, S, E = x.shape
    D = E // n_heads
    qkv = jnp.einsum("bse,fe->bsf", x, p["wqkv"]) + p["bqkv"]
    q, k, v = jnp.split(qkv, 3, axis=-1)
    q = q.reshape(B, S, n_heads, D).transpose(0, 2, 1, 3)
    k = k.reshape(B, S, n_heads, D).transpose(0, 2, 1, 3)
    v = v.reshape(B, S, n_heads, D).transpose(0, 2, 1, 3)
    s = jnp.einsum("bhqd,bhkd->bhqk", q, k) / math.sqrt(D)
    pr = jax.nn.softmax(s, axis=-1)
    a = jnp.einsum("bhqk,bhkd->bhqd", pr, v).transpose(0, 2, 1, 3).reshape(B, S, E)
    attn_out = jnp.einsum("bse,fe->bsf", a, p["wo"]) + p["bo"]

    def ln(y, g, b):
        mu = jnp.mean(y, axis=-1, keepdims=True)
        var = jnp.mean((y - mu) ** 2, axis=-1, keepdims=True)
        return (y - mu) * jax.lax.rsqrt(var + EPS) * g + b

    y1 = ln(x + attn_out, p["g1"], p["be1"])
    h1 = jnp.maximum(jnp.einsum("bse,fe->bsf", y1, p["w1"]) + p["b1"], 0.0)
    ffn = jnp.einsum("bsf,ef->bse", h1, p["w2"]) + p["b2"]
    return ln(y1 + ffn, p["g2"], p["be2"])


if __name__ == "__main__":
    # TPU-friendly demo shapes: E and D = E // H are multiples of 128, so all
    # matmul operands / stores are lane-dense; Bblk*S = 128 GEMM rows/step.
    B, S, E, H = 2, 64, 256, 2
    key = jax.random.PRNGKey(0)
    kx, kp = jax.random.split(key)
    x = jax.random.normal(kx, (B, S, E), jnp.float32)
    params = make_params(kp, E)

    out = jax.block_until_ready(transformer_layer(x, params, H))
    ref = reference_forward(x, params, H)

    assert out.shape == (B, S, E)
    # bf16 MXU operands (frozen weights + activations) vs. a pure-f32
    # reference: ~1e-2 level differences expected; accumulation, LayerNorm
    # and softmax statistics are kept in f32 inside the kernel.
    max_err = float(jnp.max(jnp.abs(out - ref)))
    assert jnp.allclose(out, ref, rtol=5e-2, atol=5e-2), \
        f"mismatch vs reference (max abs err = {max_err})"
    print("KERNEL_OK")
</pallas_src>

<mosaic_0001>
module attributes {stable_mosaic.version = 11 : i64} {
  func.func @transformer_layer_kernel(%arg0: i32, %arg1: memref<128x256xf32, #tpu.memory_space<vmem>>, %arg2: memref<256x768xbf16, #tpu.memory_space<vmem>>, %arg3: memref<256x256xbf16, #tpu.memory_space<vmem>>, %arg4: memref<256x1024xbf16, #tpu.memory_space<vmem>>, %arg5: memref<1024x256xbf16, #tpu.memory_space<vmem>>, %arg6: memref<1x3328xf32, #tpu.memory_space<vmem>>, %arg7: memref<128x256xf32, #tpu.memory_space<vmem>>, %arg8: memref<128x768xbf16, #tpu.memory_space<vmem>>, %arg9: memref<128x256xbf16, #tpu.memory_space<vmem>>) attributes {dimension_semantics = [#tpu.dimension_semantics<parallel>], iteration_bounds = array<i64: 1>, scalar_prefetch = 0 : i64, scratch_operands = 2 : i64, tpu.core_type = #tpu.core_type<tc>, window_params = [{transform_indices = @transform_0, window_bounds = array<i64: 128, 256>}, {pipeline_mode = #tpu.pipeline_mode<synchronous>, transform_indices = @transform_1, window_bounds = array<i64: 256, 768>}, {pipeline_mode = #tpu.pipeline_mode<synchronous>, transform_indices = @transform_2, window_bounds = array<i64: 256, 256>}, {pipeline_mode = #tpu.pipeline_mode<synchronous>, transform_indices = @transform_3, window_bounds = array<i64: 256, 1024>}, {pipeline_mode = #tpu.pipeline_mode<synchronous>, transform_indices = @transform_4, window_bounds = array<i64: 1024, 256>}, {pipeline_mode = #tpu.pipeline_mode<synchronous>, transform_indices = @transform_5, window_bounds = array<i64: 1, 3328>}, {transform_indices = @transform_6, window_bounds = array<i64: 128, 256>}]} {
    %c0 = arith.constant 0 : index
    %c0_0 = arith.constant 0 : index
    %0 = vector.load %arg6[%c0, %c0_0] : memref<1x3328xf32, #tpu.memory_space<vmem>>, vector<1x768xf32>
    %c0_1 = arith.constant 0 : index
    %c768 = arith.constant 768 : index
    %1 = vector.load %arg6[%c0_1, %c768] : memref<1x3328xf32, #tpu.memory_space<vmem>>, vector<1x256xf32>
    %c0_2 = arith.constant 0 : index
    %c1024 = arith.constant 1024 : index
    %2 = vector.load %arg6[%c0_2, %c1024] : memref<1x3328xf32, #tpu.memory_space<vmem>>, vector<1x1024xf32>
    %c0_3 = arith.constant 0 : index
    %c2048 = arith.constant 2048 : index
    %3 = vector.load %arg6[%c0_3, %c2048] : memref<1x3328xf32, #tpu.memory_space<vmem>>, vector<1x256xf32>
    %c0_4 = arith.constant 0 : index
    %c2304 = arith.constant 2304 : index
    %4 = vector.load %arg6[%c0_4, %c2304] : memref<1x3328xf32, #tpu.memory_space<vmem>>, vector<1x256xf32>
    %c0_5 = arith.constant 0 : index
    %c2560 = arith.constant 2560 : index
    %5 = vector.load %arg6[%c0_5, %c2560] : memref<1x3328xf32, #tpu.memory_space<vmem>>, vector<1x256xf32>
    %c0_6 = arith.constant 0 : index
    %c2816 = arith.constant 2816 : index
    %6 = vector.load %arg6[%c0_6, %c2816] : memref<1x3328xf32, #tpu.memory_space<vmem>>, vector<1x256xf32>
    %c0_7 = arith.constant 0 : index
    %c3072 = arith.constant 3072 : index
    %7 = vector.load %arg6[%c0_7, %c3072] : memref<1x3328xf32, #tpu.memory_space<vmem>>, vector<1x256xf32>
    %c0_8 = arith.constant 0 : index
    %c0_9 = arith.constant 0 : index
    %8 = vector.load %arg1[%c0_8, %c0_9] : memref<128x256xf32, #tpu.memory_space<vmem>>, vector<128x256xf32>
    %c0_10 = arith.constant 0 : index
    %c0_11 = arith.constant 0 : index
    %9 = vector.load %arg1[%c0_10, %c0_11] : memref<128x256xf32, #tpu.memory_space<vmem>>, vector<128x256xf32>
    %10 = arith.truncf %9 : vector<128x256xf32> to vector<128x256xbf16>
    %c0_12 = arith.constant 0 : index
    %c0_13 = arith.constant 0 : index
    %11 = vector.load %arg2[%c0_12, %c0_13] : memref<256x768xbf16, #tpu.memory_space<vmem>>, vector<256x768xbf16>
    %cst = arith.constant dense<0.000000e+00> : vector<128x768xf32>
    %12 = tpu.matmul %10, %11, %cst {dimension_numbers = #tpu.dot_dimension_numbers<[1], [0], [0], [1], [0, 0, 1, 1], [], []>} : vector<128x256xbf16>, vector<256x768xbf16>, vector<128x768xf32> -> vector<128x768xf32>
    %13 = vector.broadcast %0 : vector<1x768xf32> to vector<128x768xf32>
    %14 = arith.addf %12, %13 : vector<128x768xf32>
    %15 = arith.truncf %14 : vector<128x768xf32> to vector<128x768xbf16>
    %c0_14 = arith.constant 0 : index
    %c0_15 = arith.constant 0 : index
    %16 = vector.load %arg8[%c0_14, %c0_15] : memref<128x768xbf16, #tpu.memory_space<vmem>>, vector<128x768xbf16>
    tpu.vector_store %arg8[%c0_14, %c0_15], %15 {strides = array<i32>} : memref<128x768xbf16, #tpu.memory_space<vmem>>, vector<128x768xbf16>,
    %c0_16 = arith.constant 0 : index
    %c0_17 = arith.constant 0 : index
    %17 = vector.load %arg8[%c0_16, %c0_17] : memref<128x768xbf16, #tpu.memory_space<vmem>>, vector<64x128xbf16>
    %c0_18 = arith.constant 0 : index
    %c256 = arith.constant 256 : index
    %18 = vector.load %arg8[%c0_18, %c256] : memref<128x768xbf16, #tpu.memory_space<vmem>>, vector<64x128xbf16>
    %c0_19 = arith.constant 0 : index
    %c512 = arith.constant 512 : index
    %19 = vector.load %arg8[%c0_19, %c512] : memref<128x768xbf16, #tpu.memory_space<vmem>>, vector<64x128xbf16>
    "tpu.trace_start"() <{level = 10 : i32, message = "qd,kd->qk"}> : () -> ()
    %cst_20 = arith.constant dense<0.000000e+00> : vector<64x64xf32>
    %20 = tpu.matmul %17, %18, %cst_20 {dimension_numbers = #tpu.dot_dimension_numbers<[1], [1], [0], [0], [0, 0, 1, 0], [], []>} : vector<64x128xbf16>, vector<64x128xbf16>, vector<64x64xf32> -> vector<64x64xf32>
    "tpu.trace_stop"() : () -> ()
    %cst_21 = arith.constant dense<0xFF800000> : vector<64xf32>
    %21 = vector.multi_reduction <maximumf>, %20, %cst_21 [1] : vector<64x64xf32> to vector<64xf32>
    %22 = vector.shape_cast %21 : vector<64xf32> to vector<64x1xf32>
    %23 = vector.broadcast %22 : vector<64x1xf32> to vector<64x64xf32>
    %24 = arith.subf %20, %23 : vector<64x64xf32>
    %25 = math.exp %24 : vector<64x64xf32>
    %cst_22 = arith.constant dense<0.000000e+00> : vector<64xf32>
    %26 = vector.multi_reduction <add>, %25, %cst_22 [1] : vector<64x64xf32> to vector<64xf32>
    %27 = vector.shape_cast %26 : vector<64xf32> to vector<64x1xf32>
    %28 = tpu.reciprocal %27 {approx = true} : vector<64x1xf32> -> vector<64x1xf32>
    %29 = vector.broadcast %28 : vector<64x1xf32> to vector<64x64xf32>
    %30 = arith.mulf %25, %29 : vector<64x64xf32>
    %31 = arith.truncf %30 : vector<64x64xf32> to vector<64x64xbf16>
    "tpu.trace_start"() <{level = 10 : i32, message = "qk,kd->qd"}> : () -> ()
    %cst_23 = arith.constant dense<0.000000e+00> : vector<64x128xf32>
    %32 = tpu.matmul %31, %19, %cst_23 {dimension_numbers = #tpu.dot_dimension_numbers<[1], [0], [0], [1], [0, 0, 1, 1], [], []>} : vector<64x64xbf16>, vector<64x128xbf16>, vector<64x128xf32> -> vector<64x128xf32>
    "tpu.trace_stop"() : () -> ()
    %33 = arith.truncf %32 : vector<64x128xf32> to vector<64x128xbf16>
    %c0_24 = arith.constant 0 : index
    %c0_25 = arith.constant 0 : index
    %34 = vector.load %arg9[%c0_24, %c0_25] : memref<128x256xbf16, #tpu.memory_space<vmem>>, vector<64x128xbf16>
    tpu.vector_store %arg9[%c0_24, %c0_25], %33 {strides = array<i32>} : memref<128x256xbf16, #tpu.memory_space<vmem>>, vector<64x128xbf16>,
    %c0_26 = arith.constant 0 : index
    %c128 = arith.constant 128 : index
    %35 = vector.load %arg8[%c0_26, %c128] : memref<128x768xbf16, #tpu.memory_space<vmem>>, vector<64x128xbf16>
    %c0_27 = arith.constant 0 : index
    %c384 = arith.constant 384 : index
    %36 = vector.load %arg8[%c0_27, %c384] : memref<128x768xbf16, #tpu.memory_space<vmem>>, vector<64x128xbf16>
    %c0_28 = arith.constant 0 : index
    %c640 = arith.constant 640 : index
    %37 = vector.load %arg8[%c0_28, %c640] : memref<128x768xbf16, #tpu.memory_space<vmem>>, vector<64x128xbf16>
    "tpu.trace_start"() <{level = 10 : i32, message = "qd,kd->qk"}> : () -> ()
    %cst_29 = arith.constant dense<0.000000e+00> : vector<64x64xf32>
    %38 = tpu.matmul %35, %36, %cst_29 {dimension_numbers = #tpu.dot_dimension_numbers<[1], [1], [0], [0], [0, 0, 1, 0], [], []>} : vector<64x128xbf16>, vector<64x128xbf16>, vector<64x64xf32> -> vector<64x64xf32>
    "tpu.trace_stop"() : () -> ()
    %cst_30 = arith.constant dense<0xFF800000> : vector<64xf32>
    %39 = vector.multi_reduction <maximumf>, %38, %cst_30 [1] : vector<64x64xf32> to vector<64xf32>
    %40 = vector.shape_cast %39 : vector<64xf32> to vector<64x1xf32>
    %41 = vector.broadcast %40 : vector<64x1xf32> to vector<64x64xf32>
    %42 = arith.subf %38, %41 : vector<64x64xf32>
    %43 = math.exp %42 : vector<64x64xf32>
    %cst_31 = arith.constant dense<0.000000e+00> : vector<64xf32>
    %44 = vector.multi_reduction <add>, %43, %cst_31 [1] : vector<64x64xf32> to vector<64xf32>
    %45 = vector.shape_cast %44 : vector<64xf32> to vector<64x1xf32>
    %46 = tpu.reciprocal %45 {approx = true} : vector<64x1xf32> -> vector<64x1xf32>
    %47 = vector.broadcast %46 : vector<64x1xf32> to vector<64x64xf32>
    %48 = arith.mulf %43, %47 : vector<64x64xf32>
    %49 = arith.truncf %48 : vector<64x64xf32> to vector<64x64xbf16>
    "tpu.trace_start"() <{level = 10 : i32, message = "qk,kd->qd"}> : () -> ()
    %cst_32 = arith.constant dense<0.000000e+00> : vector<64x128xf32>
    %50 = tpu.matmul %49, %37, %cst_32 {dimension_numbers = #tpu.dot_dimension_numbers<[1], [0], [0], [1], [0, 0, 1, 1], [], []>} : vector<64x64xbf16>, vector<64x128xbf16>, vector<64x128xf32> -> vector<64x128xf32>
    "tpu.trace_stop"() : () -> ()
    %51 = arith.truncf %50 : vector<64x128xf32> to vector<64x128xbf16>
    %c0_33 = arith.constant 0 : index
    %c128_34 = arith.constant 128 : index
    %52 = vector.load %arg9[%c0_33, %c128_34] : memref<128x256xbf16, #tpu.memory_space<vmem>>, vector<64x128xbf16>
    tpu.vector_store %arg9[%c0_33, %c128_34], %51 {strides = array<i32>} : memref<128x256xbf16, #tpu.memory_space<vmem>>, vector<64x128xbf16>,
    %c64 = arith.constant 64 : index
    %c0_35 = arith.constant 0 : index
    %53 = vector.load %arg8[%c64, %c0_35] : memref<128x768xbf16, #tpu.memory_space<vmem>>, vector<64x128xbf16>
    %c64_36 = arith.constant 64 : index
    %c256_37 = arith.constant 256 : index
    %54 = vector.load %arg8[%c64_36, %c256_37] : memref<128x768xbf16, #tpu.memory_space<vmem>>, vector<64x128xbf16>
    %c64_38 = arith.constant 64 : index
    %c512_39 = arith.constant 512 : index
    %55 = vector.load %arg8[%c64_38, %c512_39] : memref<128x768xbf16, #tpu.memory_space<vmem>>, vector<64x128xbf16>
    "tpu.trace_start"() <{level = 10 : i32, message = "qd,kd->qk"}> : () -> ()
    %cst_40 = arith.constant dense<0.000000e+00> : vector<64x64xf32>
    %56 = tpu.matmul %53, %54, %cst_40 {dimension_numbers = #tpu.dot_dimension_numbers<[1], [1], [0], [0], [0, 0, 1, 0], [], []>} : vector<64x128xbf16>, vector<64x128xbf16>, vector<64x64xf32> -> vector<64x64xf32>
    "tpu.trace_stop"() : () -> ()
    %cst_41 = arith.constant dense<0xFF800000> : vector<64xf32>
    %57 = vector.multi_reduction <maximumf>, %56, %cst_41 [1] : vector<64x64xf32> to vector<64xf32>
    %58 = vector.shape_cast %57 : vector<64xf32> to vector<64x1xf32>
    %59 = vector.broadcast %58 : vector<64x1xf32> to vector<64x64xf32>
    %60 = arith.subf %56, %59 : vector<64x64xf32>
    %61 = math.exp %60 : vector<64x64xf32>
    %cst_42 = arith.constant dense<0.000000e+00> : vector<64xf32>
    %62 = vector.multi_reduction <add>, %61, %cst_42 [1] : vector<64x64xf32> to vector<64xf32>
    %63 = vector.shape_cast %62 : vector<64xf32> to vector<64x1xf32>
    %64 = tpu.reciprocal %63 {approx = true} : vector<64x1xf32> -> vector<64x1xf32>
    %65 = vector.broadcast %64 : vector<64x1xf32> to vector<64x64xf32>
    %66 = arith.mulf %61, %65 : vector<64x64xf32>
    %67 = arith.truncf %66 : vector<64x64xf32> to vector<64x64xbf16>
    "tpu.trace_start"() <{level = 10 : i32, message = "qk,kd->qd"}> : () -> ()
    %cst_43 = arith.constant dense<0.000000e+00> : vector<64x128xf32>
    %68 = tpu.matmul %67, %55, %cst_43 {dimension_numbers = #tpu.dot_dimension_numbers<[1], [0], [0], [1], [0, 0, 1, 1], [], []>} : vector<64x64xbf16>, vector<64x128xbf16>, vector<64x128xf32> -> vector<64x128xf32>
    "tpu.trace_stop"() : () -> ()
    %69 = arith.truncf %68 : vector<64x128xf32> to vector<64x128xbf16>
    %c64_44 = arith.constant 64 : index
    %c0_45 = arith.constant 0 : index
    %70 = vector.load %arg9[%c64_44, %c0_45] : memref<128x256xbf16, #tpu.memory_space<vmem>>, vector<64x128xbf16>
    tpu.vector_store %arg9[%c64_44, %c0_45], %69 {strides = array<i32>} : memref<128x256xbf16, #tpu.memory_space<vmem>>, vector<64x128xbf16>,
    %c64_46 = arith.constant 64 : index
    %c128_47 = arith.constant 128 : index
    %71 = vector.load %arg8[%c64_46, %c128_47] : memref<128x768xbf16, #tpu.memory_space<vmem>>, vector<64x128xbf16>
    %c64_48 = arith.constant 64 : index
    %c384_49 = arith.constant 384 : index
    %72 = vector.load %arg8[%c64_48, %c384_49] : memref<128x768xbf16, #tpu.memory_space<vmem>>, vector<64x128xbf16>
    %c64_50 = arith.constant 64 : index
    %c640_51 = arith.constant 640 : index
    %73 = vector.load %arg8[%c64_50, %c640_51] : memref<128x768xbf16, #tpu.memory_space<vmem>>, vector<64x128xbf16>
    "tpu.trace_start"() <{level = 10 : i32, message = "qd,kd->qk"}> : () -> ()
    %cst_52 = arith.constant dense<0.000000e+00> : vector<64x64xf32>
    %74 = tpu.matmul %71, %72, %cst_52 {dimension_numbers = #tpu.dot_dimension_numbers<[1], [1], [0], [0], [0, 0, 1, 0], [], []>} : vector<64x128xbf16>, vector<64x128xbf16>, vector<64x64xf32> -> vector<64x64xf32>
    "tpu.trace_stop"() : () -> ()
    %cst_53 = arith.constant dense<0xFF800000> : vector<64xf32>
    %75 = vector.multi_reduction <maximumf>, %74, %cst_53 [1] : vector<64x64xf32> to vector<64xf32>
    %76 = vector.shape_cast %75 : vector<64xf32> to vector<64x1xf32>
    %77 = vector.broadcast %76 : vector<64x1xf32> to vector<64x64xf32>
    %78 = arith.subf %74, %77 : vector<64x64xf32>
    %79 = math.exp %78 : vector<64x64xf32>
    %cst_54 = arith.constant dense<0.000000e+00> : vector<64xf32>
    %80 = vector.multi_reduction <add>, %79, %cst_54 [1] : vector<64x64xf32> to vector<64xf32>
    %81 = vector.shape_cast %80 : vector<64xf32> to vector<64x1xf32>
    %82 = tpu.reciprocal %81 {approx = true} : vector<64x1xf32> -> vector<64x1xf32>
    %83 = vector.broadcast %82 : vector<64x1xf32> to vector<64x64xf32>
    %84 = arith.mulf %79, %83 : vector<64x64xf32>
    %85 = arith.truncf %84 : vector<64x64xf32> to vector<64x64xbf16>
    "tpu.trace_start"() <{level = 10 : i32, message = "qk,kd->qd"}> : () -> ()
    %cst_55 = arith.constant dense<0.000000e+00> : vector<64x128xf32>
    %86 = tpu.matmul %85, %73, %cst_55 {dimension_numbers = #tpu.dot_dimension_numbers<[1], [0], [0], [1], [0, 0, 1, 1], [], []>} : vector<64x64xbf16>, vector<64x128xbf16>, vector<64x128xf32> -> vector<64x128xf32>
    "tpu.trace_stop"() : () -> ()
    %87 = arith.truncf %86 : vector<64x128xf32> to vector<64x128xbf16>
    %c64_56 = arith.constant 64 : index
    %c128_57 = arith.constant 128 : index
    %88 = vector.load %arg9[%c64_56, %c128_57] : memref<128x256xbf16, #tpu.memory_space<vmem>>, vector<64x128xbf16>
    tpu.vector_store %arg9[%c64_56, %c128_57], %87 {strides = array<i32>} : memref<128x256xbf16, #tpu.memory_space<vmem>>, vector<64x128xbf16>,
    %c0_58 = arith.constant 0 : index
    %c0_59 = arith.constant 0 : index
    %89 = vector.load %arg9[%c0_58, %c0_59] : memref<128x256xbf16, #tpu.memory_space<vmem>>, vector<128x256xbf16>
    %c0_60 = arith.constant 0 : index
    %c0_61 = arith.constant 0 : index
    %90 = vector.load %arg3[%c0_60, %c0_61] : memref<256x256xbf16, #tpu.memory_space<vmem>>, vector<256x256xbf16>
    %cst_62 = arith.constant dense<0.000000e+00> : vector<128x256xf32>
    %91 = tpu.matmul %89, %90, %cst_62 {dimension_numbers = #tpu.dot_dimension_numbers<[1], [0], [0], [1], [0, 0, 1, 1], [], []>} : vector<128x256xbf16>, vector<256x256xbf16>, vector<128x256xf32> -> vector<128x256xf32>
    %92 = vector.broadcast %1 : vector<1x256xf32> to vector<128x256xf32>
    %93 = arith.addf %91, %92 : vector<128x256xf32>
    %94 = arith.addf %8, %93 : vector<128x256xf32>
    %cst_63 = arith.constant dense<0.000000e+00> : vector<128xf32>
    %95 = vector.multi_reduction <add>, %94, %cst_63 [1] : vector<128x256xf32> to vector<128xf32>
    %96 = vector.shape_cast %95 : vector<128xf32> to vector<128x1xf32>
    %cst_64 = arith.constant 2.560000e+02 : f32
    %97 = vector.broadcast %cst_64 : f32 to vector<128x1xf32>
    %98 = arith.divf %96, %97 : vector<128x1xf32>
    %99 = vector.broadcast %98 : vector<128x1xf32> to vector<128x256xf32>
    %100 = arith.subf %94, %99 : vector<128x256xf32>
    %101 = arith.mulf %100, %100 : vector<128x256xf32>
    %cst_65 = arith.constant dense<0.000000e+00> : vector<128xf32>
    %102 = vector.multi_reduction <add>, %101, %cst_65 [1] : vector<128x256xf32> to vector<128xf32>
    %103 = vector.shape_cast %102 : vector<128xf32> to vector<128x1xf32>
    %cst_66 = arith.constant 2.560000e+02 : f32
    %104 = vector.broadcast %cst_66 : f32 to vector<128x1xf32>
    %105 = arith.divf %103, %104 : vector<128x1xf32>
    %106 = vector.broadcast %98 : vector<128x1xf32> to vector<128x256xf32>
    %107 = arith.subf %94, %106 : vector<128x256xf32>
    %cst_67 = arith.constant 9.99999974E-6 : f32
    %108 = vector.broadcast %cst_67 : f32 to vector<128x1xf32>
    %109 = arith.addf %105, %108 : vector<128x1xf32>
    %110 = math.rsqrt %109 : vector<128x1xf32>
    %111 = vector.broadcast %110 : vector<128x1xf32> to vector<128x256xf32>
    %112 = arith.mulf %107, %111 : vector<128x256xf32>
    %113 = vector.broadcast %4 : vector<1x256xf32> to vector<128x256xf32>
    %114 = arith.mulf %112, %113 : vector<128x256xf32>
    %115 = vector.broadcast %5 : vector<1x256xf32> to vector<128x256xf32>
    %116 = arith.addf %114, %115 : vector<128x256xf32>
    %117 = arith.truncf %116 : vector<128x256xf32> to vector<128x256xbf16>
    %c0_68 = arith.constant 0 : index
    %c0_69 = arith.constant 0 : index
    %118 = vector.load %arg4[%c0_68, %c0_69] : memref<256x1024xbf16, #tpu.memory_space<vmem>>, vector<256x1024xbf16>
    %cst_70 = arith.constant dense<0.000000e+00> : vector<128x1024xf32>
    %119 = tpu.matmul %117, %118, %cst_70 {dimension_numbers = #tpu.dot_dimension_numbers<[1], [0], [0], [1], [0, 0, 1, 1], [], []>} : vector<128x256xbf16>, vector<256x1024xbf16>, vector<128x1024xf32> -> vector<128x1024xf32>
    %120 = vector.broadcast %2 : vector<1x1024xf32> to vector<128x1024xf32>
    %121 = arith.addf %119, %120 : vector<128x1024xf32>
    %cst_71 = arith.constant 0.000000e+00 : f32
    %122 = vector.broadcast %cst_71 : f32 to vector<128x1024xf32>
    %123 = arith.maximumf %121, %122 : vector<128x1024xf32>
    %124 = arith.truncf %123 : vector<128x1024xf32> to vector<128x1024xbf16>
    %c0_72 = arith.constant 0 : index
    %c0_73 = arith.constant 0 : index
    %125 = vector.load %arg5[%c0_72, %c0_73] : memref<1024x256xbf16, #tpu.memory_space<vmem>>, vector<1024x256xbf16>
    %cst_74 = arith.constant dense<0.000000e+00> : vector<128x256xf32>
    %126 = tpu.matmul %124, %125, %cst_74 {dimension_numbers = #tpu.dot_dimension_numbers<[1], [0], [0], [1], [0, 0, 1, 1], [], []>} : vector<128x1024xbf16>, vector<1024x256xbf16>, vector<128x256xf32> -> vector<128x256xf32>
    %127 = vector.broadcast %3 : vector<1x256xf32> to vector<128x256xf32>
    %128 = arith.addf %126, %127 : vector<128x256xf32>
    %129 = arith.addf %116, %128 : vector<128x256xf32>
    %cst_75 = arith.constant dense<0.000000e+00> : vector<128xf32>
    %130 = vector.multi_reduction <add>, %129, %cst_75 [1] : vector<128x256xf32> to vector<128xf32>
    %131 = vector.shape_cast %130 : vector<128xf32> to vector<128x1xf32>
    %cst_76 = arith.constant 2.560000e+02 : f32
    %132 = vector.broadcast %cst_76 : f32 to vector<128x1xf32>
    %133 = arith.divf %131, %132 : vector<128x1xf32>
    %134 = vector.broadcast %133 : vector<128x1xf32> to vector<128x256xf32>
    %135 = arith.subf %129, %134 : vector<128x256xf32>
    %136 = arith.mulf %135, %135 : vector<128x256xf32>
    %cst_77 = arith.constant dense<0.000000e+00> : vector<128xf32>
    %137 = vector.multi_reduction <add>, %136, %cst_77 [1] : vector<128x256xf32> to vector<128xf32>
    %138 = vector.shape_cast %137 : vector<128xf32> to vector<128x1xf32>
    %cst_78 = arith.constant 2.560000e+02 : f32
    %139 = vector.broadcast %cst_78 : f32 to vector<128x1xf32>
    %140 = arith.divf %138, %139 : vector<128x1xf32>
    %141 = vector.broadcast %133 : vector<128x1xf32> to vector<128x256xf32>
    %142 = arith.subf %129, %141 : vector<128x256xf32>
    %cst_79 = arith.constant 9.99999974E-6 : f32
    %143 = vector.broadcast %cst_79 : f32 to vector<128x1xf32>
    %144 = arith.addf %140, %143 : vector<128x1xf32>
    %145 = math.rsqrt %144 : vector<128x1xf32>
    %146 = vector.broadcast %145 : vector<128x1xf32> to vector<128x256xf32>
    %147 = arith.mulf %142, %146 : vector<128x256xf32>
    %148 = vector.broadcast %6 : vector<1x256xf32> to vector<128x256xf32>
    %149 = arith.mulf %147, %148 : vector<128x256xf32>
    %150 = vector.broadcast %7 : vector<1x256xf32> to vector<128x256xf32>
    %151 = arith.addf %149, %150 : vector<128x256xf32>
    %c0_80 = arith.constant 0 : index
    %c0_81 = arith.constant 0 : index
    %152 = vector.load %arg7[%c0_80, %c0_81] : memref<128x256xf32, #tpu.memory_space<vmem>>, vector<128x256xf32>
    tpu.vector_store %arg7[%c0_80, %c0_81], %151 {strides = array<i32>} : memref<128x256xf32, #tpu.memory_space<vmem>>, vector<128x256xf32>,
    return
  }
  func.func @transform_0(%arg0: i32) -> (i32, i32) {
    %c0_i32 = arith.constant 0 : i32
    %c0_i32_0 = arith.constant 0 : i32
    return %arg0, %c0_i32 : i32, i32
  }
  func.func @transform_1(%arg0: i32) -> (i32, i32) {
    %c0_i32 = arith.constant 0 : i32
    %c0_i32_0 = arith.constant 0 : i32
    %c0_i32_1 = arith.constant 0 : i32
    return %c0_i32, %c0_i32_0 : i32, i32
  }
  func.func @transform_2(%arg0: i32) -> (i32, i32) {
    %c0_i32 = arith.constant 0 : i32
    %c0_i32_0 = arith.constant 0 : i32
    %c0_i32_1 = arith.constant 0 : i32
    return %c0_i32, %c0_i32_0 : i32, i32
  }
  func.func @transform_3(%arg0: i32) -> (i32, i32) {
    %c0_i32 = arith.constant 0 : i32
    %c0_i32_0 = arith.constant 0 : i32
    %c0_i32_1 = arith.constant 0 : i32
    return %c0_i32, %c0_i32_0 : i32, i32
  }
  func.func @transform_4(%arg0: i32) -> (i32, i32) {
    %c0_i32 = arith.constant 0 : i32
    %c0_i32_0 = arith.constant 0 : i32
    %c0_i32_1 = arith.constant 0 : i32
    return %c0_i32, %c0_i32_0 : i32, i32
  }
  func.func @transform_5(%arg0: i32) -> (i32, i32) {
    %c0_i32 = arith.constant 0 : i32
    %c0_i32_0 = arith.constant 0 : i32
    %c0_i32_1 = arith.constant 0 : i32
    return %c0_i32, %c0_i32_0 : i32, i32
  }
  func.func @transform_6(%arg0: i32) -> (i32, i32) {
    %c0_i32 = arith.constant 0 : i32
    %c0_i32_0 = arith.constant 0 : i32
    return %arg0, %c0_i32 : i32, i32
  }
}

</mosaic_0001>

<bundles_post_ra>
// kernel: tpu_custom_call.1
= control target key start
LH: loop header
LB: loop body
LE: loop exit
PB: predicated region body
PF: predicated region fallthrough
CT: control target
= control target key end

     0   :  { %11 = vsyncpa [#allocation5], 0  ;;  %s10436_s0 = inlined_call_operand.hbm [shape: f32[128,256], index: 0, kind: input, shape index: {}]   ;;  %s10437_s1 = inlined_call_operand.hbm [shape: bf16[256,768], index: 1, kind: input, shape index: {}]   ;;  %s10438_s2 = inlined_call_operand.hbm [shape: bf16[256,256], index: 2, kind: input, shape index: {}]   ;;  %s10439_s3 = inlined_call_operand.hbm [shape: bf16[256,1024], index: 3, kind: input, shape index: {}]   ;;  %s10440_s4 = inlined_call_operand.hbm [shape: bf16[1024,256], index: 4, kind: input, shape index: {}]   ;;  %s10441_s5 = inlined_call_operand.hbm [shape: f32[1,3328], index: 5, kind: input, shape index: {}]   ;;  %s10442_s6 = inlined_call_operand.hbm [shape: f32[128,256], index: 6, kind: output, shape index: {}]  }
   0x1   :  { %12 = vsyncpa [#allocation8], 0 }
   0x2   :  { %13 = vsyncpa [#allocation11], 0 }
   0x3   :  { %14 = vsyncpa [#allocation14], 0 }
   0x4   :  { %15 = vsyncpa [#allocation6], 0  ;;  %s8498_s21 = smov [#allocation7]  }
   0x5   :  { %s33_s22 = sshll.u32 %s8498_s21, 4  ;;  %s34_s22 = int_to_ptr.vmem [resolvable:$true] %s33_s22 }
   0x6   :  { %s8356_s23 = scalar_lea.vmem %s34_s22, 12288  ;;  %p8361_p1 = scmp.lt.s32.totalorder %s34_s22, %s34_s22 }
   0x7   :  { %p8357_p0 = scmp.ne.s32.totalorder %s34_s22, %s8356_s23  ;;  %p8362_p2 = scmp.lt.s32.totalorder %s8356_s23, %s8356_s23 }
   0x9   :  { %p8363_p3 = por %p8362_p2, %p8361_p1 }
   0xb   :  { %p8364_p4 = pnand %p8363_p3, %p8357_p0 }
   0xd   :  { %8367 = shalt.err (!%p8364_p4)
}
   0xe   :  { %s8499_s24 = smov 384   ;;  %s8500_s25 = smov 24  }
   0xf   :  { %39 = dma.hbm_to_vmem [thread:$0]  %s10437_s1, 12288, %s34_s22, [#allocation8], %s8499_s24, %s8499_s24, %s8500_s25  }
  0x10   :  { %s8501_s28 = smov [#allocation10]  }
  0x11   :  { %s57_s29 = sshll.u32 %s8501_s28, 4  ;;  %s58_s29 = int_to_ptr.vmem [resolvable:$true] %s57_s29 }
  0x12   :  { %s8376_s30 = scalar_lea.vmem %s58_s29, 16384  ;;  %p8381_p6 = scmp.lt.s32.totalorder %s58_s29, %s58_s29 }
  0x13   :  { %p8377_p5 = scmp.ne.s32.totalorder %s58_s29, %s8376_s30  ;;  %p8382_p7 = scmp.lt.s32.totalorder %s8376_s30, %s8376_s30 }
  0x15   :  { %p8383_p8 = por %p8382_p7, %p8381_p6 }
  0x17   :  { %p8384_p9 = pnand %p8383_p8, %p8377_p5 }
  0x19   :  { %8387 = shalt.err (!%p8384_p9)
}
  0x1a   :  { %s8502_s7 = smov 512   ;;  %s8503_s8 = smov 32  }
  0x1b   :  { %63 = dma.hbm_to_vmem [thread:$0]  %s10439_s3, 16384, %s58_s29, [#allocation11], %s8502_s7, %s8502_s7, %s8503_s8  }
  0x1c   :  { %s8504_s11 = smov [#allocation4]  }
  0x1d   :  { %s21_s12 = sshll.u32 %s8504_s11, 4  ;;  %s22_s12 = int_to_ptr.vmem [resolvable:$true] %s21_s12 }
  0x1e   :  { %s8396_s1 = scalar_lea.vmem %s22_s12, 4096  ;;  %p8401_p11 = scmp.lt.s32.totalorder %s22_s12, %s22_s12 }
  0x1f   :  { %p8397_p10 = scmp.ne.s32.totalorder %s22_s12, %s8396_s1  ;;  %p8402_p12 = scmp.lt.s32.totalorder %s8396_s1, %s8396_s1 }
  0x21   :  { %p8403_p13 = por %p8402_p12, %p8401_p11 }
  0x23   :  { %p8404_p0 = pnand %p8403_p13, %p8397_p10 }
  0x25   :  { %8407 = shalt.err (!%p8404_p0)
}
  0x26   :  { %s8505_s13 = smov 256   ;;  %s8506_s14 = smov 16  }
  0x27   :  { %27 = dma.hbm_to_vmem [thread:$0]  %s10436_s0, 4096, %s22_s12, [#allocation5], %s8505_s13, %s8505_s13, %s8506_s14  }
  0x28   :  { %s8507_s3 = smov [#allocation9]  }
  0x29   :  { %s45_s17 = sshll.u32 %s8507_s3, 4  ;;  %s46_s17 = int_to_ptr.vmem [resolvable:$true] %s45_s17 }
  0x2a   :  { %s8416_s18 = scalar_lea.vmem %s46_s17, 4096  ;;  %p8421_p2 = scmp.lt.s32.totalorder %s46_s17, %s46_s17 }
  0x2b   :  { %p8417_p1 = scmp.ne.s32.totalorder %s46_s17, %s8416_s18  ;;  %p8422_p3 = scmp.lt.s32.totalorder %s8416_s18, %s8416_s18 }
  0x2d   :  { %p8423_p4 = por %p8422_p3, %p8421_p2 }
  0x2f   :  { %p8424_p5 = pnand %p8423_p4, %p8417_p1 }
  0x31   :  { %8427 = shalt.err (!%p8424_p5)
}
  0x32   :  { %s8508_s19 = smov 128   ;;  %s8509_s20 = smov 8  }
  0x33   :  { %51 = dma.hbm_to_vmem [thread:$0]  %s10438_s2, 4096, %s46_s17, [#allocation8], %s8508_s19, %s8508_s19, %s8509_s20  }
  0x34   :  { %s8510_s23 = smov [#allocation12]   ;;  %s8511_s25 = smov [#allocation13]  }
  0x35   :  { %s69_s24 = sshll.u32 %s8510_s23, 4  ;;  %s82_s0 = sshll.u32 %s8511_s25, 4  ;;  %s70_s24 = int_to_ptr.vmem [resolvable:$true] %s69_s24  ;;  %s83_s0 = int_to_ptr.vmem [resolvable:$true] %s82_s0 }
  0x36   :  { %s8436_s26 = scalar_lea.vmem %s70_s24, 16384  ;;  %p8441_p7 = scmp.lt.s32.totalorder %s70_s24, %s70_s24 }
  0x37   :  { %p8437_p6 = scmp.ne.s32.totalorder %s70_s24, %s8436_s26  ;;  %p8442_p8 = scmp.lt.s32.totalorder %s8436_s26, %s8436_s26 }
  0x39   :  { %p8443_p9 = por %p8442_p8, %p8441_p7 }
  0x3b   :  { %p8444_p10 = pnand %p8443_p9, %p8437_p6 }
  0x3d   :  { %8447 = shalt.err (!%p8444_p10)
}
  0x3e   :  { %75 = dma.hbm_to_vmem [thread:$0]  %s10440_s4, 16384, %s70_s24, [#allocation11], %s8508_s19, %s8508_s19, %s8509_s20  }
  0x3f   :  { %s8456_s29 = scalar_lea.vmem %s83_s0, 416  ;;  %p8461_p12 = scmp.lt.s32.totalorder %s83_s0, %s83_s0 }
  0x40   :  { %p8457_p11 = scmp.ne.s32.totalorder %s83_s0, %s8456_s29  ;;  %p8462_p13 = scmp.lt.s32.totalorder %s8456_s29, %s8456_s29 }
  0x42   :  { %p8463_p0 = por %p8462_p13, %p8461_p12 }
  0x44   :  { %p8464_p1 = pnand %p8463_p0, %p8457_p11 }
  0x46   :  { %8467 = shalt.err (!%p8464_p1)
}
  0x47   :  { %85 = dma.hbm_to_vmem [thread:$0]  %s10441_s5, 416, %s83_s0, [#allocation14]  }
  0x48   :  { %8488 = dma.done.wait [#allocation5], 4096  }
  0x49   :  { %8489 = vsyncadd [#allocation5], 4294963200 }
  0x4a   :  { %8490 = dma.done.wait [#allocation8], 16384  }
  0x4b   :  { %8491 = vsyncadd [#allocation8], 4294950912 }
  0x4c   :  { %8492 = dma.done.wait [#allocation11], 32768  }
  0x4d   :  { %8493 = vsyncadd [#allocation11], 4294934528 }
  0x4e   :  { %8494 = dma.done.wait [#allocation14], 416  }
  0x4f   :  { %8495 = vsyncadd [#allocation14], 4294966880  ;;  %v7668_v0 = vld [vmem:[#allocation7 + $0x15c] ss:$24 sps:$4 sm:$0xff]   ;;  %v7670_v1 = vld [vmem:[#allocation7 + $0x158] ss:$24 sps:$4 sm:$0xff]  }
  0x50   :  { %881 = vmatprep.subr.bf16.mxu1 %v7668_v0  ;;  %v7671_v2 = vld [vmem:[#allocation7 + $0x12c] ss:$24 sps:$4 sm:$0xff]   ;;  %v7673_v3 = vld [vmem:[#allocation7 + $0x128] ss:$24 sps:$4 sm:$0xff]   ;;  %v7674_v4 = vld [vmem:[#allocation7 + $0xfc] ss:$24 sps:$4 sm:$0xff]  }
  0x51   :  { %882 = vmatpush1.bf16.msra.mxu1 %v7670_v1  ;;  %v7676_v5 = vld [vmem:[#allocation7 + $0xf8] ss:$24 sps:$4 sm:$0xff]   ;;  %v7677_v6 = vld [vmem:[#allocation7 + $0xcc] ss:$24 sps:$4 sm:$0xff]   ;;  %v7679_v7 = vld [vmem:[#allocation7 + $0xc8] ss:$24 sps:$4 sm:$0xff]  }
  0x52   :  { %883 = vmatprep.subr.bf16.mxu1 %v7671_v2  ;;  %v7680_v8 = vld [vmem:[#allocation7 + $0x9c] ss:$24 sps:$4 sm:$0xff]   ;;  %v7682_v10 = vld [vmem:[#allocation7 + $0x98] ss:$24 sps:$4 sm:$0xff]   ;;  %v7683_v11 = vld [vmem:[#allocation7 + $0x6c] ss:$24 sps:$4 sm:$0xff]  }
  0x53   :  { %v7698_v9 = vld [vmem:[#allocation7 + $0x154] ss:$24 sps:$4 sm:$0xff]   ;;  %v7702_v12 = vld [vmem:[#allocation7 + $0x150] ss:$24 sps:$4 sm:$0xff]   ;;  %v7704_v13 = vld [vmem:[#allocation7 + $0x124] ss:$24 sps:$4 sm:$0xff]  }
  0x54   :  { %768 = vmatprep.subr.bf16.mxu0 %v7698_v9  ;;  %v7685_v14 = vld [vmem:[#allocation7 + $0x68] ss:$24 sps:$4 sm:$0xff]   ;;  %v7710_v16 = vld [vmem:[#allocation7 + $0xf4] ss:$24 sps:$4 sm:$0xff]   ;;  %v7716_v19 = vld [vmem:[#allocation7 + $0xc4] ss:$24 sps:$4 sm:$0xff]  }
  0x55   :  { %884 = vmatpush1.bf16.msra.mxu1 %v7673_v3  ;;  %769 = vmatpush1.bf16.msra.mxu0 %v7702_v12  ;;  %v7708_v15 = vld [vmem:[#allocation7 + $0x120] ss:$24 sps:$4 sm:$0xff]   ;;  %v7686_v17 = vld [vmem:[#allocation7 + $0x3c] ss:$24 sps:$4 sm:$0xff]   ;;  %v7714_v18 = vld [vmem:[#allocation7 + $0xf0] ss:$24 sps:$4 sm:$0xff]  }
  0x56   :  { %885 = vmatprep.subr.bf16.mxu1 %v7674_v4  ;;  %770 = vmatprep.subr.bf16.mxu0 %v7704_v13  ;;  %v7688_v20 = vld [vmem:[#allocation7 + $0x38] ss:$24 sps:$4 sm:$0xff]   ;;  %v7689_v21 = vld [vmem:[#allocation7 + $0xc] ss:$24 sps:$4 sm:$0xff]   ;;  %v7691_v24 = vld [vmem:[#allocation7 + $0x8] ss:$24 sps:$4 sm:$0xff]  }
  0x57   :  { %v7720_v22 = vld [vmem:[#allocation7 + $0xc0] ss:$24 sps:$4 sm:$0xff]   ;;  %v7722_v23 = vld [vmem:[#allocation7 + $0x94] ss:$24 sps:$4 sm:$0xff]   ;;  %v7726_v26 = vld [vmem:[#allocation7 + $0x90] ss:$24 sps:$4 sm:$0xff]  }
  0x58   :  { %v7692_v25 = vld [vmem:[#allocation7 + $0x2dc] ss:$24 sps:$4 sm:$0xff]   ;;  %v114_v27 = vld [vmem:[#allocation4 + $0x8] sm:$0xff]  ;;  %v7694_v31 = vld [vmem:[#allocation7 + $0x2d8] ss:$24 sps:$4 sm:$0xff]   ;;  %vm1580_vm0 = vcmask 523264  }
  0x59   :  { %886 = vmatpush1.bf16.msra.mxu1 %v7676_v5  ;;  %771 = vmatpush1.bf16.msra.mxu0 %v7708_v15  ;;  %v116_v28 = vld [vmem:[#allocation4 + $0x18] sm:$0xff]  ;;  %v7695_v32 = vld [vmem:[#allocation7 + $0x2ac] ss:$24 sps:$4 sm:$0xff]   ;;  %v7697_v35 = vld [vmem:[#allocation7 + $0x2a8] ss:$24 sps:$4 sm:$0xff]   ;;  %s8512_s4 = smov [#allocation15]  }
  0x5a   :  { %887 = vmatprep.subr.bf16.mxu1 %v7677_v6  ;;  %772 = vmatprep.subr.bf16.mxu0 %v7710_v16  ;;  %v7728_v29 = vld [vmem:[#allocation7 + $0x64] ss:$24 sps:$4 sm:$0xff]   ;;  %v8569_v30 = vpack.c.bf16 %v116_v28, %v114_v27  ;;  %v7732_v33 = vld [vmem:[#allocation7 + $0x60] ss:$24 sps:$4 sm:$0xff]   ;;  %v7734_v34 = vld [vmem:[#allocation7 + $0x34] ss:$24 sps:$4 sm:$0xff]  }
  0x5b   :  { %v7700_v36 = vld [vmem:[#allocation7 + $0x27c] ss:$24 sps:$4 sm:$0xff]   ;;  %v7736_v37 = vld [vmem:[#allocation7 + $0x30] ss:$24 sps:$4 sm:$0xff]   ;;  %v7706_v40 = vld [vmem:[#allocation7 + $0x24c] ss:$24 sps:$4 sm:$0xff]  }
  0x5c   :  { %913 = vmatprep.mubr.bf16.mxu1 %v8569_v30  ;;  %800 = vmatprep.mubr.bf16.mxu0 %v8569_v30  ;;  %v7737_v38 = vld [vmem:[#allocation7 + $0x4] ss:$24 sps:$4 sm:$0xff]   ;;  %v7703_v39 = vld [vmem:[#allocation7 + $0x278] ss:$24 sps:$4 sm:$0xff]   ;;  %v7740_v42 = vld [vmem:[#allocation7 + $0x2d4] ss:$24 sps:$4 sm:$0xff]  }
  0x5d   :  { %888 = vmatpush1.bf16.msra.mxu1 %v7679_v7  ;;  %773 = vmatpush1.bf16.msra.mxu0 %v7714_v18  ;;  %v7739_v41 = vld [vmem:[#allocation7] ss:$24 sps:$4 sm:$0xff]   ;;  %v7712_v44 = vld [vmem:[#allocation7 + $0x21c] ss:$24 sps:$4 sm:$0xff]   ;;  %v7742_v45 = vld [vmem:[#allocation7 + $0x2d0] ss:$24 sps:$4 sm:$0xff]  }
  0x5e   :  { %889 = vmatprep.subr.bf16.mxu1 %v7680_v8  ;;  %774 = vmatprep.subr.bf16.mxu0 %v7716_v19  ;;  %v7709_v43 = vld [vmem:[#allocation7 + $0x248] ss:$24 sps:$4 sm:$0xff]   ;;  %v7743_v46 = vld [vmem:[#allocation7 + $0x2a4] ss:$24 sps:$4 sm:$0xff]   ;;  %v7715_v47 = vld [vmem:[#allocation7 + $0x218] ss:$24 sps:$4 sm:$0xff]  }
  0x5f   :  { %v7718_v48 = vld [vmem:[#allocation7 + $0x1ec] ss:$24 sps:$4 sm:$0xff]   ;;  %v7745_v49 = vld [vmem:[#allocation7 + $0x2a0] ss:$24 sps:$4 sm:$0xff]   ;;  %v7724_v52 = vld [vmem:[#allocation7 + $0x1bc] ss:$24 sps:$4 sm:$0xff]  }
  0x60   :  { %v7746_v50 = vld [vmem:[#allocation7 + $0x274] ss:$24 sps:$4 sm:$0xff]   ;;  %v7721_v51 = vld [vmem:[#allocation7 + $0x1e8] ss:$24 sps:$4 sm:$0xff]   ;;  %v7749_v54 = vld [vmem:[#allocation7 + $0x244] ss:$24 sps:$4 sm:$0xff]  }
  0x61   :  { %890 = vmatpush1.bf16.msra.mxu1 %v7682_v10  ;;  %775 = vmatpush1.bf16.msra.mxu0 %v7720_v22  ;;  %v7748_v53 = vld [vmem:[#allocation7 + $0x270] ss:$24 sps:$4 sm:$0xff]   ;;  %v7730_v56 = vld [vmem:[#allocation7 + $0x18c] ss:$24 sps:$4 sm:$0xff]   ;;  %v7751_v60 = vld [vmem:[#allocation7 + $0x240] ss:$24 sps:$4 sm:$0xff]  }
  0x62   :  { %891 = vmatprep.subr.bf16.mxu1 %v7683_v11  ;;  %776 = vmatprep.subr.bf16.mxu0 %v7722_v23  ;;  %v7727_v55 = vld [vmem:[#allocation7 + $0x1b8] ss:$24 sps:$4 sm:$0xff]   ;;  %v7733_v57 = vld [vmem:[#allocation7 + $0x188] ss:$24 sps:$4 sm:$0xff]   ;;  %v7752_v63 = vld [vmem:[#allocation7 + $0x214] ss:$24 sps:$4 sm:$0xff]  }
  0x63   :  { %v113_v58 = vld [vmem:[#allocation4] sm:$0xff]  ;;  %v115_v59 = vld [vmem:[#allocation4 + $0x10] sm:$0xff]  ;;  %v118_v61 = vld [vmem:[#allocation4 + $0x28] sm:$0xff]  ;;  %s6822_s5 = sshll.u32 %s8512_s4, 4  ;;  %s6823_s5 = int_to_ptr.vmem [resolvable:$true] %s6822_s5 }
  0x64   :  { %v120_v62 = vld [vmem:[#allocation4 + $0x38] sm:$0xff]  ;;  %v7754_v0 = vld [vmem:[#allocation7 + $0x210] ss:$24 sps:$4 sm:$0xff]   ;;  %v8573_v2 = vpack.c.bf16 %v115_v59, %v113_v58  ;;  %v7758_v5 = vld [vmem:[#allocation7 + $0x1b4] ss:$24 sps:$4 sm:$0xff]   ;;  %s8468_s7 = scalar_lea.vmem %s6823_s5, 4096  ;;  %p8473_p3 = scmp.lt.s32.totalorder %s6823_s5, %s6823_s5 }
  0x65   :  { %892 = vmatpush1.bf16.msra.mxu1 %v7685_v14  ;;  %777 = vmatpush1.bf16.msra.mxu0 %v7726_v26  ;;  %v7755_v1 = vld [vmem:[#allocation7 + $0x1e4] ss:$24 sps:$4 sm:$0xff]   ;;  %v8575_v3 = vpack.c.bf16 %v120_v62, %v118_v61  ;;  %v7757_v4 = vld [vmem:[#allocation7 + $0x1e0] ss:$24 sps:$4 sm:$0xff]   ;;  %v119_v7 = vld [vmem:[#allocation4 + $0x30] sm:$0xff]  ;;  %p8469_p2 = scmp.ne.s32.totalorder %s6823_s5, %s8468_s7  ;;  %p8474_p4 = scmp.lt.s32.totalorder %s8468_s7, %s8468_s7 }
  0x66   :  { %893 = vmatprep.subr.bf16.mxu1 %v7686_v17  ;;  %778 = vmatprep.subr.bf16.mxu0 %v7728_v29  ;;  %v117_v6 = vld [vmem:[#allocation4 + $0x20] sm:$0xff]  ;;  %v122_v8 = vld [vmem:[#allocation4 + $0x48] sm:$0xff]  ;;  %v124_v9 = vld [vmem:[#allocation4 + $0x58] sm:$0xff] }
  0x67   :  { %v7760_v10 = vld [vmem:[#allocation7 + $0x1b0] ss:$24 sps:$4 sm:$0xff]   ;;  %v7761_v11 = vld [vmem:[#allocation7 + $0x184] ss:$24 sps:$4 sm:$0xff]   ;;  %v8579_v12 = vpack.c.bf16 %v119_v7, %v117_v6  ;;  %v8581_v13 = vpack.c.bf16 %v124_v9, %v122_v8  ;;  %v7763_v14 = vld [vmem:[#allocation7 + $0x180] ss:$24 sps:$4 sm:$0xff]   ;;  %p8475_p5 = por %p8474_p4, %p8473_p3 }
  0x68   :  { %v7766_v15 = vld [vmem:[#allocation7 + $0x164] ss:$24 sps:$4 sm:$0xff]   ;;  %v123_v17 = vld [vmem:[#allocation4 + $0x50] sm:$0xff]  ;;  %v126_v18 = vld [vmem:[#allocation4 + $0x68] sm:$0xff] }
  0x69   :  { %894 = vmatpush1.bf16.msra.mxu1 %v7688_v20  ;;  %779 = vmatpush1.bf16.msra.mxu0 %v7732_v33  ;;  %v121_v16 = vld [vmem:[#allocation4 + $0x40] sm:$0xff]  ;;  %v128_v19 = vld [vmem:[#allocation4 + $0x78] sm:$0xff]  ;;  %v127_v27 = vld [vmem:[#allocation4 + $0x70] sm:$0xff]  ;;  %p8476_p6 = pnand %p8475_p5, %p8469_p2 }
  0x6a   :  { %895 = vmatprep.subr.bf16.mxu1 %v7689_v21  ;;  %780 = vmatprep.subr.bf16.mxu0 %v7734_v34  ;;  %v7764_v20 = vld [vmem:[#allocation7 + $0x160] ss:$24 sps:$4 sm:$0xff]   ;;  %v7769_v21 = vld [vmem:[#allocation7 + $0x134] ss:$24 sps:$4 sm:$0xff]   ;;  %v8585_v22 = vpack.c.bf16 %v123_v17, %v121_v16  ;;  %v8587_v23 = vpack.c.bf16 %v128_v19, %v126_v18  ;;  %v7778_v33 = vld [vmem:[#allocation7 + $0xa4] ss:$24 sps:$4 sm:$0xff]  }
  0x6b   :  { %v125_v26 = vld [vmem:[#allocation4 + $0x60] sm:$0xff]  ;;  %v7775_v29 = vld [vmem:[#allocation7 + $0xd4] ss:$24 sps:$4 sm:$0xff]   ;;  %v140_v59 = vld [vmem:[#allocation4 + $0xd8] sm:$0xff] }
  0x6c   :  { %v7770_v28 = vld [vmem:[#allocation7 + $0x100] ss:$24 sps:$4 sm:$0xff]   ;;  %v138_v58 = vld [vmem:[#allocation4 + $0xc8] sm:$0xff]  ;;  %v139_v62 = vld [vmem:[#allocation4 + $0xd0] sm:$0xff] }
  0x6d   :  { %896 = vmatpush1.bf16.msra.mxu1 %v7691_v24  ;;  %781 = vmatpush1.bf16.msra.mxu0 %v7736_v37  ;;  %v7767_v24 = vld [vmem:[#allocation7 + $0x130] ss:$24 sps:$4 sm:$0xff]   ;;  %v7776_v34 = vld [vmem:[#allocation7 + $0xa0] ss:$24 sps:$4 sm:$0xff]   ;;  %v7784_v37 = vld [vmem:[#allocation7 + $0x44] ss:$24 sps:$4 sm:$0xff]  }
  0x6e   :  { %897 = vmatprep.subr.bf16.mxu1 %v7692_v25  ;;  %782 = vmatprep.subr.bf16.mxu0 %v7737_v38  ;;  %v7772_v25 = vld [vmem:[#allocation7 + $0x104] ss:$24 sps:$4 sm:$0xff]   ;;  %v130_v38 = vld [vmem:[#allocation4 + $0x88] sm:$0xff]  ;;  %v7806_v18 = vld [vmem:[#allocation7 + $0x1c0] ss:$24 sps:$4 sm:$0xff]  }
  0x6f   :  { %v137_v61 = vld [vmem:[#allocation4 + $0xc0] sm:$0xff]  ;;  %v142_v6 = vld [vmem:[#allocation4 + $0xe8] sm:$0xff]  ;;  %v144_v7 = vld [vmem:[#allocation4 + $0xf8] sm:$0xff] }
  0x70   :  { %v160_v8 = vpack.c.bf16 %v144_v7, %v142_v6  ;;  %v141_v9 = vld [vmem:[#allocation4 + $0xe0] sm:$0xff]  ;;  %v7803_v16 = vld [vmem:[#allocation7 + $0x1f0] ss:$24 sps:$4 sm:$0xff]   ;;  %v7811_v19 = vld [vmem:[#allocation7 + $0x194] ss:$24 sps:$4 sm:$0xff]  }
  0x71   :  { %898 = vmatpush2.bf16.msra.mxu1 %v7694_v31  ;;  %783 = vmatpush1.bf16.msra.mxu0 %v7739_v41  ;;  %v8593_v31 = vpack.c.bf16 %v127_v27, %v125_v26  ;;  %v129_v41 = vld [vmem:[#allocation4 + $0x80] sm:$0xff] }
  0x72   :  { %899 = vmatprep.subr.bf16.mxu1 %v7695_v32  ;;  %784 = vmatprep.subr.bf16.mxu0 %v7740_v42  ;;  %v7773_v32 = vld [vmem:[#allocation7 + $0xd0] ss:$24 sps:$4 sm:$0xff]   ;;  %v7808_v17 = vld [vmem:[#allocation7 + $0x1c4] ss:$24 sps:$4 sm:$0xff]  }
  0x73   :  { %v131_v42 = vld [vmem:[#allocation4 + $0x90] sm:$0xff] }
  0x75   :  { %900 = vmatpush2.bf16.msra.mxu1 %v7697_v35  ;;  %785 = vmatpush2.bf16.msra.mxu0 %v7742_v45  ;;  %v7781_v35 = vld [vmem:[#allocation7 + $0x74] ss:$24 sps:$4 sm:$0xff]  }
  0x76   :  { %901 = vmatprep.subr.bf16.mxu1 %v7700_v36  ;;  %786 = vmatprep.subr.bf16.mxu0 %v7743_v46  ;;  %v7779_v36 = vld [vmem:[#allocation7 + $0x70] ss:$24 sps:$4 sm:$0xff]   ;;  %v7787_v45 = vld [vmem:[#allocation7 + $0x14] ss:$24 sps:$4 sm:$0xff]  }
  0x77   :  { %v7785_v46 = vld [vmem:[#allocation7 + $0x10] ss:$24 sps:$4 sm:$0xff]  }
  0x79   :  { %902 = vmatpush2.bf16.msra.mxu1 %v7703_v39  ;;  %787 = vmatpush2.bf16.msra.mxu0 %v7745_v49  ;;  %v132_v39 = vld [vmem:[#allocation4 + $0x98] sm:$0xff] }
  0x7a   :  { %903 = vmatprep.subr.bf16.mxu1 %v7706_v40  ;;  %788 = vmatprep.subr.bf16.mxu0 %v7746_v50  ;;  %v8600_v40 = vpack.c.bf16 %v132_v39, %v130_v38  ;;  %v136_v49 = vld [vmem:[#allocation4 + $0xb8] sm:$0xff] }
  0x7d   :  { %904 = vmatpush2.bf16.msra.mxu1 %v7709_v43  ;;  %789 = vmatpush2.bf16.msra.mxu0 %v7748_v53  ;;  %v7782_v43 = vld [vmem:[#allocation7 + $0x40] ss:$24 sps:$4 sm:$0xff]  }
  0x7e   :  { %905 = vmatprep.subr.bf16.mxu1 %v7712_v44  ;;  %790 = vmatprep.subr.bf16.mxu0 %v7749_v54  ;;  %v8602_v44 = vpack.c.bf16 %v131_v42, %v129_v41  ;;  %v7788_v53 = vld [vmem:[#allocation7 + $0x2e0] ss:$24 sps:$4 sm:$0xff]  }
  0x81   :  { %906 = vmatpush2.bf16.msra.mxu1 %v7715_v47  ;;  %791 = vmatpush2.bf16.msra.mxu0 %v7751_v60  ;;  %v7790_v47 = vld [vmem:[#allocation7 + $0x2e4] ss:$24 sps:$4 sm:$0xff]   ;;  %v158_v60 = vpack.c.bf16 %v140_v59, %v138_v58 }
  0x82   :  { %907 = vmatprep.subr.bf16.mxu1 %v7718_v48  ;;  %792 = vmatprep.subr.bf16.mxu0 %v7752_v63  ;;  %v134_v48 = vld [vmem:[#allocation4 + $0xa8] sm:$0xff]  ;;  %v7794_v63 = vld [vmem:[#allocation7 + $0x280] ss:$24 sps:$4 sm:$0xff]  }
  0x83   :  { %v8608_v50 = vpack.c.bf16 %v136_v49, %v134_v48 }
  0x85   :  { %908 = vmatpush2.bf16.msra.mxu1 %v7721_v51  ;;  %793 = vmatpush2.bf16.msra.mxu0 %v7754_v0  ;;  %v133_v51 = vld [vmem:[#allocation4 + $0xa0] sm:$0xff]  ;;  %v157_v0 = vpack.c.bf16 %v139_v62, %v137_v61 }
  0x86   :  { %909 = vmatprep.subr.bf16.mxu1 %v7724_v52  ;;  %794 = vmatprep.subr.bf16.mxu0 %v7755_v1  ;;  %v135_v52 = vld [vmem:[#allocation4 + $0xb0] sm:$0xff] }
  0x87   :  { %v8610_v54 = vpack.c.bf16 %v135_v52, %v133_v51  ;;  %v7799_v1 = vld [vmem:[#allocation7 + $0x254] ss:$24 sps:$4 sm:$0xff]  }
  0x89   :  { %910 = vmatpush2.bf16.msra.mxu1 %v7727_v55  ;;  %795 = vmatpush2.bf16.msra.mxu0 %v7757_v4  ;;  %v7793_v55 = vld [vmem:[#allocation7 + $0x2b4] ss:$24 sps:$4 sm:$0xff]   ;;  %v7797_v4 = vld [vmem:[#allocation7 + $0x250] ss:$24 sps:$4 sm:$0xff]  }
  0x8a   :  { %911 = vmatprep.subr.bf16.mxu1 %v7730_v56  ;;  %796 = vmatprep.subr.bf16.mxu0 %v7758_v5  ;;  %v7791_v56 = vld [vmem:[#allocation7 + $0x2b0] ss:$24 sps:$4 sm:$0xff]   ;;  %v7802_v5 = vld [vmem:[#allocation7 + $0x224] ss:$24 sps:$4 sm:$0xff]  }
  0x8d   :  { %912 = vmatpush2.bf16.msra.mxu1 %v7733_v57  ;;  %797 = vmatpush2.bf16.msra.mxu0 %v7760_v10  ;;  %v7796_v57 = vld [vmem:[#allocation7 + $0x284] ss:$24 sps:$4 sm:$0xff]   ;;  %v143_v10 = vld [vmem:[#allocation4 + $0xf0] sm:$0xff] }
  0x8e   :  { %798 = vmatprep.subr.bf16.mxu0 %v7761_v11  ;;  %v7800_v11 = vld [vmem:[#allocation7 + $0x220] ss:$24 sps:$4 sm:$0xff]  }
  0x90   :  { %914 = vmatmul.mubr.bf16.vlgmr.msra.gmra.mxu1 %v8573_v2 }
  0x91   :  { %923 = vmatprep.mubr.bf16.mxu1 %v8575_v3  ;;  %799 = vmatpush2.bf16.msra.mxu0 %v7763_v14  ;;  %v159_v14 = vpack.c.bf16 %v143_v10, %v141_v9 }
  0x92   :  { %994 = vmatprep.subr.bf16.mxu0 %v7766_v15  ;;  %v7805_v15 = vld [vmem:[#allocation7 + $0x1f4] ss:$24 sps:$4 sm:$0xff]  }
  0x94   :  { %801 = vmatmul.mubr.bf16.vlgmr.msra.gmra.mxu0 %v8573_v2 }
  0x95   :  { %810 = vmatprep.mubr.bf16.mxu0 %v8575_v3  ;;  %995 = vmatpush1.bf16.msra.mxu0 %v7764_v20  ;;  %v7809_v20 = vld [vmem:[#allocation7 + $0x190] ss:$24 sps:$4 sm:$0xff]  }
  0x96   :  { %996 = vmatprep.subr.bf16.mxu0 %v7769_v21 }
  0x98   :  { %924 = vmatmul.mubr.bf16.gmra.mxu1 %v8579_v12 }
  0x99   :  { %933 = vmatprep.mubr.bf16.mxu1 %v8581_v13  ;;  %997 = vmatpush1.bf16.msra.mxu0 %v7767_v24 }
  0x9a   :  { %998 = vmatprep.subr.bf16.mxu0 %v7772_v25 }
  0x9c   :  { %811 = vmatmul.mubr.bf16.gmra.mxu0 %v8579_v12 }
  0x9d   :  { %820 = vmatprep.mubr.bf16.mxu0 %v8581_v13  ;;  %999 = vmatpush1.bf16.msra.mxu0 %v7770_v28 }
  0x9e   :  { %1000 = vmatprep.subr.bf16.mxu0 %v7775_v29 }
  0xa0   :  { %934 = vmatmul.mubr.bf16.gmra.mxu1 %v8585_v22 }
  0xa1   :  { %943 = vmatprep.mubr.bf16.mxu1 %v8587_v23  ;;  %1001 = vmatpush1.bf16.msra.mxu0 %v7773_v32 }
  0xa2   :  { %1002 = vmatprep.subr.bf16.mxu0 %v7778_v33 }
  0xa4   :  { %821 = vmatmul.mubr.bf16.gmra.mxu0 %v8585_v22 }
  0xa5   :  { %830 = vmatprep.mubr.bf16.mxu0 %v8587_v23  ;;  %1003 = vmatpush1.bf16.msra.mxu0 %v7776_v34 }
  0xa6   :  { %1004 = vmatprep.subr.bf16.mxu0 %v7781_v35 }
  0xa8   :  { %944 = vmatmul.mubr.bf16.gmra.mxu1 %v8593_v31 }
  0xa9   :  { %1005 = vmatpush1.bf16.msra.mxu0 %v7779_v36  ;;  %953 = vmatprep.mubr.bf16.mxu1 %v8600_v40 }
  0xaa   :  { %1006 = vmatprep.subr.bf16.mxu0 %v7784_v37 }
  0xac   :  { %831 = vmatmul.mubr.bf16.gmra.mxu0 %v8593_v31 }
  0xad   :  { %1007 = vmatpush1.bf16.msra.mxu0 %v7782_v43  ;;  %840 = vmatprep.mubr.bf16.mxu0 %v8600_v40 }
  0xae   :  { %1008 = vmatprep.subr.bf16.mxu0 %v7787_v45 }
  0xb0   :  { %954 = vmatmul.mubr.bf16.gmra.mxu1 %v8602_v44 }
  0xb1   :  { %1009 = vmatpush1.bf16.msra.mxu0 %v7785_v46  ;;  %963 = vmatprep.mubr.bf16.mxu1 %v8608_v50 }
  0xb2   :  { %1010 = vmatprep.subr.bf16.mxu0 %v7790_v47 }
  0xb4   :  { %841 = vmatmul.mubr.bf16.gmra.mxu0 %v8602_v44 }
  0xb5   :  { %1011 = vmatpush2.bf16.msra.mxu0 %v7788_v53  ;;  %850 = vmatprep.mubr.bf16.mxu0 %v8608_v50 }
  0xb6   :  { %1012 = vmatprep.subr.bf16.mxu0 %v7793_v55 }
  0xb8   :  { %964 = vmatmul.mubr.bf16.gmra.mxu1 %v8610_v54 }
  0xb9   :  { %1013 = vmatpush2.bf16.msra.mxu0 %v7791_v56  ;;  %973 = vmatprep.mubr.bf16.mxu1 %v158_v60 }
  0xba   :  { %1014 = vmatprep.subr.bf16.mxu0 %v7796_v57 }
  0xbc   :  { %851 = vmatmul.mubr.bf16.gmra.mxu0 %v8610_v54 }
  0xbd   :  { %1015 = vmatpush2.bf16.msra.mxu0 %v7794_v63  ;;  %860 = vmatprep.mubr.bf16.mxu0 %v158_v60 }
  0xbe   :  { %1016 = vmatprep.subr.bf16.mxu0 %v7799_v1 }
  0xc0   :  { %974 = vmatmul.mubr.bf16.gmra.mxu1 %v157_v0 }
  0xc1   :  { %1017 = vmatpush2.bf16.msra.mxu0 %v7797_v4  ;;  %983 = vmatprep.mubr.bf16.mxu1 %v160_v8 }
  0xc2   :  { %1018 = vmatprep.subr.bf16.mxu0 %v7802_v5 }
  0xc4   :  { %861 = vmatmul.mubr.bf16.gmra.mxu0 %v157_v0 }
  0xc5   :  { %1019 = vmatpush2.bf16.msra.mxu0 %v7800_v11  ;;  %870 = vmatprep.mubr.bf16.mxu0 %v160_v8 }
  0xc6   :  { %1020 = vmatprep.subr.bf16.mxu0 %v7805_v15 }
  0xc8   :  { %984 = vmatmul.mubr.bf16.gmra.mxu1 %v159_v14 }
  0xc9   :  { %1021 = vmatpush2.bf16.msra.mxu0 %v7803_v16 }
  0xca   :  { %1022 = vmatprep.subr.bf16.mxu0 %v7808_v17 }
  0xcc   :  { %871 = vmatmul.mubr.bf16.gmra.mxu0 %v159_v14 }
  0xcd   :  { %1023 = vmatpush2.bf16.msra.mxu0 %v7806_v18  ;;  %1026 = vmatprep.mubr.bf16.mxu0 %v8569_v30  ;;  %v258_v30 = vlaneseq }
  0xce   :  { %1024 = vmatprep.subr.bf16.mxu0 %v7811_v19 }
  0xd1   :  { %1025 = vmatpush2.bf16.msra.mxu0 %v7809_v20 }
  0xd4   :  { %1027 = vmatmul.mubr.bf16.vlgmr.msra.gmra.mxu0 %v8573_v2  ;;  %v8629_v2 = vshrl.u32 %v258_v30, 7 }
  0xd5   :  { %1036 = vmatprep.mubr.bf16.mxu0 %v8575_v3 }
  0xd6   :  { %v10445_v3 = vsub.s32 2, %v8629_v2  ;;  %v8650_v33 = vsub.s32 0, %v8629_v2  ;;  %v8653_v36 = vsub.s32 1, %v8629_v2 }
  0xd8   :  { %10474 = vst [vmem:[#allocation21_spill] sm:$0xff] %v8650_v33  ;;  %10475 = vst [vmem:[#allocation22_spill] sm:$0xff] %v8653_v36 }
  0xdc   :  { %1037 = vmatmul.mubr.bf16.gmra.mxu0 %v8579_v12  ;;  %v10446_v12 = vsub.s32 3, %v8629_v2 }
  0xdd   :  { %1046 = vmatprep.mubr.bf16.mxu0 %v8581_v13  ;;  %v8633_v13 = vld [vmem:[#allocation13] sm:$0x3f] }
  0xde   :  { %v8638_v21 = vrot.slane %v8633_v13, %v10445_v3  ;;  %v8663_v43 = vrot.slane %v8633_v13, %v8653_v36 }
  0xe4   :  { %1047 = vmatmul.mubr.bf16.gmra.mxu0 %v8585_v22  ;;  %v8643_v22 = vrot.slane %v8633_v13, %v10446_v12  ;;  %v3731_v12 = vld [vmem:[#allocation10 + $0x20] sm:$0xff] }
  0xe5   :  { %1056 = vmatprep.mubr.bf16.mxu0 %v8587_v23 }
  0xec   :  { %1057 = vmatmul.mubr.bf16.gmra.mxu0 %v8593_v31 }
  0xed   :  { %1066 = vmatprep.mubr.bf16.mxu0 %v8600_v40  ;;  %v8659_v40 = vrot.slane %v8633_v13, %v8650_v33 }
  0xf4   :  { %1067 = vmatmul.mubr.bf16.gmra.mxu0 %v8602_v44 }
  0xf5   :  { %1076 = vmatprep.mubr.bf16.mxu0 %v8608_v50 }
  0xfc   :  { %1077 = vmatmul.mubr.bf16.gmra.mxu0 %v8610_v54 }
  0xfd   :  { %1086 = vmatprep.mubr.bf16.mxu0 %v158_v60 }
 0x104   :  { %1087 = vmatmul.mubr.bf16.gmra.mxu0 %v157_v0 }
 0x105   :  { %1096 = vmatprep.mubr.bf16.mxu0 %v160_v8 }
 0x10c   :  { %1097 = vmatmul.mubr.bf16.gmra.mxu0 %v159_v14 }
 0x150   :  { %v915_v23 = vpop.f32.mrf.mxu1 }
 0x151   :  { %v916_v25 = vadd.f32 %v915_v23, %v8638_v21 }
 0x152   :  { %v917_v24 = vpop.f32.mrf.mxu1 }
 0x153   :  { %v918_v26 = vadd.f32 %v917_v24, %v8643_v22 }
 0x154   :  { %v919_v27 = vpop.f32.mrf.mxu1  ;;  %v802_v45 = vpop.f32.mrf.mxu0 }
 0x155   :  { %v7382_v28 = vpack.c.bf16 %v918_v26, %v916_v25  ;;  %v920_v31 = vadd.f32 %v919_v27, %v8638_v21  ;;  %v803_v48 = vadd.f32 %v802_v45, %v8659_v40 }
 0x156   :  { %v921_v29 = vpop.f32.mrf.mxu1  ;;  %v804_v50 = vpop.f32.mrf.mxu0 }
 0x157   :  { %1396 = vst [vmem:[#allocation2 + $0x8] sm:$0xff] %v7382_v28  ;;  %v922_v32 = vadd.f32 %v921_v29, %v8643_v22  ;;  %v805_v52 = vadd.f32 %v804_v50, %v8663_v43 }
 0x158   :  { %v925_v34 = vpop.f32.mrf.mxu1  ;;  %v806_v54 = vpop.f32.mrf.mxu0 }
 0x159   :  { %v7385_v35 = vpack.c.bf16 %v922_v32, %v920_v31  ;;  %v926_v38 = vadd.f32 %v925_v34, %v8638_v21  ;;  %v7381_v57 = vpack.c.bf16 %v805_v52, %v803_v48  ;;  %v807_v58 = vadd.f32 %v806_v54, %v8659_v40 }
 0x15a   :  { %v927_v37 = vpop.f32.mrf.mxu1  ;;  %v808_v60 = vpop.f32.mrf.mxu0 }
 0x15b   :  { %1399 = vst [vmem:[#allocation2 + $0x20] sm:$0xff] %v7385_v35  ;;  %v928_v39 = vadd.f32 %v927_v37, %v8643_v22  ;;  %1395 = vst [vmem:[#allocation2] sm:$0xff] %v7381_v57  ;;  %v809_v62 = vadd.f32 %v808_v60, %v8663_v43 }
 0x15c   :  { %v929_v41 = vpop.f32.mrf.mxu1  ;;  %v812_v0 = vpop.f32.mrf.mxu0 }
 0x15d   :  { %v7388_v42 = vpack.c.bf16 %v928_v39, %v926_v38  ;;  %v930_v46 = vadd.f32 %v929_v41, %v8638_v21  ;;  %v7384_v5 = vpack.c.bf16 %v809_v62, %v807_v58  ;;  %v813_v6 = vadd.f32 %v812_v0, %v8659_v40 }
 0x15e   :  { %v931_v44 = vpop.f32.mrf.mxu1  ;;  %v814_v8 = vpop.f32.mrf.mxu0 }
 0x15f   :  { %1402 = vst [vmem:[#allocation2 + $0x38] sm:$0xff] %v7388_v42  ;;  %v932_v47 = vadd.f32 %v931_v44, %v8643_v22  ;;  %1398 = vst [vmem:[#allocation2 + $0x18] sm:$0xff] %v7384_v5  ;;  %v815_v10 = vadd.f32 %v814_v8, %v8663_v43 }
 0x160   :  { %v935_v49 = vpop.f32.mrf.mxu1  ;;  %v816_v14 = vpop.f32.mrf.mxu0 }
 0x161   :  { %v7391_v51 = vpack.c.bf16 %v932_v47, %v930_v46  ;;  %v936_v55 = vadd.f32 %v935_v49, %v8638_v21  ;;  %v7387_v17 = vpack.c.bf16 %v815_v10, %v813_v6  ;;  %v817_v18 = vadd.f32 %v816_v14, %v8659_v40 }
 0x162   :  { %v937_v53 = vpop.f32.mrf.mxu1  ;;  %v818_v20 = vpop.f32.mrf.mxu0 }
 0x163   :  { %1405 = vst [vmem:[#allocation2 + $0x50] sm:$0xff] %v7391_v51  ;;  %v938_v56 = vadd.f32 %v937_v53, %v8643_v22  ;;  %1401 = vst [vmem:[#allocation2 + $0x30] sm:$0xff] %v7387_v17  ;;  %v819_v23 = vadd.f32 %v818_v20, %v8663_v43 }
 0x164   :  { %v939_v59 = vpop.f32.mrf.mxu1  ;;  %v822_v25 = vpop.f32.mrf.mxu0 }
 0x165   :  { %v7394_v61 = vpack.c.bf16 %v938_v56, %v936_v55  ;;  %v940_v1 = vadd.f32 %v939_v59, %v8638_v21  ;;  %v7390_v28 = vpack.c.bf16 %v819_v23, %v817_v18  ;;  %v823_v29 = vadd.f32 %v822_v25, %v8659_v40 }
 0x166   :  { %v941_v63 = vpop.f32.mrf.mxu1  ;;  %v824_v31 = vpop.f32.mrf.mxu0  ;;  %v7820_v32 = vld [vmem:[#allocation2] ss:$24 sps:$4 sm:$0xff]   ;;  %v7824_v37 = vld [vmem:[#allocation2 + $0x4] ss:$24 sps:$4 sm:$0xff]  }
 0x167   :  { %1408 = vst [vmem:[#allocation2 + $0x68] sm:$0xff] %v7394_v61  ;;  %v942_v4 = vadd.f32 %v941_v63, %v8643_v22  ;;  %1404 = vst [vmem:[#allocation2 + $0x48] sm:$0xff] %v7390_v28  ;;  %v825_v35 = vadd.f32 %v824_v31, %v8663_v43  ;;  %7533 = vmatprep.mubr.bf16.mxu1 %v7820_v32  ;;  %7565 = vmatprep.mubr.bf16.mxu0 %v7824_v37 }
 0x168   :  { %v945_v7 = vpop.f32.mrf.mxu1  ;;  %v826_v38 = vpop.f32.mrf.mxu0 }
 0x169   :  { %v7397_v9 = vpack.c.bf16 %v942_v4, %v940_v1  ;;  %v946_v15 = vadd.f32 %v945_v7, %v8638_v21  ;;  %v7393_v39 = vpack.c.bf16 %v825_v35, %v823_v29  ;;  %v827_v41 = vadd.f32 %v826_v38, %v8659_v40 }
 0x16a   :  { %v947_v11 = vpop.f32.mrf.mxu1  ;;  %v828_v42 = vpop.f32.mrf.mxu0  ;;  %v7817_v29 = vld [vmem:[#allocation2 + $0x3c] ss:$24 sps:$4 sm:$0xff]  }
 0x16b   :  { %1411 = vst [vmem:[#allocation2 + $0x80] sm:$0xff] %v7397_v9  ;;  %v948_v16 = vadd.f32 %v947_v11, %v8643_v22  ;;  %1407 = vst [vmem:[#allocation2 + $0x60] sm:$0xff] %v7393_v39  ;;  %v829_v44 = vadd.f32 %v828_v42, %v8663_v43 }
 0x16c   :  { %v949_v19 = vpop.f32.mrf.mxu1  ;;  %v832_v46 = vpop.f32.mrf.mxu0 }
 0x16d   :  { %v7400_v30 = vpack.c.bf16 %v948_v16, %v946_v15  ;;  %v950_v26 = vadd.f32 %v949_v19, %v8638_v21  ;;  %v7396_v48 = vpack.c.bf16 %v829_v44, %v827_v41  ;;  %v833_v49 = vadd.f32 %v832_v46, %v8659_v40 }
 0x16e   :  { %v951_v24 = vpop.f32.mrf.mxu1  ;;  %v834_v51 = vpop.f32.mrf.mxu0 }
 0x16f   :  { %1414 = vst [vmem:[#allocation2 + $0x98] sm:$0xff] %v7400_v30  ;;  %v952_v27 = vadd.f32 %v951_v24, %v8643_v22  ;;  %1410 = vst [vmem:[#allocation2 + $0x78] sm:$0xff] %v7396_v48  ;;  %v835_v53 = vadd.f32 %v834_v51, %v8663_v43 }
 0x170   :  { %v955_v45 = vpop.f32.mrf.mxu1  ;;  %v836_v56 = vpop.f32.mrf.mxu0 }
 0x171   :  { %v7403_v34 = vpack.c.bf16 %v952_v27, %v950_v26  ;;  %v956_v47 = vadd.f32 %v955_v45, %v8638_v21  ;;  %v7399_v60 = vpack.c.bf16 %v835_v53, %v833_v49  ;;  %v837_v61 = vadd.f32 %v836_v56, %v8659_v40  ;;  %v7816_v26 = vld [vmem:[#allocation2 + $0x38] ss:$24 sps:$4 sm:$0xff]   ;;  %v7818_v53 = vld [vmem:[#allocation2 + $0x8] ss:$24 sps:$4 sm:$0xff]   ;;  %v7819_v56 = vld [vmem:[#allocation2 + $0xc] ss:$24 sps:$4 sm:$0xff]  }
 0x172   :  { %v957_v50 = vpop.f32.mrf.mxu1  ;;  %v7814_v63 = vld [vmem:[#allocation2 + $0x68] ss:$24 sps:$4 sm:$0xff]   ;;  %v838_v0 = vpop.f32.mrf.mxu0  ;;  %v7815_v4 = vld [vmem:[#allocation2 + $0x6c] ss:$24 sps:$4 sm:$0xff]  }
 0x173   :  { %1417 = vst [vmem:[#allocation2 + $0xb0] sm:$0xff] %v7403_v34  ;;  %v958_v52 = vadd.f32 %v957_v50, %v8643_v22  ;;  %1413 = vst [vmem:[#allocation2 + $0x90] sm:$0xff] %v7399_v60  ;;  %v839_v5 = vadd.f32 %v838_v0, %v8663_v43 }
 0x174   :  { %v959_v54 = vpop.f32.mrf.mxu1  ;;  %v842_v7 = vpop.f32.mrf.mxu0 }
 0x175   :  { %v7406_v57 = vpack.c.bf16 %v958_v52, %v956_v47  ;;  %v960_v58 = vadd.f32 %v959_v54, %v8638_v21  ;;  %v7402_v10 = vpack.c.bf16 %v839_v5, %v837_v61  ;;  %v843_v11 = vadd.f32 %v842_v7, %v8659_v40 }
 0x176   :  { %v961_v62 = vpop.f32.mrf.mxu1  ;;  %v844_v15 = vpop.f32.mrf.mxu0 }
 0x177   :  { %1420 = vst [vmem:[#allocation2 + $0xc8] sm:$0xff] %v7406_v57  ;;  %v962_v1 = vadd.f32 %v961_v62, %v8643_v22  ;;  %1416 = vst [vmem:[#allocation2 + $0xa8] sm:$0xff] %v7402_v10  ;;  %v845_v17 = vadd.f32 %v844_v15, %v8663_v43 }
 0x178   :  { %v965_v6 = vpop.f32.mrf.mxu1  ;;  %v846_v19 = vpop.f32.mrf.mxu0 }
 0x179   :  { %v7409_v8 = vpack.c.bf16 %v962_v1, %v960_v58  ;;  %v966_v9 = vadd.f32 %v965_v6, %v8638_v21  ;;  %v7405_v23 = vpack.c.bf16 %v845_v17, %v843_v11  ;;  %v847_v24 = vadd.f32 %v846_v19, %v8659_v40 }
 0x17a   :  { %v7812_v55 = vld [vmem:[#allocation2 + $0x98] ss:$24 sps:$4 sm:$0xff]   ;;  %v7813_v59 = vld [vmem:[#allocation2 + $0x9c] ss:$24 sps:$4 sm:$0xff]   ;;  %v967_v14 = vpop.f32.mrf.mxu1  ;;  %v848_v27 = vpop.f32.mrf.mxu0 }
 0x17b   :  { %7525 = vmatprep.subr.bf16.mxu1 %v7812_v55  ;;  %7557 = vmatprep.subr.bf16.mxu0 %v7813_v59  ;;  %1423 = vst [vmem:[#allocation2 + $0xe0] sm:$0xff] %v7409_v8  ;;  %v968_v16 = vadd.f32 %v967_v14, %v8643_v22  ;;  %1419 = vst [vmem:[#allocation2 + $0xc0] sm:$0xff] %v7405_v23  ;;  %v849_v31 = vadd.f32 %v848_v27, %v8663_v43 }
 0x17c   :  { %7526 = vmatpush3.bf16.xpose.msra.mxu1 %v7812_v55  ;;  %7558 = vmatpush3.bf16.xpose.msra.mxu0 %v7813_v59  ;;  %v969_v18 = vpop.f32.mrf.mxu1  ;;  %v852_v34 = vpop.f32.mrf.mxu0 }
 0x17d   :  { %7527 = vmatprep.subr.bf16.mxu1 %v7814_v63  ;;  %7559 = vmatprep.subr.bf16.mxu0 %v7815_v4  ;;  %v7412_v20 = vpack.c.bf16 %v968_v16, %v966_v9  ;;  %v970_v30 = vadd.f32 %v969_v18, %v8638_v21  ;;  %v7408_v38 = vpack.c.bf16 %v849_v31, %v847_v24 }
 0x17e   :  { %v971_v25 = vpop.f32.mrf.mxu1  ;;  %v853_v39 = vadd.f32 %v852_v34, %v8659_v40  ;;  %v854_v42 = vpop.f32.mrf.mxu0 }
 0x17f   :  { %1426 = vst [vmem:[#allocation2 + $0xf8] sm:$0xff] %v7412_v20  ;;  %v972_v28 = vadd.f32 %v971_v25, %v8643_v22  ;;  %1422 = vst [vmem:[#allocation2 + $0xd8] sm:$0xff] %v7408_v38  ;;  %v855_v45 = vadd.f32 %v854_v42, %v8663_v43  ;;  %v10443_v25 = vsub.s32 4, %v8629_v2  ;;  %v7823_v42 = vld [vmem:[#allocation2 + $0x90] ss:$24 sps:$4 sm:$0xff]  }
 0x180   :  { %v975_v32 = vpop.f32.mrf.mxu1  ;;  %v856_v47 = vpop.f32.mrf.mxu0 }
 0x181   :  { %v7415_v35 = vpack.c.bf16 %v972_v28, %v970_v30  ;;  %v976_v37 = vadd.f32 %v975_v32, %v8638_v21  ;;  %v7411_v50 = vpack.c.bf16 %v855_v45, %v853_v39  ;;  %v857_v51 = vadd.f32 %v856_v47, %v8659_v40  ;;  %v7827_v45 = vld [vmem:[#allocation2 + $0x94] ss:$24 sps:$4 sm:$0xff]  }
 0x182   :  { %v977_v41 = vpop.f32.mrf.mxu1  ;;  %v858_v54 = vpop.f32.mrf.mxu0  ;;  %v10444_v28 = vsub.s32 5, %v8629_v2 }
 0x183   :  { %1429 = vst [vmem:[#allocation2 + $0x110] sm:$0xff] %v7415_v35  ;;  %v978_v44 = vadd.f32 %v977_v41, %v8643_v22  ;;  %1425 = vst [vmem:[#allocation2 + $0xf0] sm:$0xff] %v7411_v50  ;;  %v859_v57 = vadd.f32 %v858_v54, %v8663_v43 }
 0x184   :  { %7528 = vmatpush3.bf16.xpose.msra.mxu1 %v7814_v63  ;;  %7560 = vmatpush3.bf16.xpose.msra.mxu0 %v7815_v4  ;;  %v979_v46 = vpop.f32.mrf.mxu1  ;;  %v862_v59 = vpop.f32.mrf.mxu0 }
 0x185   :  { %7529 = vmatprep.subr.bf16.mxu1 %v7816_v26  ;;  %7561 = vmatprep.subr.bf16.mxu0 %v7817_v29  ;;  %v7418_v48 = vpack.c.bf16 %v978_v44, %v976_v37  ;;  %v980_v49 = vadd.f32 %v979_v46, %v8638_v21  ;;  %v7414_v62 = vpack.c.bf16 %v859_v57, %v857_v51 }
 0x186   :  { %v981_v52 = vpop.f32.mrf.mxu1  ;;  %v863_v63 = vadd.f32 %v862_v59, %v8659_v40  ;;  %v864_v1 = vpop.f32.mrf.mxu0  ;;  %v8728_v37 = vrot.slane %v8633_v13, %v10443_v25 }
 0x187   :  { %1432 = vst [vmem:[#allocation2 + $0x128] sm:$0xff] %v7418_v48  ;;  %v982_v55 = vadd.f32 %v981_v52, %v8643_v22  ;;  %1428 = vst [vmem:[#allocation2 + $0x108] sm:$0xff] %v7414_v62  ;;  %v865_v5 = vadd.f32 %v864_v1, %v8663_v43 }
 0x188   :  { %v985_v58 = vpop.f32.mrf.mxu1  ;;  %v866_v7 = vpop.f32.mrf.mxu0 }
 0x189   :  { %v7421_v60 = vpack.c.bf16 %v982_v55, %v980_v49  ;;  %v986_v61 = vadd.f32 %v985_v58, %v8638_v21  ;;  %v7417_v10 = vpack.c.bf16 %v865_v5, %v863_v63  ;;  %v867_v11 = vadd.f32 %v866_v7, %v8659_v40 }
 0x18a   :  { %v987_v0 = vpop.f32.mrf.mxu1  ;;  %v868_v15 = vpop.f32.mrf.mxu0 }
 0x18b   :  { %1435 = vst [vmem:[#allocation2 + $0x140] sm:$0xff] %v7421_v60  ;;  %v988_v4 = vadd.f32 %v987_v0, %v8643_v22  ;;  %1431 = vst [vmem:[#allocation2 + $0x120] sm:$0xff] %v7417_v10  ;;  %v869_v17 = vadd.f32 %v868_v15, %v8663_v43 }
 0x18c   :  { %7530 = vmatpush3.bf16.xpose.msra.mxu1 %v7816_v26  ;;  %7562 = vmatpush3.bf16.xpose.msra.mxu0 %v7817_v29  ;;  %v989_v6 = vpop.f32.mrf.mxu1  ;;  %v872_v18 = vpop.f32.mrf.mxu0  ;;  %v7821_v26 = vld [vmem:[#allocation2 + $0x30] ss:$24 sps:$4 sm:$0xff]   ;;  %v7825_v29 = vld [vmem:[#allocation2 + $0x34] ss:$24 sps:$4 sm:$0xff]  }
 0x18d   :  { %7531 = vmatprep.subr.bf16.mxu1 %v7818_v53  ;;  %7563 = vmatprep.subr.bf16.mxu0 %v7819_v56  ;;  %v7424_v8 = vpack.c.bf16 %v988_v4, %v986_v61  ;;  %v990_v9 = vadd.f32 %v989_v6, %v8638_v21  ;;  %v7420_v20 = vpack.c.bf16 %v869_v17, %v867_v11  ;;  %v7822_v21 = vld [vmem:[#allocation2 + $0x60] ss:$24 sps:$4 sm:$0xff]  }
 0x18e   :  { %v991_v14 = vpop.f32.mrf.mxu1  ;;  %v873_v30 = vadd.f32 %v872_v18, %v8659_v40  ;;  %v874_v23 = vpop.f32.mrf.mxu0 }
 0x18f   :  { %1438 = vst [vmem:[#allocation2 + $0x158] sm:$0xff] %v7424_v8  ;;  %v992_v16 = vadd.f32 %v991_v14, %v8643_v22  ;;  %1434 = vst [vmem:[#allocation2 + $0x138] sm:$0xff] %v7420_v20  ;;  %v875_v24 = vadd.f32 %v874_v23, %v8663_v43  ;;  %v7826_v22 = vld [vmem:[#allocation2 + $0x64] ss:$24 sps:$4 sm:$0xff]  }
 0x190   :  { %v876_v27 = vpop.f32.mrf.mxu0 }
 0x191   :  { %v7427_v19 = vpack.c.bf16 %v992_v16, %v990_v9  ;;  %v7423_v31 = vpack.c.bf16 %v875_v24, %v873_v30  ;;  %v877_v32 = vadd.f32 %v876_v27, %v8659_v40  ;;  %v8734_v40 = vrot.slane %v8633_v13, %v10444_v28 }
 0x192   :  { %v878_v34 = vpop.f32.mrf.mxu0 }
 0x193   :  { %1441 = vst [vmem:[#allocation2 + $0x170] sm:$0xff] %v7427_v19  ;;  %1437 = vst [vmem:[#allocation2 + $0x150] sm:$0xff] %v7423_v31  ;;  %v879_v35 = vadd.f32 %v878_v34, %v8663_v43 }
 0x194   :  { %7532 = vmatpush3.bf16.xpose.msra.mxu1 %v7818_v53  ;;  %7564 = vmatpush3.bf16.xpose.msra.mxu0 %v7819_v56  ;;  %v1028_v38 = vpop.f32.mrf.mxu0 }
 0x195   :  { %v7426_v39 = vpack.c.bf16 %v879_v35, %v877_v32  ;;  %v1029_v41 = vadd.f32 %v1028_v38, %v8728_v37 }
 0x196   :  { %v1030_v44 = vpop.f32.mrf.mxu0 }
 0x197   :  { %1440 = vst [vmem:[#allocation2 + $0x168] sm:$0xff] %v7426_v39  ;;  %v1031_v43 = vadd.f32 %v1030_v44, %v8734_v40 }
 0x198   :  { %v1032_v46 = vpop.f32.mrf.mxu0 }
 0x199   :  { %v7383_v47 = vpack.c.bf16 %v1031_v43, %v1029_v41  ;;  %v1033_v48 = vadd.f32 %v1032_v46, %v8728_v37 }
 0x19a   :  { %v1034_v49 = vpop.f32.mrf.mxu0 }
 0x19b   :  { %7534 = vmatmul.mubr.bf16.vlgmr.msra.gmra.mxu1 %v7821_v26  ;;  %7566 = vmatmul.mubr.bf16.vlgmr.msra.gmra.mxu0 %v7825_v29  ;;  %1397 = vst [vmem:[#allocation2 + $0x10] sm:$0xff] %v7383_v47  ;;  %v1035_v50 = vadd.f32 %v1034_v49, %v8734_v40 }
 0x19c   :  { %7537 = vmatprep.mubr.bf16.mxu1 %v7822_v21  ;;  %7569 = vmatprep.mubr.bf16.mxu0 %v7826_v22  ;;  %v1038_v51 = vpop.f32.mrf.mxu0 }
 0x19d   :  { %v7386_v52 = vpack.c.bf16 %v1035_v50, %v1033_v48  ;;  %v1039_v13 = vadd.f32 %v1038_v51, %v8728_v37 }
 0x19e   :  { %v1040_v53 = vpop.f32.mrf.mxu0 }
 0x19f   :  { %1400 = vst [vmem:[#allocation2 + $0x28] sm:$0xff] %v7386_v52  ;;  %v1041_v54 = vadd.f32 %v1040_v53, %v8734_v40 }
 0x1a0   :  { %v1042_v55 = vpop.f32.mrf.mxu0 }
 0x1a1   :  { %v7389_v56 = vpack.c.bf16 %v1041_v54, %v1039_v13  ;;  %v1043_v57 = vadd.f32 %v1042_v55, %v8728_v37 }
 0x1a2   :  { %v1044_v58 = vpop.f32.mrf.mxu0 }
 0x1a3   :  { %7538 = vmatmul.mubr.bf16.gmra.mxu1 %v7823_v42  ;;  %7570 = vmatmul.mubr.bf16.gmra.mxu0 %v7827_v45  ;;  %1403 = vst [vmem:[#allocation2 + $0x40] sm:$0xff] %v7389_v56  ;;  %v1045_v59 = vadd.f32 %v1044_v58, %v8734_v40  ;;  %v8760_v56 = vld [vmem:[#allocation2 + $0x158] ss:$24 sps:$4 sm:$0xff]  }
 0x1a4   :  { %v1048_v60 = vpop.f32.mrf.mxu0 }
 0x1a5   :  { %v7392_v61 = vpack.c.bf16 %v1045_v59, %v1043_v57  ;;  %v1049_v62 = vadd.f32 %v1048_v60, %v8728_v37 }
 0x1a6   :  { %v1050_v63 = vpop.f32.mrf.mxu0  ;;  %v7831_v53 = vld [vmem:[#allocation2 + $0x10] ss:$24 sps:$4 sm:$0xff]  }
 0x1a7   :  { %1406 = vst [vmem:[#allocation2 + $0x58] sm:$0xff] %v7392_v61  ;;  %v1051_v0 = vadd.f32 %v1050_v63, %v8734_v40 }
 0x1a8   :  { %v1052_v1 = vpop.f32.mrf.mxu0 }
 0x1a9   :  { %v7395_v4 = vpack.c.bf16 %v1051_v0, %v1049_v62  ;;  %v1053_v5 = vadd.f32 %v1052_v1, %v8728_v37 }
 0x1aa   :  { %v1054_v6 = vpop.f32.mrf.mxu0 }
 0x1ab   :  { %1409 = vst [vmem:[#allocation2 + $0x70] sm:$0xff] %v7395_v4  ;;  %v1055_v7 = vadd.f32 %v1054_v6, %v8734_v40 }
 0x1ac   :  { %v1058_v8 = vpop.f32.mrf.mxu0 }
 0x1ad   :  { %v7398_v9 = vpack.c.bf16 %v1055_v7, %v1053_v5  ;;  %v1059_v10 = vadd.f32 %v1058_v8, %v8728_v37 }
 0x1ae   :  { %v1060_v11 = vpop.f32.mrf.mxu0  ;;  %v7830_v50 = vld [vmem:[#allocation2 + $0x40] ss:$24 sps:$4 sm:$0xff]  }
 0x1af   :  { %1412 = vst [vmem:[#allocation2 + $0x88] sm:$0xff] %v7398_v9  ;;  %v1061_v14 = vadd.f32 %v1060_v11, %v8734_v40 }
 0x1b0   :  { %v1062_v15 = vpop.f32.mrf.mxu0 }
 0x1b1   :  { %v7401_v16 = vpack.c.bf16 %v1061_v14, %v1059_v10  ;;  %v1063_v17 = vadd.f32 %v1062_v15, %v8728_v37 }
 0x1b2   :  { %v1064_v18 = vpop.f32.mrf.mxu0 }
 0x1b3   :  { %1415 = vst [vmem:[#allocation2 + $0xa0] sm:$0xff] %v7401_v16  ;;  %v1065_v19 = vadd.f32 %v1064_v18, %v8734_v40 }
 0x1b4   :  { %v1068_v20 = vpop.f32.mrf.mxu0 }
 0x1b5   :  { %v7404_v30 = vpack.c.bf16 %v1065_v19, %v1063_v17  ;;  %v1069_v23 = vadd.f32 %v1068_v20, %v8728_v37 }
 0x1b6   :  { %v1070_v21 = vpop.f32.mrf.mxu0  ;;  %v7829_v48 = vld [vmem:[#allocation2 + $0x70] ss:$24 sps:$4 sm:$0xff]  }
 0x1b7   :  { %1418 = vst [vmem:[#allocation2 + $0xb8] sm:$0xff] %v7404_v30  ;;  %v1071_v24 = vadd.f32 %v1070_v21, %v8734_v40 }
 0x1b8   :  { %v1072_v26 = vpop.f32.mrf.mxu0 }
 0x1b9   :  { %v7407_v22 = vpack.c.bf16 %v1071_v24, %v1069_v23  ;;  %v1073_v27 = vadd.f32 %v1072_v26, %v8728_v37 }
 0x1ba   :  { %v1074_v29 = vpop.f32.mrf.mxu0 }
 0x1bb   :  { %1421 = vst [vmem:[#allocation2 + $0xd0] sm:$0xff] %v7407_v22  ;;  %v1075_v31 = vadd.f32 %v1074_v29, %v8734_v40  ;;  %v7834_v29 = vld [vmem:[#allocation2 + $0x74] ss:$24 sps:$4 sm:$0xff]  }
 0x1bc   :  { %v1078_v32 = vpop.f32.mrf.mxu0 }
 0x1bd   :  { %v7410_v34 = vpack.c.bf16 %v1075_v31, %v1073_v27  ;;  %v1079_v35 = vadd.f32 %v1078_v32, %v8728_v37 }
 0x1be   :  { %v1080_v38 = vpop.f32.mrf.mxu0  ;;  %v7828_v46 = vld [vmem:[#allocation2 + $0xa0] ss:$24 sps:$4 sm:$0xff]   ;;  %v7833_v26 = vld [vmem:[#allocation2 + $0xa4] ss:$24 sps:$4 sm:$0xff]  }
 0x1bf   :  { %1424 = vst [vmem:[#allocation2 + $0xe8] sm:$0xff] %v7410_v34  ;;  %v1081_v39 = vadd.f32 %v1080_v38, %v8734_v40  ;;  %7541 = vmatprep.subr.bf16.mxu1 %v7828_v46  ;;  %7573 = vmatprep.subr.bf16.mxu0 %v7833_v26 }
 0x1c0   :  { %v1082_v41 = vpop.f32.mrf.mxu0  ;;  %7542 = vmatpush3.bf16.msra.mxu1 %v7828_v46  ;;  %7574 = vmatpush3.bf16.msra.mxu0 %v7833_v26  ;;  %v7836_v46 = vld [vmem:[#allocation2 + $0x14] ss:$24 sps:$4 sm:$0xff]  }
 0x1c1   :  { %v7413_v42 = vpack.c.bf16 %v1081_v39, %v1079_v35  ;;  %7543 = vmatprep.subr.bf16.mxu1 %v7829_v48  ;;  %v1083_v51 = vadd.f32 %v1082_v41, %v8728_v37  ;;  %7575 = vmatprep.subr.bf16.mxu0 %v7834_v29  ;;  %v7835_v41 = vld [vmem:[#allocation2 + $0x44] ss:$24 sps:$4 sm:$0xff]  }
 0x1c2   :  { %v1084_v44 = vpop.f32.mrf.mxu0 }
 0x1c3   :  { %1427 = vst [vmem:[#allocation2 + $0x100] sm:$0xff] %v7413_v42  ;;  %v1085_v52 = vadd.f32 %v1084_v44, %v8734_v40 }
 0x1c4   :  { %v1088_v45 = vpop.f32.mrf.mxu0  ;;  %7544 = vmatpush3.bf16.msra.mxu1 %v7829_v48  ;;  %7576 = vmatpush3.bf16.msra.mxu0 %v7834_v29 }
 0x1c5   :  { %7545 = vmatprep.subr.bf16.mxu1 %v7830_v50  ;;  %v7416_v54 = vpack.c.bf16 %v1085_v52, %v1083_v51  ;;  %v1089_v55 = vadd.f32 %v1088_v45, %v8728_v37  ;;  %7577 = vmatprep.subr.bf16.mxu0 %v7835_v41 }
 0x1c6   :  { %v1090_v43 = vpop.f32.mrf.mxu0 }
 0x1c7   :  { %1430 = vst [vmem:[#allocation2 + $0x118] sm:$0xff] %v7416_v54  ;;  %v1091_v57 = vadd.f32 %v1090_v43, %v8734_v40 }
 0x1c8   :  { %v1092_v47 = vpop.f32.mrf.mxu0  ;;  %7546 = vmatpush3.bf16.msra.mxu1 %v7830_v50  ;;  %7578 = vmatpush3.bf16.msra.mxu0 %v7835_v41 }
 0x1c9   :  { %7547 = vmatprep.subr.bf16.mxu1 %v7831_v53  ;;  %v7419_v59 = vpack.c.bf16 %v1091_v57, %v1089_v55  ;;  %v1093_v60 = vadd.f32 %v1092_v47, %v8728_v37  ;;  %7579 = vmatprep.subr.bf16.mxu0 %v7836_v46 }
 0x1ca   :  { %v1094_v49 = vpop.f32.mrf.mxu0 }
 0x1cb   :  { %1433 = vst [vmem:[#allocation2 + $0x130] sm:$0xff] %v7419_v59  ;;  %v1095_v61 = vadd.f32 %v1094_v49, %v8734_v40 }
 0x1cc   :  { %v1098_v13 = vpop.f32.mrf.mxu0  ;;  %7548 = vmatpush3.bf16.msra.mxu1 %v7831_v53  ;;  %7580 = vmatpush3.bf16.msra.mxu0 %v7836_v46 }
 0x1cd   :  { %7589 = vmatprep.subr.bf16.mxu1 %v8760_v56  ;;  %v7422_v63 = vpack.c.bf16 %v1095_v61, %v1093_v60  ;;  %v1099_v0 = vadd.f32 %v1098_v13, %v8728_v37 }
 0x1ce   :  { %v1100_v58 = vpop.f32.mrf.mxu0 }
 0x1cf   :  { %1436 = vst [vmem:[#allocation2 + $0x148] sm:$0xff] %v7422_v63  ;;  %v1101_v1 = vadd.f32 %v1100_v58, %v8734_v40 }
 0x1d0   :  { %v1102_v62 = vpop.f32.mrf.mxu0 }
 0x1d1   :  { %v7425_v5 = vpack.c.bf16 %v1101_v1, %v1099_v0  ;;  %v1103_v6 = vadd.f32 %v1102_v62, %v8728_v37 }
 0x1d2   :  { %v1104_v4 = vpop.f32.mrf.mxu0 }
 0x1d3   :  { %v1105_v7 = vadd.f32 %v1104_v4, %v8734_v40  ;;  %1439 = vst [vmem:[#allocation2 + $0x160] sm:$0xff] %v7425_v5 }
 0x1d5   :  { %v7428_v8 = vpack.c.bf16 %v1105_v7, %v1103_v6 }
 0x1d7   :  { %1442 = vst [vmem:[#allocation2 + $0x178] sm:$0xff] %v7428_v8 }
 0x25b   :  { %v7535_v9 = vpop.f32.mrf.mxu1  ;;  %v8780_v59 = vpop.f32.mrf.mxu0 }
 0x25c   :  { %v1587_v10 = vsel %vm1580_vm0, %v7535_v9, -inf }
 0x25d   :  { %1588 = vmax.xlane.f32.xlu1 %v1587_v10  ;;  %v1549_v11 = vpop.f32.mrf.mxu1  ;;  %v8786_v0 = vpop.f32.mrf.mxu0 }
 0x25e   :  { %v1581_v14 = vsel %vm1580_vm0, %v1549_v11, -inf }
 0x25f   :  { %1582 = vmax.xlane.f32.xlu0 %v1581_v14  ;;  %v7536_v15 = vpop.f32.mrf.mxu1  ;;  %v8795_v7 = vpop.f32.mrf.mxu0 }
 0x260   :  { %v1590_v16 = vsel %vm1580_vm0, %v7536_v15, -inf }
 0x261   :  { %1591 = vmax.xlane.f32.xlu1 %v1590_v16  ;;  %v1552_v17 = vpop.f32.mrf.mxu1  ;;  %v8803_v14 = vpop.f32.mrf.mxu0 }
 0x262   :  { %v1584_v37 = vsel %vm1580_vm0, %v1552_v17, -inf }
 0x263   :  { %1585 = vmax.xlane.f32.xlu0 %v1584_v37  ;;  %v7539_v40 = vpop.f32.mrf.mxu1 }
 0x264   :  { %v1599_v30 = vsel %vm1580_vm0, %v7539_v40, -inf }
 0x265   :  { %v1565_v18 = vpop.f32.mrf.mxu1 }
 0x266   :  { %v1593_v19 = vsel %vm1580_vm0, %v1565_v18, -inf }
 0x267   :  { %1594 = vmax.xlane.f32.xlu0 %v1593_v19  ;;  %v7540_v20 = vpop.f32.mrf.mxu1 }
 0x268   :  { %v1602_v24 = vsel %vm1580_vm0, %v7540_v20, -inf }
 0x269   :  { %v1568_v23 = vpop.f32.mrf.mxu1 }
 0x26a   :  { %v1596_v21 = vsel %vm1580_vm0, %v1568_v23, -inf }
 0x26b   :  { %1600 = vmax.xlane.f32.xlu0 %v1599_v30  ;;  %1597 = vmax.xlane.f32.xlu1 %v1596_v21  ;;  %v1954_v30 = vsel %vm1580_vm0, %v8803_v14, -inf }
 0x26f   :  { %1603 = vmax.xlane.f32.xlu1 %v1602_v24  ;;  %v1960_v24 = vsel %vm1580_vm0, %v8795_v7, -inf }
 0x2e6   :  { %v1589_v22 = vpop.xlane.xlu1 %1588 }
 0x2e7   :  { %v1607_v27 = vsub.f32 %v7535_v9, %v1589_v22 }
 0x2e8   :  { %v1583_v31 = vpop.xlane.xlu0 %1582 }
 0x2e9   :  { %v1605_v32 = vsub.f32 %v1549_v11, %v1583_v31  ;;  %v1617_v35 = vmul.f32 1.442695, %v1607_v27 }
 0x2ea   :  { %v1592_v34 = vpop.xlane.xlu1 %1591 }
 0x2eb   :  { %v1613_v38 = vmul.f32 1.442695, %v1605_v32  ;;  %v1608_v39 = vsub.f32 %v7536_v15, %v1592_v34 }
 0x2ec   :  { %v1586_v42 = vpop.xlane.xlu0 %1585 }
 0x2ed   :  { %8124 = vpow2.f32 %v1613_v38  ;;  %v1606_v44 = vsub.f32 %v1552_v17, %v1586_v42  ;;  %v1619_v45 = vmul.f32 1.442695, %v1608_v39  ;;  %v8808_v17 = vpop.f32.mrf.mxu0 }
 0x2ee   :  { %8126 = vpow2.f32 %v1617_v35  ;;  %v1969_v22 = vsel %vm1580_vm0, %v8808_v17, -inf }
 0x2ef   :  { %v1615_v43 = vmul.f32 1.442695, %v1606_v44  ;;  %v8813_v19 = vpop.f32.mrf.mxu0 }
 0x2f0   :  { %v1595_v47 = vpop.xlane.xlu0 %1594  ;;  %v1963_v21 = vsel %vm1580_vm0, %v8813_v19, -inf }
 0x2f1   :  { %8128 = vpow2.f32 %v1615_v43  ;;  %v1609_v48 = vsub.f32 %v1565_v18, %v1595_v47 }
 0x2f2   :  { %8130 = vpow2.f32 %v1619_v45 }
 0x2f3   :  { %v1621_v49 = vmul.f32 1.442695, %v1609_v48 }
 0x2f4   :  { %v1601_v50 = vpop.xlane.xlu0 %1600  ;;  %v1598_v51 = vpop.xlane.xlu1 %1597 }
 0x2f5   :  { %8132 = vpow2.f32 %v1621_v49  ;;  %v1611_v52 = vsub.f32 %v7539_v40, %v1601_v50  ;;  %v1610_v13 = vsub.f32 %v1568_v23, %v1598_v51  ;;  %v1951_v40 = vsel %vm1580_vm0, %v8786_v0, -inf  ;;  %v8819_v23 = vpop.f32.mrf.mxu0 }
 0x2f6   :  { %v1972_v29 = vsel %vm1580_vm0, %v8819_v23, -inf }
 0x2f7   :  { %v1625_v53 = vmul.f32 1.442695, %v1611_v52  ;;  %v1623_v54 = vmul.f32 1.442695, %v1610_v13  ;;  %v8825_v26 = vpop.f32.mrf.mxu0 }
 0x2f8   :  { %v1604_v55 = vpop.xlane.xlu1 %1603  ;;  %v1966_v27 = vsel %vm1580_vm0, %v8825_v26, -inf }
 0x2f9   :  { %8134 = vpow2.f32 %v1625_v53  ;;  %v1612_v57 = vsub.f32 %v7540_v20, %v1604_v55  ;;  %v1957_v20 = vsel %vm1580_vm0, %v8780_v59, -inf }
 0x2fa   :  { %v8778_v58 = vpop.eup %8124  ;;  %8136 = vpow2.f32 %v1623_v54  ;;  %v7837_v54 = vld [vmem:[#allocation2 + $0x128] ss:$24 sps:$4 sm:$0xff]  }
 0x2fb   :  { %v1627_v60 = vmul.f32 1.442695, %v1612_v57  ;;  %v1629_v61 = vsel %vm1580_vm0, %v8778_v58, 0.0  ;;  %v8784_v62 = vpop.eup %8126 }
 0x2fc   :  { %1630 = vadd.xlane.f32.xlu0 %v1629_v61  ;;  %v1635_v1 = vsel %vm1580_vm0, %v8784_v62, 0.0 }
 0x2fd   :  { %8138 = vpow2.f32 %v1627_v60 }
 0x2fe   :  { %v8129_v63 = vpop.eup %8128 }
 0x2ff   :  { %v1632_v4 = vsel %vm1580_vm0, %v8129_v63, 0.0  ;;  %v8791_v5 = vpop.eup %8130 }
 0x300   :  { %1636 = vadd.xlane.f32.xlu0 %v1635_v1  ;;  %1633 = vadd.xlane.f32.xlu1 %v1632_v4  ;;  %v1638_v9 = vsel %vm1580_vm0, %v8791_v5, 0.0  ;;  %v7839_v4 = vld [vmem:[#allocation2 + $0xc0] ss:$24 sps:$4 sm:$0xff]  }
 0x302   :  { %v8793_v6 = vpop.eup %8132 }
 0x303   :  { %v1641_v8 = vsel %vm1580_vm0, %v8793_v6, 0.0 }
 0x304   :  { %1642 = vadd.xlane.f32.xlu0 %v1641_v8  ;;  %1639 = vadd.xlane.f32.xlu1 %v1638_v9  ;;  %v7842_v8 = vld [vmem:[#allocation2 + $0x120] ss:$24 sps:$4 sm:$0xff]   ;;  %v7843_v9 = vld [vmem:[#allocation2 + $0x150] ss:$24 sps:$4 sm:$0xff]  }
 0x306   :  { %v8801_v10 = vpop.eup %8134 }
 0x307   :  { %v8137_v11 = vpop.eup %8136  ;;  %v1647_v15 = vsel %vm1580_vm0, %v8801_v10, 0.0 }
 0x308   :  { %1648 = vadd.xlane.f32.xlu0 %v1647_v15  ;;  %v1644_v16 = vsel %vm1580_vm0, %v8137_v11, 0.0  ;;  %v7846_v15 = vld [vmem:[#allocation2 + $0x104] ss:$24 sps:$4 sm:$0xff]  }
 0x309   :  { %1645 = vadd.xlane.f32.xlu1 %v1644_v16  ;;  %v7847_v16 = vld [vmem:[#allocation2 + $0xd4] ss:$24 sps:$4 sm:$0xff]  }
 0x30a   :  { %v8139_v37 = vpop.eup %8138 }
 0x30b   :  { %v1650_v18 = vsel %vm1580_vm0, %v8139_v37, 0.0 }
 0x30c   :  { %1952 = vmax.xlane.f32.xlu0 %v1951_v40 }
 0x30d   :  { %1651 = vadd.xlane.f32.xlu1 %v1650_v18 }
 0x310   :  { %1958 = vmax.xlane.f32.xlu0 %v1957_v20 }
 0x311   :  { %1955 = vmax.xlane.f32.xlu1 %v1954_v30 }
 0x314   :  { %1964 = vmax.xlane.f32.xlu0 %v1963_v21 }
 0x315   :  { %1961 = vmax.xlane.f32.xlu1 %v1960_v24 }
 0x318   :  { %1970 = vmax.xlane.f32.xlu0 %v1969_v22 }
 0x319   :  { %1967 = vmax.xlane.f32.xlu1 %v1966_v27 }
 0x31d   :  { %1973 = vmax.xlane.f32.xlu1 %v1972_v29 }
 0x385   :  { %v1631_v31 = vpop.xlane.xlu0 %1630 }
 0x386   :  { %8140 = vrcp.f32 %v1631_v31 }
 0x389   :  { %v1637_v32 = vpop.xlane.xlu0 %1636  ;;  %v1634_v34 = vpop.xlane.xlu1 %1633 }
 0x38a   :  { %8142 = vrcp.f32 %v1634_v34 }
 0x38b   :  { %8144 = vrcp.f32 %v1637_v32 }
 0x38d   :  { %v1643_v35 = vpop.xlane.xlu0 %1642  ;;  %v1640_v38 = vpop.xlane.xlu1 %1639 }
 0x38e   :  { %8146 = vrcp.f32 %v1640_v38 }
 0x38f   :  { %8148 = vrcp.f32 %v1643_v35 }
 0x391   :  { %v1649_v39 = vpop.xlane.xlu0 %1648 }
 0x392   :  { %v1646_v41 = vpop.xlane.xlu1 %1645 }
 0x393   :  { %8150 = vrcp.f32 %v1646_v41  ;;  %v8141_v42 = vpop.eup %8140 }
 0x394   :  { %8152 = vrcp.f32 %v1649_v39  ;;  %v1661_v43 = vmul.f32 %v8141_v42, %v8778_v58 }
 0x395   :  { %v1953_v42 = vpop.xlane.xlu0 %1952 }
 0x396   :  { %v1652_v44 = vpop.xlane.xlu1 %1651 }
 0x397   :  { %8154 = vrcp.f32 %v1652_v44  ;;  %v8143_v45 = vpop.eup %8142 }
 0x398   :  { %v1662_v46 = vmul.f32 %v8143_v45, %v8129_v63  ;;  %v8145_v47 = vpop.eup %8144 }
 0x399   :  { %v1663_v50 = vmul.f32 %v8145_v47, %v8784_v62  ;;  %v1959_v45 = vpop.xlane.xlu0 %1958 }
 0x39a   :  { %v1669_v48 = vpack.c.bf16 %v1662_v46, %v1661_v43  ;;  %v1956_v44 = vpop.xlane.xlu1 %1955  ;;  %v1975_v43 = vsub.f32 %v8786_v0, %v1953_v42 }
 0x39b   :  { %v8147_v49 = vpop.eup %8146 }
 0x39c   :  { %v1664_v51 = vmul.f32 %v8147_v49, %v8791_v5  ;;  %7549 = vmatprep.mubr.msk.bf16.mxu1 %vm1580_vm0, %v1669_v48  ;;  %v8149_v52 = vpop.eup %8148  ;;  %v7838_v5 = vld [vmem:[#allocation2 + $0xf8] ss:$24 sps:$4 sm:$0xff]   ;;  %v1977_v48 = vsub.f32 %v8780_v59, %v1959_v45  ;;  %v1983_v49 = vmul.f32 1.442695, %v1975_v43 }
 0x39d   :  { %v1665_v55 = vmul.f32 %v8149_v52, %v8793_v6  ;;  %v7840_v6 = vld [vmem:[#allocation2 + $0xc8] ss:$24 sps:$4 sm:$0xff]   ;;  %v1965_v47 = vpop.xlane.xlu0 %1964 }
 0x39e   :  { %v1670_v13 = vpack.c.bf16 %v1664_v51, %v1663_v50  ;;  %v1962_v46 = vpop.xlane.xlu1 %1961  ;;  %v1976_v50 = vsub.f32 %v8803_v14, %v1956_v44  ;;  %v1979_v52 = vsub.f32 %v8813_v19, %v1965_v47  ;;  %8156 = vpow2.f32 %v1983_v49 }
 0x3a0   :  { %v8151_v53 = vpop.eup %8150  ;;  %7550 = vmatmul.mubr.msk.bf16.vlgmr.msra.gmra.mxu1 %vm1580_vm0, %v1670_v13  ;;  %v1987_v13 = vmul.f32 1.442695, %v1977_v48  ;;  %v1991_v14 = vmul.f32 1.442695, %v1979_v52 }
 0x3a1   :  { %v1666_v57 = vmul.f32 %v8151_v53, %v8137_v11  ;;  %v8153_v58 = vpop.eup %8152  ;;  %7590 = vmatpush3.bf16.xpose.msra.mxu1 %v8760_v56  ;;  %v7841_v56 = vld [vmem:[#allocation2 + $0xf0] ss:$24 sps:$4 sm:$0xff]   ;;  %v7845_v11 = vld [vmem:[#allocation2 + $0x134] ss:$24 sps:$4 sm:$0xff]   ;;  %v1978_v53 = vsub.f32 %v8795_v7, %v1962_v46  ;;  %v1971_v0 = vpop.xlane.xlu0 %1970 }
 0x3a2   :  { %7591 = vmatprep.subr.bf16.mxu1 %v7837_v54  ;;  %v1667_v62 = vmul.f32 %v8153_v58, %v8801_v10  ;;  %v7844_v10 = vld [vmem:[#allocation2 + $0x164] ss:$24 sps:$4 sm:$0xff]   ;;  %8158 = vpow2.f32 %v1987_v13  ;;  %v1981_v19 = vsub.f32 %v8808_v17, %v1971_v0 }
 0x3a3   :  { %v1671_v60 = vpack.c.bf16 %v1666_v57, %v1665_v55  ;;  %v1985_v57 = vmul.f32 1.442695, %v1976_v50 }
 0x3a4   :  { %v8155_v61 = vpop.eup %8154 }
 0x3a5   :  { %7553 = vmatprep.mubr.msk.bf16.mxu1 %vm1580_vm0, %v1671_v60  ;;  %v1668_v63 = vmul.f32 %v8155_v61, %v8139_v37  ;;  %v8843_v37 = vld [vmem:[#allocation2 + $0x160] ss:$24 sps:$4 sm:$0xff]   ;;  %v1989_v60 = vmul.f32 1.442695, %v1978_v53  ;;  %8160 = vpow2.f32 %v1985_v57 }
 0x3a6   :  { %7605 = vmatprep.subr.bf16.mxu0 %v8843_v37  ;;  %8162 = vpow2.f32 %v1991_v14 }
 0x3a7   :  { %v1672_v1 = vpack.c.bf16 %v1668_v63, %v1667_v62  ;;  %8164 = vpow2.f32 %v1989_v60 }
 0x3a9   :  { %7554 = vmatmul.mubr.msk.bf16.gmra.mxu1 %vm1580_vm0, %v1672_v1 }
 0x3aa   :  { %7592 = vmatpush3.bf16.xpose.msra.mxu1 %v7837_v54  ;;  %7597 = vmatprep.mubr.bf16.mxu1 %v7839_v4  ;;  %v1968_v54 = vpop.xlane.xlu1 %1967 }
 0x3ab   :  { %7593 = vmatprep.subr.bf16.mxu1 %v7838_v5  ;;  %v1980_v7 = vsub.f32 %v8825_v26, %v1968_v54 }
 0x3ae   :  { %v1974_v1 = vpop.xlane.xlu1 %1973 }
 0x3b2   :  { %7594 = vmatpush3.bf16.xpose.msra.mxu1 %v7838_v5  ;;  %v1995_v5 = vmul.f32 1.442695, %v1981_v19 }
 0x3b3   :  { %7595 = vmatprep.subr.bf16.mxu1 %v7840_v6 }
 0x3b4   :  { %8166 = vpow2.f32 %v1995_v5 }
 0x3ba   :  { %7596 = vmatpush3.bf16.xpose.msra.mxu1 %v7840_v6  ;;  %v1993_v6 = vmul.f32 1.442695, %v1980_v7 }
 0x3bb   :  { %7637 = vmatprep.subr.bf16.mxu1 %v7844_v10 }
 0x3bc   :  { %8168 = vpow2.f32 %v1993_v6 }
 0x3c1   :  { %7598 = vmatmul.mubr.bf16.vlgmr.msra.gmra.mxu1 %v7841_v56  ;;  %v1982_v56 = vsub.f32 %v8819_v23, %v1974_v1 }
 0x3c2   :  { %7601 = vmatprep.mubr.bf16.mxu1 %v7842_v8  ;;  %7638 = vmatpush3.bf16.msra.mxu1 %v7844_v10 }
 0x3c3   :  { %7639 = vmatprep.subr.bf16.mxu1 %v7845_v11 }
 0x3c6   :  { %7640 = vmatpush3.bf16.msra.mxu1 %v7845_v11  ;;  %v1997_v11 = vmul.f32 1.442695, %v1982_v56 }
 0x3c7   :  { %7641 = vmatprep.subr.bf16.mxu1 %v7846_v15 }
 0x3c8   :  { %8170 = vpow2.f32 %v1997_v11 }
 0x3c9   :  { %7602 = vmatmul.mubr.bf16.gmra.mxu1 %v7843_v9 }
 0x3ca   :  { %7642 = vmatpush3.bf16.msra.mxu1 %v7846_v15 }
 0x3cb   :  { %7643 = vmatprep.subr.bf16.mxu1 %v7847_v16 }
 0x3ce   :  { %7644 = vmatpush3.bf16.msra.mxu1 %v7847_v16 }
 0x460   :  { %v7551_v40 = vpop.f32.mrf.mxu1 }
 0x461   :  { %v7431_v18 = vpack.c.bf16 %v7551_v40, %v7551_v40  ;;  %v8878_v40 = vpop.eup %8156 }
 0x462   :  { %v1743_v20 = vpop.f32.mrf.mxu1  ;;  %v8880_v23 = vpop.eup %8158 }
 0x463   :  { %1808 = vst [vmem:[#allocation3 + $0x10] sm:$0xf] %v7431_v18  ;;  %v7429_v30 = vpack.c.bf16 %v1743_v20, %v1743_v20  ;;  %v1999_v18 = vsel %vm1580_vm0, %v8878_v40, 0.0 }
 0x464   :  { %v7552_v21 = vpop.f32.mrf.mxu1 }
 0x465   :  { %1806 = vst [vmem:[#allocation3] sm:$0xf] %v7429_v30  ;;  %v7432_v24 = vpack.c.bf16 %v7552_v21, %v7552_v21  ;;  %v8886_v30 = vpop.eup %8160 }
 0x466   :  { %v1746_v22 = vpop.f32.mrf.mxu1  ;;  %v8888_v21 = vpop.eup %8162 }
 0x467   :  { %1809 = vst [vmem:[#allocation3 + $0x18] sm:$0xf] %v7432_v24  ;;  %v7430_v27 = vpack.c.bf16 %v1746_v22, %v1746_v22  ;;  %v8890_v24 = vpop.eup %8164  ;;  %v2005_v22 = vsel %vm1580_vm0, %v8880_v23, 0.0 }
 0x469   :  { %v7555_v29 = vpop.f32.mrf.mxu1  ;;  %1807 = vst [vmem:[#allocation3 + $0x8] sm:$0xf] %v7430_v27  ;;  %v2002_v27 = vsel %vm1580_vm0, %v8886_v30, 0.0 }
 0x46a   :  { %v7435_v31 = vpack.c.bf16 %v7555_v29, %v7555_v29  ;;  %v8896_v29 = vpop.eup %8166 }
 0x46b   :  { %v1759_v32 = vpop.f32.mrf.mxu1 }
 0x46c   :  { %1812 = vst [vmem:[#allocation3 + $0x30] sm:$0xf] %v7435_v31  ;;  %v7433_v34 = vpack.c.bf16 %v1759_v32, %v1759_v32  ;;  %v2011_v31 = vsel %vm1580_vm0, %v8888_v21, 0.0  ;;  %v2008_v32 = vsel %vm1580_vm0, %v8890_v24, 0.0 }
 0x46d   :  { %v7556_v35 = vpop.f32.mrf.mxu1 }
 0x46e   :  { %1810 = vst [vmem:[#allocation3 + $0x20] sm:$0xf] %v7433_v34  ;;  %v7436_v38 = vpack.c.bf16 %v7556_v35, %v7556_v35  ;;  %v8902_v34 = vpop.eup %8168  ;;  %v2017_v35 = vsel %vm1580_vm0, %v8896_v29, 0.0 }
 0x46f   :  { %v1762_v39 = vpop.f32.mrf.mxu1 }
 0x470   :  { %1813 = vst [vmem:[#allocation3 + $0x38] sm:$0xf] %v7436_v38  ;;  %v7434_v41 = vpack.c.bf16 %v1762_v39, %v1762_v39  ;;  %v2014_v38 = vsel %vm1580_vm0, %v8902_v34, 0.0  ;;  %v8908_v39 = vpop.eup %8170 }
 0x472   :  { %1811 = vst [vmem:[#allocation3 + $0x28] sm:$0xf] %v7434_v41  ;;  %v2020_v41 = vsel %vm1580_vm0, %v8908_v39, 0.0 }
 0x481   :  { %v8849_v51 = vpop.f32.mrf.mxu1 }
 0x482   :  { %v2327_v62 = vsel %vm1580_vm0, %v8849_v51, -inf }
 0x483   :  { %v8853_v55 = vpop.f32.mrf.mxu1 }
 0x484   :  { %v2321_v58 = vsel %vm1580_vm0, %v8853_v55, -inf }
 0x485   :  { %2322 = vmax.xlane.f32.xlu0 %v2321_v58  ;;  %v8857_v59 = vpop.f32.mrf.mxu1 }
 0x486   :  { %v2330_v26 = vsel %vm1580_vm0, %v8857_v59, -inf }
 0x487   :  { %v8860_v61 = vpop.f32.mrf.mxu1 }
 0x488   :  { %v2324_v63 = vsel %vm1580_vm0, %v8860_v61, -inf }
 0x489   :  { %2328 = vmax.xlane.f32.xlu0 %v2327_v62  ;;  %2325 = vmax.xlane.f32.xlu1 %v2324_v63  ;;  %v8867_v4 = vpop.f32.mrf.mxu1 }
 0x48a   :  { %v2339_v15 = vsel %vm1580_vm0, %v8867_v4, -inf }
 0x48b   :  { %v2306_v17 = vpop.f32.mrf.mxu1 }
 0x48c   :  { %v2333_v8 = vsel %vm1580_vm0, %v2306_v17, -inf }
 0x48d   :  { %2331 = vmax.xlane.f32.xlu1 %v2330_v26  ;;  %2334 = vmax.xlane.f32.xlu0 %v2333_v8  ;;  %v8873_v9 = vpop.f32.mrf.mxu1 }
 0x48e   :  { %v2342_v20 = vsel %vm1580_vm0, %v8873_v9, -inf }
 0x48f   :  { %v2309_v10 = vpop.f32.mrf.mxu1 }
 0x490   :  { %v2336_v16 = vsel %vm1580_vm0, %v2309_v10, -inf }
 0x491   :  { %2340 = vmax.xlane.f32.xlu0 %v2339_v15  ;;  %2337 = vmax.xlane.f32.xlu1 %v2336_v16 }
 0x495   :  { %2000 = vadd.xlane.f32.xlu0 %v1999_v18  ;;  %2343 = vmax.xlane.f32.xlu1 %v2342_v20 }
 0x499   :  { %2006 = vadd.xlane.f32.xlu0 %v2005_v22  ;;  %2003 = vadd.xlane.f32.xlu1 %v2002_v27 }
 0x49d   :  { %2012 = vadd.xlane.f32.xlu0 %v2011_v31  ;;  %2009 = vadd.xlane.f32.xlu1 %v2008_v32 }
 0x4a1   :  { %2018 = vadd.xlane.f32.xlu0 %v2017_v35  ;;  %2015 = vadd.xlane.f32.xlu1 %v2014_v38 }
 0x4a5   :  { %2021 = vadd.xlane.f32.xlu1 %v2020_v41 }
 0x50e   :  { %v2323_v42 = vpop.xlane.xlu0 %2322 }
 0x50f   :  { %v2345_v44 = vsub.f32 %v8853_v55, %v2323_v42 }
 0x511   :  { %v2353_v45 = vmul.f32 1.442695, %v2345_v44 }
 0x512   :  { %v2329_v43 = vpop.xlane.xlu0 %2328  ;;  %v2326_v46 = vpop.xlane.xlu1 %2325 }
 0x513   :  { %8172 = vpow2.f32 %v2353_v45  ;;  %v2347_v47 = vsub.f32 %v8849_v51, %v2329_v43  ;;  %v2346_v48 = vsub.f32 %v8860_v61, %v2326_v46 }
 0x515   :  { %v2357_v49 = vmul.f32 1.442695, %v2347_v47  ;;  %v2355_v50 = vmul.f32 1.442695, %v2346_v48 }
 0x516   :  { %v2335_v52 = vpop.xlane.xlu0 %2334  ;;  %v2332_v13 = vpop.xlane.xlu1 %2331 }
 0x517   :  { %8174 = vpow2.f32 %v2357_v49  ;;  %v2349_v53 = vsub.f32 %v2306_v17, %v2335_v52  ;;  %v2348_v54 = vsub.f32 %v8857_v59, %v2332_v13 }
 0x518   :  { %8176 = vpow2.f32 %v2355_v50 }
 0x519   :  { %v2361_v57 = vmul.f32 1.442695, %v2349_v53  ;;  %v2359_v0 = vmul.f32 1.442695, %v2348_v54 }
 0x51a   :  { %v2341_v55 = vpop.xlane.xlu0 %2340  ;;  %v2338_v58 = vpop.xlane.xlu1 %2337 }
 0x51b   :  { %8178 = vpow2.f32 %v2361_v57  ;;  %v2351_v14 = vsub.f32 %v8867_v4, %v2341_v55  ;;  %v2350_v60 = vsub.f32 %v2309_v10, %v2338_v58  ;;  %v7849_v57 = vld [vmem:[#allocation2 + $0x130] ss:$24 sps:$4 sm:$0xff]   ;;  %v7850_v58 = vld [vmem:[#allocation2 + $0x100] ss:$24 sps:$4 sm:$0xff]  }
 0x51c   :  { %8180 = vpow2.f32 %v2359_v0 }
 0x51d   :  { %v2365_v51 = vmul.f32 1.442695, %v2351_v14  ;;  %v2363_v19 = vmul.f32 1.442695, %v2350_v60 }
 0x51e   :  { %v2001_v61 = vpop.xlane.xlu0 %2000  ;;  %v2344_v7 = vpop.xlane.xlu1 %2343 }
 0x51f   :  { %8182 = vpow2.f32 %v2365_v51  ;;  %v2352_v62 = vsub.f32 %v8873_v9, %v2344_v7 }
 0x520   :  { %v8918_v63 = vpop.eup %8172  ;;  %8184 = vpow2.f32 %v2363_v19 }
 0x521   :  { %v2367_v59 = vmul.f32 1.442695, %v2352_v62  ;;  %v2369_v1 = vsel %vm1580_vm0, %v8918_v63, 0.0  ;;  %8186 = vrcp.f32 %v2001_v61 }
 0x522   :  { %2370 = vadd.xlane.f32.xlu0 %v2369_v1  ;;  %v2007_v5 = vpop.xlane.xlu0 %2006  ;;  %v2004_v4 = vpop.xlane.xlu1 %2003 }
 0x523   :  { %8188 = vpow2.f32 %v2367_v59 }
 0x524   :  { %v8922_v17 = vpop.eup %8174  ;;  %8190 = vrcp.f32 %v2004_v4 }
 0x525   :  { %v8924_v6 = vpop.eup %8176  ;;  %v2375_v56 = vsel %vm1580_vm0, %v8922_v17, 0.0  ;;  %8192 = vrcp.f32 %v2007_v5 }
 0x526   :  { %2376 = vadd.xlane.f32.xlu0 %v2375_v56  ;;  %v2013_v26 = vpop.xlane.xlu0 %2012  ;;  %v2372_v8 = vsel %vm1580_vm0, %v8924_v6, 0.0  ;;  %v2010_v9 = vpop.xlane.xlu1 %2009 }
 0x527   :  { %2373 = vadd.xlane.f32.xlu1 %v2372_v8  ;;  %8194 = vrcp.f32 %v2010_v9 }
 0x528   :  { %v8930_v10 = vpop.eup %8178  ;;  %8196 = vrcp.f32 %v2013_v26 }
 0x529   :  { %v8932_v11 = vpop.eup %8180  ;;  %v2381_v15 = vsel %vm1580_vm0, %v8930_v10, 0.0 }
 0x52a   :  { %2382 = vadd.xlane.f32.xlu0 %v2381_v15  ;;  %v2019_v16 = vpop.xlane.xlu0 %2018  ;;  %v2378_v18 = vsel %vm1580_vm0, %v8932_v11, 0.0  ;;  %v2016_v20 = vpop.xlane.xlu1 %2015 }
 0x52b   :  { %2379 = vadd.xlane.f32.xlu1 %v2378_v18  ;;  %8198 = vrcp.f32 %v2016_v20  ;;  %v7853_v20 = vld [vmem:[#allocation2 + $0x12c] ss:$24 sps:$4 sm:$0xff]  }
 0x52c   :  { %v8938_v22 = vpop.eup %8182  ;;  %8200 = vrcp.f32 %v2019_v16 }
 0x52d   :  { %v8940_v27 = vpop.eup %8184  ;;  %v2387_v31 = vsel %vm1580_vm0, %v8938_v22, 0.0 }
 0x52e   :  { %2388 = vadd.xlane.f32.xlu0 %v2387_v31  ;;  %v2384_v32 = vsel %vm1580_vm0, %v8940_v27, 0.0  ;;  %v2022_v35 = vpop.xlane.xlu1 %2021  ;;  %v8187_v38 = vpop.eup %8186 }
 0x52f   :  { %2385 = vadd.xlane.f32.xlu1 %v2384_v32  ;;  %8202 = vrcp.f32 %v2022_v35  ;;  %v2031_v43 = vmul.f32 %v8187_v38, %v8878_v40 }
 0x530   :  { %v8946_v41 = vpop.eup %8188 }
 0x531   :  { %v2390_v42 = vsel %vm1580_vm0, %v8946_v41, 0.0  ;;  %v8191_v44 = vpop.eup %8190 }
 0x532   :  { %v8193_v45 = vpop.eup %8192  ;;  %v2032_v46 = vmul.f32 %v8191_v44, %v8886_v30  ;;  %v7854_v44 = vld [vmem:[#allocation2 + $0xfc] ss:$24 sps:$4 sm:$0xff]  }
 0x533   :  { %2391 = vadd.xlane.f32.xlu1 %v2390_v42  ;;  %v2033_v49 = vmul.f32 %v8193_v45, %v8880_v23  ;;  %v7855_v42 = vld [vmem:[#allocation2 + $0xc4] ss:$24 sps:$4 sm:$0xff]  }
 0x534   :  { %v8195_v47 = vpop.eup %8194  ;;  %v2039_v48 = vpack.c.bf16 %v2032_v46, %v2031_v43  ;;  %v7858_v45 = vld [vmem:[#allocation2 + $0x124] ss:$24 sps:$4 sm:$0xff]   ;;  %v7859_v43 = vld [vmem:[#allocation2 + $0x154] ss:$24 sps:$4 sm:$0xff]  }
 0x535   :  { %v2034_v50 = vmul.f32 %v8195_v47, %v8890_v24  ;;  %v8197_v52 = vpop.eup %8196 }
 0x536   :  { %7581 = vmatprep.mubr.msk.bf16.mxu0 %vm1580_vm0, %v2039_v48  ;;  %v2035_v0 = vmul.f32 %v8197_v52, %v8888_v21  ;;  %v7851_v21 = vld [vmem:[#allocation2 + $0xd0] ss:$24 sps:$4 sm:$0xff]  }
 0x537   :  { %v2040_v13 = vpack.c.bf16 %v2034_v50, %v2033_v49 }
 0x538   :  { %v8199_v53 = vpop.eup %8198 }
 0x539   :  { %v8201_v54 = vpop.eup %8200  ;;  %7582 = vmatmul.mubr.msk.bf16.vlgmr.msra.gmra.mxu0 %vm1580_vm0, %v2040_v13  ;;  %v2036_v40 = vmul.f32 %v8199_v53, %v8902_v34  ;;  %v7852_v34 = vld [vmem:[#allocation2 + $0x15c] ss:$24 sps:$4 sm:$0xff]  }
 0x53a   :  { %7606 = vmatpush3.bf16.msra.mxu0 %v8843_v37  ;;  %v2037_v24 = vmul.f32 %v8201_v54, %v8896_v29 }
 0x53b   :  { %7607 = vmatprep.subr.bf16.mxu0 %v7849_v57  ;;  %v2041_v23 = vpack.c.bf16 %v2036_v40, %v2035_v0 }
 0x53c   :  { %v8203_v30 = vpop.eup %8202 }
 0x53d   :  { %v2038_v55 = vmul.f32 %v8203_v30, %v8908_v39  ;;  %7585 = vmatprep.mubr.msk.bf16.mxu0 %vm1580_vm0, %v2041_v23 }
 0x53e   :  { %7608 = vmatpush3.bf16.msra.mxu0 %v7849_v57 }
 0x53f   :  { %v2042_v14 = vpack.c.bf16 %v2038_v55, %v2037_v24  ;;  %7609 = vmatprep.subr.bf16.mxu0 %v7850_v58 }
 0x541   :  { %7586 = vmatmul.mubr.msk.bf16.gmra.mxu0 %vm1580_vm0, %v2042_v14 }
 0x542   :  { %7610 = vmatpush3.bf16.msra.mxu0 %v7850_v58 }
 0x543   :  { %7611 = vmatprep.subr.bf16.mxu0 %v7851_v21 }
 0x546   :  { %7612 = vmatpush3.bf16.msra.mxu0 %v7851_v21 }
 0x547   :  { %7621 = vmatprep.subr.bf16.mxu0 %v7852_v34 }
 0x5ab   :  { %v2371_v37 = vpop.xlane.xlu0 %2370 }
 0x5ac   :  { %8204 = vrcp.f32 %v2371_v37 }
 0x5af   :  { %v2377_v60 = vpop.xlane.xlu0 %2376 }
 0x5b0   :  { %v2374_v29 = vpop.xlane.xlu1 %2373 }
 0x5b1   :  { %8206 = vrcp.f32 %v2374_v29 }
 0x5b2   :  { %8208 = vrcp.f32 %v2377_v60 }
 0x5b3   :  { %v2383_v39 = vpop.xlane.xlu0 %2382 }
 0x5b4   :  { %v2380_v51 = vpop.xlane.xlu1 %2379 }
 0x5b5   :  { %8210 = vrcp.f32 %v2380_v51 }
 0x5b6   :  { %8212 = vrcp.f32 %v2383_v39 }
 0x5b7   :  { %v2389_v19 = vpop.xlane.xlu0 %2388 }
 0x5b8   :  { %v2386_v61 = vpop.xlane.xlu1 %2385 }
 0x5b9   :  { %8214 = vrcp.f32 %v2386_v61  ;;  %v8205_v7 = vpop.eup %8204 }
 0x5ba   :  { %8216 = vrcp.f32 %v2389_v19  ;;  %v2401_v1 = vmul.f32 %v8205_v7, %v8918_v63 }
 0x5bc   :  { %v2392_v62 = vpop.xlane.xlu1 %2391 }
 0x5bd   :  { %8218 = vrcp.f32 %v2392_v62 }
 0x5be   :  { %v8207_v59 = vpop.eup %8206 }
 0x5bf   :  { %v2402_v5 = vmul.f32 %v8207_v59, %v8924_v6  ;;  %v8209_v4 = vpop.eup %8208 }
 0x5c0   :  { %v2403_v8 = vmul.f32 %v8209_v4, %v8922_v17 }
 0x5c1   :  { %v2409_v56 = vpack.c.bf16 %v2402_v5, %v2401_v1 }
 0x5c2   :  { %v8211_v26 = vpop.eup %8210 }
 0x5c3   :  { %v2404_v9 = vmul.f32 %v8211_v26, %v8932_v11  ;;  %7613 = vmatprep.mubr.msk.bf16.mxu0 %vm1580_vm0, %v2409_v56  ;;  %v8213_v15 = vpop.eup %8212 }
 0x5c4   :  { %v2405_v31 = vmul.f32 %v8213_v15, %v8930_v10  ;;  %v7856_v10 = vld [vmem:[#allocation2 + $0xcc] ss:$24 sps:$4 sm:$0xff]  }
 0x5c5   :  { %v2410_v16 = vpack.c.bf16 %v2404_v9, %v2403_v8 }
 0x5c6   :  { %v8215_v18 = vpop.eup %8214 }
 0x5c7   :  { %7614 = vmatmul.mubr.msk.bf16.vlgmr.msra.gmra.mxu0 %vm1580_vm0, %v2410_v16  ;;  %v2406_v63 = vmul.f32 %v8215_v18, %v8940_v27  ;;  %v8217_v6 = vpop.eup %8216  ;;  %v7857_v27 = vld [vmem:[#allocation2 + $0xf4] ss:$24 sps:$4 sm:$0xff]  }
 0x5c8   :  { %7622 = vmatpush3.bf16.xpose.msra.mxu0 %v7852_v34  ;;  %v2407_v17 = vmul.f32 %v8217_v6, %v8938_v22 }
 0x5c9   :  { %7623 = vmatprep.subr.bf16.mxu0 %v7853_v20  ;;  %v2411_v32 = vpack.c.bf16 %v2406_v63, %v2405_v31 }
 0x5ca   :  { %v8219_v35 = vpop.eup %8218 }
 0x5cb   :  { %7617 = vmatprep.mubr.msk.bf16.mxu0 %vm1580_vm0, %v2411_v32  ;;  %v2408_v11 = vmul.f32 %v8219_v35, %v8946_v41 }
 0x5cd   :  { %v2412_v38 = vpack.c.bf16 %v2408_v11, %v2407_v17 }
 0x5cf   :  { %7618 = vmatmul.mubr.msk.bf16.gmra.mxu0 %vm1580_vm0, %v2412_v38 }
 0x5d0   :  { %7624 = vmatpush3.bf16.xpose.msra.mxu0 %v7853_v20  ;;  %7629 = vmatprep.mubr.bf16.mxu0 %v7855_v42 }
 0x5d1   :  { %7625 = vmatprep.subr.bf16.mxu0 %v7854_v44 }
 0x5d8   :  { %7626 = vmatpush3.bf16.xpose.msra.mxu0 %v7854_v44 }
 0x5d9   :  { %7627 = vmatprep.subr.bf16.mxu0 %v7856_v10 }
 0x5e0   :  { %7628 = vmatpush3.bf16.xpose.msra.mxu0 %v7856_v10 }
 0x5e7   :  { %7630 = vmatmul.mubr.bf16.vlgmr.msra.gmra.mxu0 %v7857_v27 }
 0x5e8   :  { %7633 = vmatprep.mubr.bf16.mxu0 %v7858_v45 }
 0x5ef   :  { %7634 = vmatmul.mubr.bf16.gmra.mxu0 %v7859_v43 }
 0x5f9   :  { %v7583_v22 = vpop.f32.mrf.mxu0 }
 0x5fa   :  { %v7439_v41 = vpack.c.bf16 %v7583_v22, %v7583_v22 }
 0x5fb   :  { %v2113_v46 = vpop.f32.mrf.mxu0 }
 0x5fc   :  { %2178 = vst [vmem:[#allocation3 + $0x14] sm:$0xf] %v7439_v41  ;;  %v7437_v47 = vpack.c.bf16 %v2113_v46, %v2113_v46 }
 0x5fd   :  { %v7584_v48 = vpop.f32.mrf.mxu0 }
 0x5fe   :  { %2176 = vst [vmem:[#allocation3 + $0x4] sm:$0xf] %v7437_v47  ;;  %v7440_v49 = vpack.c.bf16 %v7584_v48, %v7584_v48 }
 0x5ff   :  { %v2116_v50 = vpop.f32.mrf.mxu0 }
 0x600   :  { %2179 = vst [vmem:[#allocation3 + $0x1c] sm:$0xf] %v7440_v49  ;;  %v7438_v52 = vpack.c.bf16 %v2116_v50, %v2116_v50 }
 0x601   :  { %v7587_v13 = vpop.f32.mrf.mxu0 }
 0x602   :  { %2177 = vst [vmem:[#allocation3 + $0xc] sm:$0xf] %v7438_v52  ;;  %v7443_v53 = vpack.c.bf16 %v7587_v13, %v7587_v13 }
 0x603   :  { %v2129_v54 = vpop.f32.mrf.mxu0 }
 0x604   :  { %2182 = vst [vmem:[#allocation3 + $0x34] sm:$0xf] %v7443_v53  ;;  %v7441_v57 = vpack.c.bf16 %v2129_v54, %v2129_v54 }
 0x605   :  { %v7588_v0 = vpop.f32.mrf.mxu0 }
 0x606   :  { %2180 = vst [vmem:[#allocation3 + $0x24] sm:$0xf] %v7441_v57  ;;  %v7444_v40 = vpack.c.bf16 %v7588_v0, %v7588_v0 }
 0x607   :  { %v2132_v30 = vpop.f32.mrf.mxu0 }
 0x608   :  { %2183 = vst [vmem:[#allocation3 + $0x3c] sm:$0xf] %v7444_v40  ;;  %v7442_v23 = vpack.c.bf16 %v2132_v30, %v2132_v30 }
 0x60a   :  { %2181 = vst [vmem:[#allocation3 + $0x2c] sm:$0xf] %v7442_v23 }
 0x687   :  { %v7615_v24 = vpop.f32.mrf.mxu0 }
 0x688   :  { %v7447_v55 = vpack.c.bf16 %v7615_v24, %v7615_v24 }
 0x689   :  { %v2483_v58 = vpop.f32.mrf.mxu0 }
 0x68a   :  { %2548 = vst [vmem:[#allocation3 + $0x50] sm:$0xf] %v7447_v55  ;;  %v7445_v14 = vpack.c.bf16 %v2483_v58, %v2483_v58 }
 0x68b   :  { %v7616_v21 = vpop.f32.mrf.mxu0 }
 0x68c   :  { %2546 = vst [vmem:[#allocation3 + $0x40] sm:$0xf] %v7445_v14  ;;  %v7448_v34 = vpack.c.bf16 %v7616_v21, %v7616_v21 }
 0x68d   :  { %v2486_v37 = vpop.f32.mrf.mxu0 }
 0x68e   :  { %2549 = vst [vmem:[#allocation3 + $0x58] sm:$0xf] %v7448_v34  ;;  %v7446_v60 = vpack.c.bf16 %v2486_v37, %v2486_v37 }
 0x68f   :  { %v7619_v29 = vpop.f32.mrf.mxu0 }
 0x690   :  { %2547 = vst [vmem:[#allocation3 + $0x48] sm:$0xf] %v7446_v60  ;;  %v7451_v39 = vpack.c.bf16 %v7619_v29, %v7619_v29 }
 0x691   :  { %v2499_v51 = vpop.f32.mrf.mxu0 }
 0x692   :  { %2552 = vst [vmem:[#allocation3 + $0x70] sm:$0xf] %v7451_v39  ;;  %v7449_v19 = vpack.c.bf16 %v2499_v51, %v2499_v51 }
 0x693   :  { %v7620_v61 = vpop.f32.mrf.mxu0 }
 0x694   :  { %2550 = vst [vmem:[#allocation3 + $0x60] sm:$0xf] %v7449_v19  ;;  %v7452_v7 = vpack.c.bf16 %v7620_v61, %v7620_v61 }
 0x695   :  { %v2502_v62 = vpop.f32.mrf.mxu0 }
 0x696   :  { %2553 = vst [vmem:[#allocation3 + $0x78] sm:$0xf] %v7452_v7  ;;  %v7450_v59 = vpack.c.bf16 %v2502_v62, %v2502_v62 }
 0x698   :  { %2551 = vst [vmem:[#allocation3 + $0x68] sm:$0xf] %v7450_v59  ;;  %v7862_v59 = vld [vmem:[#allocation9 + $0x74] ss:$8 sps:$4 sm:$0xff]  }
 0x699   :  { %3223 = vmatprep.subr.bf16.mxu1 %v7862_v59  ;;  %v7907_v59 = vld [vmem:[#allocation9 + $0x94] ss:$8 sps:$4 sm:$0xff]  }
 0x6a7   :  { %v7631_v1 = vpop.f32.mrf.mxu0 }
 0x6a8   :  { %v2697_v8 = vsel %vm1580_vm0, %v7631_v1, -inf }
 0x6a9   :  { %v2660_v5 = vpop.f32.mrf.mxu0 }
 0x6aa   :  { %v2691_v4 = vsel %vm1580_vm0, %v2660_v5, -inf }
 0x6ab   :  { %2692 = vmax.xlane.f32.xlu0 %v2691_v4  ;;  %v7632_v56 = vpop.f32.mrf.mxu0 }
 0x6ac   :  { %v2700_v18 = vsel %vm1580_vm0, %v7632_v56, -inf }
 0x6ad   :  { %v2663_v26 = vpop.f32.mrf.mxu0 }
 0x6ae   :  { %v2694_v9 = vsel %vm1580_vm0, %v2663_v26, -inf }
 0x6af   :  { %2698 = vmax.xlane.f32.xlu0 %v2697_v8  ;;  %2695 = vmax.xlane.f32.xlu1 %v2694_v9  ;;  %v7635_v15 = vpop.f32.mrf.mxu0 }
 0x6b0   :  { %v2709_v6 = vsel %vm1580_vm0, %v7635_v15, -inf }
 0x6b1   :  { %v2676_v16 = vpop.f32.mrf.mxu0 }
 0x6b2   :  { %v2703_v20 = vsel %vm1580_vm0, %v2676_v16, -inf }
 0x6b3   :  { %2701 = vmax.xlane.f32.xlu1 %v2700_v18  ;;  %2704 = vmax.xlane.f32.xlu0 %v2703_v20  ;;  %v7636_v31 = vpop.f32.mrf.mxu0 }
 0x6b4   :  { %v2712_v35 = vsel %vm1580_vm0, %v7636_v31, -inf }
 0x6b5   :  { %v2679_v63 = vpop.f32.mrf.mxu0 }
 0x6b6   :  { %v2706_v32 = vsel %vm1580_vm0, %v2679_v63, -inf }
 0x6b7   :  { %2710 = vmax.xlane.f32.xlu0 %v2709_v6  ;;  %2707 = vmax.xlane.f32.xlu1 %v2706_v32 }
 0x6bb   :  { %2713 = vmax.xlane.f32.xlu1 %v2712_v35 }
 0x734   :  { %v2693_v17 = vpop.xlane.xlu0 %2692 }
 0x735   :  { %v2715_v11 = vsub.f32 %v2660_v5, %v2693_v17 }
 0x737   :  { %v2723_v38 = vmul.f32 1.442695, %v2715_v11 }
 0x738   :  { %v2699_v42 = vpop.xlane.xlu0 %2698  ;;  %v2696_v44 = vpop.xlane.xlu1 %2695 }
 0x739   :  { %8220 = vpow2.f32 %v2723_v38  ;;  %v2717_v10 = vsub.f32 %v7631_v1, %v2699_v42  ;;  %v2716_v27 = vsub.f32 %v2663_v26, %v2696_v44  ;;  %v7860_v38 = vld [vmem:[#allocation9 + $0x70] ss:$8 sps:$4 sm:$0xff]   ;;  %v7865_v44 = vld [vmem:[#allocation9 + $0x64] ss:$8 sps:$4 sm:$0xff]  }
 0x73b   :  { %v2727_v45 = vmul.f32 1.442695, %v2717_v10  ;;  %v2725_v43 = vmul.f32 1.442695, %v2716_v27 }
 0x73c   :  { %v2702_v22 = vpop.xlane.xlu1 %2701  ;;  %v2705_v41 = vpop.xlane.xlu0 %2704 }
 0x73d   :  { %8222 = vpow2.f32 %v2727_v45  ;;  %v2718_v46 = vsub.f32 %v7632_v56, %v2702_v22  ;;  %v2719_v47 = vsub.f32 %v2676_v16, %v2705_v41  ;;  %v7863_v22 = vld [vmem:[#allocation9 + $0x60] ss:$8 sps:$4 sm:$0xff]  }
 0x73e   :  { %8224 = vpow2.f32 %v2725_v43 }
 0x73f   :  { %v2729_v48 = vmul.f32 1.442695, %v2718_v46  ;;  %v2731_v49 = vmul.f32 1.442695, %v2719_v47  ;;  %v7868_v47 = vld [vmem:[#allocation9 + $0x54] ss:$8 sps:$4 sm:$0xff]  }
 0x740   :  { %v2711_v50 = vpop.xlane.xlu0 %2710  ;;  %v2708_v52 = vpop.xlane.xlu1 %2707 }
 0x741   :  { %8226 = vpow2.f32 %v2729_v48  ;;  %v2721_v13 = vsub.f32 %v7635_v15, %v2711_v50  ;;  %v2720_v53 = vsub.f32 %v2679_v63, %v2708_v52  ;;  %v7866_v50 = vld [vmem:[#allocation9 + $0x50] ss:$8 sps:$4 sm:$0xff]  }
 0x742   :  { %8228 = vpow2.f32 %v2731_v49 }
 0x743   :  { %v2735_v54 = vmul.f32 1.442695, %v2721_v13  ;;  %v2733_v57 = vmul.f32 1.442695, %v2720_v53  ;;  %v7874_v13 = vld [vmem:[#allocation9 + $0x44] ss:$8 sps:$4 sm:$0xff]  }
 0x744   :  { %v2714_v0 = vpop.xlane.xlu1 %2713  ;;  %v7871_v53 = vld [vmem:[#allocation3 + $0x4] ss:$8 sps:$4 sm:$0xff]  }
 0x745   :  { %8230 = vpow2.f32 %v2735_v54  ;;  %v2722_v40 = vsub.f32 %v7636_v31, %v2714_v0  ;;  %v7872_v54 = vld [vmem:[#allocation9 + $0x40] ss:$8 sps:$4 sm:$0xff]   ;;  %v7875_v0 = vld [vmem:[#allocation9 + $0x30] ss:$8 sps:$4 sm:$0xff]  }
 0x746   :  { %v8221_v30 = vpop.eup %8220  ;;  %8232 = vpow2.f32 %v2733_v57  ;;  %v7877_v57 = vld [vmem:[#allocation9 + $0x34] ss:$8 sps:$4 sm:$0xff]  }
 0x747   :  { %v2737_v23 = vmul.f32 1.442695, %v2722_v40  ;;  %v2739_v24 = vsel %vm1580_vm0, %v8221_v30, 0.0  ;;  %v7880_v40 = vld [vmem:[#allocation9 + $0x24] ss:$8 sps:$4 sm:$0xff]  }
 0x748   :  { %2740 = vadd.xlane.f32.xlu0 %v2739_v24  ;;  %v7881_v24 = vld [vmem:[#allocation9 + $0x10] ss:$8 sps:$4 sm:$0xff]  }
 0x749   :  { %8234 = vpow2.f32 %v2737_v23  ;;  %v7883_v23 = vld [vmem:[#allocation9 + $0x14] ss:$8 sps:$4 sm:$0xff]  }
 0x74a   :  { %v8223_v55 = vpop.eup %8222 }
 0x74b   :  { %v8225_v58 = vpop.eup %8224  ;;  %v2745_v14 = vsel %vm1580_vm0, %v8223_v55, 0.0 }
 0x74c   :  { %2746 = vadd.xlane.f32.xlu0 %v2745_v14  ;;  %v2742_v21 = vsel %vm1580_vm0, %v8225_v58, 0.0  ;;  %v7889_v14 = vld [vmem:[#allocation9 + $0xf4] ss:$8 sps:$4 sm:$0xff]  }
 0x74d   :  { %2743 = vadd.xlane.f32.xlu1 %v2742_v21  ;;  %v7887_v21 = vld [vmem:[#allocation9 + $0xf0] ss:$8 sps:$4 sm:$0xff]  }
 0x74e   :  { %v8227_v34 = vpop.eup %8226 }
 0x74f   :  { %v8229_v37 = vpop.eup %8228  ;;  %v2748_v60 = vsel %vm1580_vm0, %v8227_v34, 0.0 }
 0x750   :  { %v2751_v29 = vsel %vm1580_vm0, %v8229_v37, 0.0 }
 0x751   :  { %2752 = vadd.xlane.f32.xlu0 %v2751_v29  ;;  %2749 = vadd.xlane.f32.xlu1 %v2748_v60  ;;  %v7895_v60 = vld [vmem:[#allocation9 + $0xd4] ss:$8 sps:$4 sm:$0xff]   ;;  %v7893_v29 = vld [vmem:[#allocation9 + $0xd0] ss:$8 sps:$4 sm:$0xff]  }
 0x752   :  { %v8231_v39 = vpop.eup %8230 }
 0x753   :  { %v8233_v51 = vpop.eup %8232  ;;  %v2757_v19 = vsel %vm1580_vm0, %v8231_v39, 0.0 }
 0x754   :  { %v2754_v61 = vsel %vm1580_vm0, %v8233_v51, 0.0 }
 0x755   :  { %2758 = vadd.xlane.f32.xlu0 %v2757_v19  ;;  %2755 = vadd.xlane.f32.xlu1 %v2754_v61  ;;  %v7901_v19 = vld [vmem:[#allocation9 + $0xb4] ss:$8 sps:$4 sm:$0xff]   ;;  %v7899_v61 = vld [vmem:[#allocation9 + $0xb0] ss:$8 sps:$4 sm:$0xff]  }
 0x756   :  { %v8235_v7 = vpop.eup %8234 }
 0x757   :  { %v2760_v62 = vsel %vm1580_vm0, %v8235_v7, 0.0 }
 0x759   :  { %2761 = vadd.xlane.f32.xlu1 %v2760_v62  ;;  %v7902_v62 = vld [vmem:[#allocation9 + $0xa0] ss:$8 sps:$4 sm:$0xff]  }
 0x7d1   :  { %v2741_v1 = vpop.xlane.xlu0 %2740 }
 0x7d2   :  { %8236 = vrcp.f32 %v2741_v1  ;;  %v7905_v1 = vld [vmem:[#allocation9 + $0x90] ss:$8 sps:$4 sm:$0xff]  }
 0x7d5   :  { %v2747_v5 = vpop.xlane.xlu0 %2746 }
 0x7d6   :  { %v2744_v4 = vpop.xlane.xlu1 %2743 }
 0x7d7   :  { %8238 = vrcp.f32 %v2744_v4  ;;  %v7908_v4 = vld [vmem:[#allocation9 + $0x80] ss:$8 sps:$4 sm:$0xff]  }
 0x7d8   :  { %8240 = vrcp.f32 %v2747_v5  ;;  %v7910_v5 = vld [vmem:[#allocation9 + $0x84] ss:$8 sps:$4 sm:$0xff]  }
 0x7da   :  { %v2753_v56 = vpop.xlane.xlu0 %2752  ;;  %v2750_v26 = vpop.xlane.xlu1 %2749 }
 0x7db   :  { %8242 = vrcp.f32 %v2750_v26  ;;  %v7911_v26 = vld [vmem:[#allocation3 + $0x14] ss:$8 sps:$4 sm:$0xff]  }
 0x7dc   :  { %8244 = vrcp.f32 %v2753_v56  ;;  %v7869_v56 = vld [vmem:[#allocation3] ss:$8 sps:$4 sm:$0xff]  }
 0x7de   :  { %v2759_v8 = vpop.xlane.xlu0 %2758  ;;  %v2756_v9 = vpop.xlane.xlu1 %2755 }
 0x7df   :  { %8246 = vrcp.f32 %v2756_v9  ;;  %v8237_v15 = vpop.eup %8236  ;;  %v7914_v9 = vld [vmem:[#allocation3 + $0x24] ss:$8 sps:$4 sm:$0xff]  }
 0x7e0   :  { %8248 = vrcp.f32 %v2759_v8  ;;  %v2771_v20 = vmul.f32 %v8237_v15, %v8221_v30  ;;  %v7878_v30 = vld [vmem:[#allocation9 + $0x20] ss:$8 sps:$4 sm:$0xff]   ;;  %v7913_v8 = vld [vmem:[#allocation3 + $0x10] ss:$8 sps:$4 sm:$0xff]  }
 0x7e1   :  { %v7916_v15 = vld [vmem:[#allocation3 + $0x20] ss:$8 sps:$4 sm:$0xff]  }
 0x7e2   :  { %v2762_v16 = vpop.xlane.xlu1 %2761 }
 0x7e3   :  { %8250 = vrcp.f32 %v2762_v16  ;;  %v7917_v16 = vld [vmem:[#allocation3 + $0x34] ss:$8 sps:$4 sm:$0xff]  }
 0x7e4   :  { %v8239_v18 = vpop.eup %8238 }
 0x7e5   :  { %v2772_v31 = vmul.f32 %v8239_v18, %v8225_v58  ;;  %v8241_v63 = vpop.eup %8240  ;;  %v7884_v58 = vld [vmem:[#allocation9] ss:$8 sps:$4 sm:$0xff]   ;;  %v7919_v18 = vld [vmem:[#allocation3 + $0x30] ss:$8 sps:$4 sm:$0xff]  }
 0x7e6   :  { %v2773_v35 = vmul.f32 %v8241_v63, %v8223_v55  ;;  %v7886_v55 = vld [vmem:[#allocation9 + $0x4] ss:$8 sps:$4 sm:$0xff]  }
 0x7e7   :  { %v2779_v6 = vpack.c.bf16 %v2772_v31, %v2771_v20 }
 0x7e8   :  { %v8243_v32 = vpop.eup %8242 }
 0x7e9   :  { %7645 = vmatprep.mubr.msk.bf16.mxu1 %vm1580_vm0, %v2779_v6  ;;  %v2774_v17 = vmul.f32 %v8243_v32, %v8227_v34  ;;  %v8245_v11 = vpop.eup %8244  ;;  %v7892_v34 = vld [vmem:[#allocation9 + $0xe4] ss:$8 sps:$4 sm:$0xff]  }
 0x7ea   :  { %v2775_v45 = vmul.f32 %v8245_v11, %v8229_v37  ;;  %v7890_v37 = vld [vmem:[#allocation9 + $0xe0] ss:$8 sps:$4 sm:$0xff]  }
 0x7eb   :  { %v2780_v42 = vpack.c.bf16 %v2774_v17, %v2773_v35 }
 0x7ec   :  { %v8247_v10 = vpop.eup %8246 }
 0x7ed   :  { %v8249_v27 = vpop.eup %8248  ;;  %7646 = vmatmul.mubr.msk.bf16.vlgmr.msra.gmra.mxu1 %vm1580_vm0, %v2780_v42  ;;  %v2776_v43 = vmul.f32 %v8247_v10, %v8233_v51  ;;  %v7896_v51 = vld [vmem:[#allocation9 + $0xc0] ss:$8 sps:$4 sm:$0xff]  }
 0x7ee   :  { %3224 = vmatpush1.bf16.msra.mxu1 %v7860_v38  ;;  %v2777_v48 = vmul.f32 %v8249_v27, %v8231_v39  ;;  %v7898_v39 = vld [vmem:[#allocation9 + $0xc4] ss:$8 sps:$4 sm:$0xff]  }
 0x7ef   :  { %3225 = vmatprep.subr.bf16.mxu1 %v7865_v44  ;;  %v2781_v46 = vpack.c.bf16 %v2776_v43, %v2775_v45 }
 0x7f0   :  { %v8251_v41 = vpop.eup %8250 }
 0x7f1   :  { %v2778_v49 = vmul.f32 %v8251_v41, %v8235_v7  ;;  %7649 = vmatprep.mubr.msk.bf16.mxu1 %vm1580_vm0, %v2781_v46  ;;  %v7904_v7 = vld [vmem:[#allocation9 + $0xa4] ss:$8 sps:$4 sm:$0xff]   ;;  %v7922_v46 = vld [vmem:[#allocation3 + $0x40] ss:$8 sps:$4 sm:$0xff]  }
 0x7f2   :  { %3226 = vmatpush1.bf16.msra.mxu1 %v7863_v22 }
 0x7f3   :  { %v2782_v52 = vpack.c.bf16 %v2778_v49, %v2777_v48  ;;  %3227 = vmatprep.subr.bf16.mxu1 %v7868_v47  ;;  %v7925_v48 = vld [vmem:[#allocation3 + $0x50] ss:$8 sps:$4 sm:$0xff]  }
 0x7f5   :  { %7650 = vmatmul.mubr.msk.bf16.gmra.mxu1 %vm1580_vm0, %v2782_v52 }
 0x7f6   :  { %3228 = vmatpush1.bf16.msra.mxu1 %v7866_v50  ;;  %3255 = vmatprep.mubr.bf16.mxu1 %v7871_v53  ;;  %v7928_v50 = vld [vmem:[#allocation3 + $0x60] ss:$8 sps:$4 sm:$0xff]   ;;  %v106_v53 = vld [vmem:[#allocation13 + $0x6] sm:$0x3] }
 0x7f7   :  { %3229 = vmatprep.subr.bf16.mxu1 %v7874_v13  ;;  %v7931_v13 = vld [vmem:[#allocation3 + $0x70] ss:$8 sps:$4 sm:$0xff]  }
 0x7fa   :  { %3230 = vmatpush1.bf16.msra.mxu1 %v7872_v54  ;;  %v8996_v54 = vrot.slane %v106_v53, %v8650_v33 }
 0x7fb   :  { %3231 = vmatprep.subr.bf16.mxu1 %v7877_v57  ;;  %v8999_v57 = vrot.slane %v106_v53, %v8653_v36 }
 0x7fe   :  { %3232 = vmatpush1.bf16.msra.mxu1 %v7875_v0 }
 0x7ff   :  { %3233 = vmatprep.subr.bf16.mxu1 %v7880_v40 }
 0x802   :  { %3234 = vmatpush1.bf16.msra.mxu1 %v7878_v30 }
 0x803   :  { %3235 = vmatprep.subr.bf16.mxu1 %v7883_v23 }
 0x806   :  { %3236 = vmatpush1.bf16.msra.mxu1 %v7881_v24 }
 0x807   :  { %3237 = vmatprep.subr.bf16.mxu1 %v7886_v55  ;;  %v8316_v55 = vld [vmem:[#allocation4] sm:$0xff] }
 0x80a   :  { %3238 = vmatpush1.bf16.msra.mxu1 %v7884_v58 }
 0x80b   :  { %3239 = vmatprep.subr.bf16.mxu1 %v7889_v14  ;;  %v8317_v14 = vld [vmem:[#allocation4 + $0x8] sm:$0xff] }
 0x80e   :  { %3240 = vmatpush2.bf16.msra.mxu1 %v7887_v21 }
 0x80f   :  { %3241 = vmatprep.subr.bf16.mxu1 %v7892_v34 }
 0x812   :  { %3242 = vmatpush2.bf16.msra.mxu1 %v7890_v37 }
 0x813   :  { %3243 = vmatprep.subr.bf16.mxu1 %v7895_v60 }
 0x816   :  { %3244 = vmatpush2.bf16.msra.mxu1 %v7893_v29 }
 0x817   :  { %3245 = vmatprep.subr.bf16.mxu1 %v7898_v39 }
 0x81a   :  { %3246 = vmatpush2.bf16.msra.mxu1 %v7896_v51  ;;  %v8318_v51 = vld [vmem:[#allocation4 + $0x10] sm:$0xff] }
 0x81b   :  { %3247 = vmatprep.subr.bf16.mxu1 %v7901_v19 }
 0x81e   :  { %3248 = vmatpush2.bf16.msra.mxu1 %v7899_v61 }
 0x81f   :  { %3249 = vmatprep.subr.bf16.mxu1 %v7904_v7  ;;  %v8319_v7 = vld [vmem:[#allocation4 + $0x18] sm:$0xff] }
 0x822   :  { %3250 = vmatpush2.bf16.msra.mxu1 %v7902_v62 }
 0x823   :  { %3251 = vmatprep.subr.bf16.mxu1 %v7907_v59 }
 0x826   :  { %3252 = vmatpush2.bf16.msra.mxu1 %v7905_v1 }
 0x827   :  { %3253 = vmatprep.subr.bf16.mxu1 %v7910_v5 }
 0x82a   :  { %3254 = vmatpush2.bf16.msra.mxu1 %v7908_v4 }
 0x82d   :  { %3256 = vmatmul.mubr.bf16.vlgmr.msra.gmra.mxu1 %v7869_v56  ;;  %v8320_v56 = vld [vmem:[#allocation4 + $0x20] sm:$0xff] }
 0x82e   :  { %3265 = vmatprep.mubr.bf16.mxu1 %v7911_v26 }
 0x835   :  { %3266 = vmatmul.mubr.bf16.gmra.mxu1 %v7913_v8  ;;  %v8321_v8 = vld [vmem:[#allocation4 + $0x28] sm:$0xff] }
 0x836   :  { %3275 = vmatprep.mubr.bf16.mxu1 %v7914_v9 }
 0x83d   :  { %3276 = vmatmul.mubr.bf16.gmra.mxu1 %v7916_v15 }
 0x83e   :  { %3285 = vmatprep.mubr.bf16.mxu1 %v7917_v16 }
 0x845   :  { %3286 = vmatmul.mubr.bf16.gmra.mxu1 %v7919_v18 }
 0x8ad   :  { %v7647_v20 = vpop.f32.mrf.mxu1 }
 0x8ae   :  { %v7455_v31 = vpack.c.bf16 %v7647_v20, %v7647_v20 }
 0x8af   :  { %v2853_v63 = vpop.f32.mrf.mxu1 }
 0x8b0   :  { %2918 = vst [vmem:[#allocation3 + $0x54] sm:$0xf] %v7455_v31  ;;  %v7453_v6 = vpack.c.bf16 %v2853_v63, %v2853_v63  ;;  %v8322_v63 = vld [vmem:[#allocation4 + $0x30] sm:$0xff] }
 0x8b1   :  { %v7648_v32 = vpop.f32.mrf.mxu1 }
 0x8b2   :  { %2916 = vst [vmem:[#allocation3 + $0x44] sm:$0xf] %v7453_v6  ;;  %v7456_v35 = vpack.c.bf16 %v7648_v32, %v7648_v32 }
 0x8b3   :  { %v2856_v17 = vpop.f32.mrf.mxu1 }
 0x8b4   :  { %2919 = vst [vmem:[#allocation3 + $0x5c] sm:$0xf] %v7456_v35  ;;  %v7454_v11 = vpack.c.bf16 %v2856_v17, %v2856_v17  ;;  %v8323_v35 = vld [vmem:[#allocation4 + $0x38] sm:$0xff] }
 0x8b5   :  { %v7651_v38 = vpop.f32.mrf.mxu1 }
 0x8b6   :  { %2917 = vst [vmem:[#allocation3 + $0x4c] sm:$0xf] %v7454_v11  ;;  %v7459_v42 = vpack.c.bf16 %v7651_v38, %v7651_v38 }
 0x8b7   :  { %v2869_v44 = vpop.f32.mrf.mxu1 }
 0x8b8   :  { %2922 = vst [vmem:[#allocation3 + $0x74] sm:$0xf] %v7459_v42  ;;  %v7457_v10 = vpack.c.bf16 %v2869_v44, %v2869_v44 }
 0x8b9   :  { %v7652_v27 = vpop.f32.mrf.mxu1 }
 0x8ba   :  { %2920 = vst [vmem:[#allocation3 + $0x64] sm:$0xf] %v7457_v10  ;;  %v7460_v45 = vpack.c.bf16 %v7652_v27, %v7652_v27  ;;  %v8324_v10 = vld [vmem:[#allocation4 + $0x40] sm:$0xff] }
 0x8bb   :  { %v2872_v43 = vpop.f32.mrf.mxu1  ;;  %v7923_v47 = vld [vmem:[#allocation3 + $0x54] ss:$8 sps:$4 sm:$0xff]  }
 0x8bc   :  { %2923 = vst [vmem:[#allocation3 + $0x7c] sm:$0xf] %v7460_v45  ;;  %v7458_v22 = vpack.c.bf16 %v2872_v43, %v2872_v43  ;;  %v8325_v45 = vld [vmem:[#allocation4 + $0x48] sm:$0xff] }
 0x8bd   :  { %v7920_v41 = vld [vmem:[#allocation3 + $0x44] ss:$8 sps:$4 sm:$0xff]  }
 0x8be   :  { %2921 = vst [vmem:[#allocation3 + $0x6c] sm:$0xf] %v7458_v22  ;;  %3295 = vmatprep.mubr.bf16.mxu1 %v7920_v41 }
 0x8bf   :  { %3296 = vmatmul.mubr.bf16.gmra.mxu1 %v7922_v46 }
 0x8c0   :  { %3305 = vmatprep.mubr.bf16.mxu1 %v7923_v47 }
 0x8c3   :  { %v7929_v52 = vld [vmem:[#allocation3 + $0x74] ss:$8 sps:$4 sm:$0xff]  }
 0x8c5   :  { %v7926_v49 = vld [vmem:[#allocation3 + $0x64] ss:$8 sps:$4 sm:$0xff]  }
 0x8c7   :  { %3306 = vmatmul.mubr.bf16.gmra.mxu1 %v7925_v48 }
 0x8c8   :  { %3315 = vmatprep.mubr.bf16.mxu1 %v7926_v49  ;;  %v8326_v49 = vld [vmem:[#allocation4 + $0x50] sm:$0xff] }
 0x8cf   :  { %3316 = vmatmul.mubr.bf16.gmra.mxu1 %v7928_v50 }
 0x8d0   :  { %3325 = vmatprep.mubr.bf16.mxu1 %v7929_v52 }
 0x8d7   :  { %3326 = vmatmul.mubr.bf16.gmra.mxu1 %v7931_v13  ;;  %v8327_v13 = vld [vmem:[#allocation4 + $0x58] sm:$0xff] }
 0x8ed   :  { %v3257_v0 = vpop.f32.mrf.mxu1 }
 0x8ee   :  { %v3258_v40 = vadd.f32 %v3257_v0, %v8996_v54 }
 0x8ef   :  { %v3259_v30 = vpop.f32.mrf.mxu1 }
 0x8f0   :  { %v3260_v23 = vadd.f32 %v3259_v30, %v8999_v57  ;;  %v9003_v58 = vadd.f32 %v8316_v55, %v3258_v40 }
 0x8f1   :  { %v3261_v24 = vpop.f32.mrf.mxu1 }
 0x8f2   :  { %v9005_v21 = vadd.f32 %v8317_v14, %v3260_v23  ;;  %v3262_v34 = vadd.f32 %v3261_v24, %v8996_v54  ;;  %v8328_v24 = vld [vmem:[#allocation4 + $0x60] sm:$0xff]  ;;  %v8329_v14 = vld [vmem:[#allocation4 + $0x68] sm:$0xff] }
 0x8f3   :  { %v3263_v37 = vpop.f32.mrf.mxu1 }
 0x8f4   :  { %v3264_v60 = vadd.f32 %v3263_v37, %v8999_v57  ;;  %v3368_v29 = vadd.f32 %v9005_v21, %v9003_v58  ;;  %v9011_v19 = vadd.f32 %v8318_v51, %v3262_v34  ;;  %v8330_v51 = vld [vmem:[#allocation4 + $0x70] sm:$0xff] }
 0x8f5   :  { %v3267_v39 = vpop.f32.mrf.mxu1 }
 0x8f6   :  { %v3268_v61 = vadd.f32 %v3267_v39, %v8996_v54  ;;  %3369 = vadd.xlane.f32.xlu0 %v3368_v29  ;;  %v9014_v62 = vadd.f32 %v8319_v7, %v3264_v60  ;;  %v8331_v7 = vld [vmem:[#allocation4 + $0x78] sm:$0xff] }
 0x8f7   :  { %v3269_v59 = vpop.f32.mrf.mxu1 }
 0x8f8   :  { %v3270_v1 = vadd.f32 %v3269_v59, %v8999_v57  ;;  %v3371_v5 = vadd.f32 %v9014_v62, %v9011_v19  ;;  %v9019_v26 = vadd.f32 %v8320_v56, %v3268_v61  ;;  %v3784_v56 = vld [vmem:[#allocation10 + $0x1c8] sm:$0xff] }
 0x8f9   :  { %v3271_v4 = vpop.f32.mrf.mxu1 }
 0x8fa   :  { %v9021_v9 = vadd.f32 %v8321_v8, %v3270_v1  ;;  %v3272_v15 = vadd.f32 %v3271_v4, %v8996_v54  ;;  %3372 = vadd.xlane.f32.xlu1 %v3371_v5  ;;  %v3783_v5 = vld [vmem:[#allocation10 + $0x1c0] sm:$0xff] }
 0x8fb   :  { %v3273_v16 = vpop.f32.mrf.mxu1  ;;  %v3787_v4 = vld [vmem:[#allocation10 + $0x1e0] sm:$0xff] }
 0x8fc   :  { %v3274_v18 = vadd.f32 %v3273_v16, %v8999_v57  ;;  %v3374_v20 = vadd.f32 %v9021_v9, %v9019_v26  ;;  %v9027_v6 = vadd.f32 %v8322_v63, %v3272_v15  ;;  %v7181_v8 = vcombine.low %v3783_v5, %v3787_v4  ;;  %v3788_v16 = vld [vmem:[#allocation10 + $0x1e8] sm:$0xff] }
 0x8fd   :  { %v3277_v31 = vpop.f32.mrf.mxu1  ;;  %v7182_v15 = vcombine.high %v3783_v5, %v3787_v4  ;;  %v7184_v63 = vcombine.high %v3784_v56, %v3788_v16  ;;  %v8336_v4 = vld [vmem:[#allocation4 + $0xa0] sm:$0xff] }
 0x8fe   :  { %v3278_v32 = vadd.f32 %v3277_v31, %v8996_v54  ;;  %3375 = vadd.xlane.f32.xlu0 %v3374_v20  ;;  %v9030_v17 = vadd.f32 %v8323_v35, %v3274_v18  ;;  %v3775_v18 = vld [vmem:[#allocation10 + $0x180] sm:$0xff]  ;;  %v7183_v31 = vcombine.low %v3784_v56, %v3788_v16  ;;  %v3776_v35 = vld [vmem:[#allocation10 + $0x188] sm:$0xff] }
 0x8ff   :  { %v3279_v11 = vpop.f32.mrf.mxu1  ;;  %v3779_v20 = vld [vmem:[#allocation10 + $0x1a0] sm:$0xff]  ;;  %4536 = vmatprep.subr.bf16.mxu0 %v7182_v15  ;;  %4649 = vmatprep.subr.bf16.mxu1 %v7184_v63 }
 0x900   :  { %v3280_v38 = vadd.f32 %v3279_v11, %v8999_v57  ;;  %v3377_v42 = vadd.f32 %v9030_v17, %v9027_v6  ;;  %v9035_v27 = vadd.f32 %v8324_v10, %v3278_v32  ;;  %v7174_v32 = vcombine.high %v3775_v18, %v3779_v20  ;;  %v3780_v11 = vld [vmem:[#allocation10 + $0x1a8] sm:$0xff]  ;;  %4537 = vmatpush1.bf16.msra.mxu0 %v7181_v8 }
 0x901   :  { %v3281_v44 = vpop.f32.mrf.mxu1  ;;  %4650 = vmatpush1.bf16.msra.mxu1 %v7183_v31  ;;  %v8337_v8 = vld [vmem:[#allocation4 + $0xa8] sm:$0xff] }
 0x902   :  { %v9037_v43 = vadd.f32 %v8325_v45, %v3280_v38  ;;  %v3282_v22 = vadd.f32 %v3281_v44, %v8996_v54  ;;  %3378 = vadd.xlane.f32.xlu1 %v3377_v42  ;;  %v7176_v38 = vcombine.high %v3776_v35, %v3780_v11  ;;  %v7173_v42 = vcombine.low %v3775_v18, %v3779_v20 }
 0x903   :  { %v3283_v41 = vpop.f32.mrf.mxu1  ;;  %4538 = vmatprep.subr.bf16.mxu0 %v7174_v32  ;;  %v7175_v44 = vcombine.low %v3776_v35, %v3780_v11  ;;  %v8338_v11 = vld [vmem:[#allocation4 + $0xb0] sm:$0xff] }
 0x904   :  { %v3284_v46 = vadd.f32 %v3283_v41, %v8999_v57  ;;  %v3380_v47 = vadd.f32 %v9037_v43, %v9035_v27  ;;  %v9043_v50 = vadd.f32 %v8326_v49, %v3282_v22  ;;  %4651 = vmatprep.subr.bf16.mxu1 %v7176_v38  ;;  %4539 = vmatpush1.bf16.msra.mxu0 %v7173_v42  ;;  %v8333_v49 = vld [vmem:[#allocation4 + $0x88] sm:$0xff] }
 0x905   :  { %v3287_v48 = vpop.f32.mrf.mxu1  ;;  %4652 = vmatpush1.bf16.msra.mxu1 %v7175_v44  ;;  %v8339_v44 = vld [vmem:[#allocation4 + $0xb8] sm:$0xff] }
 0x906   :  { %v3288_v52 = vadd.f32 %v3287_v48, %v8996_v54  ;;  %3381 = vadd.xlane.f32.xlu0 %v3380_v47  ;;  %v9046_v53 = vadd.f32 %v8327_v13, %v3284_v46  ;;  %v8332_v47 = vld [vmem:[#allocation4 + $0x80] sm:$0xff] }
 0x907   :  { %v3289_v0 = vpop.f32.mrf.mxu1 }
 0x908   :  { %v3290_v40 = vadd.f32 %v3289_v0, %v8999_v57  ;;  %v3383_v30 = vadd.f32 %v9046_v53, %v9043_v50  ;;  %v9051_v55 = vadd.f32 %v8328_v24, %v3288_v52  ;;  %v8334_v24 = vld [vmem:[#allocation4 + $0x90] sm:$0xff] }
 0x909   :  { %v3291_v23 = vpop.f32.mrf.mxu1 }
 0x90a   :  { %v9053_v34 = vadd.f32 %v8329_v14, %v3290_v40  ;;  %v3292_v37 = vadd.f32 %v3291_v23, %v8996_v54  ;;  %3384 = vadd.xlane.f32.xlu1 %v3383_v30 }
 0x90b   :  { %v3293_v60 = vpop.f32.mrf.mxu1 }
 0x90c   :  { %v3294_v29 = vadd.f32 %v3293_v60, %v8999_v57  ;;  %v3386_v39 = vadd.f32 %v9053_v34, %v9051_v55  ;;  %v9059_v61 = vadd.f32 %v8330_v51, %v3292_v37  ;;  %v8335_v60 = vld [vmem:[#allocation4 + $0x98] sm:$0xff] }
 0x90e   :  { %3387 = vadd.xlane.f32.xlu0 %v3386_v39  ;;  %v9061_v59 = vadd.f32 %v8331_v7, %v3294_v29 }
 0x910   :  { %v3389_v1 = vadd.f32 %v9061_v59, %v9059_v61 }
 0x912   :  { %3390 = vadd.xlane.f32.xlu1 %v3389_v1 }
 0x97f   :  { %v3297_v10 = vpop.f32.mrf.mxu1  ;;  %v3370_v51 = vpop.xlane.xlu0 %3369 }
 0x980   :  { %v3298_v45 = vadd.f32 %v3297_v10, %v8996_v54  ;;  %v3417_v18 = vmul.f32 0.00390625, %v3370_v51 }
 0x981   :  { %v3299_v22 = vpop.f32.mrf.mxu1 }
 0x982   :  { %v3300_v41 = vadd.f32 %v3299_v22, %v8999_v57  ;;  %v9067_v48 = vadd.f32 %v8332_v47, %v3298_v45  ;;  %v9097_v45 = vsub.f32 %v9003_v58, %v3417_v18  ;;  %v9100_v22 = vsub.f32 %v9005_v21, %v3417_v18  ;;  %v8341_v58 = vld [vmem:[#allocation4 + $0xc8] sm:$0xff] }
 0x983   :  { %v3301_v46 = vpop.f32.mrf.mxu1  ;;  %v3373_v35 = vpop.xlane.xlu1 %3372 }
 0x984   :  { %v9069_v52 = vadd.f32 %v8333_v49, %v3300_v41  ;;  %v3302_v13 = vadd.f32 %v3301_v46, %v8996_v54  ;;  %v3418_v49 = vmul.f32 0.00390625, %v3373_v35 }
 0x985   :  { %v3303_v0 = vpop.f32.mrf.mxu1 }
 0x986   :  { %v3304_v40 = vadd.f32 %v3303_v0, %v8999_v57  ;;  %v3392_v30 = vadd.f32 %v9069_v52, %v9067_v48  ;;  %v9075_v14 = vadd.f32 %v8334_v24, %v3302_v13  ;;  %v8340_v13 = vld [vmem:[#allocation4 + $0xc0] sm:$0xff]  ;;  %v3768_v24 = vld [vmem:[#allocation10 + $0x148] sm:$0xff] }
 0x987   :  { %v3307_v23 = vpop.f32.mrf.mxu1 }
 0x988   :  { %v3308_v37 = vadd.f32 %v3307_v23, %v8996_v54  ;;  %3393 = vadd.xlane.f32.xlu0 %v3392_v30  ;;  %v9078_v29 = vadd.f32 %v8335_v60, %v3304_v40  ;;  %v3767_v30 = vld [vmem:[#allocation10 + $0x140] sm:$0xff] }
 0x989   :  { %v3309_v39 = vpop.f32.mrf.mxu1  ;;  %v3771_v23 = vld [vmem:[#allocation10 + $0x160] sm:$0xff] }
 0x98a   :  { %v3310_v7 = vadd.f32 %v3309_v39, %v8999_v57  ;;  %v3395_v1 = vadd.f32 %v9078_v29, %v9075_v14  ;;  %v9083_v56 = vadd.f32 %v8336_v4, %v3308_v37  ;;  %v3376_v37 = vpop.xlane.xlu0 %3375  ;;  %v7165_v39 = vcombine.low %v3767_v30, %v3771_v23 }
 0x98b   :  { %v3311_v5 = vpop.f32.mrf.mxu1  ;;  %v7166_v51 = vcombine.high %v3767_v30, %v3771_v23  ;;  %v3466_v4 = vmul.f32 %v9100_v22, %v9100_v22  ;;  %v9126_v23 = vsub.f32 %v9014_v62, %v3418_v49 }
 0x98c   :  { %v9085_v15 = vadd.f32 %v8337_v8, %v3310_v7  ;;  %v3312_v16 = vadd.f32 %v3311_v5, %v8996_v54  ;;  %3396 = vadd.xlane.f32.xlu1 %v3395_v1  ;;  %v3772_v7 = vld [vmem:[#allocation10 + $0x168] sm:$0xff]  ;;  %v3465_v5 = vmul.f32 %v9097_v45, %v9097_v45 }
 0x98d   :  { %v3313_v20 = vpop.f32.mrf.mxu1  ;;  %v7167_v8 = vcombine.low %v3768_v24, %v3772_v7  ;;  %4540 = vmatprep.subr.bf16.mxu0 %v7166_v51 }
 0x98e   :  { %v3314_v31 = vadd.f32 %v3313_v20, %v8999_v57  ;;  %v3398_v63 = vadd.f32 %v9085_v15, %v9083_v56  ;;  %v9091_v38 = vadd.f32 %v8338_v11, %v3312_v16  ;;  %v7168_v20 = vcombine.high %v3768_v24, %v3772_v7  ;;  %4541 = vmatpush1.bf16.msra.mxu0 %v7165_v39 }
 0x98f   :  { %v3317_v32 = vpop.f32.mrf.mxu1  ;;  %v3419_v24 = vmul.f32 0.00390625, %v3376_v37  ;;  %v3751_v37 = vld [vmem:[#allocation10 + $0xc0] sm:$0xff] }
 0x990   :  { %v3318_v42 = vadd.f32 %v3317_v32, %v8996_v54  ;;  %3399 = vadd.xlane.f32.xlu0 %v3398_v63  ;;  %v9094_v10 = vadd.f32 %v8339_v44, %v3314_v31  ;;  %v9118_v31 = vsub.f32 %v9011_v19, %v3418_v49  ;;  %v3379_v63 = vpop.xlane.xlu1 %3378  ;;  %v8342_v32 = vld [vmem:[#allocation4 + $0xd0] sm:$0xff]  ;;  %v3763_v44 = vld [vmem:[#allocation10 + $0x120] sm:$0xff]  ;;  %4653 = vmatprep.subr.bf16.mxu1 %v7168_v20  ;;  %v3764_v19 = vld [vmem:[#allocation10 + $0x128] sm:$0xff] }
 0x991   :  { %v3319_v41 = vpop.f32.mrf.mxu1  ;;  %4654 = vmatpush1.bf16.msra.mxu1 %v7167_v8  ;;  %v3420_v51 = vmul.f32 0.00390625, %v3379_v63  ;;  %v8344_v20 = vld [vmem:[#allocation4 + $0xe0] sm:$0xff]  ;;  %v8345_v8 = vld [vmem:[#allocation4 + $0xe8] sm:$0xff] }
 0x992   :  { %v3320_v46 = vadd.f32 %v3319_v41, %v8999_v57  ;;  %v3401_v47 = vadd.f32 %v9094_v10, %v9091_v38  ;;  %v9105_v0 = vadd.f32 %v8340_v13, %v3318_v42  ;;  %v3759_v42 = vld [vmem:[#allocation10 + $0x100] sm:$0xff]  ;;  %v3760_v41 = vld [vmem:[#allocation10 + $0x108] sm:$0xff]  ;;  %v8343_v13 = vld [vmem:[#allocation4 + $0xd8] sm:$0xff]  ;;  %v9137_v62 = vmul.f32 %v9118_v31, %v9118_v31 }
 0x993   :  { %v3321_v40 = vpop.f32.mrf.mxu1  ;;  %v7157_v30 = vcombine.low %v3759_v42, %v3763_v44  ;;  %v7158_v39 = vcombine.high %v3759_v42, %v3763_v44  ;;  %v7160_v49 = vcombine.high %v3760_v41, %v3764_v19 }
 0x994   :  { %v9107_v60 = vadd.f32 %v8341_v58, %v3320_v46  ;;  %v3322_v21 = vadd.f32 %v3321_v40, %v8996_v54  ;;  %3402 = vadd.xlane.f32.xlu1 %v3401_v47  ;;  %v3382_v46 = vpop.xlane.xlu0 %3381 }
 0x995   :  { %v3323_v1 = vpop.f32.mrf.mxu1  ;;  %4542 = vmatprep.subr.bf16.mxu0 %v7158_v39  ;;  %4655 = vmatprep.subr.bf16.mxu1 %v7160_v49  ;;  %v3747_v49 = vld [vmem:[#allocation10 + $0xa0] sm:$0xff] }
 0x996   :  { %v3324_v16 = vadd.f32 %v3323_v1, %v8999_v57  ;;  %v3404_v18 = vadd.f32 %v9107_v60, %v9105_v0  ;;  %v9120_v35 = vadd.f32 %v8342_v32, %v3322_v21  ;;  %v9128_v21 = vadd.f32 %v3466_v4, %v3465_v5  ;;  %v3755_v5 = vld [vmem:[#allocation10 + $0xe0] sm:$0xff]  ;;  %v3752_v4 = vld [vmem:[#allocation10 + $0xc8] sm:$0xff]  ;;  %4543 = vmatpush1.bf16.msra.mxu0 %v7157_v30 }
 0x997   :  { %v3327_v11 = vpop.f32.mrf.mxu1  ;;  %v7149_v44 = vcombine.low %v3751_v37, %v3755_v5  ;;  %v7150_v39 = vcombine.high %v3751_v37, %v3755_v5  ;;  %v3744_v37 = vld [vmem:[#allocation10 + $0x88] sm:$0xff]  ;;  %v8346_v5 = vld [vmem:[#allocation4 + $0xf0] sm:$0xff] }
 0x998   :  { %v3328_v47 = vadd.f32 %v3327_v11, %v8996_v54  ;;  %3405 = vadd.xlane.f32.xlu0 %v3404_v18  ;;  %v9123_v40 = vadd.f32 %v8343_v13, %v3324_v16  ;;  %v7159_v16 = vcombine.low %v3760_v41, %v3764_v19  ;;  %v3421_v18 = vmul.f32 0.00390625, %v3382_v46  ;;  %v3756_v46 = vld [vmem:[#allocation10 + $0xe8] sm:$0xff] }
 0x999   :  { %v3329_v58 = vpop.f32.mrf.mxu1  ;;  %v9146_v13 = vsub.f32 %v9021_v9, %v3419_v24  ;;  %v3468_v19 = vmul.f32 %v9126_v23, %v9126_v23  ;;  %v9157_v9 = vsub.f32 %v9030_v17, %v3420_v51  ;;  %4544 = vmatprep.subr.bf16.mxu0 %v7150_v39 }
 0x99a   :  { %v3330_v7 = vadd.f32 %v3329_v58, %v8999_v57  ;;  %v3407_v1 = vadd.f32 %v9123_v40, %v9120_v35  ;;  %v9133_v32 = vadd.f32 %v8344_v20, %v3328_v47  ;;  %v9143_v47 = vsub.f32 %v9019_v26, %v3419_v24  ;;  %v3385_v58 = vpop.xlane.xlu1 %3384  ;;  %4656 = vmatpush1.bf16.msra.mxu1 %v7159_v16  ;;  %v8347_v16 = vld [vmem:[#allocation4 + $0xf8] sm:$0xff] }
 0x99b   :  { %v3331_v11 = vpop.f32.mrf.mxu1  ;;  %v9160_v24 = vsub.f32 %v9035_v27, %v3421_v18  ;;  %v9163_v20 = vsub.f32 %v9037_v43, %v3421_v18  ;;  %4545 = vmatpush1.bf16.msra.mxu0 %v7149_v44  ;;  %v3748_v27 = vld [vmem:[#allocation10 + $0xa8] sm:$0xff] }
 0x99c   :  { %v9139_v63 = vadd.f32 %v8345_v8, %v3330_v7  ;;  %v3332_v42 = vadd.f32 %v3331_v11, %v8996_v54  ;;  %3408 = vadd.xlane.f32.xlu1 %v3407_v1  ;;  %v9151_v7 = vsub.f32 %v9027_v6, %v3420_v51  ;;  %v3388_v54 = vpop.xlane.xlu0 %3387  ;;  %v7151_v1 = vcombine.low %v3752_v4, %v3756_v46  ;;  %v3743_v11 = vld [vmem:[#allocation10 + $0x80] sm:$0xff] }
 0x99d   :  { %v3333_v41 = vpop.f32.mrf.mxu1  ;;  %v7152_v6 = vcombine.high %v3752_v4, %v3756_v46  ;;  %v7142_v17 = vcombine.high %v3743_v11, %v3747_v49  ;;  %v3423_v51 = vmul.f32 0.00390625, %v3388_v54  ;;  %v3469_v43 = vmul.f32 %v9143_v47, %v9143_v47 }
 0x99e   :  { %v3334_v30 = vadd.f32 %v3333_v41, %v8999_v57  ;;  %v3410_v26 = vadd.f32 %v9139_v63, %v9133_v32  ;;  %v3422_v57 = vmul.f32 0.00390625, %v3385_v58  ;;  %v9165_v8 = vadd.f32 %v8346_v5, %v3332_v42  ;;  %v3391_v39 = vpop.xlane.xlu1 %3390 }
 0x99f   :  { %4657 = vmatprep.subr.bf16.mxu1 %v7152_v6  ;;  %v7141_v18 = vcombine.low %v3743_v11, %v3747_v49  ;;  %v7144_v4 = vcombine.high %v3744_v37, %v3748_v27  ;;  %v3470_v42 = vmul.f32 %v9146_v13, %v9146_v13  ;;  %4546 = vmatprep.subr.bf16.mxu0 %v7142_v17  ;;  %v3735_v6 = vld [vmem:[#allocation10 + $0x40] sm:$0xff]  ;;  %v3736_v49 = vld [vmem:[#allocation10 + $0x48] sm:$0xff]  ;;  %v3424_v28 = vmul.f32 0.00390625, %v3391_v39 }
 0x9a0   :  { %3411 = vadd.xlane.f32.xlu0 %v3410_v26  ;;  %v9167_v41 = vadd.f32 %v8347_v16, %v3334_v30  ;;  %4658 = vmatpush1.bf16.msra.mxu1 %v7151_v1  ;;  %v7143_v58 = vcombine.low %v3744_v37, %v3748_v27  ;;  %v3471_v44 = vmul.f32 %v9151_v7, %v9151_v7  ;;  %v3739_v11 = vld [vmem:[#allocation10 + $0x60] sm:$0xff]  ;;  %v3740_v16 = vld [vmem:[#allocation10 + $0x68] sm:$0xff] }
 0x9a1   :  { %v3472_v54 = vmul.f32 %v9157_v9, %v9157_v9  ;;  %v3473_v30 = vmul.f32 %v9160_v24, %v9160_v24  ;;  %v3474_v26 = vmul.f32 %v9163_v20, %v9163_v20  ;;  %4659 = vmatprep.subr.bf16.mxu1 %v7144_v4  ;;  %v9184_v1 = vsub.f32 %v9043_v50, %v3422_v57 }
 0x9a2   :  { %v3413_v46 = vadd.f32 %v9167_v41, %v9165_v8  ;;  %v9187_v37 = vsub.f32 %v9046_v53, %v3422_v57  ;;  %v7134_v5 = vcombine.high %v3735_v6, %v3739_v11  ;;  %v9191_v17 = vsub.f32 %v9051_v55, %v3423_v51  ;;  %4547 = vmatpush1.bf16.msra.mxu0 %v7141_v18  ;;  %v3728_v55 = vld [vmem:[#allocation10 + $0x8] sm:$0xff] }
 0x9a3   :  { %v9194_v27 = vsub.f32 %v9053_v34, %v3423_v51  ;;  %v7133_v4 = vcombine.low %v3735_v6, %v3739_v11  ;;  %v7136_v25 = vcombine.high %v3736_v49, %v3740_v16  ;;  %v3500_v50 = vadd.f32 %v3468_v19, %v9137_v62  ;;  %v3732_v62 = vld [vmem:[#allocation10 + $0x28] sm:$0xff] }
 0x9a4   :  { %3414 = vadd.xlane.f32.xlu1 %v3413_v46  ;;  %3498 = vadd.xlane.f32.xlu0 %v9128_v21  ;;  %v3503_v3 = vadd.f32 %v3470_v42, %v3469_v43  ;;  %v7135_v53 = vcombine.low %v3736_v49, %v3740_v16  ;;  %v3506_v57 = vadd.f32 %v3472_v54, %v3471_v44  ;;  %v3727_v46 = vld [vmem:[#allocation10] sm:$0xff]  ;;  %v3852_v6 = vld [vmem:[#allocation10 + $0x3e8] sm:$0xff] }
 0x9a5   :  { %4660 = vmatpush1.bf16.msra.mxu1 %v7143_v58  ;;  %4548 = vmatprep.subr.bf16.mxu0 %v7134_v5  ;;  %v3509_v21 = vadd.f32 %v3474_v26, %v3473_v30  ;;  %v3475_v34 = vmul.f32 %v9184_v1, %v9184_v1  ;;  %v3476_v51 = vmul.f32 %v9187_v37, %v9187_v37  ;;  %v3847_v44 = vld [vmem:[#allocation10 + $0x3c0] sm:$0xff]  ;;  %v3848_v30 = vld [vmem:[#allocation10 + $0x3c8] sm:$0xff] }
 0x9a6   :  { %4661 = vmatprep.subr.bf16.mxu1 %v7136_v25  ;;  %v7126_v18 = vcombine.high %v3727_v46, %v3731_v12  ;;  %v3477_v19 = vmul.f32 %v9191_v17, %v9191_v17  ;;  %v3478_v43 = vmul.f32 %v9194_v27, %v9194_v27  ;;  %4549 = vmatpush1.bf16.msra.mxu0 %v7133_v4  ;;  %v3851_v54 = vld [vmem:[#allocation10 + $0x3e0] sm:$0xff] }
 0x9a7   :  { %v7125_v25 = vcombine.low %v3727_v46, %v3731_v12  ;;  %v7128_v42 = vcombine.high %v3728_v55, %v3732_v62  ;;  %v9206_v58 = vsub.f32 %v9059_v61, %v3424_v28  ;;  %v7127_v39 = vcombine.low %v3728_v55, %v3732_v62  ;;  %v3839_v16 = vld [vmem:[#allocation10 + $0x380] sm:$0xff]  ;;  %v3832_v62 = vld [vmem:[#allocation10 + $0x348] sm:$0xff] }
 0x9a8   :  { %3501 = vadd.xlane.f32.xlu1 %v3500_v50  ;;  %3504 = vadd.xlane.f32.xlu0 %v3503_v3  ;;  %v9209_v3 = vsub.f32 %v9061_v59, %v3424_v28  ;;  %v7246_v26 = vcombine.high %v3847_v44, %v3851_v54  ;;  %v3512_v11 = vadd.f32 %v3476_v51, %v3475_v34  ;;  %v3843_v4 = vld [vmem:[#allocation10 + $0x3a0] sm:$0xff]  ;;  %v3840_v50 = vld [vmem:[#allocation10 + $0x388] sm:$0xff] }
 0x9a9   :  { %4662 = vmatpush1.bf16.msra.mxu1 %v7135_v53  ;;  %4550 = vmatprep.subr.bf16.mxu0 %v7126_v18  ;;  %v3515_v12 = vadd.f32 %v3478_v43, %v3477_v19  ;;  %v7245_v49 = vcombine.low %v3847_v44, %v3851_v54  ;;  %v7248_v61 = vcombine.high %v3848_v30, %v3852_v6  ;;  %v3831_v51 = vld [vmem:[#allocation10 + $0x340] sm:$0xff]  ;;  %v3836_v43 = vld [vmem:[#allocation10 + $0x368] sm:$0xff] }
 0x9aa   :  { %4663 = vmatprep.subr.bf16.mxu1 %v7128_v42  ;;  %4551 = vmatpush1.bf16.msra.mxu0 %v7125_v25  ;;  %v3479_v28 = vmul.f32 %v9206_v58, %v9206_v58  ;;  %v3480_v59 = vmul.f32 %v9209_v3, %v9209_v3  ;;  %v7247_v5 = vcombine.low %v3848_v30, %v3852_v6  ;;  %v3835_v18 = vld [vmem:[#allocation10 + $0x360] sm:$0xff]  ;;  %v3824_v30 = vld [vmem:[#allocation10 + $0x308] sm:$0xff] }
 0x9ab   :  { %4552 = vmatprep.subr.bf16.mxu0 %v7246_v26  ;;  %v7238_v53 = vcombine.high %v3839_v16, %v3843_v4  ;;  %v7230_v19 = vcombine.high %v3831_v51, %v3835_v18  ;;  %v7229_v25 = vcombine.low %v3831_v51, %v3835_v18  ;;  %v7232_v42 = vcombine.high %v3832_v62, %v3836_v43  ;;  %v3823_v44 = vld [vmem:[#allocation10 + $0x300] sm:$0xff]  ;;  %v3828_v6 = vld [vmem:[#allocation10 + $0x328] sm:$0xff] }
 0x9ac   :  { %3507 = vadd.xlane.f32.xlu1 %v3506_v57  ;;  %3510 = vadd.xlane.f32.xlu0 %v3509_v21  ;;  %v3844_v57 = vld [vmem:[#allocation10 + $0x3a8] sm:$0xff]  ;;  %v7237_v21 = vcombine.low %v3839_v16, %v3843_v4  ;;  %v3518_v55 = vadd.f32 %v3480_v59, %v3479_v28  ;;  %v3827_v54 = vld [vmem:[#allocation10 + $0x320] sm:$0xff] }
 0x9ad   :  { %4664 = vmatpush1.bf16.msra.mxu1 %v7127_v39  ;;  %v7240_v46 = vcombine.high %v3840_v50, %v3844_v57  ;;  %v7239_v34 = vcombine.low %v3840_v50, %v3844_v57  ;;  %v7231_v39 = vcombine.low %v3832_v62, %v3836_v43  ;;  %v7222_v26 = vcombine.high %v3823_v44, %v3827_v54  ;;  %v3819_v28 = vld [vmem:[#allocation10 + $0x2e0] sm:$0xff]  ;;  %v3816_v59 = vld [vmem:[#allocation10 + $0x2c8] sm:$0xff] }
 0x9ae   :  { %4665 = vmatprep.subr.bf16.mxu1 %v7248_v61  ;;  %4553 = vmatpush2.bf16.msra.mxu0 %v7245_v49  ;;  %v7223_v49 = vcombine.low %v3824_v30, %v3828_v6  ;;  %v3815_v61 = vld [vmem:[#allocation10 + $0x2c0] sm:$0xff]  ;;  %v3820_v16 = vld [vmem:[#allocation10 + $0x2e8] sm:$0xff] }
 0x9af   :  { %4554 = vmatprep.subr.bf16.mxu0 %v7238_v53  ;;  %v7213_v4 = vcombine.low %v3815_v61, %v3819_v28  ;;  %v7216_v50 = vcombine.high %v3816_v59, %v3820_v16  ;;  %v7215_v53 = vcombine.low %v3816_v59, %v3820_v16  ;;  %v3807_v57 = vld [vmem:[#allocation10 + $0x280] sm:$0xff]  ;;  %v9217_v16 = vld [vmem:[#allocation10 + $0x1f0] sm:$0xff] }
 0x9b0   :  { %3513 = vadd.xlane.f32.xlu1 %v3512_v11  ;;  %3516 = vadd.xlane.f32.xlu0 %v3515_v12  ;;  %v7221_v11 = vcombine.low %v3823_v44, %v3827_v54  ;;  %v7224_v12 = vcombine.high %v3824_v30, %v3828_v6  ;;  %v3803_v43 = vld [vmem:[#allocation10 + $0x260] sm:$0xff]  ;;  %v3792_v6 = vld [vmem:[#allocation10 + $0x208] sm:$0xff] }
 0x9b1   :  { %4666 = vmatpush2.bf16.msra.mxu1 %v7247_v5  ;;  %v7214_v5 = vcombine.high %v3815_v61, %v3819_v28  ;;  %v3791_v44 = vld [vmem:[#allocation10 + $0x200] sm:$0xff] }
 0x9b2   :  { %4667 = vmatprep.subr.bf16.mxu1 %v7240_v46  ;;  %4555 = vmatpush2.bf16.msra.mxu0 %v7237_v21  ;;  %v3811_v21 = vld [vmem:[#allocation10 + $0x2a0] sm:$0xff]  ;;  %v3808_v46 = vld [vmem:[#allocation10 + $0x288] sm:$0xff] }
 0x9b3   :  { %4556 = vmatprep.subr.bf16.mxu0 %v7230_v19  ;;  %v7205_v51 = vcombine.low %v3807_v57, %v3811_v21  ;;  %v3799_v19 = vld [vmem:[#allocation10 + $0x240] sm:$0xff] }
 0x9b4   :  { %3519 = vadd.xlane.f32.xlu1 %v3518_v55  ;;  %v7206_v55 = vcombine.high %v3807_v57, %v3811_v21  ;;  %v3795_v54 = vld [vmem:[#allocation10 + $0x220] sm:$0xff]  ;;  %v7197_v30 = vcombine.low %v3799_v19, %v3803_v43  ;;  %v9225_v57 = vld [vmem:[#allocation10 + $0x1f8] sm:$0xff] }
 0x9b5   :  { %4668 = vmatpush2.bf16.msra.mxu1 %v7239_v34  ;;  %v3812_v34 = vld [vmem:[#allocation10 + $0x2a8] sm:$0xff]  ;;  %v7189_v28 = vcombine.low %v3791_v44, %v3795_v54 }
 0x9b6   :  { %4669 = vmatprep.subr.bf16.mxu1 %v7232_v42  ;;  %4557 = vmatpush2.bf16.msra.mxu0 %v7229_v25  ;;  %v7208_v18 = vcombine.high %v3808_v46, %v3812_v34  ;;  %v7207_v62 = vcombine.low %v3808_v46, %v3812_v34  ;;  %v3800_v25 = vld [vmem:[#allocation10 + $0x248] sm:$0xff]  ;;  %v7198_v42 = vcombine.high %v3799_v19, %v3803_v43 }
 0x9b7   :  { %4558 = vmatprep.subr.bf16.mxu0 %v7222_v26 }
 0x9b9   :  { %4670 = vmatpush2.bf16.msra.mxu1 %v7231_v39  ;;  %v3804_v39 = vld [vmem:[#allocation10 + $0x268] sm:$0xff] }
 0x9ba   :  { %4671 = vmatprep.subr.bf16.mxu1 %v7224_v12  ;;  %4559 = vmatpush2.bf16.msra.mxu0 %v7221_v11  ;;  %v7200_v26 = vcombine.high %v3800_v25, %v3804_v39  ;;  %v3796_v11 = vld [vmem:[#allocation10 + $0x228] sm:$0xff]  ;;  %v7199_v12 = vcombine.low %v3800_v25, %v3804_v39 }
 0x9bb   :  { %4560 = vmatprep.subr.bf16.mxu0 %v7214_v5  ;;  %v7192_v61 = vcombine.high %v3792_v6, %v3796_v11  ;;  %v7191_v59 = vcombine.low %v3792_v6, %v3796_v11  ;;  %v9215_v5 = vld [vmem:[#allocation10 + $0x1d0] sm:$0xff] }
 0x9bd   :  { %4672 = vmatpush2.bf16.msra.mxu1 %v7223_v49  ;;  %v7190_v49 = vcombine.high %v3791_v44, %v3795_v54 }
 0x9be   :  { %4673 = vmatprep.subr.bf16.mxu1 %v7216_v50  ;;  %4561 = vmatpush2.bf16.msra.mxu0 %v7213_v4  ;;  %v9219_v4 = vld [vmem:[#allocation10 + $0x1d8] sm:$0xff]  ;;  %v7185_v50 = vcombine.low %v9215_v5, %v9217_v16 }
 0x9bf   :  { %4562 = vmatprep.subr.bf16.mxu0 %v7206_v55  ;;  %v7188_v46 = vcombine.high %v9219_v4, %v9225_v57 }
 0x9c1   :  { %4674 = vmatpush2.bf16.msra.mxu1 %v7215_v53  ;;  %v7186_v53 = vcombine.high %v9215_v5, %v9217_v16 }
 0x9c2   :  { %4675 = vmatprep.subr.bf16.mxu1 %v7208_v18  ;;  %4563 = vmatpush2.bf16.msra.mxu0 %v7205_v51 }
 0x9c3   :  { %4564 = vmatprep.subr.bf16.mxu0 %v7198_v42 }
 0x9c5   :  { %4676 = vmatpush2.bf16.msra.mxu1 %v7207_v62 }
 0x9c6   :  { %4677 = vmatprep.subr.bf16.mxu1 %v7200_v26  ;;  %4565 = vmatpush2.bf16.msra.mxu0 %v7197_v30 }
 0x9c7   :  { %4566 = vmatprep.subr.bf16.mxu0 %v7190_v49 }
 0x9c9   :  { %4678 = vmatpush2.bf16.msra.mxu1 %v7199_v12 }
 0x9ca   :  { %4679 = vmatprep.subr.bf16.mxu1 %v7192_v61  ;;  %4567 = vmatpush2.bf16.msra.mxu0 %v7189_v28 }
 0x9cb   :  { %4762 = vmatprep.subr.bf16.mxu0 %v7186_v53 }
 0x9cd   :  { %4680 = vmatpush2.bf16.msra.mxu1 %v7191_v59 }
 0x9ce   :  { %4875 = vmatprep.subr.bf16.mxu1 %v7188_v46 }
 0xa11   :  { %v3394_v55 = vpop.xlane.xlu0 %3393 }
 0xa12   :  { %v3425_v34 = vmul.f32 0.00390625, %v3394_v55 }
 0xa14   :  { %v9232_v51 = vsub.f32 %v9067_v48, %v3425_v34  ;;  %v9235_v18 = vsub.f32 %v9069_v52, %v3425_v34 }
 0xa15   :  { %v3397_v62 = vpop.xlane.xlu1 %3396 }
 0xa16   :  { %v3426_v19 = vmul.f32 0.00390625, %v3397_v62  ;;  %v3481_v43 = vmul.f32 %v9232_v51, %v9232_v51  ;;  %v3482_v25 = vmul.f32 %v9235_v18, %v9235_v18 }
 0xa18   :  { %v9242_v42 = vsub.f32 %v9075_v14, %v3426_v19  ;;  %v9245_v39 = vsub.f32 %v9078_v29, %v3426_v19  ;;  %v3521_v44 = vadd.f32 %v3482_v25, %v3481_v43 }
 0xa19   :  { %v3400_v48 = vpop.xlane.xlu0 %3399 }
 0xa1a   :  { %v3427_v54 = vmul.f32 0.00390625, %v3400_v48  ;;  %3522 = vadd.xlane.f32.xlu0 %v3521_v44  ;;  %v3483_v52 = vmul.f32 %v9242_v42, %v9242_v42  ;;  %v3484_v30 = vmul.f32 %v9245_v39, %v9245_v39 }
 0xa1c   :  { %v9252_v26 = vsub.f32 %v9083_v56, %v3427_v54  ;;  %v9255_v6 = vsub.f32 %v9085_v15, %v3427_v54  ;;  %v3524_v14 = vadd.f32 %v3484_v30, %v3483_v52 }
 0xa1d   :  { %v3403_v11 = vpop.xlane.xlu1 %3402 }
 0xa1e   :  { %v3428_v29 = vmul.f32 0.00390625, %v3403_v11  ;;  %3525 = vadd.xlane.f32.xlu1 %v3524_v14  ;;  %v3485_v12 = vmul.f32 %v9252_v26, %v9252_v26  ;;  %v3486_v49 = vmul.f32 %v9255_v6, %v9255_v6 }
 0xa20   :  { %v9262_v61 = vsub.f32 %v9091_v38, %v3428_v29  ;;  %v9265_v28 = vsub.f32 %v9094_v10, %v3428_v29  ;;  %v3527_v56 = vadd.f32 %v3486_v49, %v3485_v12 }
 0xa21   :  { %v3406_v59 = vpop.xlane.xlu0 %3405 }
 0xa22   :  { %v3429_v15 = vmul.f32 0.00390625, %v3406_v59  ;;  %3528 = vadd.xlane.f32.xlu0 %v3527_v56  ;;  %v3487_v53 = vmul.f32 %v9262_v61, %v9262_v61  ;;  %v3488_v46 = vmul.f32 %v9265_v28, %v9265_v28 }
 0xa24   :  { %v9272_v55 = vsub.f32 %v9105_v0, %v3429_v15  ;;  %v9275_v34 = vsub.f32 %v9107_v60, %v3429_v15  ;;  %v3530_v38 = vadd.f32 %v3488_v46, %v3487_v53 }
 0xa25   :  { %v3409_v62 = vpop.xlane.xlu1 %3408 }
 0xa26   :  { %v3430_v10 = vmul.f32 0.00390625, %v3409_v62  ;;  %3531 = vadd.xlane.f32.xlu1 %v3530_v38  ;;  %v3489_v19 = vmul.f32 %v9272_v55, %v9272_v55  ;;  %v3490_v43 = vmul.f32 %v9275_v34, %v9275_v34 }
 0xa28   :  { %v9282_v25 = vsub.f32 %v9120_v35, %v3430_v10  ;;  %v9285_v44 = vsub.f32 %v9123_v40, %v3430_v10  ;;  %v3533_v0 = vadd.f32 %v3490_v43, %v3489_v19 }
 0xa29   :  { %v3412_v48 = vpop.xlane.xlu0 %3411 }
 0xa2a   :  { %v3431_v60 = vmul.f32 0.00390625, %v3412_v48  ;;  %3534 = vadd.xlane.f32.xlu0 %v3533_v0  ;;  %v3491_v54 = vmul.f32 %v9282_v25, %v9282_v25  ;;  %v3492_v52 = vmul.f32 %v9285_v44, %v9285_v44 }
 0xa2c   :  { %v9292_v30 = vsub.f32 %v9133_v32, %v3431_v60  ;;  %v9295_v14 = vsub.f32 %v9139_v63, %v3431_v60  ;;  %v3536_v35 = vadd.f32 %v3492_v52, %v3491_v54 }
 0xa2d   :  { %v3415_v11 = vpop.xlane.xlu1 %3414  ;;  %v3499_v40 = vpop.xlane.xlu0 %3498 }
 0xa2e   :  { %v3432_v29 = vmul.f32 0.00390625, %v3415_v11  ;;  %v3545_v12 = vmul.f32 0.00390625, %v3499_v40  ;;  %3537 = vadd.xlane.f32.xlu1 %v3536_v35  ;;  %v3493_v49 = vmul.f32 %v9292_v30, %v9292_v30  ;;  %v3494_v56 = vmul.f32 %v9295_v14, %v9295_v14 }
 0xa30   :  { %v9302_v59 = vsub.f32 %v9165_v8, %v3432_v29  ;;  %v9305_v32 = vsub.f32 %v9167_v41, %v3432_v29  ;;  %v3561_v63 = vadd.f32 1e-05, %v3545_v12  ;;  %v3539_v15 = vadd.f32 %v3494_v56, %v3493_v49  ;;  %v109_v56 = vld [vmem:[#allocation13 + $0x12] sm:$0x3] }
 0xa31   :  { %v3502_v53 = vpop.xlane.xlu1 %3501  ;;  %v3505_v46 = vpop.xlane.xlu0 %3504 }
 0xa32   :  { %8252 = vrsqrt.f32 %v3561_v63  ;;  %v3546_v38 = vmul.f32 0.00390625, %v3502_v53  ;;  %v3547_v62 = vmul.f32 0.00390625, %v3505_v46  ;;  %3540 = vadd.xlane.f32.xlu0 %v3539_v15  ;;  %v3495_v10 = vmul.f32 %v9302_v59, %v9302_v59 }
 0xa33   :  { %v3496_v19 = vmul.f32 %v9305_v32, %v9305_v32 }
 0xa34   :  { %v3562_v43 = vadd.f32 1e-05, %v3546_v38  ;;  %v3563_v8 = vadd.f32 1e-05, %v3547_v62  ;;  %v9312_v38 = vrot.slane %v109_v56, %v8650_v33  ;;  %v9315_v62 = vrot.slane %v109_v56, %v8653_v36 }
 0xa35   :  { %v3508_v0 = vpop.xlane.xlu1 %3507  ;;  %v3511_v48 = vpop.xlane.xlu0 %3510  ;;  %v3542_v41 = vadd.f32 %v3496_v19, %v3495_v10 }
 0xa36   :  { %8254 = vrsqrt.f32 %v3562_v43  ;;  %v3548_v60 = vmul.f32 0.00390625, %v3508_v0  ;;  %v3549_v54 = vmul.f32 0.00390625, %v3511_v48  ;;  %v110_v43 = vld [vmem:[#allocation13 + $0x14] sm:$0x3] }
 0xa37   :  { %8256 = vrsqrt.f32 %v3563_v8  ;;  %3543 = vadd.xlane.f32.xlu1 %v3542_v41  ;;  %v9321_v41 = vrot.slane %v110_v43, %v8650_v33 }
 0xa38   :  { %v3564_v52 = vadd.f32 1e-05, %v3548_v60  ;;  %v3565_v35 = vadd.f32 1e-05, %v3549_v54  ;;  %v9324_v60 = vrot.slane %v110_v43, %v8653_v36 }
 0xa39   :  { %v3514_v11 = vpop.xlane.xlu1 %3513  ;;  %v3517_v40 = vpop.xlane.xlu0 %3516 }
 0xa3a   :  { %8258 = vrsqrt.f32 %v3564_v52  ;;  %v3550_v29 = vmul.f32 0.00390625, %v3514_v11  ;;  %v3551_v12 = vmul.f32 0.00390625, %v3517_v40 }
 0xa3b   :  { %8260 = vrsqrt.f32 %v3565_v35 }
 0xa3c   :  { %v3566_v49 = vadd.f32 1e-05, %v3550_v29  ;;  %v3567_v63 = vadd.f32 1e-05, %v3551_v12 }
 0xa3d   :  { %v3520_v15 = vpop.xlane.xlu1 %3519 }
 0xa3e   :  { %8262 = vrsqrt.f32 %v3566_v49  ;;  %v3552_v53 = vmul.f32 0.00390625, %v3520_v15 }
 0xa3f   :  { %v8253_v46 = vpop.eup %8252  ;;  %8264 = vrsqrt.f32 %v3567_v63 }
 0xa40   :  { %v3593_v10 = vmul.f32 %v8253_v46, %v9097_v45  ;;  %v3568_v19 = vadd.f32 1e-05, %v3552_v53  ;;  %v3594_v8 = vmul.f32 %v8253_v46, %v9100_v22  ;;  %v3777_v53 = vld [vmem:[#allocation10 + $0x190] sm:$0xff] }
 0xa41   :  { %v3781_v46 = vld [vmem:[#allocation10 + $0x1b0] sm:$0xff] }
 0xa42   :  { %8266 = vrsqrt.f32 %v3568_v19  ;;  %v3637_v48 = vmul.f32 %v9315_v62, %v3594_v8  ;;  %v3636_v54 = vmul.f32 %v9312_v38, %v3593_v10 }
 0xa43   :  { %v8255_v0 = vpop.eup %8254 }
 0xa44   :  { %v8257_v52 = vpop.eup %8256  ;;  %v3595_v45 = vmul.f32 %v8255_v0, %v9118_v31  ;;  %v3596_v35 = vmul.f32 %v8255_v0, %v9126_v23  ;;  %v9333_v12 = vadd.f32 %v9324_v60, %v3637_v48  ;;  %v9336_v49 = vadd.f32 %v9321_v41, %v3636_v54  ;;  %v3778_v48 = vld [vmem:[#allocation10 + $0x198] sm:$0xff] }
 0xa45   :  { %v3598_v22 = vmul.f32 %v8257_v52, %v9146_v13  ;;  %v3597_v10 = vmul.f32 %v8257_v52, %v9143_v47 }
 0xa46   :  { %v3639_v11 = vmul.f32 %v9315_v62, %v3596_v35  ;;  %v3638_v40 = vmul.f32 %v9312_v38, %v3595_v45  ;;  %v7178_v45 = vcombine.high %v3777_v53, %v3781_v46 }
 0xa47   :  { %v8259_v29 = vpop.eup %8258  ;;  %v3641_v56 = vmul.f32 %v9315_v62, %v3598_v22  ;;  %v3769_v22 = vld [vmem:[#allocation10 + $0x150] sm:$0xff] }
 0xa48   :  { %v8261_v63 = vpop.eup %8260  ;;  %v9340_v31 = vadd.f32 %v9324_v60, %v3639_v11  ;;  %v9343_v23 = vadd.f32 %v9321_v41, %v3638_v40  ;;  %v3600_v13 = vmul.f32 %v8259_v29, %v9157_v9  ;;  %v3599_v15 = vmul.f32 %v8259_v29, %v9151_v7  ;;  %v3782_v9 = vld [vmem:[#allocation10 + $0x1b8] sm:$0xff] }
 0xa49   :  { %v3602_v0 = vmul.f32 %v8261_v63, %v9163_v20  ;;  %v9362_v47 = vadd.f32 %v9324_v60, %v3641_v56  ;;  %v3773_v20 = vld [vmem:[#allocation10 + $0x170] sm:$0xff]  ;;  %v3640_v11 = vmul.f32 %v9312_v38, %v3597_v10  ;;  %v7177_v40 = vcombine.low %v3777_v53, %v3781_v46 }
 0xa4a   :  { %10476 = vst [vmem:[#allocation23_spill] sm:$0xff] %v9340_v31  ;;  %10477 = vst [vmem:[#allocation24_spill] sm:$0xff] %v9343_v23  ;;  %v9350_v19 = vpack.c.bf16 %v9340_v31, %v9333_v12  ;;  %v9354_v43 = vpack.c.bf16 %v9343_v23, %v9336_v49  ;;  %v3643_v8 = vmul.f32 %v9315_v62, %v3600_v13  ;;  %v3770_v13 = vld [vmem:[#allocation10 + $0x158] sm:$0xff] }
 0xa4b   :  { %v8263_v54 = vpop.eup %8262  ;;  %v3642_v7 = vmul.f32 %v9312_v38, %v3599_v15  ;;  %v7180_v29 = vcombine.high %v3778_v48, %v3782_v9  ;;  %v3774_v15 = vld [vmem:[#allocation10 + $0x178] sm:$0xff]  ;;  %v7179_v31 = vcombine.low %v3778_v48, %v3782_v9  ;;  %v10479_v10 = vcombine.low %v9219_v4, %v9225_v57  ;;  %v3765_v4 = vld [vmem:[#allocation10 + $0x130] sm:$0xff] }
 0xa4c   :  { %4568 = vmatprep.mubr.bf16.mxu0 %v9350_v19  ;;  %4681 = vmatprep.mubr.bf16.mxu1 %v9350_v19  ;;  %v9365_v52 = vadd.f32 %v9324_v60, %v3643_v8  ;;  %v3604_v35 = vmul.f32 %v8263_v54, %v9187_v37  ;;  %v8265_v21 = vpop.eup %8264  ;;  %v3645_v8 = vmul.f32 %v9315_v62, %v3602_v0  ;;  %v3761_v0 = vld [vmem:[#allocation10 + $0x110] sm:$0xff]  ;;  %v3762_v57 = vld [vmem:[#allocation10 + $0x118] sm:$0xff] }
 0xa4d   :  { %4569 = vmatmul.mubr.bf16.vlgmr.msra.gmra.mxu0 %v9354_v43  ;;  %4682 = vmatmul.mubr.bf16.vlgmr.msra.gmra.mxu1 %v9354_v43  ;;  %v9381_v53 = vadd.f32 %v9321_v41, %v3642_v7  ;;  %v3603_v46 = vmul.f32 %v8263_v54, %v9184_v1  ;;  %v9394_v48 = vadd.f32 %v9321_v41, %v3640_v11  ;;  %v3766_v9 = vld [vmem:[#allocation10 + $0x138] sm:$0xff] }
 0xa4e   :  { %10478 = vst [vmem:[#allocation25_spill] sm:$0xff] %v9365_v52  ;;  %v9373_v56 = vpack.c.bf16 %v9365_v52, %v9362_v47  ;;  %v3647_v37 = vmul.f32 %v9315_v62, %v3604_v35  ;;  %4763 = vmatpush1.bf16.msra.mxu0 %v7185_v50  ;;  %4876 = vmatpush1.bf16.msra.mxu1 %v10479_v10 }
 0xa4f   :  { %v8267_v23 = vpop.eup %8266  ;;  %4764 = vmatprep.subr.bf16.mxu0 %v7178_v45  ;;  %v7170_v52 = vcombine.high %v3769_v22, %v3773_v20  ;;  %v7172_v50 = vcombine.high %v3770_v13, %v3774_v15  ;;  %v3601_v1 = vmul.f32 %v8261_v63, %v9160_v24  ;;  %4877 = vmatprep.subr.bf16.mxu1 %v7180_v29 }
 0xa50   :  { %4578 = vmatprep.mubr.bf16.mxu0 %v9373_v56  ;;  %4691 = vmatprep.mubr.bf16.mxu1 %v9373_v56  ;;  %v9390_v5 = vadd.f32 %v9324_v60, %v3647_v37  ;;  %v3608_v16 = vmul.f32 %v8267_v23, %v9209_v3  ;;  %v9398_v54 = vadd.f32 %v9324_v60, %v3645_v8 }
 0xa51   :  { %v3606_v7 = vmul.f32 %v8265_v21, %v9194_v27  ;;  %v7169_v45 = vcombine.low %v3769_v22, %v3773_v20  ;;  %v9403_v3 = vpack.c.bf16 %v9381_v53, %v9394_v48  ;;  %v3646_v35 = vmul.f32 %v9312_v38, %v3603_v46  ;;  %v3757_v20 = vld [vmem:[#allocation10 + $0xf0] sm:$0xff] }
 0xa52   :  { %10480 = vst [vmem:[#allocation26_spill] sm:$0xff] %v9390_v5  ;;  %4765 = vmatpush1.bf16.msra.mxu0 %v7177_v40  ;;  %4878 = vmatpush1.bf16.msra.mxu1 %v7179_v31  ;;  %v7171_v24 = vcombine.low %v3770_v13, %v3774_v15  ;;  %v9408_v63 = vpack.c.bf16 %v9390_v5, %v9398_v54  ;;  %v3753_v40 = vld [vmem:[#allocation10 + $0xd0] sm:$0xff]  ;;  %v3754_v31 = vld [vmem:[#allocation10 + $0xd8] sm:$0xff] }
 0xa53   :  { %4766 = vmatprep.subr.bf16.mxu0 %v7170_v52  ;;  %v3651_v11 = vmul.f32 %v9315_v62, %v3608_v16  ;;  %4879 = vmatprep.subr.bf16.mxu1 %v7172_v50  ;;  %v7162_v29 = vcombine.high %v3761_v0, %v3765_v4  ;;  %v7164_v27 = vcombine.high %v3762_v57, %v3766_v9  ;;  %v3758_v52 = vld [vmem:[#allocation10 + $0xf8] sm:$0xff] }
 0xa54   :  { %v3644_v22 = vmul.f32 %v9312_v38, %v3601_v1  ;;  %v3649_v13 = vmul.f32 %v9315_v62, %v3606_v7  ;;  %v7161_v15 = vcombine.low %v3761_v0, %v3765_v4  ;;  %v9418_v8 = vadd.f32 %v9321_v41, %v3646_v35  ;;  %v3745_v1 = vld [vmem:[#allocation10 + $0x90] sm:$0xff]  ;;  %v3746_v7 = vld [vmem:[#allocation10 + $0x98] sm:$0xff] }
 0xa55   :  { %4579 = vmatmul.mubr.bf16.gmra.mxu0 %v9403_v3  ;;  %4692 = vmatmul.mubr.bf16.gmra.mxu1 %v9403_v3  ;;  %v3607_v37 = vmul.f32 %v8267_v23, %v9206_v58  ;;  %v7163_v46 = vcombine.low %v3762_v57, %v3766_v9  ;;  %v9422_v10 = vadd.f32 %v9324_v60, %v3651_v11  ;;  %v3749_v4 = vld [vmem:[#allocation10 + $0xb0] sm:$0xff]  ;;  %v3750_v35 = vld [vmem:[#allocation10 + $0xb8] sm:$0xff] }
 0xa56   :  { %4588 = vmatprep.mubr.bf16.mxu0 %v9408_v63  ;;  %4701 = vmatprep.mubr.bf16.mxu1 %v9408_v63  ;;  %v7154_v16 = vcombine.high %v3753_v40, %v3757_v20  ;;  %v7156_v50 = vcombine.high %v3754_v31, %v3758_v52  ;;  %v9425_v5 = vadd.f32 %v9321_v41, %v3644_v22  ;;  %v3737_v11 = vld [vmem:[#allocation10 + $0x50] sm:$0xff]  ;;  %v3742_v22 = vld [vmem:[#allocation10 + $0x78] sm:$0xff] }
 0xa57   :  { %4767 = vmatpush1.bf16.msra.mxu0 %v7169_v45  ;;  %4880 = vmatpush1.bf16.msra.mxu1 %v7171_v24  ;;  %10481 = vst [vmem:[#allocation27_spill] sm:$0xff] %v9422_v10  ;;  %v3605_v0 = vmul.f32 %v8265_v21, %v9191_v17  ;;  %v9429_v58 = vadd.f32 %v9324_v60, %v3649_v13 }
 0xa58   :  { %4768 = vmatprep.subr.bf16.mxu0 %v7162_v29  ;;  %4881 = vmatprep.subr.bf16.mxu1 %v7164_v27  ;;  %v7153_v23 = vcombine.low %v3753_v40, %v3757_v20  ;;  %v9433_v57 = vpack.c.bf16 %v9418_v8, %v9425_v5  ;;  %v3650_v9 = vmul.f32 %v9312_v38, %v3607_v37  ;;  %v3741_v27 = vld [vmem:[#allocation10 + $0x70] sm:$0xff]  ;;  %v3738_v40 = vld [vmem:[#allocation10 + $0x58] sm:$0xff] }
 0xa59   :  { %10482 = vst [vmem:[#allocation28_spill] sm:$0xff] %v9429_v58  ;;  %v7155_v45 = vcombine.low %v3754_v31, %v3758_v52  ;;  %v9438_v24 = vpack.c.bf16 %v9422_v10, %v9429_v58  ;;  %v7146_v17 = vcombine.high %v3745_v1, %v3749_v4  ;;  %v7148_v21 = vcombine.high %v3746_v7, %v3750_v35  ;;  %v3729_v37 = vld [vmem:[#allocation10 + $0x10] sm:$0xff] }
 0xa5a   :  { %v3648_v29 = vmul.f32 %v9312_v38, %v3605_v0  ;;  %v9446_v20 = vadd.f32 %v9321_v41, %v3650_v9  ;;  %v7145_v31 = vcombine.low %v3745_v1, %v3749_v4  ;;  %v7147_v52 = vcombine.low %v3746_v7, %v3750_v35  ;;  %v3734_v0 = vld [vmem:[#allocation10 + $0x38] sm:$0xff]  ;;  %v3849_v35 = vld [vmem:[#allocation10 + $0x3d0] sm:$0xff] }
 0xa5b   :  { %4769 = vmatpush1.bf16.msra.mxu0 %v7161_v15  ;;  %4882 = vmatpush1.bf16.msra.mxu1 %v7163_v46  ;;  %v7138_v13 = vcombine.high %v3737_v11, %v3741_v27  ;;  %v7140_v15 = vcombine.high %v3738_v40, %v3742_v22  ;;  %v7139_v1 = vcombine.low %v3738_v40, %v3742_v22  ;;  %v3853_v9 = vld [vmem:[#allocation10 + $0x3f0] sm:$0xff] }
 0xa5c   :  { %4770 = vmatprep.subr.bf16.mxu0 %v7154_v16  ;;  %4883 = vmatprep.subr.bf16.mxu1 %v7156_v50  ;;  %10483 = vst [vmem:[#allocation29_spill] sm:$0xff] %v9446_v20  ;;  %v9449_v46 = vadd.f32 %v9321_v41, %v3648_v29  ;;  %v3733_v16 = vld [vmem:[#allocation10 + $0x30] sm:$0xff]  ;;  %v3730_v50 = vld [vmem:[#allocation10 + $0x18] sm:$0xff] }
 0xa5d   :  { %4589 = vmatmul.mubr.bf16.gmra.mxu0 %v9433_v57  ;;  %4702 = vmatmul.mubr.bf16.gmra.mxu1 %v9433_v57  ;;  %v7130_v4 = vcombine.high %v3729_v37, %v3733_v16  ;;  %v7132_v7 = vcombine.high %v3730_v50, %v3734_v0  ;;  %v7131_v29 = vcombine.low %v3730_v50, %v3734_v0  ;;  %v3841_v40 = vld [vmem:[#allocation10 + $0x390] sm:$0xff] }
 0xa5e   :  { %4598 = vmatprep.mubr.bf16.mxu0 %v9438_v24  ;;  %4711 = vmatprep.mubr.bf16.mxu1 %v9438_v24  ;;  %v9453_v10 = vpack.c.bf16 %v9446_v20, %v9449_v46  ;;  %v3845_v22 = vld [vmem:[#allocation10 + $0x3b0] sm:$0xff] }
 0xa5f   :  { %4771 = vmatpush1.bf16.msra.mxu0 %v7153_v23  ;;  %4884 = vmatpush1.bf16.msra.mxu1 %v7155_v45  ;;  %v7137_v23 = vcombine.low %v3737_v11, %v3741_v27  ;;  %v3850_v45 = vld [vmem:[#allocation10 + $0x3d8] sm:$0xff]  ;;  %v7250_v11 = vcombine.high %v3849_v35, %v3853_v9  ;;  %v7242_v20 = vcombine.high %v3841_v40, %v3845_v22 }
 0xa60   :  { %4772 = vmatprep.subr.bf16.mxu0 %v7146_v17  ;;  %4885 = vmatprep.subr.bf16.mxu1 %v7148_v21  ;;  %v3854_v17 = vld [vmem:[#allocation10 + $0x3f8] sm:$0xff]  ;;  %v7129_v21 = vcombine.low %v3729_v37, %v3733_v16  ;;  %v7241_v50 = vcombine.low %v3841_v40, %v3845_v22 }
 0xa61   :  { %v7252_v27 = vcombine.high %v3850_v45, %v3854_v17  ;;  %v3834_v37 = vld [vmem:[#allocation10 + $0x358] sm:$0xff] }
 0xa62   :  { %v3838_v16 = vld [vmem:[#allocation10 + $0x378] sm:$0xff] }
 0xa63   :  { %4773 = vmatpush1.bf16.msra.mxu0 %v7145_v31  ;;  %4886 = vmatpush1.bf16.msra.mxu1 %v7147_v52  ;;  %v3842_v31 = vld [vmem:[#allocation10 + $0x398] sm:$0xff] }
 0xa64   :  { %4774 = vmatprep.subr.bf16.mxu0 %v7138_v13  ;;  %4887 = vmatprep.subr.bf16.mxu1 %v7140_v15  ;;  %v3846_v52 = vld [vmem:[#allocation10 + $0x3b8] sm:$0xff]  ;;  %v7249_v13 = vcombine.low %v3849_v35, %v3853_v9  ;;  %v7251_v15 = vcombine.low %v3850_v45, %v3854_v17  ;;  %v7235_v17 = vcombine.low %v3834_v37, %v3838_v16 }
 0xa65   :  { %4599 = vmatmul.mubr.bf16.gmra.mxu0 %v9453_v10  ;;  %4712 = vmatmul.mubr.bf16.gmra.mxu1 %v9453_v10  ;;  %v7244_v58 = vcombine.high %v3842_v31, %v3846_v52  ;;  %v7243_v0 = vcombine.low %v3842_v31, %v3846_v52  ;;  %v3826_v35 = vld [vmem:[#allocation10 + $0x318] sm:$0xff] }
 0xa66   :  { %v3830_v9 = vld [vmem:[#allocation10 + $0x338] sm:$0xff] }
 0xa67   :  { %4775 = vmatpush1.bf16.msra.mxu0 %v7137_v23  ;;  %4888 = vmatpush1.bf16.msra.mxu1 %v7139_v1  ;;  %v3833_v23 = vld [vmem:[#allocation10 + $0x350] sm:$0xff]  ;;  %v3818_v40 = vld [vmem:[#allocation10 + $0x2d8] sm:$0xff] }
 0xa68   :  { %4776 = vmatprep.subr.bf16.mxu0 %v7130_v4  ;;  %4889 = vmatprep.subr.bf16.mxu1 %v7132_v7  ;;  %v3837_v1 = vld [vmem:[#allocation10 + $0x370] sm:$0xff]  ;;  %v7236_v7 = vcombine.high %v3834_v37, %v3838_v16  ;;  %v3822_v22 = vld [vmem:[#allocation10 + $0x2f8] sm:$0xff] }
 0xa69   :  { %v7234_v4 = vcombine.high %v3833_v23, %v3837_v1  ;;  %v7233_v45 = vcombine.low %v3833_v23, %v3837_v1  ;;  %v7220_v52 = vcombine.high %v3818_v40, %v3822_v22  ;;  %v3810_v23 = vld [vmem:[#allocation10 + $0x298] sm:$0xff]  ;;  %v7219_v16 = vcombine.low %v3818_v40, %v3822_v22 }
 0xa6a   :  { %v3814_v1 = vld [vmem:[#allocation10 + $0x2b8] sm:$0xff] }
 0xa6b   :  { %4777 = vmatpush1.bf16.msra.mxu0 %v7129_v21  ;;  %4890 = vmatpush1.bf16.msra.mxu1 %v7131_v29  ;;  %v3825_v21 = vld [vmem:[#allocation10 + $0x310] sm:$0xff] }
 0xa6c   :  { %4778 = vmatprep.subr.bf16.mxu0 %v7250_v11  ;;  %4891 = vmatprep.subr.bf16.mxu1 %v7252_v27  ;;  %v3829_v29 = vld [vmem:[#allocation10 + $0x330] sm:$0xff]  ;;  %v7228_v27 = vcombine.high %v3826_v35, %v3830_v9 }
 0xa6d   :  { %v7226_v11 = vcombine.high %v3825_v21, %v3829_v29 }
 0xa6f   :  { %4779 = vmatpush2.bf16.msra.mxu0 %v7249_v13  ;;  %4892 = vmatpush2.bf16.msra.mxu1 %v7251_v15  ;;  %v3817_v13 = vld [vmem:[#allocation10 + $0x2d0] sm:$0xff] }
 0xa70   :  { %4780 = vmatprep.subr.bf16.mxu0 %v7242_v20  ;;  %4893 = vmatprep.subr.bf16.mxu1 %v7244_v58  ;;  %v3821_v15 = vld [vmem:[#allocation10 + $0x2f0] sm:$0xff]  ;;  %v7225_v58 = vcombine.low %v3825_v21, %v3829_v29  ;;  %v7227_v20 = vcombine.low %v3826_v35, %v3830_v9  ;;  %v3802_v21 = vld [vmem:[#allocation10 + $0x258] sm:$0xff]  ;;  %v7211_v9 = vcombine.low %v3810_v23, %v3814_v1 }
 0xa71   :  { %v7218_v31 = vcombine.high %v3817_v13, %v3821_v15  ;;  %v7217_v37 = vcombine.low %v3817_v13, %v3821_v15  ;;  %v3806_v29 = vld [vmem:[#allocation10 + $0x278] sm:$0xff] }
 0xa72   :  { %v3794_v13 = vld [vmem:[#allocation10 + $0x218] sm:$0xff]  ;;  %v7203_v22 = vcombine.low %v3802_v21, %v3806_v29 }
 0xa73   :  { %4781 = vmatpush2.bf16.msra.mxu0 %v7241_v50  ;;  %4894 = vmatpush2.bf16.msra.mxu1 %v7243_v0  ;;  %v3809_v50 = vld [vmem:[#allocation10 + $0x290] sm:$0xff]  ;;  %v3798_v15 = vld [vmem:[#allocation10 + $0x238] sm:$0xff] }
 0xa74   :  { %4782 = vmatprep.subr.bf16.mxu0 %v7234_v4  ;;  %4895 = vmatprep.subr.bf16.mxu1 %v7236_v7  ;;  %v3813_v0 = vld [vmem:[#allocation10 + $0x2b0] sm:$0xff]  ;;  %v7212_v7 = vcombine.high %v3810_v23, %v3814_v1 }
 0xa75   :  { %v7210_v4 = vcombine.high %v3809_v50, %v3813_v0  ;;  %v7209_v35 = vcombine.low %v3809_v50, %v3813_v0  ;;  %v7195_v0 = vcombine.low %v3794_v13, %v3798_v15  ;;  %v7934_v23 = vld [vmem:[#allocation12 + $0x74] ss:$8 sps:$4 sm:$0xff]  }
 0xa76   :  { %v7937_v1 = vld [vmem:[#allocation12 + $0x174] ss:$8 sps:$4 sm:$0xff]  }
 0xa77   :  { %4783 = vmatpush2.bf16.msra.mxu0 %v7233_v45  ;;  %4896 = vmatpush2.bf16.msra.mxu1 %v7235_v17  ;;  %v3801_v45 = vld [vmem:[#allocation10 + $0x250] sm:$0xff] }
 0xa78   :  { %4784 = vmatprep.subr.bf16.mxu0 %v7226_v11  ;;  %4897 = vmatprep.subr.bf16.mxu1 %v7228_v27  ;;  %v3805_v17 = vld [vmem:[#allocation10 + $0x270] sm:$0xff]  ;;  %v7204_v27 = vcombine.high %v3802_v21, %v3806_v29 }
 0xa79   :  { %v7202_v11 = vcombine.high %v3801_v45, %v3805_v17  ;;  %v7201_v40 = vcombine.low %v3801_v45, %v3805_v17 }
 0xa7b   :  { %4785 = vmatpush2.bf16.msra.mxu0 %v7225_v58  ;;  %4898 = vmatpush2.bf16.msra.mxu1 %v7227_v20  ;;  %v3793_v58 = vld [vmem:[#allocation10 + $0x210] sm:$0xff] }
 0xa7c   :  { %4786 = vmatprep.subr.bf16.mxu0 %v7218_v31  ;;  %4899 = vmatprep.subr.bf16.mxu1 %v7220_v52  ;;  %v3797_v20 = vld [vmem:[#allocation10 + $0x230] sm:$0xff]  ;;  %v7196_v52 = vcombine.high %v3794_v13, %v3798_v15 }
 0xa7d   :  { %v7194_v31 = vcombine.high %v3793_v58, %v3797_v20  ;;  %v7193_v50 = vcombine.low %v3793_v58, %v3797_v20 }
 0xa7f   :  { %4787 = vmatpush2.bf16.msra.mxu0 %v7217_v37  ;;  %4900 = vmatpush2.bf16.msra.mxu1 %v7219_v16 }
 0xa80   :  { %4788 = vmatprep.subr.bf16.mxu0 %v7210_v4  ;;  %4901 = vmatprep.subr.bf16.mxu1 %v7212_v7 }
 0xa83   :  { %4789 = vmatpush2.bf16.msra.mxu0 %v7209_v35  ;;  %4902 = vmatpush2.bf16.msra.mxu1 %v7211_v9 }
 0xa84   :  { %4790 = vmatprep.subr.bf16.mxu0 %v7202_v11  ;;  %4903 = vmatprep.subr.bf16.mxu1 %v7204_v27 }
 0xa87   :  { %4791 = vmatpush2.bf16.msra.mxu0 %v7201_v40  ;;  %4904 = vmatpush2.bf16.msra.mxu1 %v7203_v22 }
 0xa88   :  { %4792 = vmatprep.subr.bf16.mxu0 %v7194_v31  ;;  %4905 = vmatprep.subr.bf16.mxu1 %v7196_v52 }
 0xa8b   :  { %4793 = vmatpush2.bf16.msra.mxu0 %v7193_v50  ;;  %4906 = vmatpush2.bf16.msra.mxu1 %v7195_v0 }
 0xa8c   :  { %5959 = vmatprep.subr.bf16.mxu0 %v7934_v23  ;;  %6072 = vmatprep.subr.bf16.mxu1 %v7937_v1 }
 0xaa3   :  { %v3523_v37 = vpop.xlane.xlu0 %3522 }
 0xaa4   :  { %v3553_v16 = vmul.f32 0.00390625, %v3523_v37 }
 0xaa6   :  { %v3569_v4 = vadd.f32 1e-05, %v3553_v16 }
 0xaa7   :  { %v3526_v7 = vpop.xlane.xlu1 %3525 }
 0xaa8   :  { %8268 = vrsqrt.f32 %v3569_v4  ;;  %v3554_v45 = vmul.f32 0.00390625, %v3526_v7 }
 0xaaa   :  { %v3570_v17 = vadd.f32 1e-05, %v3554_v45 }
 0xaab   :  { %v3529_v21 = vpop.xlane.xlu0 %3528 }
 0xaac   :  { %8270 = vrsqrt.f32 %v3570_v17  ;;  %v3555_v29 = vmul.f32 0.00390625, %v3529_v21 }
 0xaae   :  { %v3571_v35 = vadd.f32 1e-05, %v3555_v29 }
 0xaaf   :  { %v3532_v9 = vpop.xlane.xlu1 %3531 }
 0xab0   :  { %8272 = vrsqrt.f32 %v3571_v35  ;;  %v3556_v11 = vmul.f32 0.00390625, %v3532_v9 }
 0xab2   :  { %v3572_v27 = vadd.f32 1e-05, %v3556_v11 }
 0xab3   :  { %v3535_v58 = vpop.xlane.xlu0 %3534 }
 0xab4   :  { %8274 = vrsqrt.f32 %v3572_v27  ;;  %v3557_v20 = vmul.f32 0.00390625, %v3535_v58 }
 0xab5   :  { %v8269_v13 = vpop.eup %8268 }
 0xab6   :  { %v3573_v15 = vadd.f32 1e-05, %v3557_v20  ;;  %v3610_v40 = vmul.f32 %v8269_v13, %v9235_v18  ;;  %v3609_v22 = vmul.f32 %v8269_v13, %v9232_v51 }
 0xab7   :  { %v3538_v31 = vpop.xlane.xlu1 %3537 }
 0xab8   :  { %8276 = vrsqrt.f32 %v3573_v15  ;;  %v3558_v52 = vmul.f32 0.00390625, %v3538_v31  ;;  %v3653_v0 = vmul.f32 %v9315_v62, %v3610_v40  ;;  %v3652_v23 = vmul.f32 %v9312_v38, %v3609_v22 }
 0xab9   :  { %v8271_v50 = vpop.eup %8270 }
 0xaba   :  { %v3574_v1 = vadd.f32 1e-05, %v3558_v52  ;;  %v3612_v37 = vmul.f32 %v8271_v50, %v9245_v39  ;;  %v3611_v16 = vmul.f32 %v8271_v50, %v9242_v42  ;;  %v9466_v17 = vadd.f32 %v9324_v60, %v3653_v0 }
 0xabb   :  { %v3541_v4 = vpop.xlane.xlu0 %3540  ;;  %v9469_v21 = vadd.f32 %v9321_v41, %v3652_v23 }
 0xabc   :  { %8278 = vrsqrt.f32 %v3574_v1  ;;  %v3559_v7 = vmul.f32 0.00390625, %v3541_v4  ;;  %v3655_v18 = vmul.f32 %v9315_v62, %v3612_v37  ;;  %v3654_v51 = vmul.f32 %v9312_v38, %v3611_v16  ;;  %10484 = vst [vmem:[#allocation30_spill] sm:$0xff] %v9466_v17 }
 0xabd   :  { %v8273_v45 = vpop.eup %8272  ;;  %10485 = vst [vmem:[#allocation31_spill] sm:$0xff] %v9469_v21 }
 0xabe   :  { %v3575_v29 = vadd.f32 1e-05, %v3559_v7  ;;  %v9472_v35 = vadd.f32 %v9324_v60, %v3655_v18  ;;  %v9475_v42 = vadd.f32 %v9321_v41, %v3654_v51  ;;  %v3614_v39 = vmul.f32 %v8273_v45, %v9255_v6 }
 0xabf   :  { %v3613_v9 = vmul.f32 %v8273_v45, %v9252_v26 }
 0xac0   :  { %10486 = vst [vmem:[#allocation32_spill] sm:$0xff] %v9472_v35  ;;  %10487 = vst [vmem:[#allocation33_spill] sm:$0xff] %v9475_v42  ;;  %8280 = vrsqrt.f32 %v3575_v29  ;;  %v3544_v11 = vpop.xlane.xlu1 %3543  ;;  %v9481_v27 = vpack.c.bf16 %v9472_v35, %v9466_v17  ;;  %v9485_v58 = vpack.c.bf16 %v9475_v42, %v9469_v21  ;;  %v3657_v15 = vmul.f32 %v9315_v62, %v3614_v39 }
 0xac1   :  { %v8275_v20 = vpop.eup %8274  ;;  %v3560_v13 = vmul.f32 0.00390625, %v3544_v11  ;;  %v3656_v40 = vmul.f32 %v9312_v38, %v3613_v9 }
 0xac2   :  { %4608 = vmatprep.mubr.bf16.mxu0 %v9481_v27  ;;  %4721 = vmatprep.mubr.bf16.mxu1 %v9481_v27  ;;  %v3616_v26 = vmul.f32 %v8275_v20, %v9265_v28  ;;  %v3615_v6 = vmul.f32 %v8275_v20, %v9262_v61  ;;  %v9498_v0 = vadd.f32 %v9324_v60, %v3657_v15 }
 0xac3   :  { %v3576_v22 = vadd.f32 1e-05, %v3560_v13  ;;  %4609 = vmatmul.mubr.bf16.gmra.mxu0 %v9485_v58  ;;  %4722 = vmatmul.mubr.bf16.gmra.mxu1 %v9485_v58  ;;  %v9501_v23 = vadd.f32 %v9321_v41, %v3656_v40 }
 0xac4   :  { %v3659_v31 = vmul.f32 %v9315_v62, %v3616_v26  ;;  %v3658_v52 = vmul.f32 %v9312_v38, %v3615_v6  ;;  %10488 = vst [vmem:[#allocation34_spill] sm:$0xff] %v9498_v0 }
 0xac5   :  { %v8277_v50 = vpop.eup %8276  ;;  %8282 = vrsqrt.f32 %v3576_v22  ;;  %10489 = vst [vmem:[#allocation35_spill] sm:$0xff] %v9501_v23 }
 0xac6   :  { %v9504_v28 = vadd.f32 %v9324_v60, %v3659_v31  ;;  %v9507_v61 = vadd.f32 %v9321_v41, %v3658_v52  ;;  %v3618_v1 = vmul.f32 %v8277_v50, %v9275_v34  ;;  %v3617_v37 = vmul.f32 %v8277_v50, %v9272_v55 }
 0xac8   :  { %10490 = vst [vmem:[#allocation36_spill] sm:$0xff] %v9504_v28  ;;  %10491 = vst [vmem:[#allocation37_spill] sm:$0xff] %v9507_v61  ;;  %v9513_v16 = vpack.c.bf16 %v9504_v28, %v9498_v0  ;;  %v9517_v4 = vpack.c.bf16 %v9507_v61, %v9501_v23  ;;  %v3661_v18 = vmul.f32 %v9315_v62, %v3618_v1 }
 0xac9   :  { %v8279_v7 = vpop.eup %8278  ;;  %v3660_v55 = vmul.f32 %v9312_v38, %v3617_v37 }
 0xaca   :  { %4618 = vmatprep.mubr.bf16.mxu0 %v9513_v16  ;;  %4731 = vmatprep.mubr.bf16.mxu1 %v9513_v16  ;;  %v3620_v51 = vmul.f32 %v8279_v7, %v9285_v44  ;;  %v3619_v34 = vmul.f32 %v8279_v7, %v9282_v25  ;;  %v9530_v9 = vadd.f32 %v9324_v60, %v3661_v18  ;;  %v7938_v18 = vld [vmem:[#allocation12 + $0x60] ss:$8 sps:$4 sm:$0xff]  }
 0xacb   :  { %4619 = vmatmul.mubr.bf16.gmra.mxu0 %v9517_v4  ;;  %4732 = vmatmul.mubr.bf16.gmra.mxu1 %v9517_v4  ;;  %v9536_v44 = vadd.f32 %v9321_v41, %v3660_v55  ;;  %v7944_v55 = vld [vmem:[#allocation12 + $0x50] ss:$8 sps:$4 sm:$0xff]  }
 0xacc   :  { %v3663_v45 = vmul.f32 %v9315_v62, %v3620_v51  ;;  %v3662_v29 = vmul.f32 %v9312_v38, %v3619_v34  ;;  %10492 = vst [vmem:[#allocation38_spill] sm:$0xff] %v9530_v9  ;;  %v7941_v51 = vld [vmem:[#allocation12 + $0x160] ss:$8 sps:$4 sm:$0xff]   ;;  %v7946_v34 = vld [vmem:[#allocation12 + $0x54] ss:$8 sps:$4 sm:$0xff]  }
 0xacd   :  { %v8281_v39 = vpop.eup %8280  ;;  %10494 = vst [vmem:[#allocation40_spill] sm:$0xff] %v9536_v44 }
 0xace   :  { %v9533_v11 = vadd.f32 %v9324_v60, %v3663_v45  ;;  %v9539_v25 = vadd.f32 %v9321_v41, %v3662_v29  ;;  %v3622_v20 = vmul.f32 %v8281_v39, %v9295_v14  ;;  %v3621_v13 = vmul.f32 %v8281_v39, %v9292_v30  ;;  %v7947_v45 = vld [vmem:[#allocation12 + $0x150] ss:$8 sps:$4 sm:$0xff]   ;;  %v7952_v29 = vld [vmem:[#allocation12 + $0x44] ss:$8 sps:$4 sm:$0xff]   ;;  %v7953_v39 = vld [vmem:[#allocation12 + $0x140] ss:$8 sps:$4 sm:$0xff]  }
 0xad0   :  { %10493 = vst [vmem:[#allocation39_spill] sm:$0xff] %v9533_v11  ;;  %10495 = vst [vmem:[#allocation41_spill] sm:$0xff] %v9539_v25  ;;  %v9545_v15 = vpack.c.bf16 %v9533_v11, %v9530_v9  ;;  %v9549_v40 = vpack.c.bf16 %v9539_v25, %v9536_v44  ;;  %v3665_v6 = vmul.f32 %v9315_v62, %v3622_v20  ;;  %v7958_v20 = vld [vmem:[#allocation12 + $0x34] ss:$8 sps:$4 sm:$0xff]  }
 0xad1   :  { %v3664_v22 = vmul.f32 %v9312_v38, %v3621_v13  ;;  %v7961_v13 = vld [vmem:[#allocation12 + $0x134] ss:$8 sps:$4 sm:$0xff]  }
 0xad2   :  { %v8283_v26 = vpop.eup %8282  ;;  %4628 = vmatprep.mubr.bf16.mxu0 %v9545_v15  ;;  %4741 = vmatprep.mubr.bf16.mxu1 %v9545_v15  ;;  %v9562_v50 = vadd.f32 %v9324_v60, %v3665_v6  ;;  %v7959_v6 = vld [vmem:[#allocation12 + $0x130] ss:$8 sps:$4 sm:$0xff]  }
 0xad3   :  { %4629 = vmatmul.mubr.bf16.gmra.mxu0 %v9549_v40  ;;  %4742 = vmatmul.mubr.bf16.gmra.mxu1 %v9549_v40  ;;  %v3624_v30 = vmul.f32 %v8283_v26, %v9305_v32  ;;  %v3623_v14 = vmul.f32 %v8283_v26, %v9302_v59  ;;  %v9568_v37 = vadd.f32 %v9321_v41, %v3664_v22  ;;  %v7956_v26 = vld [vmem:[#allocation12 + $0x30] ss:$8 sps:$4 sm:$0xff]   ;;  %v7970_v22 = vld [vmem:[#allocation12 + $0x14] ss:$8 sps:$4 sm:$0xff]  }
 0xad4   :  { %10496 = vst [vmem:[#allocation42_spill] sm:$0xff] %v9562_v50 }
 0xad5   :  { %v3667_v31 = vmul.f32 %v9315_v62, %v3624_v30  ;;  %v3666_v52 = vmul.f32 %v9312_v38, %v3623_v14  ;;  %10498 = vst [vmem:[#allocation44_spill] sm:$0xff] %v9568_v37  ;;  %v7932_v38 = vld [vmem:[#allocation12 + $0x70] ss:$8 sps:$4 sm:$0xff]   ;;  %v7964_v30 = vld [vmem:[#allocation12 + $0x24] ss:$8 sps:$4 sm:$0xff]  }
 0xad6   :  { %v7935_v62 = vld [vmem:[#allocation12 + $0x170] ss:$8 sps:$4 sm:$0xff]   ;;  %v7965_v14 = vld [vmem:[#allocation12 + $0x120] ss:$8 sps:$4 sm:$0xff]  }
 0xad7   :  { %v9565_v1 = vadd.f32 %v9324_v60, %v3667_v31  ;;  %v9571_v7 = vadd.f32 %v9321_v41, %v3666_v52  ;;  %v7940_v41 = vld [vmem:[#allocation12 + $0x64] ss:$8 sps:$4 sm:$0xff]   ;;  %v7973_v31 = vld [vmem:[#allocation12 + $0x114] ss:$8 sps:$4 sm:$0xff]   ;;  %v7968_v52 = vld [vmem:[#allocation12 + $0x10] ss:$8 sps:$4 sm:$0xff]  }
 0xad8   :  { %v7943_v60 = vld [vmem:[#allocation12 + $0x164] ss:$8 sps:$4 sm:$0xff]  }
 0xad9   :  { %10497 = vst [vmem:[#allocation43_spill] sm:$0xff] %v9565_v1  ;;  %10499 = vst [vmem:[#allocation45_spill] sm:$0xff] %v9571_v7  ;;  %v9575_v59 = vpack.c.bf16 %v9565_v1, %v9562_v50  ;;  %v9579_v32 = vpack.c.bf16 %v9571_v7, %v9568_v37 }
 0xadb   :  { %4638 = vmatprep.mubr.bf16.mxu0 %v9575_v59  ;;  %4751 = vmatprep.mubr.bf16.mxu1 %v9575_v59 }
 0xadc   :  { %4639 = vmatmul.mubr.bf16.gmra.mxu0 %v9579_v32  ;;  %4752 = vmatmul.mubr.bf16.gmra.mxu1 %v9579_v32 }
 0xadd   :  { %4794 = vmatprep.mubr.bf16.mxu0 %v9350_v19  ;;  %4907 = vmatprep.mubr.bf16.mxu1 %v9350_v19  ;;  %v7949_v19 = vld [vmem:[#allocation12 + $0x154] ss:$8 sps:$4 sm:$0xff]  }
 0xae4   :  { %4795 = vmatmul.mubr.bf16.vlgmr.msra.gmra.mxu0 %v9354_v43  ;;  %4908 = vmatmul.mubr.bf16.vlgmr.msra.gmra.mxu1 %v9354_v43  ;;  %v7955_v43 = vld [vmem:[#allocation12 + $0x144] ss:$8 sps:$4 sm:$0xff]  }
 0xae5   :  { %4804 = vmatprep.mubr.bf16.mxu0 %v9373_v56  ;;  %4917 = vmatprep.mubr.bf16.mxu1 %v9373_v56  ;;  %v7950_v56 = vld [vmem:[#allocation12 + $0x40] ss:$8 sps:$4 sm:$0xff]  }
 0xae6   :  { %5960 = vmatpush1.bf16.msra.mxu0 %v7932_v38  ;;  %6073 = vmatpush1.bf16.msra.mxu1 %v7935_v62  ;;  %v7971_v38 = vld [vmem:[#allocation12 + $0x110] ss:$8 sps:$4 sm:$0xff]   ;;  %v7976_v62 = vld [vmem:[#allocation12 + $0x4] ss:$8 sps:$4 sm:$0xff]  }
 0xae7   :  { %5961 = vmatprep.subr.bf16.mxu0 %v7940_v41  ;;  %6074 = vmatprep.subr.bf16.mxu1 %v7943_v60  ;;  %v7977_v41 = vld [vmem:[#allocation12 + $0x100] ss:$8 sps:$4 sm:$0xff]   ;;  %v7982_v60 = vld [vmem:[#allocation12 + $0xf4] ss:$8 sps:$4 sm:$0xff]  }
 0xaea   :  { %5962 = vmatpush1.bf16.msra.mxu0 %v7938_v18  ;;  %6075 = vmatpush1.bf16.msra.mxu1 %v7941_v51  ;;  %v7985_v18 = vld [vmem:[#allocation12 + $0x1f4] ss:$8 sps:$4 sm:$0xff]   ;;  %v7980_v51 = vld [vmem:[#allocation12 + $0xf0] ss:$8 sps:$4 sm:$0xff]  }
 0xaeb   :  { %5963 = vmatprep.subr.bf16.mxu0 %v7946_v34  ;;  %6076 = vmatprep.subr.bf16.mxu1 %v7949_v19  ;;  %v7983_v34 = vld [vmem:[#allocation12 + $0x1f0] ss:$8 sps:$4 sm:$0xff]   ;;  %v7988_v19 = vld [vmem:[#allocation12 + $0xe4] ss:$8 sps:$4 sm:$0xff]  }
 0xaec   :  { %4805 = vmatmul.mubr.bf16.gmra.mxu0 %v9403_v3  ;;  %4918 = vmatmul.mubr.bf16.gmra.mxu1 %v9403_v3  ;;  %v7967_v3 = vld [vmem:[#allocation12 + $0x124] ss:$8 sps:$4 sm:$0xff]  }
 0xaed   :  { %4814 = vmatprep.mubr.bf16.mxu0 %v9408_v63  ;;  %4927 = vmatprep.mubr.bf16.mxu1 %v9408_v63  ;;  %v7962_v63 = vld [vmem:[#allocation12 + $0x20] ss:$8 sps:$4 sm:$0xff]  }
 0xaee   :  { %5964 = vmatpush1.bf16.msra.mxu0 %v7944_v55  ;;  %6077 = vmatpush1.bf16.msra.mxu1 %v7947_v45  ;;  %v7989_v55 = vld [vmem:[#allocation12 + $0x1e0] ss:$8 sps:$4 sm:$0xff]   ;;  %v7994_v45 = vld [vmem:[#allocation12 + $0xd4] ss:$8 sps:$4 sm:$0xff]  }
 0xaef   :  { %5965 = vmatprep.subr.bf16.mxu0 %v7952_v29  ;;  %6078 = vmatprep.subr.bf16.mxu1 %v7955_v43  ;;  %v7997_v29 = vld [vmem:[#allocation12 + $0x1d4] ss:$8 sps:$4 sm:$0xff]   ;;  %v7992_v43 = vld [vmem:[#allocation12 + $0xd0] ss:$8 sps:$4 sm:$0xff]  }
 0xaf2   :  { %5966 = vmatpush1.bf16.msra.mxu0 %v7950_v56  ;;  %6079 = vmatpush1.bf16.msra.mxu1 %v7953_v39  ;;  %v7995_v56 = vld [vmem:[#allocation12 + $0x1d0] ss:$8 sps:$4 sm:$0xff]   ;;  %v8000_v39 = vld [vmem:[#allocation12 + $0xc4] ss:$8 sps:$4 sm:$0xff]  }
 0xaf3   :  { %5967 = vmatprep.subr.bf16.mxu0 %v7958_v20  ;;  %6080 = vmatprep.subr.bf16.mxu1 %v7961_v13  ;;  %v7998_v13 = vld [vmem:[#allocation12 + $0xc0] ss:$8 sps:$4 sm:$0xff]  }
 0xaf4   :  { %4815 = vmatmul.mubr.bf16.gmra.mxu0 %v9433_v57  ;;  %4928 = vmatmul.mubr.bf16.gmra.mxu1 %v9433_v57  ;;  %v7979_v57 = vld [vmem:[#allocation12 + $0x104] ss:$8 sps:$4 sm:$0xff]  }
 0xaf5   :  { %4824 = vmatprep.mubr.bf16.mxu0 %v9438_v24  ;;  %4937 = vmatprep.mubr.bf16.mxu1 %v9438_v24  ;;  %v7974_v24 = vld [vmem:[#allocation12] ss:$8 sps:$4 sm:$0xff]  }
 0xaf6   :  { %5968 = vmatpush1.bf16.msra.mxu0 %v7956_v26  ;;  %6081 = vmatpush1.bf16.msra.mxu1 %v7959_v6  ;;  %v8001_v26 = vld [vmem:[#allocation12 + $0x1c0] ss:$8 sps:$4 sm:$0xff]  }
 0xaf7   :  { %5969 = vmatprep.subr.bf16.mxu0 %v7964_v30  ;;  %6082 = vmatprep.subr.bf16.mxu1 %v7967_v3  ;;  %v8006_v3 = vld [vmem:[#allocation12 + $0xb4] ss:$8 sps:$4 sm:$0xff]  }
 0xafa   :  { %5970 = vmatpush1.bf16.msra.mxu0 %v7962_v63  ;;  %6083 = vmatpush1.bf16.msra.mxu1 %v7965_v14  ;;  %v8009_v63 = vld [vmem:[#allocation12 + $0x1b4] ss:$8 sps:$4 sm:$0xff]   ;;  %v9613_v14 = vld [vmem:[#allocation13 + $0x8] sm:$0xff] }
 0xafb   :  { %5971 = vmatprep.subr.bf16.mxu0 %v7970_v22  ;;  %6084 = vmatprep.subr.bf16.mxu1 %v7973_v31 }
 0xafc   :  { %4825 = vmatmul.mubr.bf16.gmra.mxu0 %v9453_v10  ;;  %4938 = vmatmul.mubr.bf16.gmra.mxu1 %v9453_v10  ;;  %v7991_v10 = vld [vmem:[#allocation12 + $0x1e4] ss:$8 sps:$4 sm:$0xff]  }
 0xafd   :  { %4834 = vmatprep.mubr.bf16.mxu0 %v9481_v27  ;;  %4947 = vmatprep.mubr.bf16.mxu1 %v9481_v27  ;;  %v7986_v27 = vld [vmem:[#allocation12 + $0xe0] ss:$8 sps:$4 sm:$0xff]  }
 0xafe   :  { %5972 = vmatpush1.bf16.msra.mxu0 %v7968_v52  ;;  %6085 = vmatpush1.bf16.msra.mxu1 %v7971_v38  ;;  %v8004_v38 = vld [vmem:[#allocation12 + $0xb0] ss:$8 sps:$4 sm:$0xff]  }
 0xaff   :  { %5973 = vmatprep.subr.bf16.mxu0 %v7976_v62  ;;  %6086 = vmatprep.subr.bf16.mxu1 %v7979_v57  ;;  %v8007_v62 = vld [vmem:[#allocation12 + $0x1b0] ss:$8 sps:$4 sm:$0xff]  }
 0xb02   :  { %5974 = vmatpush1.bf16.msra.mxu0 %v7974_v24  ;;  %6087 = vmatpush1.bf16.msra.mxu1 %v7977_v41  ;;  %v8012_v41 = vld [vmem:[#allocation12 + $0xa4] ss:$8 sps:$4 sm:$0xff]  }
 0xb03   :  { %5975 = vmatprep.subr.bf16.mxu0 %v7982_v60  ;;  %6088 = vmatprep.subr.bf16.mxu1 %v7985_v18  ;;  %v8015_v60 = vld [vmem:[#allocation12 + $0x1a4] ss:$8 sps:$4 sm:$0xff]  }
 0xb04   :  { %4835 = vmatmul.mubr.bf16.gmra.mxu0 %v9485_v58  ;;  %4948 = vmatmul.mubr.bf16.gmra.mxu1 %v9485_v58  ;;  %v8003_v58 = vld [vmem:[#allocation12 + $0x1c4] ss:$8 sps:$4 sm:$0xff]  }
 0xb05   :  { %4844 = vmatprep.mubr.bf16.mxu0 %v9513_v16  ;;  %4957 = vmatprep.mubr.bf16.mxu1 %v9513_v16 }
 0xb06   :  { %5976 = vmatpush2.bf16.msra.mxu0 %v7980_v51  ;;  %6089 = vmatpush2.bf16.msra.mxu1 %v7983_v34 }
 0xb07   :  { %5977 = vmatprep.subr.bf16.mxu0 %v7988_v19  ;;  %6090 = vmatprep.subr.bf16.mxu1 %v7991_v10 }
 0xb0a   :  { %5978 = vmatpush2.bf16.msra.mxu0 %v7986_v27  ;;  %6091 = vmatpush2.bf16.msra.mxu1 %v7989_v55  ;;  %v9638_v55 = vrot.slane %v9613_v14, %v8650_v33 }
 0xb0b   :  { %5979 = vmatprep.subr.bf16.mxu0 %v7994_v45  ;;  %6092 = vmatprep.subr.bf16.mxu1 %v7997_v29  ;;  %v8010_v45 = vld [vmem:[#allocation12 + $0xa0] ss:$8 sps:$4 sm:$0xff]  }
 0xb0c   :  { %4845 = vmatmul.mubr.bf16.gmra.mxu0 %v9517_v4  ;;  %4958 = vmatmul.mubr.bf16.gmra.mxu1 %v9517_v4  ;;  %v9617_v4 = vrot.slane %v9613_v14, %v8653_v36 }
 0xb0d   :  { %4854 = vmatprep.mubr.bf16.mxu0 %v9545_v15  ;;  %4967 = vmatprep.mubr.bf16.mxu1 %v9545_v15  ;;  %v4570_v16 = vpop.f32.mrf.mxu0  ;;  %v9611_v20 = vpop.f32.mrf.mxu1  ;;  %v10500_v15 = vsub.s32 3, %v8629_v2 }
 0xb0e   :  { %5980 = vmatpush2.bf16.msra.mxu0 %v7992_v43  ;;  %6093 = vmatpush2.bf16.msra.mxu1 %v7995_v56 }
 0xb0f   :  { %v4572_v6 = vpop.f32.mrf.mxu0  ;;  %v4685_v30 = vpop.f32.mrf.mxu1  ;;  %5981 = vmatprep.subr.bf16.mxu0 %v8000_v39  ;;  %6094 = vmatprep.subr.bf16.mxu1 %v8003_v58  ;;  %v9622_v22 = vrot.slane %v9613_v14, %v10500_v15  ;;  %v8018_v58 = vld [vmem:[#allocation12 + $0x94] ss:$8 sps:$4 sm:$0xff]  }
 0xb10   :  { %v4573_v34 = vadd.f32 %v4572_v6, %v9617_v4 }
 0xb11   :  { %v4574_v31 = vpop.f32.mrf.mxu0  ;;  %v4687_v52 = vpop.f32.mrf.mxu1  ;;  %v4686_v19 = vadd.f32 %v4685_v30, %v9622_v22 }
 0xb12   :  { %5982 = vmatpush2.bf16.msra.mxu0 %v7998_v13  ;;  %6095 = vmatpush2.bf16.msra.mxu1 %v8001_v26  ;;  %v10501_v13 = vsub.s32 2, %v8629_v2  ;;  %v4989_v6 = vmax.f32 %v4573_v34, 0.0  ;;  %v8024_v34 = vld [vmem:[#allocation12 + $0x84] ss:$8 sps:$4 sm:$0xff]  }
 0xb13   :  { %v4576_v57 = vpop.f32.mrf.mxu0  ;;  %v4689_v24 = vpop.f32.mrf.mxu1  ;;  %5983 = vmatprep.subr.bf16.mxu0 %v8006_v3  ;;  %6096 = vmatprep.subr.bf16.mxu1 %v8009_v63  ;;  %v4991_v30 = vmax.f32 %v4686_v19, 0.0  ;;  %v4575_v3 = vadd.f32 %v4574_v31, %v9638_v55  ;;  %v8027_v19 = vld [vmem:[#allocation12 + $0x184] ss:$8 sps:$4 sm:$0xff]  }
 0xb14   :  { %v4577_v18 = vadd.f32 %v4576_v57, %v9617_v4  ;;  %v4690_v51 = vadd.f32 %v4689_v24, %v9622_v22  ;;  %4855 = vmatmul.mubr.bf16.gmra.mxu0 %v9549_v40  ;;  %4968 = vmatmul.mubr.bf16.gmra.mxu1 %v9549_v40  ;;  %v8013_v40 = vld [vmem:[#allocation12 + $0x1a0] ss:$8 sps:$4 sm:$0xff]   ;;  %v9643_v26 = vrot.slane %v9613_v14, %v10501_v13  ;;  %v8019_v57 = vld [vmem:[#allocation12 + $0x190] ss:$8 sps:$4 sm:$0xff]  }
 0xb15   :  { %4864 = vmatprep.mubr.bf16.mxu0 %v9575_v59  ;;  %4977 = vmatprep.mubr.bf16.mxu1 %v9575_v59  ;;  %v9632_v10 = vpop.f32.mrf.mxu0  ;;  %v9634_v27 = vpop.f32.mrf.mxu1  ;;  %v8021_v59 = vld [vmem:[#allocation12 + $0x194] ss:$8 sps:$4 sm:$0xff]  }
 0xb16   :  { %5984 = vmatpush2.bf16.msra.mxu0 %v8004_v38  ;;  %6097 = vmatpush2.bf16.msra.mxu1 %v8007_v62  ;;  %v4997_v29 = vmax.f32 %v4577_v18, 0.0  ;;  %v4999_v43 = vmax.f32 %v4690_v51, 0.0  ;;  %v4571_v38 = vadd.f32 %v4570_v16, %v9638_v55  ;;  %v8016_v62 = vld [vmem:[#allocation12 + $0x90] ss:$8 sps:$4 sm:$0xff]   ;;  %v4688_v24 = vadd.f32 %v4687_v52, %v9643_v26 }
 0xb17   :  { %v4582_v56 = vpop.f32.mrf.mxu0  ;;  %v4695_v39 = vpop.f32.mrf.mxu1  ;;  %5985 = vmatprep.subr.bf16.mxu0 %v8012_v41  ;;  %6098 = vmatprep.subr.bf16.mxu1 %v8015_v60  ;;  %v4684_v16 = vadd.f32 %v9611_v20, %v9643_v26  ;;  %v4996_v52 = vmax.f32 %v4575_v3, 0.0  ;;  %v8030_v20 = vld [vmem:[#allocation12 + $0x274] ss:$8 sps:$4 sm:$0xff]  }
 0xb18   :  { %v5117_v18 = vpack.c.bf16 %v4997_v29, %v4989_v6  ;;  %v5119_v51 = vpack.c.bf16 %v4999_v43, %v4991_v30  ;;  %v4583_v29 = vadd.f32 %v4582_v56, %v9617_v4  ;;  %v4696_v43 = vadd.f32 %v4695_v39, %v9622_v22  ;;  %v8033_v3 = vld [vmem:[#allocation12 + $0x374] ss:$8 sps:$4 sm:$0xff]  }
 0xb19   :  { %v4584_v63 = vpop.f32.mrf.mxu0  ;;  %v4697_v15 = vpop.f32.mrf.mxu1  ;;  %v4988_v6 = vmax.f32 %v4571_v38, 0.0 }
 0xb1a   :  { %5986 = vmatpush2.bf16.msra.mxu0 %v8010_v45  ;;  %6099 = vmatpush2.bf16.msra.mxu1 %v8013_v40  ;;  %v5005_v50 = vmax.f32 %v4583_v29, 0.0  ;;  %v5007_v39 = vmax.f32 %v4696_v43, 0.0  ;;  %v8036_v43 = vld [vmem:[#allocation12 + $0x264] ss:$8 sps:$4 sm:$0xff]  }
 0xb1b   :  { %v4586_v41 = vpop.f32.mrf.mxu0  ;;  %v4699_v60 = vpop.f32.mrf.mxu1  ;;  %5987 = vmatprep.subr.bf16.mxu0 %v8018_v58  ;;  %6100 = vmatprep.subr.bf16.mxu1 %v8021_v59  ;;  %v8022_v58 = vld [vmem:[#allocation12 + $0x80] ss:$8 sps:$4 sm:$0xff]   ;;  %v5116_v1 = vpack.c.bf16 %v4996_v52, %v4988_v6 }
 0xb1c   :  { %v4587_v31 = vadd.f32 %v4586_v41, %v9617_v4  ;;  %v4700_v13 = vadd.f32 %v4699_v60, %v9622_v22  ;;  %4865 = vmatmul.mubr.bf16.gmra.mxu0 %v9579_v32  ;;  %4978 = vmatmul.mubr.bf16.gmra.mxu1 %v9579_v32  ;;  %v8025_v59 = vld [vmem:[#allocation12 + $0x180] ss:$8 sps:$4 sm:$0xff]   ;;  %v4998_v32 = vmax.f32 %v4688_v24, 0.0  ;;  %v4581_v24 = vadd.f32 %v9632_v10, %v9638_v55 }
 0xb1d   :  { %5991 = vmatprep.mubr.bf16.mxu0 %v5117_v18  ;;  %6104 = vmatprep.mubr.bf16.mxu1 %v5119_v51  ;;  %v9654_v45 = vpop.f32.mrf.mxu0  ;;  %v9656_v40 = vpop.f32.mrf.mxu1  ;;  %v4990_v51 = vmax.f32 %v4684_v16, 0.0  ;;  %v8031_v16 = vld [vmem:[#allocation12 + $0x370] ss:$8 sps:$4 sm:$0xff]  }
 0xb1e   :  { %5988 = vmatpush2.bf16.msra.mxu0 %v8016_v62  ;;  %6101 = vmatpush2.bf16.msra.mxu1 %v8019_v57  ;;  %v5013_v60 = vmax.f32 %v4587_v31, 0.0  ;;  %v5015_v18 = vmax.f32 %v4700_v13, 0.0  ;;  %v4585_v62 = vadd.f32 %v4584_v63, %v9638_v55  ;;  %v4698_v57 = vadd.f32 %v4697_v15, %v9643_v26  ;;  %v8028_v13 = vld [vmem:[#allocation12 + $0x270] ss:$8 sps:$4 sm:$0xff]  }
 0xb1f   :  { %v4592_v30 = vpop.f32.mrf.mxu0  ;;  %v4705_v41 = vpop.f32.mrf.mxu1  ;;  %5989 = vmatprep.subr.bf16.mxu0 %v8024_v34  ;;  %6102 = vmatprep.subr.bf16.mxu1 %v8027_v19  ;;  %v5118_v38 = vpack.c.bf16 %v4998_v32, %v4990_v51  ;;  %v4694_v34 = vadd.f32 %v9634_v27, %v9643_v26 }
 0xb20   :  { %v5125_v15 = vpack.c.bf16 %v5013_v60, %v5005_v50  ;;  %v5127_v29 = vpack.c.bf16 %v5015_v18, %v5007_v39  ;;  %v5012_v6 = vmax.f32 %v4585_v62, 0.0  ;;  %v5014_v32 = vmax.f32 %v4698_v57, 0.0 }
 0xb21   :  { %v4594_v7 = vpop.f32.mrf.mxu0  ;;  %v4707_v56 = vpop.f32.mrf.mxu1  ;;  %v5004_v18 = vmax.f32 %v4581_v24, 0.0  ;;  %v5006_v39 = vmax.f32 %v4694_v34, 0.0 }
 0xb22   :  { %5990 = vmatpush2.bf16.msra.mxu0 %v8022_v58  ;;  %6103 = vmatpush2.bf16.msra.mxu1 %v8025_v59  ;;  %v4593_v58 = vadd.f32 %v4592_v30, %v9617_v4  ;;  %v8039_v59 = vld [vmem:[#allocation12 + $0x364] ss:$8 sps:$4 sm:$0xff]   ;;  %v8037_v30 = vld [vmem:[#allocation12 + $0x360] ss:$8 sps:$4 sm:$0xff]  }
 0xb23   :  { %v4596_v19 = vpop.f32.mrf.mxu0  ;;  %v4709_v31 = vpop.f32.mrf.mxu1  ;;  %6185 = vmatprep.subr.bf16.mxu0 %v8030_v20  ;;  %6298 = vmatprep.subr.bf16.mxu1 %v8033_v3  ;;  %v4706_v20 = vadd.f32 %v4705_v41, %v9622_v22  ;;  %v8034_v3 = vld [vmem:[#allocation12 + $0x260] ss:$8 sps:$4 sm:$0xff]   ;;  %v5124_v41 = vpack.c.bf16 %v5012_v6, %v5004_v18 }
 0xb24   :  { %v4597_v52 = vadd.f32 %v4596_v19, %v9617_v4  ;;  %v4710_v63 = vadd.f32 %v4709_v31, %v9622_v22  ;;  %v8045_v19 = vld [vmem:[#allocation12 + $0x354] ss:$8 sps:$4 sm:$0xff]   ;;  %v5021_v31 = vmax.f32 %v4593_v58, 0.0 }
 0xb25   :  { %5992 = vmatmul.mubr.bf16.vlgmr.msra.gmra.mxu0 %v5116_v1  ;;  %6105 = vmatmul.mubr.bf16.vlgmr.msra.gmra.mxu1 %v5118_v38  ;;  %v9669_v10 = vpop.f32.mrf.mxu0  ;;  %v9671_v27 = vpop.f32.mrf.mxu1  ;;  %v8042_v1 = vld [vmem:[#allocation12 + $0x254] ss:$8 sps:$4 sm:$0xff]  }
 0xb26   :  { %6001 = vmatprep.mubr.bf16.mxu0 %v5125_v15  ;;  %6114 = vmatprep.mubr.bf16.mxu1 %v5127_v29  ;;  %v5029_v51 = vmax.f32 %v4597_v52, 0.0  ;;  %v5031_v38 = vmax.f32 %v4710_v63, 0.0  ;;  %v5126_v15 = vpack.c.bf16 %v5014_v32, %v5006_v39  ;;  %v5023_v29 = vmax.f32 %v4706_v20, 0.0  ;;  %v8040_v63 = vld [vmem:[#allocation12 + $0x250] ss:$8 sps:$4 sm:$0xff]  }
 0xb27   :  { %v4602_v50 = vpop.f32.mrf.mxu0  ;;  %v4715_v60 = vpop.f32.mrf.mxu1  ;;  %6186 = vmatpush1.bf16.msra.mxu0 %v8028_v13  ;;  %6299 = vmatpush1.bf16.msra.mxu1 %v8031_v16  ;;  %v4595_v52 = vadd.f32 %v4594_v7, %v9638_v55  ;;  %v4591_v13 = vadd.f32 %v9654_v45, %v9638_v55  ;;  %v4708_v16 = vadd.f32 %v4707_v56, %v9643_v26  ;;  %v8048_v7 = vld [vmem:[#allocation12 + $0x244] ss:$8 sps:$4 sm:$0xff]  }
 0xb28   :  { %6187 = vmatprep.subr.bf16.mxu0 %v8036_v43  ;;  %6300 = vmatprep.subr.bf16.mxu1 %v8039_v59  ;;  %v5133_v34 = vpack.c.bf16 %v5029_v51, %v5021_v31  ;;  %v8043_v43 = vld [vmem:[#allocation12 + $0x350] ss:$8 sps:$4 sm:$0xff]   ;;  %v5135_v6 = vpack.c.bf16 %v5031_v38, %v5023_v29  ;;  %v8051_v32 = vld [vmem:[#allocation12 + $0x344] ss:$8 sps:$4 sm:$0xff]   ;;  %v4704_v45 = vadd.f32 %v9656_v40, %v9643_v26  ;;  %v8057_v40 = vld [vmem:[#allocation12 + $0x334] ss:$8 sps:$4 sm:$0xff]  }
 0xb29   :  { %v4604_v62 = vpop.f32.mrf.mxu0  ;;  %v4717_v57 = vpop.f32.mrf.mxu1  ;;  %v5028_v56 = vmax.f32 %v4595_v52, 0.0  ;;  %v4603_v20 = vadd.f32 %v4602_v50, %v9617_v4  ;;  %v5030_v51 = vmax.f32 %v4708_v16, 0.0  ;;  %v5020_v18 = vmax.f32 %v4591_v13, 0.0  ;;  %v8052_v52 = vld [vmem:[#allocation12 + $0x230] ss:$8 sps:$4 sm:$0xff]  }
 0xb2a   :  { %v4718_v29 = vadd.f32 %v4717_v57, %v9643_v26  ;;  %v8055_v16 = vld [vmem:[#allocation12 + $0x330] ss:$8 sps:$4 sm:$0xff]  }
 0xb2b   :  { %v4606_v37 = vpop.f32.mrf.mxu0  ;;  %v4719_v24 = vpop.f32.mrf.mxu1  ;;  %6188 = vmatpush1.bf16.msra.mxu0 %v8034_v3  ;;  %6301 = vmatpush1.bf16.msra.mxu1 %v8037_v30  ;;  %v4716_v3 = vadd.f32 %v4715_v60, %v9622_v22  ;;  %v8049_v30 = vld [vmem:[#allocation12 + $0x340] ss:$8 sps:$4 sm:$0xff]   ;;  %v5132_v31 = vpack.c.bf16 %v5028_v56, %v5020_v18  ;;  %v4605_v60 = vadd.f32 %v4604_v62, %v9638_v55  ;;  %v8078_v18 = vld [vmem:[#allocation12 + $0x2f4] ss:$8 sps:$4 sm:$0xff]  }
 0xb2c   :  { %v4607_v58 = vadd.f32 %v4606_v37, %v9617_v4  ;;  %v4720_v59 = vadd.f32 %v4719_v24, %v9622_v22  ;;  %6189 = vmatprep.subr.bf16.mxu0 %v8042_v1  ;;  %6302 = vmatprep.subr.bf16.mxu1 %v8045_v19  ;;  %v8046_v37 = vld [vmem:[#allocation12 + $0x240] ss:$8 sps:$4 sm:$0xff]   ;;  %v8054_v1 = vld [vmem:[#allocation12 + $0x234] ss:$8 sps:$4 sm:$0xff]   ;;  %v5022_v19 = vmax.f32 %v4704_v45, 0.0  ;;  %v5046_v57 = vmax.f32 %v4718_v29, 0.0 }
 0xb2d   :  { %6002 = vmatmul.mubr.bf16.gmra.mxu0 %v5124_v41  ;;  %6115 = vmatmul.mubr.bf16.gmra.mxu1 %v5126_v15  ;;  %v5037_v41 = vmax.f32 %v4603_v20, 0.0  ;;  %v5039_v50 = vmax.f32 %v4716_v3, 0.0  ;;  %v5044_v62 = vmax.f32 %v4605_v60, 0.0  ;;  %v8067_v3 = vld [vmem:[#allocation12 + $0x310] ss:$8 sps:$4 sm:$0xff]  }
 0xb2e   :  { %6011 = vmatprep.mubr.bf16.mxu0 %v5133_v34  ;;  %6124 = vmatprep.mubr.bf16.mxu1 %v5135_v6  ;;  %v5045_v39 = vmax.f32 %v4607_v58, 0.0  ;;  %v5047_v38 = vmax.f32 %v4720_v59, 0.0  ;;  %v5134_v15 = vpack.c.bf16 %v5030_v51, %v5022_v19  ;;  %v8060_v34 = vld [vmem:[#allocation12 + $0x224] ss:$8 sps:$4 sm:$0xff]   ;;  %v4714_v58 = vadd.f32 %v9671_v27, %v9643_v26  ;;  %v8058_v59 = vld [vmem:[#allocation12 + $0x220] ss:$8 sps:$4 sm:$0xff]  }
 0xb2f   :  { %6190 = vmatpush1.bf16.msra.mxu0 %v8040_v63  ;;  %6303 = vmatpush1.bf16.msra.mxu1 %v8043_v43  ;;  %v8063_v63 = vld [vmem:[#allocation12 + $0x324] ss:$8 sps:$4 sm:$0xff]   ;;  %v4601_v43 = vadd.f32 %v9669_v10, %v9638_v55  ;;  %v8061_v6 = vld [vmem:[#allocation12 + $0x320] ss:$8 sps:$4 sm:$0xff]   ;;  %v8064_v27 = vld [vmem:[#allocation12 + $0x210] ss:$8 sps:$4 sm:$0xff]  }
 0xb30   :  { %6191 = vmatprep.subr.bf16.mxu0 %v8048_v7  ;;  %6304 = vmatprep.subr.bf16.mxu1 %v8051_v32  ;;  %v5141_v24 = vpack.c.bf16 %v5045_v39, %v5037_v41  ;;  %v5143_v13 = vpack.c.bf16 %v5047_v38, %v5039_v50  ;;  %v8066_v7 = vld [vmem:[#allocation12 + $0x214] ss:$8 sps:$4 sm:$0xff]   ;;  %v5038_v56 = vmax.f32 %v4714_v58, 0.0  ;;  %v8075_v51 = vld [vmem:[#allocation12 + $0x304] ss:$8 sps:$4 sm:$0xff]  }
 0xb31   :  { %v8069_v32 = vld [vmem:[#allocation12 + $0x314] ss:$8 sps:$4 sm:$0xff]   ;;  %v5036_v45 = vmax.f32 %v4601_v43, 0.0  ;;  %v8076_v38 = vld [vmem:[#allocation12 + $0x2f0] ss:$8 sps:$4 sm:$0xff]  }
 0xb32   :  { %v5142_v20 = vpack.c.bf16 %v5046_v57, %v5038_v56  ;;  %v8081_v39 = vld [vmem:[#allocation12 + $0x3f4] ss:$8 sps:$4 sm:$0xff]   ;;  %v8084_v19 = vld [vmem:[#allocation12 + $0x2e4] ss:$8 sps:$4 sm:$0xff]   ;;  %v8082_v41 = vld [vmem:[#allocation12 + $0x2e0] ss:$8 sps:$4 sm:$0xff]  }
 0xb33   :  { %6192 = vmatpush1.bf16.msra.mxu0 %v8046_v37  ;;  %6305 = vmatpush1.bf16.msra.mxu1 %v8049_v30  ;;  %v5140_v10 = vpack.c.bf16 %v5044_v62, %v5036_v45  ;;  %v8072_v37 = vld [vmem:[#allocation12 + $0x204] ss:$8 sps:$4 sm:$0xff]   ;;  %v8070_v30 = vld [vmem:[#allocation12 + $0x200] ss:$8 sps:$4 sm:$0xff]   ;;  %v8093_v60 = vld [vmem:[#allocation12 + $0x3d4] ss:$8 sps:$4 sm:$0xff]  }
 0xb34   :  { %6193 = vmatprep.subr.bf16.mxu0 %v8054_v1  ;;  %6306 = vmatprep.subr.bf16.mxu1 %v8057_v40  ;;  %v8073_v1 = vld [vmem:[#allocation12 + $0x300] ss:$8 sps:$4 sm:$0xff]   ;;  %v8079_v40 = vld [vmem:[#allocation12 + $0x3f0] ss:$8 sps:$4 sm:$0xff]   ;;  %v8105_v43 = vld [vmem:[#allocation12 + $0x3b4] ss:$8 sps:$4 sm:$0xff]  }
 0xb35   :  { %6012 = vmatmul.mubr.bf16.gmra.mxu0 %v5132_v31  ;;  %6125 = vmatmul.mubr.bf16.gmra.mxu1 %v5134_v15  ;;  %v8087_v31 = vld [vmem:[#allocation12 + $0x3e4] ss:$8 sps:$4 sm:$0xff]   ;;  %v8085_v50 = vld [vmem:[#allocation12 + $0x3e0] ss:$8 sps:$4 sm:$0xff]   ;;  %v8090_v15 = vld [vmem:[#allocation12 + $0x2d4] ss:$8 sps:$4 sm:$0xff]  }
 0xb36   :  { %6021 = vmatprep.mubr.bf16.mxu0 %v5141_v24  ;;  %6134 = vmatprep.mubr.bf16.mxu1 %v5143_v13  ;;  %v8088_v29 = vld [vmem:[#allocation12 + $0x2d0] ss:$8 sps:$4 sm:$0xff]   ;;  %v8099_v24 = vld [vmem:[#allocation12 + $0x3c4] ss:$8 sps:$4 sm:$0xff]   ;;  %v8094_v13 = vld [vmem:[#allocation12 + $0x2c0] ss:$8 sps:$4 sm:$0xff]  }
 0xb37   :  { %6194 = vmatpush1.bf16.msra.mxu0 %v8052_v52  ;;  %6307 = vmatpush1.bf16.msra.mxu1 %v8055_v16  ;;  %v8091_v52 = vld [vmem:[#allocation12 + $0x3d0] ss:$8 sps:$4 sm:$0xff]   ;;  %v8096_v16 = vld [vmem:[#allocation12 + $0x2c4] ss:$8 sps:$4 sm:$0xff]   ;;  %v8117_v45 = vld [vmem:[#allocation12 + $0x394] ss:$8 sps:$4 sm:$0xff]  }
 0xb38   :  { %6195 = vmatprep.subr.bf16.mxu0 %v8060_v34  ;;  %6308 = vmatprep.subr.bf16.mxu1 %v8063_v63  ;;  %v8097_v34 = vld [vmem:[#allocation12 + $0x3c0] ss:$8 sps:$4 sm:$0xff]   ;;  %v8102_v63 = vld [vmem:[#allocation12 + $0x2b4] ss:$8 sps:$4 sm:$0xff]   ;;  %v8100_v58 = vld [vmem:[#allocation12 + $0x2b0] ss:$8 sps:$4 sm:$0xff]  }
 0xb39   :  { %v8103_v62 = vld [vmem:[#allocation12 + $0x3b0] ss:$8 sps:$4 sm:$0xff]   ;;  %v8108_v57 = vld [vmem:[#allocation12 + $0x2a4] ss:$8 sps:$4 sm:$0xff]  }
 0xb3a   :  { %v8112_v56 = vld [vmem:[#allocation12 + $0x290] ss:$8 sps:$4 sm:$0xff]  }
 0xb3b   :  { %6196 = vmatpush1.bf16.msra.mxu0 %v8058_v59  ;;  %6309 = vmatpush1.bf16.msra.mxu1 %v8061_v6  ;;  %v8111_v59 = vld [vmem:[#allocation12 + $0x3a4] ss:$8 sps:$4 sm:$0xff]   ;;  %v8106_v6 = vld [vmem:[#allocation12 + $0x2a0] ss:$8 sps:$4 sm:$0xff]  }
 0xb3c   :  { %6197 = vmatprep.subr.bf16.mxu0 %v8066_v7  ;;  %6310 = vmatprep.subr.bf16.mxu1 %v8069_v32  ;;  %v8109_v7 = vld [vmem:[#allocation12 + $0x3a0] ss:$8 sps:$4 sm:$0xff]   ;;  %v8114_v32 = vld [vmem:[#allocation12 + $0x294] ss:$8 sps:$4 sm:$0xff]  }
 0xb3d   :  { %6022 = vmatmul.mubr.bf16.gmra.mxu0 %v5140_v10  ;;  %6135 = vmatmul.mubr.bf16.gmra.mxu1 %v5142_v20  ;;  %v8115_v10 = vld [vmem:[#allocation12 + $0x390] ss:$8 sps:$4 sm:$0xff]   ;;  %v8120_v20 = vld [vmem:[#allocation12 + $0x284] ss:$8 sps:$4 sm:$0xff]  }
 0xb3f   :  { %6198 = vmatpush1.bf16.msra.mxu0 %v8064_v27  ;;  %6311 = vmatpush1.bf16.msra.mxu1 %v8067_v3  ;;  %v8123_v27 = vld [vmem:[#allocation12 + $0x384] ss:$8 sps:$4 sm:$0xff]   ;;  %v8118_v3 = vld [vmem:[#allocation12 + $0x280] ss:$8 sps:$4 sm:$0xff]  }
 0xb40   :  { %6199 = vmatprep.subr.bf16.mxu0 %v8072_v37  ;;  %6312 = vmatprep.subr.bf16.mxu1 %v8075_v51  ;;  %v8121_v37 = vld [vmem:[#allocation12 + $0x380] ss:$8 sps:$4 sm:$0xff]  }
 0xb43   :  { %6200 = vmatpush1.bf16.msra.mxu0 %v8070_v30  ;;  %6313 = vmatpush1.bf16.msra.mxu1 %v8073_v1 }
 0xb44   :  { %6201 = vmatprep.subr.bf16.mxu0 %v8078_v18  ;;  %6314 = vmatprep.subr.bf16.mxu1 %v8081_v39 }
 0xb47   :  { %6202 = vmatpush2.bf16.msra.mxu0 %v8076_v38  ;;  %6315 = vmatpush2.bf16.msra.mxu1 %v8079_v40 }
 0xb48   :  { %6203 = vmatprep.subr.bf16.mxu0 %v8084_v19  ;;  %6316 = vmatprep.subr.bf16.mxu1 %v8087_v31 }
 0xb4b   :  { %6204 = vmatpush2.bf16.msra.mxu0 %v8082_v41  ;;  %6317 = vmatpush2.bf16.msra.mxu1 %v8085_v50 }
 0xb4c   :  { %6205 = vmatprep.subr.bf16.mxu0 %v8090_v15  ;;  %6318 = vmatprep.subr.bf16.mxu1 %v8093_v60 }
 0xb4f   :  { %6206 = vmatpush2.bf16.msra.mxu0 %v8088_v29  ;;  %6319 = vmatpush2.bf16.msra.mxu1 %v8091_v52 }
 0xb50   :  { %6207 = vmatprep.subr.bf16.mxu0 %v8096_v16  ;;  %6320 = vmatprep.subr.bf16.mxu1 %v8099_v24 }
 0xb53   :  { %6208 = vmatpush2.bf16.msra.mxu0 %v8094_v13  ;;  %6321 = vmatpush2.bf16.msra.mxu1 %v8097_v34 }
 0xb54   :  { %6209 = vmatprep.subr.bf16.mxu0 %v8102_v63  ;;  %6322 = vmatprep.subr.bf16.mxu1 %v8105_v43 }
 0xb57   :  { %6210 = vmatpush2.bf16.msra.mxu0 %v8100_v58  ;;  %6323 = vmatpush2.bf16.msra.mxu1 %v8103_v62 }
 0xb58   :  { %6211 = vmatprep.subr.bf16.mxu0 %v8108_v57  ;;  %6324 = vmatprep.subr.bf16.mxu1 %v8111_v59 }
 0xb5b   :  { %6212 = vmatpush2.bf16.msra.mxu0 %v8106_v6  ;;  %6325 = vmatpush2.bf16.msra.mxu1 %v8109_v7 }
 0xb5c   :  { %6213 = vmatprep.subr.bf16.mxu0 %v8114_v32  ;;  %6326 = vmatprep.subr.bf16.mxu1 %v8117_v45 }
 0xb5f   :  { %6214 = vmatpush2.bf16.msra.mxu0 %v8112_v56  ;;  %6327 = vmatpush2.bf16.msra.mxu1 %v8115_v10 }
 0xb60   :  { %6215 = vmatprep.subr.bf16.mxu0 %v8120_v20  ;;  %6328 = vmatprep.subr.bf16.mxu1 %v8123_v27 }
 0xb63   :  { %6216 = vmatpush2.bf16.msra.mxu0 %v8118_v3  ;;  %6329 = vmatpush2.bf16.msra.mxu1 %v8121_v37 }
 0xb83   :  { %v4610_v51 = vpop.f32.mrf.mxu0  ;;  %v4723_v30 = vpop.f32.mrf.mxu1 }
 0xb84   :  { %v4611_v50 = vadd.f32 %v4610_v51, %v9638_v55  ;;  %v4724_v15 = vadd.f32 %v4723_v30, %v9643_v26 }
 0xb85   :  { %v4612_v1 = vpop.f32.mrf.mxu0  ;;  %v4725_v18 = vpop.f32.mrf.mxu1 }
 0xb86   :  { %v4613_v40 = vadd.f32 %v4612_v1, %v9617_v4  ;;  %v4726_v19 = vadd.f32 %v4725_v18, %v9622_v22  ;;  %v5052_v59 = vmax.f32 %v4611_v50, 0.0  ;;  %v5054_v6 = vmax.f32 %v4724_v15, 0.0 }
 0xb87   :  { %v4614_v39 = vpop.f32.mrf.mxu0  ;;  %v4727_v38 = vpop.f32.mrf.mxu1 }
 0xb88   :  { %v4615_v31 = vadd.f32 %v4614_v39, %v9638_v55  ;;  %v4728_v41 = vadd.f32 %v4727_v38, %v9643_v26  ;;  %v5053_v43 = vmax.f32 %v4613_v40, 0.0  ;;  %v5055_v58 = vmax.f32 %v4726_v19, 0.0 }
 0xb89   :  { %v4616_v60 = vpop.f32.mrf.mxu0  ;;  %v4729_v29 = vpop.f32.mrf.mxu1 }
 0xb8a   :  { %v4617_v52 = vadd.f32 %v4616_v60, %v9617_v4  ;;  %v4730_v16 = vadd.f32 %v4729_v29, %v9622_v22  ;;  %v5060_v24 = vmax.f32 %v4615_v31, 0.0  ;;  %v5062_v13 = vmax.f32 %v4728_v41, 0.0 }
 0xb8b   :  { %v4620_v34 = vpop.f32.mrf.mxu0  ;;  %v4733_v63 = vpop.f32.mrf.mxu1 }
 0xb8c   :  { %v5061_v62 = vmax.f32 %v4617_v52, 0.0  ;;  %v5063_v57 = vmax.f32 %v4730_v16, 0.0  ;;  %v5148_v10 = vpack.c.bf16 %v5060_v24, %v5052_v59  ;;  %v5150_v20 = vpack.c.bf16 %v5062_v13, %v5054_v6 }
 0xb8d   :  { %v4622_v7 = vpop.f32.mrf.mxu0  ;;  %v4735_v32 = vpop.f32.mrf.mxu1  ;;  %v4621_v18 = vadd.f32 %v4620_v34, %v9638_v55  ;;  %v4734_v39 = vadd.f32 %v4733_v63, %v9643_v26 }
 0xb8e   :  { %v5149_v45 = vpack.c.bf16 %v5061_v62, %v5053_v43  ;;  %v5151_v56 = vpack.c.bf16 %v5063_v57, %v5055_v58  ;;  %v4623_v27 = vadd.f32 %v4622_v7, %v9617_v4  ;;  %v4736_v51 = vadd.f32 %v4735_v32, %v9622_v22 }
 0xb8f   :  { %v4624_v3 = vpop.f32.mrf.mxu0  ;;  %v4737_v37 = vpop.f32.mrf.mxu1  ;;  %v5068_v13 = vmax.f32 %v4621_v18, 0.0  ;;  %v5070_v34 = vmax.f32 %v4734_v39, 0.0 }
 0xb90   :  { %v4625_v30 = vadd.f32 %v4624_v3, %v9638_v55  ;;  %v4738_v1 = vadd.f32 %v4737_v37, %v9643_v26  ;;  %6031 = vmatprep.mubr.bf16.mxu0 %v5149_v45  ;;  %6144 = vmatprep.mubr.bf16.mxu1 %v5151_v56  ;;  %v5069_v29 = vmax.f32 %v4623_v27, 0.0  ;;  %v5071_v52 = vmax.f32 %v4736_v51, 0.0 }
 0xb91   :  { %v4626_v38 = vpop.f32.mrf.mxu0  ;;  %v4739_v40 = vpop.f32.mrf.mxu1  ;;  %6032 = vmatmul.mubr.bf16.gmra.mxu0 %v5148_v10  ;;  %6145 = vmatmul.mubr.bf16.gmra.mxu1 %v5150_v20 }
 0xb92   :  { %v4627_v19 = vadd.f32 %v4626_v38, %v9617_v4  ;;  %v4740_v31 = vadd.f32 %v4739_v40, %v9622_v22  ;;  %v5076_v41 = vmax.f32 %v4625_v30, 0.0  ;;  %v5078_v50 = vmax.f32 %v4738_v1, 0.0 }
 0xb93   :  { %v4630_v15 = vpop.f32.mrf.mxu0  ;;  %v4743_v60 = vpop.f32.mrf.mxu1 }
 0xb94   :  { %v5077_v16 = vmax.f32 %v4627_v19, 0.0  ;;  %v5079_v24 = vmax.f32 %v4740_v31, 0.0  ;;  %v5156_v57 = vpack.c.bf16 %v5076_v41, %v5068_v13  ;;  %v5158_v59 = vpack.c.bf16 %v5078_v50, %v5070_v34 }
 0xb95   :  { %v4632_v43 = vpop.f32.mrf.mxu0  ;;  %v4745_v63 = vpop.f32.mrf.mxu1  ;;  %v4631_v20 = vadd.f32 %v4630_v15, %v9638_v55  ;;  %v4744_v27 = vadd.f32 %v4743_v60, %v9643_v26 }
 0xb96   :  { %v5157_v58 = vpack.c.bf16 %v5077_v16, %v5069_v29  ;;  %v5159_v62 = vpack.c.bf16 %v5079_v24, %v5071_v52  ;;  %v4633_v6 = vadd.f32 %v4632_v43, %v9617_v4  ;;  %v4746_v45 = vadd.f32 %v4745_v63, %v9622_v22 }
 0xb97   :  { %v4634_v7 = vpop.f32.mrf.mxu0  ;;  %v4747_v32 = vpop.f32.mrf.mxu1  ;;  %v5084_v50 = vmax.f32 %v4631_v20, 0.0  ;;  %v5086_v15 = vmax.f32 %v4744_v27, 0.0 }
 0xb98   :  { %v4635_v56 = vadd.f32 %v4634_v7, %v9638_v55  ;;  %v4748_v10 = vadd.f32 %v4747_v32, %v9643_v26  ;;  %6041 = vmatprep.mubr.bf16.mxu0 %v5157_v58  ;;  %6154 = vmatprep.mubr.bf16.mxu1 %v5159_v62  ;;  %v5085_v39 = vmax.f32 %v4633_v6, 0.0  ;;  %v5087_v38 = vmax.f32 %v4746_v45, 0.0 }
 0xb99   :  { %v4636_v3 = vpop.f32.mrf.mxu0  ;;  %v4749_v37 = vpop.f32.mrf.mxu1  ;;  %6042 = vmatmul.mubr.bf16.gmra.mxu0 %v5156_v57  ;;  %6155 = vmatmul.mubr.bf16.gmra.mxu1 %v5158_v59  ;;  %v3886_v58 = vsub.s32 7, %v8629_v2 }
 0xb9a   :  { %v4637_v51 = vadd.f32 %v4636_v3, %v9617_v4  ;;  %v4750_v30 = vadd.f32 %v4749_v37, %v9622_v22  ;;  %v5092_v1 = vmax.f32 %v4635_v56, 0.0  ;;  %v5094_v18 = vmax.f32 %v4748_v10, 0.0 }
 0xb9b   :  { %v3882_v56 = vsub.s32 6, %v8629_v2 }
 0xb9c   :  { %v5093_v40 = vmax.f32 %v4637_v51, 0.0  ;;  %v5095_v19 = vmax.f32 %v4750_v30, 0.0  ;;  %v4640_v31 = vpop.f32.mrf.mxu0  ;;  %v4753_v41 = vpop.f32.mrf.mxu1  ;;  %v5164_v24 = vpack.c.bf16 %v5092_v1, %v5084_v50  ;;  %v5166_v13 = vpack.c.bf16 %v5094_v18, %v5086_v15 }
 0xb9d   :  { %v4641_v6 = vadd.f32 %v4640_v31, %v9638_v55  ;;  %v4754_v7 = vadd.f32 %v4753_v41, %v9643_v26  ;;  %v10502_v30 = vsub.s32 5, %v8629_v2  ;;  %v9738_v31 = vrot.slane %v9613_v14, %v3882_v56 }
 0xb9e   :  { %v5165_v29 = vpack.c.bf16 %v5093_v40, %v5085_v39  ;;  %v5167_v60 = vpack.c.bf16 %v5095_v19, %v5087_v38  ;;  %v4642_v52 = vpop.f32.mrf.mxu0  ;;  %v4755_v16 = vpop.f32.mrf.mxu1 }
 0xb9f   :  { %v4643_v34 = vadd.f32 %v4642_v52, %v9617_v4  ;;  %v4756_v62 = vadd.f32 %v4755_v16, %v9622_v22  ;;  %v9727_v1 = vrot.slane %v9613_v14, %v10502_v30  ;;  %v5100_v40 = vmax.f32 %v4641_v6, 0.0 }
 0xba0   :  { %v4644_v43 = vpop.f32.mrf.mxu0  ;;  %v4757_v63 = vpop.f32.mrf.mxu1  ;;  %6051 = vmatprep.mubr.bf16.mxu0 %v5165_v29  ;;  %6164 = vmatprep.mubr.bf16.mxu1 %v5167_v60 }
 0xba1   :  { %v4645_v57 = vadd.f32 %v4644_v43, %v9638_v55  ;;  %v4758_v59 = vadd.f32 %v4757_v63, %v9643_v26  ;;  %6052 = vmatmul.mubr.bf16.gmra.mxu0 %v5164_v24  ;;  %6165 = vmatmul.mubr.bf16.gmra.mxu1 %v5166_v13  ;;  %v9730_v55 = vrot.slane %v9613_v14, %v3886_v58  ;;  %v5101_v26 = vmax.f32 %v4643_v34, 0.0 }
 0xba2   :  { %v4646_v32 = vpop.f32.mrf.mxu0  ;;  %v4759_v45 = vpop.f32.mrf.mxu1  ;;  %v5103_v18 = vmax.f32 %v4756_v62, 0.0 }
 0xba3   :  { %v4647_v10 = vadd.f32 %v4646_v32, %v9617_v4  ;;  %v4760_v20 = vadd.f32 %v4759_v45, %v9622_v22  ;;  %v5108_v27 = vmax.f32 %v4645_v57, 0.0  ;;  %v5110_v3 = vmax.f32 %v4758_v59, 0.0 }
 0xba4   :  { %v4796_v37 = vpop.f32.mrf.mxu0  ;;  %v4909_v51 = vpop.f32.mrf.mxu1  ;;  %v5102_v4 = vmax.f32 %v4754_v7, 0.0  ;;  %v10503_v22 = vsub.s32 4, %v8629_v2 }
 0xba5   :  { %v5109_v39 = vmax.f32 %v4647_v10, 0.0  ;;  %v5111_v38 = vmax.f32 %v4760_v20, 0.0  ;;  %v5172_v60 = vpack.c.bf16 %v5108_v27, %v5100_v40  ;;  %v4910_v63 = vadd.f32 %v4909_v51, %v9738_v31 }
 0xba6   :  { %v9735_v19 = vrot.slane %v9613_v14, %v10503_v22  ;;  %v4798_v41 = vpop.f32.mrf.mxu0  ;;  %v4911_v50 = vpop.f32.mrf.mxu1  ;;  %v5174_v52 = vpack.c.bf16 %v5110_v3, %v5102_v4 }
 0xba7   :  { %v5173_v15 = vpack.c.bf16 %v5109_v39, %v5101_v26  ;;  %v5175_v29 = vpack.c.bf16 %v5111_v38, %v5103_v18  ;;  %v4799_v16 = vadd.f32 %v4798_v41, %v9727_v1  ;;  %v4912_v34 = vadd.f32 %v4911_v50, %v9730_v55 }
 0xba8   :  { %v4800_v24 = vpop.f32.mrf.mxu0  ;;  %v4913_v13 = vpop.f32.mrf.mxu1  ;;  %v4797_v14 = vadd.f32 %v4796_v37, %v9735_v19  ;;  %v4994_v37 = vmax.f32 %v4910_v63, 0.0 }
 0xba9   :  { %v4801_v2 = vadd.f32 %v4800_v24, %v9735_v19  ;;  %v4914_v43 = vadd.f32 %v4913_v13, %v9738_v31  ;;  %6061 = vmatprep.mubr.bf16.mxu0 %v5173_v15  ;;  %6174 = vmatprep.mubr.bf16.mxu1 %v5175_v29  ;;  %v4993_v56 = vmax.f32 %v4799_v16, 0.0  ;;  %v4995_v10 = vmax.f32 %v4912_v34, 0.0 }
 0xbaa   :  { %v4802_v58 = vpop.f32.mrf.mxu0  ;;  %v4915_v62 = vpop.f32.mrf.mxu1  ;;  %6062 = vmatmul.mubr.bf16.gmra.mxu0 %v5172_v60  ;;  %6175 = vmatmul.mubr.bf16.gmra.mxu1 %v5174_v52  ;;  %v4992_v3 = vmax.f32 %v4797_v14, 0.0 }
 0xbab   :  { %v4803_v57 = vadd.f32 %v4802_v58, %v9727_v1  ;;  %v4916_v59 = vadd.f32 %v4915_v62, %v9730_v55  ;;  %v5000_v6 = vmax.f32 %v4801_v2, 0.0  ;;  %v5002_v7 = vmax.f32 %v4914_v43, 0.0 }
 0xbac   :  { %v4806_v32 = vpop.f32.mrf.mxu0  ;;  %v4919_v45 = vpop.f32.mrf.mxu1 }
 0xbad   :  { %v5001_v20 = vmax.f32 %v4803_v57, 0.0  ;;  %v5003_v27 = vmax.f32 %v4916_v59, 0.0  ;;  %v5120_v39 = vpack.c.bf16 %v5000_v6, %v4992_v3  ;;  %v5122_v38 = vpack.c.bf16 %v5002_v7, %v4994_v37 }
 0xbae   :  { %v4808_v30 = vpop.f32.mrf.mxu0  ;;  %v4921_v51 = vpop.f32.mrf.mxu1  ;;  %v4807_v29 = vadd.f32 %v4806_v32, %v9735_v19  ;;  %v4920_v60 = vadd.f32 %v4919_v45, %v9738_v31 }
 0xbaf   :  { %v5121_v26 = vpack.c.bf16 %v5001_v20, %v4993_v56  ;;  %v5123_v18 = vpack.c.bf16 %v5003_v27, %v4995_v10  ;;  %v4809_v40 = vadd.f32 %v4808_v30, %v9727_v1  ;;  %v4922_v41 = vadd.f32 %v4921_v51, %v9730_v55 }
 0xbb0   :  { %v4810_v4 = vpop.f32.mrf.mxu0  ;;  %v4923_v22 = vpop.f32.mrf.mxu1  ;;  %v5008_v59 = vmax.f32 %v4807_v29, 0.0  ;;  %v5010_v6 = vmax.f32 %v4920_v60, 0.0 }
 0xbb1   :  { %v4811_v50 = vadd.f32 %v4810_v4, %v9735_v19  ;;  %v4924_v15 = vadd.f32 %v4923_v22, %v9738_v31  ;;  %6217 = vmatprep.mubr.bf16.mxu0 %v5121_v26  ;;  %6330 = vmatprep.mubr.bf16.mxu1 %v5123_v18  ;;  %v5009_v63 = vmax.f32 %v4809_v40, 0.0  ;;  %v5011_v58 = vmax.f32 %v4922_v41, 0.0 }
 0xbb2   :  { %v4812_v52 = vpop.f32.mrf.mxu0  ;;  %v4925_v16 = vpop.f32.mrf.mxu1  ;;  %6218 = vmatmul.mubr.bf16.vlgmr.msra.gmra.mxu0 %v5120_v39  ;;  %6331 = vmatmul.mubr.bf16.vlgmr.msra.gmra.mxu1 %v5122_v38 }
 0xbb3   :  { %v4813_v24 = vadd.f32 %v4812_v52, %v9727_v1  ;;  %v4926_v13 = vadd.f32 %v4925_v16, %v9730_v55  ;;  %v5016_v34 = vmax.f32 %v4811_v50, 0.0  ;;  %v5018_v2 = vmax.f32 %v4924_v15, 0.0 }
 0xbb4   :  { %v4816_v43 = vpop.f32.mrf.mxu0  ;;  %v4929_v14 = vpop.f32.mrf.mxu1 }
 0xbb5   :  { %v5017_v62 = vmax.f32 %v4813_v24, 0.0  ;;  %v5019_v57 = vmax.f32 %v4926_v13, 0.0  ;;  %v5128_v10 = vpack.c.bf16 %v5016_v34, %v5008_v59  ;;  %v5130_v20 = vpack.c.bf16 %v5018_v2, %v5010_v6 }
 0xbb6   :  { %v4818_v7 = vpop.f32.mrf.mxu0  ;;  %v4931_v32 = vpop.f32.mrf.mxu1  ;;  %v4817_v18 = vadd.f32 %v4816_v43, %v9735_v19  ;;  %v4930_v39 = vadd.f32 %v4929_v14, %v9738_v31 }
 0xbb7   :  { %v5129_v45 = vpack.c.bf16 %v5017_v62, %v5009_v63  ;;  %v5131_v56 = vpack.c.bf16 %v5019_v57, %v5011_v58  ;;  %v4819_v27 = vadd.f32 %v4818_v7, %v9727_v1  ;;  %v4932_v30 = vadd.f32 %v4931_v32, %v9730_v55 }
 0xbb8   :  { %v4820_v3 = vpop.f32.mrf.mxu0  ;;  %v4933_v37 = vpop.f32.mrf.mxu1  ;;  %v5024_v13 = vmax.f32 %v4817_v18, 0.0  ;;  %v5026_v34 = vmax.f32 %v4930_v39, 0.0 }
 0xbb9   :  { %v4821_v51 = vadd.f32 %v4820_v3, %v9735_v19  ;;  %v4934_v26 = vadd.f32 %v4933_v37, %v9738_v31  ;;  %6227 = vmatprep.mubr.bf16.mxu0 %v5129_v45  ;;  %6340 = vmatprep.mubr.bf16.mxu1 %v5131_v56  ;;  %v5025_v60 = vmax.f32 %v4819_v27, 0.0  ;;  %v5027_v52 = vmax.f32 %v4932_v30, 0.0 }
 0xbba   :  { %v4822_v38 = vpop.f32.mrf.mxu0  ;;  %v4935_v40 = vpop.f32.mrf.mxu1  ;;  %6228 = vmatmul.mubr.bf16.gmra.mxu0 %v5128_v10  ;;  %6341 = vmatmul.mubr.bf16.gmra.mxu1 %v5130_v20 }
 0xbbb   :  { %v4823_v4 = vadd.f32 %v4822_v38, %v9727_v1  ;;  %v4936_v22 = vadd.f32 %v4935_v40, %v9730_v55  ;;  %v5032_v41 = vmax.f32 %v4821_v51, 0.0  ;;  %v5034_v50 = vmax.f32 %v4934_v26, 0.0 }
 0xbbc   :  { %v4826_v15 = vpop.f32.mrf.mxu0  ;;  %v4939_v29 = vpop.f32.mrf.mxu1 }
 0xbbd   :  { %v5033_v16 = vmax.f32 %v4823_v4, 0.0  ;;  %v5035_v24 = vmax.f32 %v4936_v22, 0.0  ;;  %v5136_v58 = vpack.c.bf16 %v5032_v41, %v5024_v13  ;;  %v5138_v62 = vpack.c.bf16 %v5034_v50, %v5026_v34 }
 0xbbe   :  { %v4828_v2 = vpop.f32.mrf.mxu0  ;;  %v4941_v43 = vpop.f32.mrf.mxu1  ;;  %v4827_v56 = vadd.f32 %v4826_v15, %v9735_v19  ;;  %v4940_v10 = vadd.f32 %v4939_v29, %v9738_v31 }
 0xbbf   :  { %v5137_v14 = vpack.c.bf16 %v5033_v16, %v5025_v60  ;;  %v5139_v63 = vpack.c.bf16 %v5035_v24, %v5027_v52  ;;  %v4829_v57 = vadd.f32 %v4828_v2, %v9727_v1  ;;  %v4942_v7 = vadd.f32 %v4941_v43, %v9730_v55 }
 0xbc0   :  { %v4830_v59 = vpop.f32.mrf.mxu0  ;;  %v4943_v6 = vpop.f32.mrf.mxu1  ;;  %v5040_v22 = vmax.f32 %v4827_v56, 0.0  ;;  %v5042_v41 = vmax.f32 %v4940_v10, 0.0 }
 0xbc1   :  { %v4831_v32 = vadd.f32 %v4830_v59, %v9735_v19  ;;  %v4944_v45 = vadd.f32 %v4943_v6, %v9738_v31  ;;  %6237 = vmatprep.mubr.bf16.mxu0 %v5137_v14  ;;  %6350 = vmatprep.mubr.bf16.mxu1 %v5139_v63  ;;  %v5041_v39 = vmax.f32 %v4829_v57, 0.0  ;;  %v5043_v38 = vmax.f32 %v4942_v7, 0.0 }
 0xbc2   :  { %v4832_v20 = vpop.f32.mrf.mxu0  ;;  %v4945_v27 = vpop.f32.mrf.mxu1  ;;  %6238 = vmatmul.mubr.bf16.gmra.mxu0 %v5136_v58  ;;  %6351 = vmatmul.mubr.bf16.gmra.mxu1 %v5138_v62 }
 0xbc3   :  { %v4833_v3 = vadd.f32 %v4832_v20, %v9727_v1  ;;  %v4946_v37 = vadd.f32 %v4945_v27, %v9730_v55  ;;  %v5048_v30 = vmax.f32 %v4831_v32, 0.0  ;;  %v5050_v51 = vmax.f32 %v4944_v45, 0.0 }
 0xbc4   :  { %v4836_v26 = vpop.f32.mrf.mxu0  ;;  %v4949_v18 = vpop.f32.mrf.mxu1 }
 0xbc5   :  { %v5049_v40 = vmax.f32 %v4833_v3, 0.0  ;;  %v5051_v4 = vmax.f32 %v4946_v37, 0.0  ;;  %v5144_v52 = vpack.c.bf16 %v5048_v30, %v5040_v22  ;;  %v5146_v16 = vpack.c.bf16 %v5050_v51, %v5042_v41 }
 0xbc6   :  { %v4838_v50 = vpop.f32.mrf.mxu0  ;;  %v4951_v15 = vpop.f32.mrf.mxu1  ;;  %v4837_v63 = vadd.f32 %v4836_v26, %v9735_v19  ;;  %v4950_v58 = vadd.f32 %v4949_v18, %v9738_v31 }
 0xbc7   :  { %v5145_v29 = vpack.c.bf16 %v5049_v40, %v5041_v39  ;;  %v5147_v60 = vpack.c.bf16 %v5051_v4, %v5043_v38  ;;  %v4839_v24 = vadd.f32 %v4838_v50, %v9727_v1  ;;  %v4952_v2 = vadd.f32 %v4951_v15, %v9730_v55 }
 0xbc8   :  { %v4840_v13 = vpop.f32.mrf.mxu0  ;;  %v4953_v34 = vpop.f32.mrf.mxu1  ;;  %v5056_v37 = vmax.f32 %v4837_v63, 0.0  ;;  %v5058_v30 = vmax.f32 %v4950_v58, 0.0 }
 0xbc9   :  { %v4841_v43 = vadd.f32 %v4840_v13, %v9735_v19  ;;  %v4954_v14 = vadd.f32 %v4953_v34, %v9738_v31  ;;  %6247 = vmatprep.mubr.bf16.mxu0 %v5145_v29  ;;  %6360 = vmatprep.mubr.bf16.mxu1 %v5147_v60  ;;  %v5057_v10 = vmax.f32 %v4839_v24, 0.0  ;;  %v5059_v20 = vmax.f32 %v4952_v2, 0.0 }
 0xbca   :  { %v4842_v62 = vpop.f32.mrf.mxu0  ;;  %v4955_v57 = vpop.f32.mrf.mxu1  ;;  %6248 = vmatmul.mubr.bf16.gmra.mxu0 %v5144_v52  ;;  %6361 = vmatmul.mubr.bf16.gmra.mxu1 %v5146_v16 }
 0xbcb   :  { %v4843_v59 = vadd.f32 %v4842_v62, %v9727_v1  ;;  %v4956_v6 = vadd.f32 %v4955_v57, %v9730_v55  ;;  %v5064_v7 = vmax.f32 %v4841_v43, 0.0  ;;  %v5066_v32 = vmax.f32 %v4954_v14, 0.0 }
 0xbcc   :  { %v4846_v45 = vpop.f32.mrf.mxu0  ;;  %v4959_v56 = vpop.f32.mrf.mxu1 }
 0xbcd   :  { %v5065_v27 = vmax.f32 %v4843_v59, 0.0  ;;  %v5067_v3 = vmax.f32 %v4956_v6, 0.0  ;;  %v5152_v38 = vpack.c.bf16 %v5064_v7, %v5056_v37  ;;  %v5154_v40 = vpack.c.bf16 %v5066_v32, %v5058_v30 }
 0xbce   :  { %v4848_v51 = vpop.f32.mrf.mxu0  ;;  %v4961_v26 = vpop.f32.mrf.mxu1  ;;  %v4847_v60 = vadd.f32 %v4846_v45, %v9735_v19  ;;  %v4960_v52 = vadd.f32 %v4959_v56, %v9738_v31 }
 0xbcf   :  { %v5153_v18 = vpack.c.bf16 %v5065_v27, %v5057_v10  ;;  %v5155_v39 = vpack.c.bf16 %v5067_v3, %v5059_v20  ;;  %v4849_v4 = vadd.f32 %v4848_v51, %v9727_v1  ;;  %v4962_v50 = vadd.f32 %v4961_v26, %v9730_v55 }
 0xbd0   :  { %v4850_v22 = vpop.f32.mrf.mxu0  ;;  %v4963_v41 = vpop.f32.mrf.mxu1  ;;  %v5072_v6 = vmax.f32 %v4847_v60, 0.0  ;;  %v5074_v7 = vmax.f32 %v4960_v52, 0.0 }
 0xbd1   :  { %v4851_v15 = vadd.f32 %v4850_v22, %v9735_v19  ;;  %v4964_v29 = vadd.f32 %v4963_v41, %v9738_v31  ;;  %6257 = vmatprep.mubr.bf16.mxu0 %v5153_v18  ;;  %6370 = vmatprep.mubr.bf16.mxu1 %v5155_v39  ;;  %v5073_v58 = vmax.f32 %v4849_v4, 0.0  ;;  %v5075_v62 = vmax.f32 %v4962_v50, 0.0 }
 0xbd2   :  { %v4852_v16 = vpop.f32.mrf.mxu0  ;;  %v4965_v24 = vpop.f32.mrf.mxu1  ;;  %6258 = vmatmul.mubr.bf16.gmra.mxu0 %v5152_v38  ;;  %6371 = vmatmul.mubr.bf16.gmra.mxu1 %v5154_v40 }
 0xbd3   :  { %v4853_v13 = vadd.f32 %v4852_v16, %v9727_v1  ;;  %v4966_v34 = vadd.f32 %v4965_v24, %v9730_v55  ;;  %v5080_v2 = vmax.f32 %v4851_v15, 0.0  ;;  %v5082_v43 = vmax.f32 %v4964_v29, 0.0 }
 0xbd4   :  { %v4856_v14 = vpop.f32.mrf.mxu0  ;;  %v4969_v63 = vpop.f32.mrf.mxu1 }
 0xbd5   :  { %v5081_v57 = vmax.f32 %v4853_v13, 0.0  ;;  %v5083_v59 = vmax.f32 %v4966_v34, 0.0  ;;  %v5160_v20 = vpack.c.bf16 %v5080_v2, %v5072_v6  ;;  %v5162_v27 = vpack.c.bf16 %v5082_v43, %v5074_v7 }
 0xbd6   :  { %v4858_v32 = vpop.f32.mrf.mxu0  ;;  %v4971_v45 = vpop.f32.mrf.mxu1  ;;  %v4857_v39 = vadd.f32 %v4856_v14, %v9735_v19  ;;  %v4970_v38 = vadd.f32 %v4969_v63, %v9738_v31 }
 0xbd7   :  { %v5161_v56 = vpack.c.bf16 %v5081_v57, %v5073_v58  ;;  %v5163_v10 = vpack.c.bf16 %v5083_v59, %v5075_v62  ;;  %v4859_v3 = vadd.f32 %v4858_v32, %v9727_v1  ;;  %v4972_v51 = vadd.f32 %v4971_v45, %v9730_v55 }
 0xbd8   :  { %v4860_v37 = vpop.f32.mrf.mxu0  ;;  %v4973_v30 = vpop.f32.mrf.mxu1  ;;  %v5088_v34 = vmax.f32 %v4857_v39, 0.0  ;;  %v5090_v2 = vmax.f32 %v4970_v38, 0.0 }
 0xbd9   :  { %v4861_v26 = vadd.f32 %v4860_v37, %v9735_v19  ;;  %v4974_v18 = vadd.f32 %v4973_v30, %v9738_v31  ;;  %6267 = vmatprep.mubr.bf16.mxu0 %v5161_v56  ;;  %6380 = vmatprep.mubr.bf16.mxu1 %v5163_v10  ;;  %v5089_v52 = vmax.f32 %v4859_v3, 0.0  ;;  %v5091_v16 = vmax.f32 %v4972_v51, 0.0 }
 0xbda   :  { %v4862_v40 = vpop.f32.mrf.mxu0  ;;  %v4975_v4 = vpop.f32.mrf.mxu1  ;;  %6268 = vmatmul.mubr.bf16.gmra.mxu0 %v5160_v20  ;;  %6381 = vmatmul.mubr.bf16.gmra.mxu1 %v5162_v27 }
 0xbdb   :  { %v4863_v22 = vadd.f32 %v4862_v40, %v9727_v1  ;;  %v4976_v41 = vadd.f32 %v4975_v4, %v9730_v55  ;;  %v5096_v50 = vmax.f32 %v4861_v26, 0.0  ;;  %v5098_v15 = vmax.f32 %v4974_v18, 0.0 }
 0xbdc   :  { %v4866_v29 = vpop.f32.mrf.mxu0  ;;  %v4979_v60 = vpop.f32.mrf.mxu1 }
 0xbdd   :  { %v5097_v24 = vmax.f32 %v4863_v22, 0.0  ;;  %v5099_v13 = vmax.f32 %v4976_v41, 0.0  ;;  %v5168_v62 = vpack.c.bf16 %v5096_v50, %v5088_v34  ;;  %v5170_v57 = vpack.c.bf16 %v5098_v15, %v5090_v2 }
 0xbde   :  { %v4868_v43 = vpop.f32.mrf.mxu0  ;;  %v4981_v14 = vpop.f32.mrf.mxu1  ;;  %v4867_v10 = vadd.f32 %v4866_v29, %v9735_v19  ;;  %v4980_v20 = vadd.f32 %v4979_v60, %v9738_v31 }
 0xbdf   :  { %v5169_v63 = vpack.c.bf16 %v5097_v24, %v5089_v52  ;;  %v5171_v58 = vpack.c.bf16 %v5099_v13, %v5091_v16  ;;  %v4869_v59 = vadd.f32 %v4868_v43, %v9727_v1  ;;  %v4982_v32 = vadd.f32 %v4981_v14, %v9730_v55 }
 0xbe0   :  { %v4870_v6 = vpop.f32.mrf.mxu0  ;;  %v4983_v7 = vpop.f32.mrf.mxu1  ;;  %v5104_v4 = vmax.f32 %v4867_v10, 0.0  ;;  %v5106_v22 = vmax.f32 %v4980_v20, 0.0 }
 0xbe1   :  { %v4871_v45 = vadd.f32 %v4870_v6, %v9735_v19  ;;  %v4984_v56 = vadd.f32 %v4983_v7, %v9738_v31  ;;  %6277 = vmatprep.mubr.bf16.mxu0 %v5169_v63  ;;  %6390 = vmatprep.mubr.bf16.mxu1 %v5171_v58  ;;  %v5105_v18 = vmax.f32 %v4869_v59, 0.0  ;;  %v5107_v39 = vmax.f32 %v4982_v32, 0.0 }
 0xbe2   :  { %v4872_v27 = vpop.f32.mrf.mxu0  ;;  %v4985_v3 = vpop.f32.mrf.mxu1  ;;  %6278 = vmatmul.mubr.bf16.gmra.mxu0 %v5168_v62  ;;  %6391 = vmatmul.mubr.bf16.gmra.mxu1 %v5170_v57 }
 0xbe3   :  { %v4873_v37 = vadd.f32 %v4872_v27, %v9727_v1  ;;  %v4986_v30 = vadd.f32 %v4985_v3, %v9730_v55  ;;  %v5112_v51 = vmax.f32 %v4871_v45, 0.0  ;;  %v5114_v26 = vmax.f32 %v4984_v56, 0.0 }
 0xbe5   :  { %v5113_v38 = vmax.f32 %v4873_v37, 0.0  ;;  %v5115_v40 = vmax.f32 %v4986_v30, 0.0  ;;  %v5176_v50 = vpack.c.bf16 %v5112_v51, %v5104_v4  ;;  %v5178_v31 = vpack.c.bf16 %v5114_v26, %v5106_v22  ;;  %v9804_v15 = vpop.f32.mrf.mxu0  ;;  %v9806_v1 = vpop.f32.mrf.mxu1 }
 0xbe7   :  { %v5177_v41 = vpack.c.bf16 %v5113_v38, %v5105_v18  ;;  %v5179_v19 = vpack.c.bf16 %v5115_v40, %v5107_v39  ;;  %v9808_v55 = vpop.f32.mrf.mxu0  ;;  %v9810_v29 = vpop.f32.mrf.mxu1 }
 0xbe9   :  { %6287 = vmatprep.mubr.bf16.mxu0 %v5177_v41  ;;  %6400 = vmatprep.mubr.bf16.mxu1 %v5179_v19  ;;  %v9812_v60 = vpop.f32.mrf.mxu0  ;;  %v9814_v52 = vpop.f32.mrf.mxu1 }
 0xbea   :  { %6288 = vmatmul.mubr.bf16.gmra.mxu0 %v5176_v50  ;;  %6401 = vmatmul.mubr.bf16.gmra.mxu1 %v5178_v31 }
 0xbeb   :  { %v9816_v16 = vpop.f32.mrf.mxu0  ;;  %v9818_v24 = vpop.f32.mrf.mxu1 }
 0xbed   :  { %v9820_v13 = vpop.f32.mrf.mxu0  ;;  %v9822_v34 = vpop.f32.mrf.mxu1 }
 0xbef   :  { %v9824_v2 = vpop.f32.mrf.mxu0  ;;  %v9826_v43 = vpop.f32.mrf.mxu1 }
 0xbf1   :  { %v9828_v14 = vpop.f32.mrf.mxu0  ;;  %v9830_v63 = vpop.f32.mrf.mxu1 }
 0xbf3   :  { %v9832_v58 = vpop.f32.mrf.mxu0  ;;  %v9834_v62 = vpop.f32.mrf.mxu1 }
 0xbf5   :  { %v9836_v57 = vpop.f32.mrf.mxu0  ;;  %v9838_v59 = vpop.f32.mrf.mxu1 }
 0xbf7   :  { %v9840_v6 = vpop.f32.mrf.mxu0  ;;  %v9842_v7 = vpop.f32.mrf.mxu1 }
 0xbf9   :  { %v9844_v32 = vpop.f32.mrf.mxu0  ;;  %v9846_v45 = vpop.f32.mrf.mxu1 }
 0xbfb   :  { %v9848_v56 = vpop.f32.mrf.mxu0  ;;  %v9850_v10 = vpop.f32.mrf.mxu1 }
 0xbfd   :  { %v9852_v20 = vpop.f32.mrf.mxu0  ;;  %v9854_v27 = vpop.f32.mrf.mxu1 }
 0xbff   :  { %v9856_v3 = vpop.f32.mrf.mxu0  ;;  %v9858_v37 = vpop.f32.mrf.mxu1 }
 0xc01   :  { %v9860_v30 = vpop.f32.mrf.mxu0  ;;  %v9862_v51 = vpop.f32.mrf.mxu1 }
 0xc03   :  { %v9864_v26 = vpop.f32.mrf.mxu0  ;;  %v9866_v18 = vpop.f32.mrf.mxu1 }
 0xc51   :  { %v9868_v39 = vpop.f32.mrf.mxu0  ;;  %v9870_v38 = vpop.f32.mrf.mxu1 }
 0xc53   :  { %v9872_v40 = vpop.f32.mrf.mxu0  ;;  %v9874_v4 = vpop.f32.mrf.mxu1 }
 0xc55   :  { %v9876_v22 = vpop.f32.mrf.mxu0  ;;  %v9878_v41 = vpop.f32.mrf.mxu1 }
 0xc57   :  { %v9880_v19 = vpop.f32.mrf.mxu0  ;;  %v9882_v50 = vpop.f32.mrf.mxu1 }
 0xc58   :  { %10504 = vst [vmem:[#allocation46_spill] sm:$0xff] %v9882_v50 }
 0xc59   :  { %v9884_v31 = vpop.f32.mrf.mxu0  ;;  %v9886_v11 = vpop.f32.mrf.mxu1 }
 0xc5a   :  { %10505 = vst [vmem:[#allocation47_spill] sm:$0xff] %v9884_v31  ;;  %10506 = vst [vmem:[#allocation48_spill] sm:$0xff] %v9886_v11 }
 0xc5b   :  { %v9888_v25 = vpop.f32.mrf.mxu0  ;;  %v9890_v9 = vpop.f32.mrf.mxu1 }
 0xc5c   :  { %10507 = vst [vmem:[#allocation49_spill] sm:$0xff] %v9888_v25  ;;  %10508 = vst [vmem:[#allocation50_spill] sm:$0xff] %v9890_v9  ;;  %v108_v9 = vld [vmem:[#allocation13 + $0x10] sm:$0x3] }
 0xc5d   :  { %v9892_v44 = vpop.f32.mrf.mxu0  ;;  %v9894_v28 = vpop.f32.mrf.mxu1 }
 0xc5e   :  { %10509 = vst [vmem:[#allocation51_spill] sm:$0xff] %v9892_v44  ;;  %10510 = vst [vmem:[#allocation52_spill] sm:$0xff] %v9894_v28 }
 0xc5f   :  { %v9896_v61 = vpop.f32.mrf.mxu0  ;;  %v9898_v0 = vpop.f32.mrf.mxu1 }
 0xc60   :  { %10511 = vst [vmem:[#allocation53_spill] sm:$0xff] %v9896_v61  ;;  %10512 = vst [vmem:[#allocation54_spill] sm:$0xff] %v9898_v0  ;;  %v9917_v61 = vrot.slane %v108_v9, %v8650_v33 }
 0xc61   :  { %v9900_v23 = vpop.f32.mrf.mxu0  ;;  %v9902_v35 = vpop.f32.mrf.mxu1 }
 0xc62   :  { %10513 = vst [vmem:[#allocation55_spill] sm:$0xff] %v9900_v23  ;;  %10514 = vst [vmem:[#allocation56_spill] sm:$0xff] %v9902_v35  ;;  %v9924_v35 = vrot.slane %v108_v9, %v8653_v36  ;;  %v5998_v36 = vadd.f32 %v9812_v60, %v9917_v61 }
 0xc63   :  { %v9904_v42 = vpop.f32.mrf.mxu0  ;;  %v9906_v17 = vpop.f32.mrf.mxu1 }
 0xc64   :  { %10515 = vst [vmem:[#allocation57_spill] sm:$0xff] %v9904_v42  ;;  %10516 = vst [vmem:[#allocation58_spill] sm:$0xff] %v9906_v17  ;;  %v5996_v33 = vadd.f32 %v9808_v55, %v9924_v35  ;;  %v6004_v55 = vadd.f32 %v9820_v13, %v9917_v61 }
 0xc65   :  { %v9908_v21 = vpop.f32.mrf.mxu0  ;;  %v9910_v11 = vpop.f32.mrf.mxu1 }
 0xc66   :  { %10517 = vst [vmem:[#allocation59_spill] sm:$0xff] %v9908_v21  ;;  %10518 = vst [vmem:[#allocation60_spill] sm:$0xff] %v9910_v11  ;;  %v5994_v11 = vadd.f32 %v9804_v15, %v9917_v61  ;;  %v6109_v15 = vadd.f32 %v9810_v29, %v5996_v33 }
 0xc67   :  { %v9912_v44 = vpop.f32.mrf.mxu0  ;;  %v9914_v28 = vpop.f32.mrf.mxu1 }
 0xc68   :  { %10519 = vst [vmem:[#allocation61_spill] sm:$0xff] %v9912_v44  ;;  %10520 = vst [vmem:[#allocation62_spill] sm:$0xff] %v9914_v28  ;;  %v6107_v9 = vadd.f32 %v9806_v1, %v5994_v11  ;;  %v6006_v1 = vadd.f32 %v9824_v2, %v9924_v35 }
 0xc6a   :  { %v9919_v0 = vpop.f32.mrf.mxu0  ;;  %v9921_v23 = vpop.f32.mrf.mxu1 }
 0xc6b   :  { %10521 = vst [vmem:[#allocation63_spill] sm:$0xff] %v9919_v0  ;;  %10522 = vst [vmem:[#allocation64_spill] sm:$0xff] %v9921_v23 }
 0xc6c   :  { %v9926_v17 = vpop.f32.mrf.mxu0  ;;  %v9928_v21 = vpop.f32.mrf.mxu1 }
 0xc6d   :  { %10523 = vst [vmem:[#allocation65_spill] sm:$0xff] %v9926_v17  ;;  %10524 = vst [vmem:[#allocation66_spill] sm:$0xff] %v9928_v21 }
 0xc6e   :  { %v9932_v44 = vpop.f32.mrf.mxu0  ;;  %v9934_v28 = vpop.f32.mrf.mxu1 }
 0xc6f   :  { %10525 = vst [vmem:[#allocation67_spill] sm:$0xff] %v9932_v44  ;;  %10526 = vst [vmem:[#allocation68_spill] sm:$0xff] %v9934_v28  ;;  %v6000_v44 = vadd.f32 %v9816_v16, %v9924_v35  ;;  %v6008_v16 = vadd.f32 %v9828_v14, %v9917_v61 }
 0xc70   :  { %v9938_v0 = vpop.f32.mrf.mxu0  ;;  %v9940_v23 = vpop.f32.mrf.mxu1 }
 0xc71   :  { %10527 = vst [vmem:[#allocation69_spill] sm:$0xff] %v9938_v0  ;;  %10528 = vst [vmem:[#allocation70_spill] sm:$0xff] %v9940_v23  ;;  %v6111_v23 = vadd.f32 %v9814_v52, %v5998_v36  ;;  %v6113_v33 = vadd.f32 %v9818_v24, %v6000_v44  ;;  %v6119_v52 = vadd.f32 %v9826_v43, %v6006_v1  ;;  %v10530_v43 = vld [vmem:[#allocation23_spill] sm:$0xff] }
 0xc72   :  { %v6219_v21 = vpop.f32.mrf.mxu0  ;;  %v6332_v17 = vpop.f32.mrf.mxu1 }
 0xc73   :  { %v6220_v28 = vadd.f32 %v6219_v21, %v6107_v9  ;;  %v6117_v21 = vadd.f32 %v9822_v34, %v6004_v55 }
 0xc74   :  { %v6221_v42 = vpop.f32.mrf.mxu0  ;;  %v6334_v0 = vpop.f32.mrf.mxu1 }
 0xc75   :  { %v6333_v50 = vadd.f32 %v6332_v17, %v6220_v28  ;;  %v6222_v11 = vadd.f32 %v6221_v42, %v6109_v15 }
 0xc76   :  { %v6223_v60 = vpop.f32.mrf.mxu0  ;;  %v6336_v25 = vpop.f32.mrf.mxu1 }
 0xc77   :  { %v6335_v29 = vadd.f32 %v6334_v0, %v6222_v11  ;;  %v6224_v31 = vadd.f32 %v6223_v60, %v6111_v23  ;;  %v9958_v36 = vadd.f32 %v6333_v50, %v9336_v49  ;;  %v6010_v23 = vadd.f32 %v9832_v58, %v9924_v35  ;;  %v10529_v50 = vld [vmem:[#allocation24_spill] sm:$0xff] }
 0xc78   :  { %v6225_v13 = vpop.f32.mrf.mxu0  ;;  %v6338_v9 = vpop.f32.mrf.mxu1  ;;  %v6121_v49 = vadd.f32 %v9830_v63, %v6008_v16  ;;  %v6016_v11 = vadd.f32 %v9840_v6, %v9924_v35  ;;  %v6018_v16 = vadd.f32 %v9844_v32, %v9917_v61 }
 0xc79   :  { %v9961_v17 = vadd.f32 %v6335_v29, %v9333_v12  ;;  %v6337_v42 = vadd.f32 %v6336_v25, %v6224_v31  ;;  %v6226_v28 = vadd.f32 %v6225_v13, %v6113_v33  ;;  %v6014_v12 = vadd.f32 %v9836_v57, %v9917_v61 }
 0xc7a   :  { %v6229_v44 = vpop.f32.mrf.mxu0  ;;  %v6342_v0 = vpop.f32.mrf.mxu1  ;;  %v6123_v63 = vadd.f32 %v9834_v62, %v6010_v23 }
 0xc7b   :  { %v6339_v24 = vadd.f32 %v6338_v9, %v6226_v28  ;;  %v6230_v34 = vadd.f32 %v6229_v44, %v6117_v21  ;;  %v6443_v2 = vadd.f32 %v9961_v17, %v9958_v36  ;;  %v9972_v31 = vadd.f32 %v6337_v42, %v10529_v50 }
 0xc7c   :  { %v6231_v14 = vpop.f32.mrf.mxu0  ;;  %v6344_v25 = vpop.f32.mrf.mxu1  ;;  %v6127_v21 = vadd.f32 %v9838_v59, %v6014_v12  ;;  %v6020_v59 = vadd.f32 %v9848_v56, %v9924_v35 }
 0xc7d   :  { %v9975_v15 = vadd.f32 %v6339_v24, %v10530_v43  ;;  %v6343_v55 = vadd.f32 %v6342_v0, %v6230_v34  ;;  %v6232_v58 = vadd.f32 %v6231_v14, %v6119_v52  ;;  %6444 = vadd.xlane.f32.xlu0 %v6443_v2  ;;  %v6129_v52 = vadd.f32 %v9842_v7, %v6016_v11  ;;  %v10531_v7 = vld [vmem:[#allocation25_spill] sm:$0xff] }
 0xc7e   :  { %v6233_v1 = vpop.f32.mrf.mxu0  ;;  %v6346_v60 = vpop.f32.mrf.mxu1  ;;  %v6028_v11 = vadd.f32 %v9860_v30, %v9917_v61 }
 0xc7f   :  { %v6345_v33 = vadd.f32 %v6344_v25, %v6232_v58  ;;  %v6234_v57 = vadd.f32 %v6233_v1, %v6121_v49  ;;  %v6446_v29 = vadd.f32 %v9975_v15, %v9972_v31  ;;  %v9986_v42 = vadd.f32 %v6343_v55, %v9394_v48 }
 0xc80   :  { %v6235_v13 = vpop.f32.mrf.mxu0  ;;  %v6348_v9 = vpop.f32.mrf.mxu1  ;;  %v6131_v48 = vadd.f32 %v9846_v45, %v6018_v16  ;;  %v6026_v25 = vadd.f32 %v9856_v3, %v9924_v35  ;;  %v6133_v45 = vadd.f32 %v9850_v10, %v6020_v59 }
 0xc81   :  { %v9989_v6 = vadd.f32 %v6345_v33, %v9362_v47  ;;  %v6347_v28 = vadd.f32 %v6346_v60, %v6234_v57  ;;  %v6236_v62 = vadd.f32 %v6235_v13, %v6123_v63  ;;  %6447 = vadd.xlane.f32.xlu1 %v6446_v29  ;;  %v6024_v47 = vadd.f32 %v9852_v20, %v9917_v61 }
 0xc82   :  { %v6239_v44 = vpop.f32.mrf.mxu0  ;;  %v6352_v0 = vpop.f32.mrf.mxu1  ;;  %v6139_v57 = vadd.f32 %v9858_v37, %v6026_v25  ;;  %v10532_v37 = vld [vmem:[#allocation26_spill] sm:$0xff] }
 0xc83   :  { %v6349_v23 = vadd.f32 %v6348_v9, %v6236_v62  ;;  %v6240_v32 = vadd.f32 %v6239_v44, %v6127_v21  ;;  %v6449_v24 = vadd.f32 %v9989_v6, %v9986_v42  ;;  %v10000_v49 = vadd.f32 %v6347_v28, %v9381_v53 }
 0xc84   :  { %v6241_v34 = vpop.f32.mrf.mxu0  ;;  %v6354_v2 = vpop.f32.mrf.mxu1  ;;  %v6137_v53 = vadd.f32 %v9854_v27, %v6024_v47  ;;  %v6030_v27 = vadd.f32 %v9864_v26, %v9924_v35 }
 0xc85   :  { %v10003_v12 = vadd.f32 %v6349_v23, %v10531_v7  ;;  %v6353_v14 = vadd.f32 %v6352_v0, %v6240_v32  ;;  %v6242_v56 = vadd.f32 %v6241_v34, %v6129_v52  ;;  %6450 = vadd.xlane.f32.xlu0 %v6449_v24  ;;  %v6036_v0 = vadd.f32 %v9872_v40, %v9924_v35  ;;  %v10533_v40 = vld [vmem:[#allocation28_spill] sm:$0xff] }
 0xc86   :  { %v6243_v50 = vpop.f32.mrf.mxu0  ;;  %v6356_v43 = vpop.f32.mrf.mxu1 }
 0xc87   :  { %v6355_v55 = vadd.f32 %v6354_v2, %v6242_v56  ;;  %v6244_v20 = vadd.f32 %v6243_v50, %v6131_v48  ;;  %v6452_v58 = vadd.f32 %v10003_v12, %v10000_v49  ;;  %v10014_v63 = vadd.f32 %v6353_v14, %v9425_v5 }
 0xc88   :  { %v6245_v1 = vpop.f32.mrf.mxu0  ;;  %v6358_v60 = vpop.f32.mrf.mxu1  ;;  %v6141_v5 = vadd.f32 %v9862_v51, %v6028_v11  ;;  %v6143_v51 = vadd.f32 %v9866_v18, %v6030_v27  ;;  %v6038_v48 = vadd.f32 %v9876_v22, %v9917_v61  ;;  %v6149_v56 = vadd.f32 %v9874_v4, %v6036_v0  ;;  %v10535_v11 = vld [vmem:[#allocation29_spill] sm:$0xff]  ;;  %v10536_v4 = vld [vmem:[#allocation27_spill] sm:$0xff] }
 0xc89   :  { %v10017_v3 = vadd.f32 %v6355_v55, %v9398_v54  ;;  %v6357_v33 = vadd.f32 %v6356_v43, %v6244_v20  ;;  %v6246_v10 = vadd.f32 %v6245_v1, %v6133_v45  ;;  %6453 = vadd.xlane.f32.xlu1 %v6452_v58  ;;  %v6034_v54 = vadd.f32 %v9868_v39, %v9917_v61  ;;  %v10534_v55 = vld [vmem:[#allocation47_spill] sm:$0xff] }
 0xc8a   :  { %v6249_v29 = vpop.f32.mrf.mxu0  ;;  %v6362_v21 = vpop.f32.mrf.mxu1  ;;  %v6044_v20 = vadd.f32 %v10534_v55, %v9917_v61  ;;  %v10548_v55 = vld [vmem:[#allocation32_spill] sm:$0xff] }
 0xc8b   :  { %v6359_v16 = vadd.f32 %v6358_v60, %v6246_v10  ;;  %v6250_v30 = vadd.f32 %v6249_v29, %v6137_v53  ;;  %v6455_v13 = vadd.f32 %v10017_v3, %v10014_v63  ;;  %v10028_v62 = vadd.f32 %v6357_v33, %v9418_v8  ;;  %v10537_v10 = vld [vmem:[#allocation49_spill] sm:$0xff] }
 0xc8c   :  { %v6251_v9 = vpop.f32.mrf.mxu0  ;;  %v6364_v28 = vpop.f32.mrf.mxu1  ;;  %v6147_v8 = vadd.f32 %v9870_v38, %v6034_v54  ;;  %v6040_v38 = vadd.f32 %v9880_v19, %v9924_v35 }
 0xc8d   :  { %v10031_v52 = vadd.f32 %v6359_v16, %v10532_v37  ;;  %v6363_v44 = vadd.f32 %v6362_v21, %v6250_v30  ;;  %v6252_v26 = vadd.f32 %v6251_v9, %v6139_v57  ;;  %6456 = vadd.xlane.f32.xlu0 %v6455_v13  ;;  %v6046_v57 = vadd.f32 %v10537_v10, %v9924_v35  ;;  %v10540_v9 = vld [vmem:[#allocation51_spill] sm:$0xff]  ;;  %v10550_v10 = vld [vmem:[#allocation54_spill] sm:$0xff] }
 0xc8e   :  { %v6253_v59 = vpop.f32.mrf.mxu0  ;;  %v6366_v23 = vpop.f32.mrf.mxu1 }
 0xc8f   :  { %v6365_v32 = vadd.f32 %v6364_v28, %v6252_v26  ;;  %v6254_v39 = vadd.f32 %v6253_v59, %v6141_v5  ;;  %v6458_v24 = vadd.f32 %v10031_v52, %v10028_v62  ;;  %v10042_v2 = vadd.f32 %v6363_v44, %v9449_v46  ;;  %v10539_v5 = vld [vmem:[#allocation48_spill] sm:$0xff]  ;;  %v10541_v26 = vld [vmem:[#allocation31_spill] sm:$0xff]  ;;  %v10542_v59 = vld [vmem:[#allocation30_spill] sm:$0xff] }
 0xc90   :  { %v6255_v47 = vpop.f32.mrf.mxu0  ;;  %v6368_v34 = vpop.f32.mrf.mxu1  ;;  %v6151_v46 = vadd.f32 %v9878_v41, %v6038_v48  ;;  %v10538_v41 = vld [vmem:[#allocation46_spill] sm:$0xff]  ;;  %v6157_v54 = vadd.f32 %v10539_v5, %v6044_v20  ;;  %v6048_v28 = vadd.f32 %v10540_v9, %v9917_v61  ;;  %v10553_v9 = vld [vmem:[#allocation35_spill] sm:$0xff] }
 0xc91   :  { %v10045_v7 = vadd.f32 %v6365_v32, %v10533_v40  ;;  %v6367_v14 = vadd.f32 %v6366_v23, %v6254_v39  ;;  %v6256_v18 = vadd.f32 %v6255_v47, %v6143_v51  ;;  %6459 = vadd.xlane.f32.xlu1 %v6458_v24  ;;  %v6153_v27 = vadd.f32 %v10538_v41, %v6040_v38  ;;  %v10543_v39 = vld [vmem:[#allocation50_spill] sm:$0xff]  ;;  %v10544_v47 = vld [vmem:[#allocation53_spill] sm:$0xff] }
 0xc92   :  { %v6259_v25 = vpop.f32.mrf.mxu0  ;;  %v6372_v50 = vpop.f32.mrf.mxu1  ;;  %v6159_v24 = vadd.f32 %v10543_v39, %v6046_v57 }
 0xc93   :  { %v6369_v43 = vadd.f32 %v6368_v34, %v6256_v18  ;;  %v6260_v22 = vadd.f32 %v6259_v25, %v6147_v8  ;;  %v6461_v45 = vadd.f32 %v10045_v7, %v10042_v2  ;;  %v10056_v1 = vadd.f32 %v6367_v14, %v10535_v11  ;;  %v10549_v11 = vld [vmem:[#allocation57_spill] sm:$0xff] }
 0xc94   :  { %v6261_v58 = vpop.f32.mrf.mxu0  ;;  %v6374_v53 = vpop.f32.mrf.mxu1  ;;  %v6050_v34 = vadd.f32 %v10544_v47, %v9924_v35 }
 0xc95   :  { %v10059_v60 = vadd.f32 %v6369_v43, %v10536_v4  ;;  %v6373_v33 = vadd.f32 %v6372_v50, %v6260_v22  ;;  %v6262_v19 = vadd.f32 %v6261_v58, %v6149_v56  ;;  %6462 = vadd.xlane.f32.xlu0 %v6461_v45  ;;  %v10545_v56 = vld [vmem:[#allocation52_spill] sm:$0xff]  ;;  %v10546_v50 = vld [vmem:[#allocation55_spill] sm:$0xff]  ;;  %v10547_v45 = vld [vmem:[#allocation33_spill] sm:$0xff]  ;;  %v6056_v4 = vadd.f32 %v10549_v11, %v9924_v35 }
 0xc96   :  { %v6263_v29 = vpop.f32.mrf.mxu0  ;;  %v6376_v21 = vpop.f32.mrf.mxu1  ;;  %v6161_v25 = vadd.f32 %v10545_v56, %v6048_v28  ;;  %v6054_v38 = vadd.f32 %v10546_v50, %v9917_v61  ;;  %v6163_v57 = vadd.f32 %v10550_v10, %v6050_v34  ;;  %v10558_v56 = vld [vmem:[#allocation63_spill] sm:$0xff]  ;;  %v10561_v11 = vld [vmem:[#allocation65_spill] sm:$0xff]  ;;  %v10562_v10 = vld [vmem:[#allocation62_spill] sm:$0xff] }
 0xc97   :  { %v6375_v16 = vadd.f32 %v6374_v53, %v6262_v19  ;;  %v6264_v30 = vadd.f32 %v6263_v29, %v6151_v46  ;;  %v6464_v13 = vadd.f32 %v10059_v60, %v10056_v1  ;;  %v10070_v0 = vadd.f32 %v6373_v33, %v10541_v26 }
 0xc98   :  { %v6265_v37 = vpop.f32.mrf.mxu0  ;;  %v6378_v44 = vpop.f32.mrf.mxu1 }
 0xc99   :  { %v10073_v23 = vadd.f32 %v6375_v16, %v10542_v59  ;;  %v6377_v51 = vadd.f32 %v6376_v21, %v6264_v30  ;;  %v6266_v32 = vadd.f32 %v6265_v37, %v6153_v27  ;;  %6465 = vadd.xlane.f32.xlu1 %v6464_v13  ;;  %v10551_v27 = vld [vmem:[#allocation56_spill] sm:$0xff]  ;;  %v10552_v30 = vld [vmem:[#allocation59_spill] sm:$0xff]  ;;  %v10554_v37 = vld [vmem:[#allocation34_spill] sm:$0xff] }
 0xc9a   :  { %v6269_v8 = vpop.f32.mrf.mxu0  ;;  %v6382_v48 = vpop.f32.mrf.mxu1  ;;  %v6167_v16 = vadd.f32 %v10551_v27, %v6054_v38  ;;  %v6058_v13 = vadd.f32 %v10552_v30, %v9917_v61  ;;  %v10563_v27 = vld [vmem:[#allocation64_spill] sm:$0xff]  ;;  %v10564_v30 = vld [vmem:[#allocation67_spill] sm:$0xff] }
 0xc9b   :  { %v6379_v40 = vadd.f32 %v6378_v44, %v6266_v32  ;;  %v6270_v14 = vadd.f32 %v6269_v8, %v6157_v54  ;;  %v6467_v18 = vadd.f32 %v10073_v23, %v10070_v0  ;;  %v10084_v46 = vadd.f32 %v6377_v51, %v10547_v45  ;;  %v10555_v51 = vld [vmem:[#allocation58_spill] sm:$0xff]  ;;  %v10556_v8 = vld [vmem:[#allocation61_spill] sm:$0xff]  ;;  %v10560_v45 = vld [vmem:[#allocation36_spill] sm:$0xff] }
 0xc9c   :  { %v6271_v43 = vpop.f32.mrf.mxu0  ;;  %v6384_v22 = vpop.f32.mrf.mxu1  ;;  %v6169_v32 = vadd.f32 %v10555_v51, %v6056_v4  ;;  %v6066_v4 = vadd.f32 %v10561_v11, %v9924_v35 }
 0xc9d   :  { %v10087_v20 = vadd.f32 %v6379_v40, %v10548_v55  ;;  %v6383_v58 = vadd.f32 %v6382_v48, %v6270_v14  ;;  %v6272_v53 = vadd.f32 %v6271_v43, %v6159_v24  ;;  %6468 = vadd.xlane.f32.xlu0 %v6467_v18  ;;  %v6060_v48 = vadd.f32 %v10556_v8, %v9924_v35  ;;  %v10557_v14 = vld [vmem:[#allocation60_spill] sm:$0xff]  ;;  %v10559_v43 = vld [vmem:[#allocation37_spill] sm:$0xff] }
 0xc9e   :  { %v6273_v33 = vpop.f32.mrf.mxu0  ;;  %v6386_v19 = vpop.f32.mrf.mxu1  ;;  %v6171_v18 = vadd.f32 %v10557_v14, %v6058_v13  ;;  %v6068_v13 = vadd.f32 %v10564_v30, %v9917_v61 }
 0xc9f   :  { %v6385_v29 = vadd.f32 %v6384_v22, %v6272_v53  ;;  %v6274_v21 = vadd.f32 %v6273_v33, %v6161_v25  ;;  %v6470_v41 = vadd.f32 %v10087_v20, %v10084_v46  ;;  %v10098_v28 = vadd.f32 %v6383_v58, %v10553_v9  ;;  %v10565_v9 = vld [vmem:[#allocation40_spill] sm:$0xff] }
 0xca0   :  { %v6275_v5 = vpop.f32.mrf.mxu0  ;;  %v6388_v54 = vpop.f32.mrf.mxu1  ;;  %v6064_v25 = vadd.f32 %v10558_v56, %v9917_v61 }
 0xca1   :  { %v10101_v44 = vadd.f32 %v6385_v29, %v10554_v37  ;;  %v6387_v26 = vadd.f32 %v6386_v19, %v6274_v21  ;;  %v6276_v59 = vadd.f32 %v6275_v5, %v6163_v57  ;;  %6471 = vadd.xlane.f32.xlu1 %v6470_v41  ;;  %v6173_v57 = vadd.f32 %v10562_v10, %v6060_v48 }
 0xca2   :  { %v6279_v39 = vpop.f32.mrf.mxu0  ;;  %v6392_v24 = vpop.f32.mrf.mxu1 }
 0xca3   :  { %v6389_v47 = vadd.f32 %v6388_v54, %v6276_v59  ;;  %v6280_v34 = vadd.f32 %v6279_v39, %v6167_v16  ;;  %v6473_v40 = vadd.f32 %v10101_v44, %v10098_v28  ;;  %v10112_v22 = vadd.f32 %v6387_v26, %v10559_v43  ;;  %v10566_v26 = vld [vmem:[#allocation38_spill] sm:$0xff] }
 0xca4   :  { %v6281_v50 = vpop.f32.mrf.mxu0  ;;  %v6394_v38 = vpop.f32.mrf.mxu1  ;;  %v6177_v16 = vadd.f32 %v10563_v27, %v6064_v25  ;;  %v10567_v39 = vld [vmem:[#allocation66_spill] sm:$0xff] }
 0xca5   :  { %v10115_v55 = vadd.f32 %v6389_v47, %v10560_v45  ;;  %v6393_v58 = vadd.f32 %v6392_v24, %v6280_v34  ;;  %v6282_v53 = vadd.f32 %v6281_v50, %v6169_v32  ;;  %6474 = vadd.xlane.f32.xlu0 %v6473_v40  ;;  %v6179_v24 = vadd.f32 %v10567_v39, %v6066_v4  ;;  %v10568_v47 = vld [vmem:[#allocation69_spill] sm:$0xff]  ;;  %v10571_v45 = vld [vmem:[#allocation39_spill] sm:$0xff] }
 0xca6   :  { %v6283_v33 = vpop.f32.mrf.mxu0  ;;  %v6396_v19 = vpop.f32.mrf.mxu1  ;;  %v6070_v34 = vadd.f32 %v10568_v47, %v9924_v35  ;;  %v10576_v39 = vld [vmem:[#allocation43_spill] sm:$0xff] }
 0xca7   :  { %v6395_v29 = vadd.f32 %v6394_v38, %v6282_v53  ;;  %v6284_v21 = vadd.f32 %v6283_v33, %v6171_v18  ;;  %v6476_v41 = vadd.f32 %v10115_v55, %v10112_v22  ;;  %v10126_v37 = vadd.f32 %v6393_v58, %v10565_v9  ;;  %v10569_v18 = vld [vmem:[#allocation68_spill] sm:$0xff]  ;;  %v10570_v38 = vld [vmem:[#allocation41_spill] sm:$0xff]  ;;  %v10572_v33 = vld [vmem:[#allocation70_spill] sm:$0xff] }
 0xca8   :  { %v6285_v5 = vpop.f32.mrf.mxu0  ;;  %v6398_v54 = vpop.f32.mrf.mxu1  ;;  %v6181_v56 = vadd.f32 %v10569_v18, %v6068_v13 }
 0xca9   :  { %v10129_v59 = vadd.f32 %v6395_v29, %v10566_v26  ;;  %v6397_v51 = vadd.f32 %v6396_v19, %v6284_v21  ;;  %v6286_v32 = vadd.f32 %v6285_v5, %v6173_v57  ;;  %6477 = vadd.xlane.f32.xlu1 %v6476_v41  ;;  %v6183_v19 = vadd.f32 %v10572_v33, %v6070_v34  ;;  %v10573_v41 = vld [vmem:[#allocation44_spill] sm:$0xff] }
 0xcaa   :  { %v6289_v8 = vpop.f32.mrf.mxu0  ;;  %v6402_v48 = vpop.f32.mrf.mxu1 }
 0xcab   :  { %v6399_v40 = vadd.f32 %v6398_v54, %v6286_v32  ;;  %v6290_v61 = vadd.f32 %v6289_v8, %v6177_v16  ;;  %v6479_v14 = vadd.f32 %v10129_v59, %v10126_v37  ;;  %v10138_v43 = vadd.f32 %v6397_v51, %v10570_v38  ;;  %v10574_v16 = vld [vmem:[#allocation42_spill] sm:$0xff]  ;;  %v10575_v51 = vld [vmem:[#allocation45_spill] sm:$0xff] }
 0xcac   :  { %v6291_v25 = vpop.f32.mrf.mxu0  ;;  %v6404_v50 = vpop.f32.mrf.mxu1 }
 0xcad   :  { %v10141_v58 = vadd.f32 %v6399_v40, %v10571_v45  ;;  %v6403_v53 = vadd.f32 %v6402_v48, %v6290_v61  ;;  %v6292_v11 = vadd.f32 %v6291_v25, %v6179_v24  ;;  %6480 = vadd.xlane.f32.xlu0 %v6479_v14 }
 0xcae   :  { %v6293_v4 = vpop.f32.mrf.mxu0  ;;  %v6406_v35 = vpop.f32.mrf.mxu1 }
 0xcaf   :  { %v6405_v10 = vadd.f32 %v6404_v50, %v6292_v11  ;;  %v6294_v57 = vadd.f32 %v6293_v4, %v6181_v56  ;;  %v6482_v29 = vadd.f32 %v10141_v58, %v10138_v43  ;;  %v10147_v27 = vadd.f32 %v6403_v53, %v10573_v41 }
 0xcb0   :  { %v6295_v21 = vpop.f32.mrf.mxu0  ;;  %v6408_v54 = vpop.f32.mrf.mxu1 }
 0xcb1   :  { %v10150_v30 = vadd.f32 %v6405_v10, %v10574_v16  ;;  %v6407_v13 = vadd.f32 %v6406_v35, %v6294_v57  ;;  %v6296_v5 = vadd.f32 %v6295_v21, %v6183_v19  ;;  %6483 = vadd.xlane.f32.xlu1 %v6482_v29 }
 0xcb3   :  { %v6409_v9 = vadd.f32 %v6408_v54, %v6296_v5  ;;  %v6485_v26 = vadd.f32 %v10150_v30, %v10147_v27  ;;  %v10155_v32 = vadd.f32 %v6407_v13, %v10575_v51 }
 0xcb5   :  { %v10158_v24 = vadd.f32 %v6409_v9, %v10576_v39  ;;  %6486 = vadd.xlane.f32.xlu0 %v6485_v26 }
 0xcb7   :  { %v6488_v8 = vadd.f32 %v10158_v24, %v10155_v32 }
 0xcb9   :  { %6489 = vadd.xlane.f32.xlu1 %v6488_v8 }
 0xd06   :  { %v6445_v48 = vpop.xlane.xlu0 %6444 }
 0xd07   :  { %v6491_v47 = vmul.f32 0.00390625, %v6445_v48 }
 0xd09   :  { %v10163_v34 = vsub.f32 %v9958_v36, %v6491_v47  ;;  %v10166_v40 = vsub.f32 %v9961_v17, %v6491_v47 }
 0xd0a   :  { %v6448_v61 = vpop.xlane.xlu1 %6447 }
 0xd0b   :  { %v6539_v14 = vmul.f32 %v10163_v34, %v10163_v34  ;;  %v6540_v18 = vmul.f32 %v10166_v40, %v10166_v40  ;;  %v6492_v56 = vmul.f32 0.00390625, %v6448_v61 }
 0xd0d   :  { %v10173_v25 = vsub.f32 %v9972_v31, %v6492_v56  ;;  %v10176_v50 = vsub.f32 %v9975_v15, %v6492_v56  ;;  %v6571_v38 = vadd.f32 %v6540_v18, %v6539_v14 }
 0xd0e   :  { %v6451_v36 = vpop.xlane.xlu0 %6450 }
 0xd0f   :  { %v6541_v17 = vmul.f32 %v10173_v25, %v10173_v25  ;;  %v6542_v45 = vmul.f32 %v10176_v50, %v10176_v50  ;;  %v6493_v53 = vmul.f32 0.00390625, %v6451_v36  ;;  %6572 = vadd.xlane.f32.xlu0 %v6571_v38 }
 0xd11   :  { %v10183_v11 = vsub.f32 %v9986_v42, %v6493_v53  ;;  %v10186_v4 = vsub.f32 %v9989_v6, %v6493_v53  ;;  %v6574_v31 = vadd.f32 %v6542_v45, %v6541_v17 }
 0xd12   :  { %v6454_v35 = vpop.xlane.xlu1 %6453 }
 0xd13   :  { %v6543_v15 = vmul.f32 %v10183_v11, %v10183_v11  ;;  %v6544_v33 = vmul.f32 %v10186_v4, %v10186_v4  ;;  %v6494_v19 = vmul.f32 0.00390625, %v6454_v35  ;;  %6575 = vadd.xlane.f32.xlu1 %v6574_v31 }
 0xd15   :  { %v10193_v10 = vsub.f32 %v10000_v49, %v6494_v19  ;;  %v10196_v57 = vsub.f32 %v10003_v12, %v6494_v19  ;;  %v6577_v42 = vadd.f32 %v6544_v33, %v6543_v15 }
 0xd16   :  { %v6457_v29 = vpop.xlane.xlu0 %6456 }
 0xd17   :  { %v6545_v6 = vmul.f32 %v10193_v10, %v10193_v10  ;;  %v6546_v21 = vmul.f32 %v10196_v57, %v10196_v57  ;;  %v6495_v41 = vmul.f32 0.00390625, %v6457_v29  ;;  %6578 = vadd.xlane.f32.xlu0 %v6577_v42 }
 0xd19   :  { %v10203_v16 = vsub.f32 %v10014_v63, %v6495_v41  ;;  %v10206_v13 = vsub.f32 %v10017_v3, %v6495_v41  ;;  %v6580_v49 = vadd.f32 %v6546_v21, %v6545_v6 }
 0xd1a   :  { %v6460_v5 = vpop.xlane.xlu1 %6459 }
 0xd1b   :  { %v6547_v12 = vmul.f32 %v10203_v16, %v10203_v16  ;;  %v6548_v54 = vmul.f32 %v10206_v13, %v10206_v13  ;;  %v6496_v9 = vmul.f32 0.00390625, %v6460_v5  ;;  %6581 = vadd.xlane.f32.xlu1 %v6580_v49 }
 0xd1d   :  { %v10213_v26 = vsub.f32 %v10028_v62, %v6496_v9  ;;  %v10216_v51 = vsub.f32 %v10031_v52, %v6496_v9  ;;  %v6583_v63 = vadd.f32 %v6548_v54, %v6547_v12 }
 0xd1e   :  { %v6463_v39 = vpop.xlane.xlu0 %6462 }
 0xd1f   :  { %v6549_v3 = vmul.f32 %v10213_v26, %v10213_v26  ;;  %v6550_v8 = vmul.f32 %v10216_v51, %v10216_v51  ;;  %v6497_v48 = vmul.f32 0.00390625, %v6463_v39  ;;  %6584 = vadd.xlane.f32.xlu0 %v6583_v63 }
 0xd21   :  { %v10223_v47 = vsub.f32 %v10042_v2, %v6497_v48  ;;  %v10226_v61 = vsub.f32 %v10045_v7, %v6497_v48  ;;  %v6586_v62 = vadd.f32 %v6550_v8, %v6549_v3 }
 0xd22   :  { %v6466_v14 = vpop.xlane.xlu1 %6465 }
 0xd23   :  { %v6551_v52 = vmul.f32 %v10223_v47, %v10223_v47  ;;  %v6552_v18 = vmul.f32 %v10226_v61, %v10226_v61  ;;  %v6498_v56 = vmul.f32 0.00390625, %v6466_v14  ;;  %6587 = vadd.xlane.f32.xlu1 %v6586_v62 }
 0xd25   :  { %v10233_v38 = vsub.f32 %v10056_v1, %v6498_v56  ;;  %v10236_v36 = vsub.f32 %v10059_v60, %v6498_v56  ;;  %v6589_v2 = vadd.f32 %v6552_v18, %v6551_v52 }
 0xd26   :  { %v6469_v17 = vpop.xlane.xlu0 %6468 }
 0xd27   :  { %v6553_v7 = vmul.f32 %v10233_v38, %v10233_v38  ;;  %v6554_v45 = vmul.f32 %v10236_v36, %v10236_v36  ;;  %v6499_v53 = vmul.f32 0.00390625, %v6469_v17  ;;  %6590 = vadd.xlane.f32.xlu0 %v6589_v2 }
 0xd29   :  { %v10243_v31 = vsub.f32 %v10070_v0, %v6499_v53  ;;  %v10246_v35 = vsub.f32 %v10073_v23, %v6499_v53  ;;  %v6592_v1 = vadd.f32 %v6554_v45, %v6553_v7 }
 0xd2a   :  { %v6472_v15 = vpop.xlane.xlu1 %6471 }
 0xd2b   :  { %v6555_v60 = vmul.f32 %v10243_v31, %v10243_v31  ;;  %v6556_v33 = vmul.f32 %v10246_v35, %v10246_v35  ;;  %v6500_v19 = vmul.f32 0.00390625, %v6472_v15  ;;  %6593 = vadd.xlane.f32.xlu1 %v6592_v1 }
 0xd2d   :  { %v10253_v42 = vsub.f32 %v10084_v46, %v6500_v19  ;;  %v10256_v29 = vsub.f32 %v10087_v20, %v6500_v19  ;;  %v6595_v0 = vadd.f32 %v6556_v33, %v6555_v60 }
 0xd2e   :  { %v6475_v6 = vpop.xlane.xlu0 %6474 }
 0xd2f   :  { %v6557_v23 = vmul.f32 %v10253_v42, %v10253_v42  ;;  %v6558_v21 = vmul.f32 %v10256_v29, %v10256_v29  ;;  %v6501_v41 = vmul.f32 0.00390625, %v6475_v6  ;;  %6596 = vadd.xlane.f32.xlu0 %v6595_v0 }
 0xd31   :  { %v10263_v49 = vsub.f32 %v10098_v28, %v6501_v41  ;;  %v10266_v5 = vsub.f32 %v10101_v44, %v6501_v41  ;;  %v6598_v46 = vadd.f32 %v6558_v21, %v6557_v23 }
 0xd32   :  { %v6478_v12 = vpop.xlane.xlu1 %6477 }
 0xd33   :  { %v6559_v20 = vmul.f32 %v10263_v49, %v10263_v49  ;;  %v6560_v54 = vmul.f32 %v10266_v5, %v10266_v5  ;;  %v6502_v9 = vmul.f32 0.00390625, %v6478_v12  ;;  %6599 = vadd.xlane.f32.xlu1 %v6598_v46 }
 0xd35   :  { %v10273_v63 = vsub.f32 %v10112_v22, %v6502_v9  ;;  %v10276_v39 = vsub.f32 %v10115_v55, %v6502_v9  ;;  %v6601_v28 = vadd.f32 %v6560_v54, %v6559_v20 }
 0xd36   :  { %v6481_v3 = vpop.xlane.xlu0 %6480 }
 0xd37   :  { %v6561_v44 = vmul.f32 %v10273_v63, %v10273_v63  ;;  %v6562_v8 = vmul.f32 %v10276_v39, %v10276_v39  ;;  %v6503_v48 = vmul.f32 0.00390625, %v6481_v3  ;;  %6602 = vadd.xlane.f32.xlu0 %v6601_v28 }
 0xd39   :  { %v10283_v62 = vsub.f32 %v10126_v37, %v6503_v48  ;;  %v10286_v14 = vsub.f32 %v10129_v59, %v6503_v48  ;;  %v6604_v22 = vadd.f32 %v6562_v8, %v6561_v44  ;;  %v111_v8 = vld [vmem:[#allocation13 + $0x16] sm:$0x3]  ;;  %v112_v48 = vld [vmem:[#allocation13 + $0x18] sm:$0x3] }
 0xd3a   :  { %v6484_v52 = vpop.xlane.xlu1 %6483 }
 0xd3b   :  { %v6563_v55 = vmul.f32 %v10283_v62, %v10283_v62  ;;  %v6564_v18 = vmul.f32 %v10286_v14, %v10286_v14  ;;  %v6504_v56 = vmul.f32 0.00390625, %v6484_v52  ;;  %6605 = vadd.xlane.f32.xlu1 %v6604_v22 }
 0xd3d   :  { %v10293_v2 = vsub.f32 %v10138_v43, %v6504_v56  ;;  %v10296_v17 = vsub.f32 %v10141_v58, %v6504_v56  ;;  %v6607_v37 = vadd.f32 %v6564_v18, %v6563_v55  ;;  %v10577_v55 = vld [vmem:[#allocation21_spill] sm:$0xff]  ;;  %v10578_v56 = vld [vmem:[#allocation22_spill] sm:$0xff] }
 0xd3e   :  { %v6487_v7 = vpop.xlane.xlu0 %6486  ;;  %v10323_v18 = vrot.slane %v111_v8, %v10577_v55 }
 0xd3f   :  { %v6565_v59 = vmul.f32 %v10293_v2, %v10293_v2  ;;  %v6566_v45 = vmul.f32 %v10296_v17, %v10296_v17  ;;  %v6505_v53 = vmul.f32 0.00390625, %v6487_v7  ;;  %6608 = vadd.xlane.f32.xlu0 %v6607_v37  ;;  %v10326_v37 = vrot.slane %v111_v8, %v10578_v56 }
 0xd41   :  { %v10303_v1 = vsub.f32 %v10147_v27, %v6505_v53  ;;  %v10306_v15 = vsub.f32 %v10150_v30, %v6505_v53  ;;  %v6610_v43 = vadd.f32 %v6566_v45, %v6565_v59  ;;  %v10329_v45 = vrot.slane %v112_v48, %v10577_v55 }
 0xd42   :  { %v6490_v60 = vpop.xlane.xlu1 %6489  ;;  %v10332_v53 = vrot.slane %v112_v48, %v10578_v56 }
 0xd43   :  { %v6567_v58 = vmul.f32 %v10303_v1, %v10303_v1  ;;  %v6568_v33 = vmul.f32 %v10306_v15, %v10306_v15  ;;  %v6506_v19 = vmul.f32 0.00390625, %v6490_v60  ;;  %6611 = vadd.xlane.f32.xlu1 %v6610_v43 }
 0xd45   :  { %v10313_v0 = vsub.f32 %v10155_v32, %v6506_v19  ;;  %v10316_v6 = vsub.f32 %v10158_v24, %v6506_v19  ;;  %v6613_v27 = vadd.f32 %v6568_v33, %v6567_v58 }
 0xd47   :  { %v6569_v30 = vmul.f32 %v10313_v0, %v10313_v0  ;;  %v6570_v23 = vmul.f32 %v10316_v6, %v10316_v6  ;;  %6614 = vadd.xlane.f32.xlu0 %v6613_v27 }
 0xd49   :  { %v6616_v21 = vadd.f32 %v6570_v23, %v6569_v30 }
 0xd4b   :  { %6617 = vadd.xlane.f32.xlu1 %v6616_v21 }
 0xd98   :  { %v6573_v41 = vpop.xlane.xlu0 %6572 }
 0xd99   :  { %v6619_v46 = vmul.f32 0.00390625, %v6573_v41 }
 0xd9b   :  { %v6635_v12 = vadd.f32 1e-05, %v6619_v46 }
 0xd9c   :  { %v6576_v20 = vpop.xlane.xlu1 %6575 }
 0xd9d   :  { %8284 = vrsqrt.f32 %v6635_v12  ;;  %v6620_v32 = vmul.f32 0.00390625, %v6576_v20 }
 0xd9f   :  { %v6636_v54 = vadd.f32 1e-05, %v6620_v32 }
 0xda0   :  { %v6579_v9 = vpop.xlane.xlu0 %6578 }
 0xda1   :  { %8286 = vrsqrt.f32 %v6636_v54  ;;  %v6621_v24 = vmul.f32 0.00390625, %v6579_v9 }
 0xda3   :  { %v6637_v28 = vadd.f32 1e-05, %v6621_v24 }
 0xda4   :  { %v6582_v3 = vpop.xlane.xlu1 %6581 }
 0xda5   :  { %8288 = vrsqrt.f32 %v6637_v28  ;;  %v6622_v44 = vmul.f32 0.00390625, %v6582_v3 }
 0xda7   :  { %v6638_v22 = vadd.f32 1e-05, %v6622_v44 }
 0xda8   :  { %v6585_v52 = vpop.xlane.xlu0 %6584 }
 0xda9   :  { %8290 = vrsqrt.f32 %v6638_v22  ;;  %v6623_v7 = vmul.f32 0.00390625, %v6585_v52 }
 0xdaa   :  { %v8285_v59 = vpop.eup %8284 }
 0xdab   :  { %v6667_v43 = vmul.f32 %v8285_v59, %v10163_v34  ;;  %v6668_v60 = vmul.f32 %v8285_v59, %v10166_v40  ;;  %v6639_v58 = vadd.f32 1e-05, %v6623_v7 }
 0xdac   :  { %v6588_v33 = vpop.xlane.xlu1 %6587 }
 0xdad   :  { %v6710_v19 = vmul.f32 %v10323_v18, %v6667_v43  ;;  %v6711_v27 = vmul.f32 %v10326_v37, %v6668_v60  ;;  %8292 = vrsqrt.f32 %v6639_v58  ;;  %v6624_v30 = vmul.f32 0.00390625, %v6588_v33 }
 0xdae   :  { %v8287_v23 = vpop.eup %8286 }
 0xdaf   :  { %v6753_v21 = vadd.f32 %v10329_v45, %v6710_v19  ;;  %v6754_v41 = vadd.f32 %v10332_v53, %v6711_v27  ;;  %v6669_v46 = vmul.f32 %v8287_v23, %v10173_v25  ;;  %v6670_v12 = vmul.f32 %v8287_v23, %v10176_v50 }
 0xdb0   :  { %v6640_v34 = vadd.f32 1e-05, %v6624_v30  ;;  %v6591_v20 = vpop.xlane.xlu0 %6590 }
 0xdb1   :  { %6785 = vst [vmem:[#allocation15] sm:$0xff] %v6753_v21  ;;  %6786 = vst [vmem:[#allocation15 + $0x8] sm:$0xff] %v6754_v41  ;;  %v6712_v40 = vmul.f32 %v10323_v18, %v6669_v46  ;;  %v6713_v32 = vmul.f32 %v10326_v37, %v6670_v12  ;;  %v6625_v54 = vmul.f32 0.00390625, %v6591_v20 }
 0xdb2   :  { %v8289_v9 = vpop.eup %8288  ;;  %8294 = vrsqrt.f32 %v6640_v34 }
 0xdb3   :  { %v6755_v24 = vadd.f32 %v10329_v45, %v6712_v40  ;;  %v6756_v28 = vadd.f32 %v10332_v53, %v6713_v32  ;;  %v6671_v3 = vmul.f32 %v8289_v9, %v10183_v11  ;;  %v6672_v25 = vmul.f32 %v8289_v9, %v10186_v4 }
 0xdb4   :  { %v6641_v50 = vadd.f32 1e-05, %v6625_v54  ;;  %v6594_v44 = vpop.xlane.xlu1 %6593 }
 0xdb5   :  { %6787 = vst [vmem:[#allocation15 + $0x10] sm:$0xff] %v6755_v24  ;;  %6788 = vst [vmem:[#allocation15 + $0x18] sm:$0xff] %v6756_v28  ;;  %v6714_v8 = vmul.f32 %v10323_v18, %v6671_v3  ;;  %v6715_v48 = vmul.f32 %v10326_v37, %v6672_v25  ;;  %v6626_v22 = vmul.f32 0.00390625, %v6594_v44 }
 0xdb6   :  { %v8291_v52 = vpop.eup %8290  ;;  %8296 = vrsqrt.f32 %v6641_v50 }
 0xdb7   :  { %v6757_v55 = vadd.f32 %v10329_v45, %v6714_v8  ;;  %v6758_v56 = vadd.f32 %v10332_v53, %v6715_v48  ;;  %v6673_v7 = vmul.f32 %v8291_v52, %v10193_v10  ;;  %v6674_v11 = vmul.f32 %v8291_v52, %v10196_v57 }
 0xdb8   :  { %v6642_v4 = vadd.f32 1e-05, %v6626_v22  ;;  %v6597_v59 = vpop.xlane.xlu0 %6596 }
 0xdb9   :  { %6789 = vst [vmem:[#allocation15 + $0x20] sm:$0xff] %v6757_v55  ;;  %6790 = vst [vmem:[#allocation15 + $0x28] sm:$0xff] %v6758_v56  ;;  %v6716_v43 = vmul.f32 %v10323_v18, %v6673_v7  ;;  %v6717_v60 = vmul.f32 %v10326_v37, %v6674_v11  ;;  %v6627_v58 = vmul.f32 0.00390625, %v6597_v59 }
 0xdba   :  { %v8293_v33 = vpop.eup %8292  ;;  %8298 = vrsqrt.f32 %v6642_v4 }
 0xdbb   :  { %v6759_v19 = vadd.f32 %v10329_v45, %v6716_v43  ;;  %v6760_v27 = vadd.f32 %v10332_v53, %v6717_v60  ;;  %v6675_v30 = vmul.f32 %v8293_v33, %v10203_v16  ;;  %v6676_v10 = vmul.f32 %v8293_v33, %v10206_v13 }
 0xdbc   :  { %v6643_v57 = vadd.f32 1e-05, %v6627_v58  ;;  %v6600_v23 = vpop.xlane.xlu1 %6599 }
 0xdbd   :  { %6791 = vst [vmem:[#allocation15 + $0x30] sm:$0xff] %v6759_v19  ;;  %6792 = vst [vmem:[#allocation15 + $0x38] sm:$0xff] %v6760_v27  ;;  %v6718_v21 = vmul.f32 %v10323_v18, %v6675_v30  ;;  %v6719_v41 = vmul.f32 %v10326_v37, %v6676_v10  ;;  %v6628_v46 = vmul.f32 0.00390625, %v6600_v23 }
 0xdbe   :  { %8300 = vrsqrt.f32 %v6643_v57 }
 0xdbf   :  { %v8295_v12 = vpop.eup %8294  ;;  %v6761_v34 = vadd.f32 %v10329_v45, %v6718_v21  ;;  %v6762_v20 = vadd.f32 %v10332_v53, %v6719_v41  ;;  %v6644_v40 = vadd.f32 1e-05, %v6628_v46 }
 0xdc0   :  { %v6677_v16 = vmul.f32 %v8295_v12, %v10213_v26  ;;  %v6678_v13 = vmul.f32 %v8295_v12, %v10216_v51  ;;  %v6603_v32 = vpop.xlane.xlu0 %6602 }
 0xdc1   :  { %6793 = vst [vmem:[#allocation15 + $0x40] sm:$0xff] %v6761_v34  ;;  %6794 = vst [vmem:[#allocation15 + $0x48] sm:$0xff] %v6762_v20  ;;  %8302 = vrsqrt.f32 %v6644_v40  ;;  %v6629_v54 = vmul.f32 0.00390625, %v6603_v32 }
 0xdc2   :  { %v6720_v9 = vmul.f32 %v10323_v18, %v6677_v16  ;;  %v6721_v24 = vmul.f32 %v10326_v37, %v6678_v13 }
 0xdc3   :  { %v8297_v28 = vpop.eup %8296  ;;  %v6645_v3 = vadd.f32 1e-05, %v6629_v54 }
 0xdc4   :  { %v6763_v25 = vadd.f32 %v10329_v45, %v6720_v9  ;;  %v6764_v50 = vadd.f32 %v10332_v53, %v6721_v24  ;;  %v6679_v44 = vmul.f32 %v8297_v28, %v10223_v47  ;;  %v6680_v26 = vmul.f32 %v8297_v28, %v10226_v61  ;;  %v6606_v51 = vpop.xlane.xlu1 %6605 }
 0xdc5   :  { %8304 = vrsqrt.f32 %v6645_v3  ;;  %v6630_v8 = vmul.f32 0.00390625, %v6606_v51 }
 0xdc6   :  { %6795 = vst [vmem:[#allocation15 + $0x50] sm:$0xff] %v6763_v25  ;;  %6796 = vst [vmem:[#allocation15 + $0x58] sm:$0xff] %v6764_v50  ;;  %v6722_v48 = vmul.f32 %v10323_v18, %v6679_v44  ;;  %v6723_v22 = vmul.f32 %v10326_v37, %v6680_v26 }
 0xdc7   :  { %v8299_v52 = vpop.eup %8298  ;;  %v6646_v55 = vadd.f32 1e-05, %v6630_v8 }
 0xdc8   :  { %v6765_v56 = vadd.f32 %v10329_v45, %v6722_v48  ;;  %v6766_v7 = vadd.f32 %v10332_v53, %v6723_v22  ;;  %v6681_v11 = vmul.f32 %v8299_v52, %v10233_v38  ;;  %v6682_v47 = vmul.f32 %v8299_v52, %v10236_v36  ;;  %v6609_v61 = vpop.xlane.xlu0 %6608 }
 0xdc9   :  { %8306 = vrsqrt.f32 %v6646_v55  ;;  %v6631_v4 = vmul.f32 0.00390625, %v6609_v61 }
 0xdca   :  { %6797 = vst [vmem:[#allocation15 + $0x60] sm:$0xff] %v6765_v56  ;;  %6798 = vst [vmem:[#allocation15 + $0x68] sm:$0xff] %v6766_v7  ;;  %v6724_v59 = vmul.f32 %v10323_v18, %v6681_v11  ;;  %v6725_v43 = vmul.f32 %v10326_v37, %v6682_v47 }
 0xdcb   :  { %v8301_v60 = vpop.eup %8300  ;;  %v6647_v58 = vadd.f32 1e-05, %v6631_v4 }
 0xdcc   :  { %v6767_v33 = vadd.f32 %v10329_v45, %v6724_v59  ;;  %v6768_v19 = vadd.f32 %v10332_v53, %v6725_v43  ;;  %v6683_v27 = vmul.f32 %v8301_v60, %v10243_v31  ;;  %v6684_v38 = vmul.f32 %v8301_v60, %v10246_v35  ;;  %v6612_v36 = vpop.xlane.xlu1 %6611 }
 0xdcd   :  { %8308 = vrsqrt.f32 %v6647_v58  ;;  %v6632_v30 = vmul.f32 0.00390625, %v6612_v36 }
 0xdce   :  { %v8303_v10 = vpop.eup %8302  ;;  %6799 = vst [vmem:[#allocation15 + $0x70] sm:$0xff] %v6767_v33  ;;  %6800 = vst [vmem:[#allocation15 + $0x78] sm:$0xff] %v6768_v19  ;;  %v6726_v57 = vmul.f32 %v10323_v18, %v6683_v27  ;;  %v6727_v23 = vmul.f32 %v10326_v37, %v6684_v38 }
 0xdcf   :  { %v6685_v21 = vmul.f32 %v8303_v10, %v10253_v42  ;;  %v6686_v41 = vmul.f32 %v8303_v10, %v10256_v29  ;;  %v6648_v46 = vadd.f32 1e-05, %v6632_v30 }
 0xdd0   :  { %v6769_v12 = vadd.f32 %v10329_v45, %v6726_v57  ;;  %v6770_v31 = vadd.f32 %v10332_v53, %v6727_v23  ;;  %v6615_v35 = vpop.xlane.xlu0 %6614 }
 0xdd1   :  { %v6728_v34 = vmul.f32 %v10323_v18, %v6685_v21  ;;  %v6729_v20 = vmul.f32 %v10326_v37, %v6686_v41  ;;  %8310 = vrsqrt.f32 %v6648_v46  ;;  %v6633_v40 = vmul.f32 0.00390625, %v6615_v35 }
 0xdd2   :  { %v8305_v16 = vpop.eup %8304  ;;  %6801 = vst [vmem:[#allocation15 + $0x80] sm:$0xff] %v6769_v12  ;;  %6802 = vst [vmem:[#allocation15 + $0x88] sm:$0xff] %v6770_v31 }
 0xdd3   :  { %v6771_v13 = vadd.f32 %v10329_v45, %v6728_v34  ;;  %v6772_v42 = vadd.f32 %v10332_v53, %v6729_v20  ;;  %v6687_v29 = vmul.f32 %v8305_v16, %v10263_v49  ;;  %v6688_v32 = vmul.f32 %v8305_v16, %v10266_v5 }
 0xdd4   :  { %v6649_v54 = vadd.f32 1e-05, %v6633_v40  ;;  %v6618_v9 = vpop.xlane.xlu1 %6617 }
 0xdd5   :  { %6803 = vst [vmem:[#allocation15 + $0x90] sm:$0xff] %v6771_v13  ;;  %6804 = vst [vmem:[#allocation15 + $0x98] sm:$0xff] %v6772_v42  ;;  %v6730_v24 = vmul.f32 %v10323_v18, %v6687_v29  ;;  %v6731_v28 = vmul.f32 %v10326_v37, %v6688_v32  ;;  %v6634_v3 = vmul.f32 0.00390625, %v6618_v9 }
 0xdd6   :  { %v8307_v25 = vpop.eup %8306  ;;  %8312 = vrsqrt.f32 %v6649_v54 }
 0xdd7   :  { %v6773_v50 = vadd.f32 %v10329_v45, %v6730_v24  ;;  %v6774_v44 = vadd.f32 %v10332_v53, %v6731_v28  ;;  %v6689_v26 = vmul.f32 %v8307_v25, %v10273_v63  ;;  %v6690_v49 = vmul.f32 %v8307_v25, %v10276_v39 }
 0xdd8   :  { %v6650_v5 = vadd.f32 1e-05, %v6634_v3 }
 0xdd9   :  { %6805 = vst [vmem:[#allocation15 + $0xa0] sm:$0xff] %v6773_v50  ;;  %6806 = vst [vmem:[#allocation15 + $0xa8] sm:$0xff] %v6774_v44  ;;  %v6732_v51 = vmul.f32 %v10323_v18, %v6689_v26  ;;  %v6733_v8 = vmul.f32 %v10326_v37, %v6690_v49 }
 0xdda   :  { %v8309_v48 = vpop.eup %8308  ;;  %8314 = vrsqrt.f32 %v6650_v5 }
 0xddb   :  { %v6775_v22 = vadd.f32 %v10329_v45, %v6732_v51  ;;  %v6776_v52 = vadd.f32 %v10332_v53, %v6733_v8  ;;  %v6691_v55 = vmul.f32 %v8309_v48, %v10283_v62  ;;  %v6692_v56 = vmul.f32 %v8309_v48, %v10286_v14 }
 0xddd   :  { %6807 = vst [vmem:[#allocation15 + $0xb0] sm:$0xff] %v6775_v22  ;;  %6808 = vst [vmem:[#allocation15 + $0xb8] sm:$0xff] %v6776_v52  ;;  %v6734_v63 = vmul.f32 %v10323_v18, %v6691_v55  ;;  %v6735_v39 = vmul.f32 %v10326_v37, %v6692_v56 }
 0xdde   :  { %v8311_v7 = vpop.eup %8310 }
 0xddf   :  { %v6777_v11 = vadd.f32 %v10329_v45, %v6734_v63  ;;  %v6778_v47 = vadd.f32 %v10332_v53, %v6735_v39  ;;  %v6693_v61 = vmul.f32 %v8311_v7, %v10293_v2  ;;  %v6694_v4 = vmul.f32 %v8311_v7, %v10296_v17 }
 0xde1   :  { %6809 = vst [vmem:[#allocation15 + $0xc0] sm:$0xff] %v6777_v11  ;;  %6810 = vst [vmem:[#allocation15 + $0xc8] sm:$0xff] %v6778_v47  ;;  %v6736_v62 = vmul.f32 %v10323_v18, %v6693_v61  ;;  %v6737_v14 = vmul.f32 %v10326_v37, %v6694_v4 }
 0xde3   :  { %v8313_v59 = vpop.eup %8312  ;;  %v6779_v43 = vadd.f32 %v10329_v45, %v6736_v62  ;;  %v6780_v60 = vadd.f32 %v10332_v53, %v6737_v14 }
 0xde4   :  { %v6695_v58 = vmul.f32 %v8313_v59, %v10303_v1  ;;  %v6696_v33 = vmul.f32 %v8313_v59, %v10306_v15 }
 0xde5   :  { %6811 = vst [vmem:[#allocation15 + $0xd0] sm:$0xff] %v6779_v43  ;;  %6812 = vst [vmem:[#allocation15 + $0xd8] sm:$0xff] %v6780_v60 }
 0xde6   :  { %v6738_v2 = vmul.f32 %v10323_v18, %v6695_v58  ;;  %v6739_v17 = vmul.f32 %v10326_v37, %v6696_v33 }
 0xde7   :  { %v8315_v19 = vpop.eup %8314 }
 0xde8   :  { %v6781_v27 = vadd.f32 %v10329_v45, %v6738_v2  ;;  %v6782_v38 = vadd.f32 %v10332_v53, %v6739_v17  ;;  %v6697_v36 = vmul.f32 %v8315_v19, %v10313_v0  ;;  %v6698_v30 = vmul.f32 %v8315_v19, %v10316_v6 }
 0xdea   :  { %6813 = vst [vmem:[#allocation15 + $0xe0] sm:$0xff] %v6781_v27  ;;  %6814 = vst [vmem:[#allocation15 + $0xe8] sm:$0xff] %v6782_v38  ;;  %v6740_v1 = vmul.f32 %v10323_v18, %v6697_v36  ;;  %v6741_v15 = vmul.f32 %v10326_v37, %v6698_v30 }
 0xdec   :  { %v6783_v10 = vadd.f32 %v10329_v45, %v6740_v1  ;;  %v6784_v57 = vadd.f32 %v10332_v53, %v6741_v15 }
 0xdee   :  { %6815 = vst [vmem:[#allocation15 + $0xf0] sm:$0xff] %v6783_v10  ;;  %6816 = vst [vmem:[#allocation15 + $0xf8] sm:$0xff] %v6784_v57 }
 0xdef   :  { %8479 = shalt.err (!%p8476_p6)
}
 0xdf0   :  { %6828 = dma.vmem_to_hbm [thread:$0]  %s6823_s5, 4096, %s10442_s6, [#allocation6], %s8505_s13, %s8505_s13, %s8506_s14  }
 0xdf1   :  { %8496 = dma.done.wait [#allocation6], 4096  }
 0xdf2   :  { %8497 = vsyncadd [#allocation6], 4294963200 }
 0xdf3   :  { %6832 = vsyncpa [#allocation5], 1 }
 0xdf4   :  { %6833 = vsyncpa [#allocation8], 1 }
 0xdf5   :  { %6834 = vsyncpa [#allocation11], 1 }
 0xdf6   :  { %6835 = vsyncpa [#allocation14], 1 }
 0xdf7   :  { %6836 = vsyncpa [#allocation6], 1 }

</bundles_post_ra>
